<compile_context>
chip_gen: v6e
topology: v6e:2x2x1
jax: 0.10.0
libtpu: 0.0.40
codegen_flags: <defaults>
</compile_context>

<pallas_src>
import numpy as np
import jax
import jax.numpy as jnp
from jax import lax
from jax.experimental import pallas as pl
from jax.experimental.pallas import tpu as pltpu


def _lstm_prompt_kernel(idx_ref, emb_ref, wih_ref, whh_ref, b_ref,
                        w1_ref, b1_ref, w2_ref, b2_ref,
                        out_ref, rw_scr):
    L, D = emb_ref.shape
    H = D // 2
    N = out_ref.shape[0]

    # Block-diagonal selection mask used to rebuild the padded carry
    #   h_pad = [[h_fwd, 0], [0, h_rev]]   shape (2, 2H)
    lane = lax.broadcasted_iota(jnp.int32, (2, 2 * H), 1)
    row = lax.broadcasted_iota(jnp.int32, (2, 2 * H), 0)
    dir_mask = ((lane >= H) == (row == 1)).astype(jnp.float32)

    # ---- 2-layer bidirectional LSTM over embeds = embedding(arange(L)) ----
    x = emb_ref[...]                                   # (L, D) f32
    for layer in range(2):
        wih = wih_ref[layer]                           # (D, 8H)  bf16 (fwd|rev)
        whh = whh_ref[layer]                           # (2H, 4H) bf16 (fwd;rev)
        bias = b_ref[pl.ds(layer, 1), :]               # (1, 8H)  f32 (b_ih+b_hh)

        # Merged input projection for BOTH directions: one MXU call per layer.
        # Kept as a traced value (no scratch round-trip).
        xproj = jnp.dot(x.astype(jnp.bfloat16), wih,
                        preferred_element_type=jnp.float32) + bias   # (L, 8H)

        h_pad = jnp.zeros((2, 2 * H), jnp.bfloat16)    # [[h_f, 0], [0, h_r]]
        c = jnp.zeros((2, H), jnp.float32)             # [c_f ; c_r]
        fwd_rows = [None] * L
        rev_rows = [None] * L

        # Fully unrolled, fused forward+reverse recurrence (L is static).
        for s in range(L):
            t_rev = L - 1 - s
            x_fwd = xproj[s:s + 1, 0:4 * H]                       # (1, 4H)
            x_rev = xproj[t_rev:t_rev + 1, 4 * H:8 * H]           # (1, 4H)
            x_both = jnp.concatenate([x_fwd, x_rev], axis=0)      # (2, 4H)

            # One block matmul produces both directions' recurrent gates.
            g = x_both + jnp.dot(h_pad, whh,
                                 preferred_element_type=jnp.float32)  # (2, 4H)
            # Gate column order (repacked in the wrapper): i, f, o, g
            sig = jax.nn.sigmoid(g[:, 0:3 * H])                   # one EUP op
            i_g = sig[:, 0:H]
            f_g = sig[:, H:2 * H]
            o_g = sig[:, 2 * H:3 * H]
            g_g = jnp.tanh(g[:, 3 * H:4 * H])                     # one EUP op
            c = f_g * c + i_g * g_g
            h_new = o_g * jnp.tanh(c)                             # (2, H)

            # Forward output -> time s, cols [0,H); reverse -> time L-1-s,
            # cols [H,2H) (torch bidirectional concat order) — kept as values.
            fwd_rows[s] = h_new[0:1, :]
            rev_rows[t_rev] = h_new[1:2, :]

            # Rebuild the block-padded carry for the next step's matmul.
            h_tile = jnp.concatenate([h_new, h_new], axis=1)      # (2, 2H)
            h_pad = (h_tile * dir_mask).astype(jnp.bfloat16)

        fwd_seq = jnp.concatenate(fwd_rows, axis=0)               # (L, H)
        rev_seq = jnp.concatenate(rev_rows, axis=0)               # (L, H)
        x = jnp.concatenate([fwd_seq, rev_seq], axis=1)           # (L, 2H)==(L,D)

    # ---- MLP: Linear(D, HS) -> ReLU -> Linear(HS, D) ----
    h1 = jnp.maximum(
        jnp.dot(x.astype(jnp.bfloat16), w1_ref[...],
                preferred_element_type=jnp.float32) + b1_ref[...], 0.0)
    rw_scr[...] = jnp.dot(h1.astype(jnp.bfloat16), w2_ref[...],
                          preferred_element_type=jnp.float32) + b2_ref[...]

    # ---- gather rows by the precomputed index_list (SMEM scalars) ----
    # No-match tokens map to row 0 (argmax of an all-zero row, torch semantics).
    for n in range(N):
        out_ref[pl.ds(n, 1), :] = rw_scr[pl.ds(idx_ref[n], 1), :]


def lstm_prompt_encoder_forward(params, prompt_token_ids):
    emb = params["emb"]
    L, D = emb.shape
    H = D // 2
    tok = prompt_token_ids.reshape(-1).astype(jnp.int32)     # torch .view(-1, 1)
    N = tok.shape[0]
    ids = params["input_ids"].astype(jnp.int32).reshape(L)

    # index_list = (prompt_token_ids[:,None] == input_ids).int().argmax(dim=1)
    # Computed here in plain JAX; passed to the kernel through SMEM.
    idx = jnp.argmax((tok[:, None] == ids[None, :]).astype(jnp.int32),
                     axis=1).astype(jnp.int32)

    # Repack gate columns i,f,g,o -> i,f,o,g so sigmoid covers one contiguous
    # (.., 3H) slice inside the kernel.
    def _reorder(w):
        return jnp.concatenate(
            [w[..., 0:2 * H], w[..., 3 * H:4 * H], w[..., 2 * H:3 * H]], axis=-1)

    # Pack per-layer fused weights: forward | reverse merged, cast to bf16 for
    # the MXU (accumulation stays f32 inside the kernel).
    wih, whh, b = params["wih"], params["whh"], params["b"]
    wih_cat = jnp.stack(
        [jnp.concatenate([_reorder(wih[2 * l]), _reorder(wih[2 * l + 1])], axis=1)
         for l in range(2)]).astype(jnp.bfloat16)                 # (2, D, 8H)
    whh_stk = jnp.stack(
        [jnp.concatenate([_reorder(whh[2 * l]), _reorder(whh[2 * l + 1])], axis=0)
         for l in range(2)]).astype(jnp.bfloat16)                 # (2, 2H, 4H)
    b_cat = jnp.stack(
        [jnp.concatenate([_reorder(b[2 * l]), _reorder(b[2 * l + 1])], axis=0)
         for l in range(2)])                                      # (2, 8H) f32

    w1 = params["w1"].astype(jnp.bfloat16)
    w2 = params["w2"].astype(jnp.bfloat16)

    vmem = pl.BlockSpec(memory_space=pltpu.MemorySpace.VMEM)
    smem = pl.BlockSpec(memory_space=pltpu.MemorySpace.SMEM)
    return pl.pallas_call(
        _lstm_prompt_kernel,
        out_shape=jax.ShapeDtypeStruct((N, D), jnp.float32),
        in_specs=[smem] + [vmem] * 8,
        out_specs=vmem,
        scratch_shapes=[
            pltpu.VMEM((L, D), jnp.float32),       # running_weight (MLP output)
        ],
    )(idx, emb, wih_cat, whh_stk, b_cat, w1, params["b1"], w2, params["b2"])


def reference_forward(params, prompt_token_ids):
    """Pure-JAX mirror of the torch forward (for correctness checking)."""
    emb = params["emb"]
    L, D = emb.shape
    H = D // 2
    x = emb
    for layer in range(2):
        outs = []
        for d in range(2):
            k = 2 * layer + d
            wih, whh, b = params["wih"][k], params["whh"][k], params["b"][k]
            xp = x @ wih + b                     # (L, 4H)

            def step(carry, xp_t):
                h, c = carry
                g = xp_t + h @ whh
                i = jax.nn.sigmoid(g[0:H])
                f = jax.nn.sigmoid(g[H:2 * H])
                gg = jnp.tanh(g[2 * H:3 * H])
                o = jax.nn.sigmoid(g[3 * H:4 * H])
                c = f * c + i * gg
                h = o * jnp.tanh(c)
                return (h, c), h

            seq = xp if d == 0 else xp[::-1]
            (_, _), hs = lax.scan(step, (jnp.zeros(H), jnp.zeros(H)), seq)
            if d == 1:
                hs = hs[::-1]
            outs.append(hs)
        x = jnp.concatenate(outs, axis=-1)
    h1 = jax.nn.relu(x @ params["w1"] + params["b1"])
    y = h1 @ params["w2"] + params["b2"]
    tok = prompt_token_ids.reshape(-1)
    eq = (tok[:, None] == params["input_ids"][None, :]).astype(jnp.int32)
    idx = jnp.argmax(eq, axis=1)
    return y[idx]


def init_params(key, L, D, HS):
    H = D // 2
    ks = jax.random.split(key, 9)

    def u(k, shape, bound):
        return jax.random.uniform(k, shape, jnp.float32, -bound, bound)

    k_lstm = 1.0 / np.sqrt(H)
    k1 = 1.0 / np.sqrt(D)
    k2 = 1.0 / np.sqrt(HS)
    return {
        "emb": jax.random.normal(ks[0], (L, D), jnp.float32),
        # 4 (layer, direction) combos, index = 2*layer + dir; stored transposed.
        "wih": u(ks[1], (4, D, 4 * H), k_lstm),
        "whh": u(ks[2], (4, H, 4 * H), k_lstm),
        "b": u(ks[3], (4, 4 * H), k_lstm) + u(ks[4], (4, 4 * H), k_lstm),
        "w1": u(ks[5], (D, HS), k1),
        "b1": u(ks[6], (1, HS), k1),
        "w2": u(ks[7], (HS, D), k2),
        "b2": u(ks[8], (1, D), k2),
    }


if __name__ == "__main__":
    L = 8          # prompt length (== number of prompt ids)
    D = 256        # embedding_dim
    HS = D         # hidden_size=-1  ->  hsize = embedding_dim

    key = jax.random.PRNGKey(0)
    params = init_params(key, L, D, HS)
    # id_offset = 0, prompt ids occupy [1000, 1000+L); net_inps = arange(L).
    params["input_ids"] = jnp.asarray(np.arange(1000, 1000 + L), dtype=jnp.int32)
    perm = np.array([3, 1, 7, 0, 5, 2, 6, 4])
    prompt_token_ids = jnp.asarray(1000 + perm, dtype=jnp.int32)

    out = lstm_prompt_encoder_forward(params, prompt_token_ids)
    out = jax.block_until_ready(out)

    ref = reference_forward(params, prompt_token_ids)
    np.testing.assert_allclose(np.asarray(out), np.asarray(ref),
                               rtol=2e-2, atol=2e-2)
    assert out.shape == (prompt_token_ids.shape[0], D)
    print("KERNEL_OK")
</pallas_src>

<mosaic_0001>
module attributes {stable_mosaic.version = 11 : i64} {
  func.func @_lstm_prompt_kernel(%arg0: memref<8xi32, #tpu.memory_space<smem>>, %arg1: memref<8x256xf32, #tpu.memory_space<vmem>>, %arg2: memref<2x256x1024xbf16, #tpu.memory_space<vmem>>, %arg3: memref<2x256x512xbf16, #tpu.memory_space<vmem>>, %arg4: memref<2x1024xf32, #tpu.memory_space<vmem>>, %arg5: memref<256x256xbf16, #tpu.memory_space<vmem>>, %arg6: memref<1x256xf32, #tpu.memory_space<vmem>>, %arg7: memref<256x256xbf16, #tpu.memory_space<vmem>>, %arg8: memref<1x256xf32, #tpu.memory_space<vmem>>, %arg9: memref<8x256xf32, #tpu.memory_space<vmem>>, %arg10: memref<8x256xf32, #tpu.memory_space<vmem>>) attributes {dimension_semantics = [], scalar_prefetch = 0 : i64, scratch_operands = 1 : i64, tpu.core_type = #tpu.core_type<tc>} {
    %0 = tpu.iota {dimensions = array<i32: 1>} : vector<2x256xi32>
    %1 = tpu.iota {dimensions = array<i32: 0>} : vector<2x256xi32>
    %c128_i32 = arith.constant 128 : i32
    %2 = vector.broadcast %c128_i32 : i32 to vector<2x256xi32>
    %3 = arith.cmpi sge, %0, %2 : vector<2x256xi32>
    %c1_i32 = arith.constant 1 : i32
    %4 = vector.broadcast %c1_i32 : i32 to vector<2x256xi32>
    %5 = arith.cmpi eq, %1, %4 : vector<2x256xi32>
    %6 = arith.xori %3, %5 : vector<2x256xi1>
    %cst = arith.constant dense<true> : vector<2x256xi1>
    %7 = arith.xori %6, %cst : vector<2x256xi1>
    %8 = arith.extui %7 : vector<2x256xi1> to vector<2x256xi32>
    %9 = arith.sitofp %8 : vector<2x256xi32> to vector<2x256xf32>
    %c0 = arith.constant 0 : index
    %c0_0 = arith.constant 0 : index
    %10 = vector.load %arg1[%c0, %c0_0] : memref<8x256xf32, #tpu.memory_space<vmem>>, vector<8x256xf32>
    %c0_1 = arith.constant 0 : index
    %c0_2 = arith.constant 0 : index
    %c0_3 = arith.constant 0 : index
    %11 = vector.load %arg2[%c0_1, %c0_2, %c0_3] : memref<2x256x1024xbf16, #tpu.memory_space<vmem>>, vector<1x256x1024xbf16>
    %12 = vector.shape_cast %11 : vector<1x256x1024xbf16> to vector<256x1024xbf16>
    %c0_4 = arith.constant 0 : index
    %c0_5 = arith.constant 0 : index
    %c0_6 = arith.constant 0 : index
    %13 = vector.load %arg3[%c0_4, %c0_5, %c0_6] : memref<2x256x512xbf16, #tpu.memory_space<vmem>>, vector<1x256x512xbf16>
    %14 = vector.shape_cast %13 : vector<1x256x512xbf16> to vector<256x512xbf16>
    %c0_7 = arith.constant 0 : index
    %c0_8 = arith.constant 0 : index
    %15 = vector.load %arg4[%c0_7, %c0_8] : memref<2x1024xf32, #tpu.memory_space<vmem>>, vector<1x1024xf32>
    %16 = arith.truncf %10 : vector<8x256xf32> to vector<8x256xbf16>
    %cst_9 = arith.constant dense<0.000000e+00> : vector<8x1024xf32>
    %17 = tpu.matmul %16, %12, %cst_9 {dimension_numbers = #tpu.dot_dimension_numbers<[1], [0], [0], [1], [0, 0, 1, 1], [], []>} : vector<8x256xbf16>, vector<256x1024xbf16>, vector<8x1024xf32> -> vector<8x1024xf32>
    %18 = vector.broadcast %15 : vector<1x1024xf32> to vector<8x1024xf32>
    %19 = arith.addf %17, %18 : vector<8x1024xf32>
    %cst_10 = arith.constant 0.000000e+00 : bf16
    %20 = vector.broadcast %cst_10 : bf16 to vector<2x256xbf16>
    %cst_11 = arith.constant 0.000000e+00 : f32
    %21 = vector.broadcast %cst_11 : f32 to vector<2x128xf32>
    %22 = vector.extract_strided_slice %19 {offsets = [0, 0], sizes = [1, 512], strides = [1, 1]} : vector<8x1024xf32> to vector<1x512xf32>
    %23 = vector.extract_strided_slice %19 {offsets = [7, 512], sizes = [1, 512], strides = [1, 1]} : vector<8x1024xf32> to vector<1x512xf32>
    %24 = tpu.concatenate %22, %23 in 0 : vector<1x512xf32>, vector<1x512xf32> -> vector<2x512xf32>
    %cst_12 = arith.constant dense<0.000000e+00> : vector<2x512xf32>
    %25 = tpu.matmul %20, %14, %cst_12 {dimension_numbers = #tpu.dot_dimension_numbers<[1], [0], [0], [1], [0, 0, 1, 1], [], []>} : vector<2x256xbf16>, vector<256x512xbf16>, vector<2x512xf32> -> vector<2x512xf32>
    %26 = arith.addf %24, %25 : vector<2x512xf32>
    %27 = vector.extract_strided_slice %26 {offsets = [0, 0], sizes = [2, 384], strides = [1, 1]} : vector<2x512xf32> to vector<2x384xf32>
    %28 = arith.negf %27 : vector<2x384xf32>
    %29 = math.exp %28 : vector<2x384xf32>
    %cst_13 = arith.constant 1.000000e+00 : f32
    %30 = vector.broadcast %cst_13 : f32 to vector<2x384xf32>
    %31 = arith.addf %30, %29 : vector<2x384xf32>
    %32 = arith.divf %30, %31 : vector<2x384xf32>
    %33 = vector.extract_strided_slice %32 {offsets = [0, 0], sizes = [2, 128], strides = [1, 1]} : vector<2x384xf32> to vector<2x128xf32>
    %34 = vector.extract_strided_slice %32 {offsets = [0, 128], sizes = [2, 128], strides = [1, 1]} : vector<2x384xf32> to vector<2x128xf32>
    %35 = vector.extract_strided_slice %32 {offsets = [0, 256], sizes = [2, 128], strides = [1, 1]} : vector<2x384xf32> to vector<2x128xf32>
    %36 = vector.extract_strided_slice %26 {offsets = [0, 384], sizes = [2, 128], strides = [1, 1]} : vector<2x512xf32> to vector<2x128xf32>
    %37 = math.tanh %36 : vector<2x128xf32>
    %38 = arith.mulf %34, %21 : vector<2x128xf32>
    %39 = arith.mulf %33, %37 : vector<2x128xf32>
    %40 = arith.addf %38, %39 : vector<2x128xf32>
    %41 = math.tanh %40 : vector<2x128xf32>
    %42 = arith.mulf %35, %41 : vector<2x128xf32>
    %43 = vector.extract_strided_slice %42 {offsets = [0, 0], sizes = [1, 128], strides = [1, 1]} : vector<2x128xf32> to vector<1x128xf32>
    %44 = vector.extract_strided_slice %42 {offsets = [1, 0], sizes = [1, 128], strides = [1, 1]} : vector<2x128xf32> to vector<1x128xf32>
    %45 = tpu.concatenate %42, %42 in 1 : vector<2x128xf32>, vector<2x128xf32> -> vector<2x256xf32>
    %46 = arith.mulf %45, %9 : vector<2x256xf32>
    %47 = arith.truncf %46 : vector<2x256xf32> to vector<2x256xbf16>
    %48 = vector.extract_strided_slice %19 {offsets = [1, 0], sizes = [1, 512], strides = [1, 1]} : vector<8x1024xf32> to vector<1x512xf32>
    %49 = vector.extract_strided_slice %19 {offsets = [6, 512], sizes = [1, 512], strides = [1, 1]} : vector<8x1024xf32> to vector<1x512xf32>
    %50 = tpu.concatenate %48, %49 in 0 : vector<1x512xf32>, vector<1x512xf32> -> vector<2x512xf32>
    %cst_14 = arith.constant dense<0.000000e+00> : vector<2x512xf32>
    %51 = tpu.matmul %47, %14, %cst_14 {dimension_numbers = #tpu.dot_dimension_numbers<[1], [0], [0], [1], [0, 0, 1, 1], [], []>} : vector<2x256xbf16>, vector<256x512xbf16>, vector<2x512xf32> -> vector<2x512xf32>
    %52 = arith.addf %50, %51 : vector<2x512xf32>
    %53 = vector.extract_strided_slice %52 {offsets = [0, 0], sizes = [2, 384], strides = [1, 1]} : vector<2x512xf32> to vector<2x384xf32>
    %54 = arith.negf %53 : vector<2x384xf32>
    %55 = math.exp %54 : vector<2x384xf32>
    %cst_15 = arith.constant 1.000000e+00 : f32
    %56 = vector.broadcast %cst_15 : f32 to vector<2x384xf32>
    %57 = arith.addf %56, %55 : vector<2x384xf32>
    %58 = arith.divf %56, %57 : vector<2x384xf32>
    %59 = vector.extract_strided_slice %58 {offsets = [0, 0], sizes = [2, 128], strides = [1, 1]} : vector<2x384xf32> to vector<2x128xf32>
    %60 = vector.extract_strided_slice %58 {offsets = [0, 128], sizes = [2, 128], strides = [1, 1]} : vector<2x384xf32> to vector<2x128xf32>
    %61 = vector.extract_strided_slice %58 {offsets = [0, 256], sizes = [2, 128], strides = [1, 1]} : vector<2x384xf32> to vector<2x128xf32>
    %62 = vector.extract_strided_slice %52 {offsets = [0, 384], sizes = [2, 128], strides = [1, 1]} : vector<2x512xf32> to vector<2x128xf32>
    %63 = math.tanh %62 : vector<2x128xf32>
    %64 = arith.mulf %60, %40 : vector<2x128xf32>
    %65 = arith.mulf %59, %63 : vector<2x128xf32>
    %66 = arith.addf %64, %65 : vector<2x128xf32>
    %67 = math.tanh %66 : vector<2x128xf32>
    %68 = arith.mulf %61, %67 : vector<2x128xf32>
    %69 = vector.extract_strided_slice %68 {offsets = [0, 0], sizes = [1, 128], strides = [1, 1]} : vector<2x128xf32> to vector<1x128xf32>
    %70 = vector.extract_strided_slice %68 {offsets = [1, 0], sizes = [1, 128], strides = [1, 1]} : vector<2x128xf32> to vector<1x128xf32>
    %71 = tpu.concatenate %68, %68 in 1 : vector<2x128xf32>, vector<2x128xf32> -> vector<2x256xf32>
    %72 = arith.mulf %71, %9 : vector<2x256xf32>
    %73 = arith.truncf %72 : vector<2x256xf32> to vector<2x256xbf16>
    %74 = vector.extract_strided_slice %19 {offsets = [2, 0], sizes = [1, 512], strides = [1, 1]} : vector<8x1024xf32> to vector<1x512xf32>
    %75 = vector.extract_strided_slice %19 {offsets = [5, 512], sizes = [1, 512], strides = [1, 1]} : vector<8x1024xf32> to vector<1x512xf32>
    %76 = tpu.concatenate %74, %75 in 0 : vector<1x512xf32>, vector<1x512xf32> -> vector<2x512xf32>
    %cst_16 = arith.constant dense<0.000000e+00> : vector<2x512xf32>
    %77 = tpu.matmul %73, %14, %cst_16 {dimension_numbers = #tpu.dot_dimension_numbers<[1], [0], [0], [1], [0, 0, 1, 1], [], []>} : vector<2x256xbf16>, vector<256x512xbf16>, vector<2x512xf32> -> vector<2x512xf32>
    %78 = arith.addf %76, %77 : vector<2x512xf32>
    %79 = vector.extract_strided_slice %78 {offsets = [0, 0], sizes = [2, 384], strides = [1, 1]} : vector<2x512xf32> to vector<2x384xf32>
    %80 = arith.negf %79 : vector<2x384xf32>
    %81 = math.exp %80 : vector<2x384xf32>
    %cst_17 = arith.constant 1.000000e+00 : f32
    %82 = vector.broadcast %cst_17 : f32 to vector<2x384xf32>
    %83 = arith.addf %82, %81 : vector<2x384xf32>
    %84 = arith.divf %82, %83 : vector<2x384xf32>
    %85 = vector.extract_strided_slice %84 {offsets = [0, 0], sizes = [2, 128], strides = [1, 1]} : vector<2x384xf32> to vector<2x128xf32>
    %86 = vector.extract_strided_slice %84 {offsets = [0, 128], sizes = [2, 128], strides = [1, 1]} : vector<2x384xf32> to vector<2x128xf32>
    %87 = vector.extract_strided_slice %84 {offsets = [0, 256], sizes = [2, 128], strides = [1, 1]} : vector<2x384xf32> to vector<2x128xf32>
    %88 = vector.extract_strided_slice %78 {offsets = [0, 384], sizes = [2, 128], strides = [1, 1]} : vector<2x512xf32> to vector<2x128xf32>
    %89 = math.tanh %88 : vector<2x128xf32>
    %90 = arith.mulf %86, %66 : vector<2x128xf32>
    %91 = arith.mulf %85, %89 : vector<2x128xf32>
    %92 = arith.addf %90, %91 : vector<2x128xf32>
    %93 = math.tanh %92 : vector<2x128xf32>
    %94 = arith.mulf %87, %93 : vector<2x128xf32>
    %95 = vector.extract_strided_slice %94 {offsets = [0, 0], sizes = [1, 128], strides = [1, 1]} : vector<2x128xf32> to vector<1x128xf32>
    %96 = vector.extract_strided_slice %94 {offsets = [1, 0], sizes = [1, 128], strides = [1, 1]} : vector<2x128xf32> to vector<1x128xf32>
    %97 = tpu.concatenate %94, %94 in 1 : vector<2x128xf32>, vector<2x128xf32> -> vector<2x256xf32>
    %98 = arith.mulf %97, %9 : vector<2x256xf32>
    %99 = arith.truncf %98 : vector<2x256xf32> to vector<2x256xbf16>
    %100 = vector.extract_strided_slice %19 {offsets = [3, 0], sizes = [1, 512], strides = [1, 1]} : vector<8x1024xf32> to vector<1x512xf32>
    %101 = vector.extract_strided_slice %19 {offsets = [4, 512], sizes = [1, 512], strides = [1, 1]} : vector<8x1024xf32> to vector<1x512xf32>
    %102 = tpu.concatenate %100, %101 in 0 : vector<1x512xf32>, vector<1x512xf32> -> vector<2x512xf32>
    %cst_18 = arith.constant dense<0.000000e+00> : vector<2x512xf32>
    %103 = tpu.matmul %99, %14, %cst_18 {dimension_numbers = #tpu.dot_dimension_numbers<[1], [0], [0], [1], [0, 0, 1, 1], [], []>} : vector<2x256xbf16>, vector<256x512xbf16>, vector<2x512xf32> -> vector<2x512xf32>
    %104 = arith.addf %102, %103 : vector<2x512xf32>
    %105 = vector.extract_strided_slice %104 {offsets = [0, 0], sizes = [2, 384], strides = [1, 1]} : vector<2x512xf32> to vector<2x384xf32>
    %106 = arith.negf %105 : vector<2x384xf32>
    %107 = math.exp %106 : vector<2x384xf32>
    %cst_19 = arith.constant 1.000000e+00 : f32
    %108 = vector.broadcast %cst_19 : f32 to vector<2x384xf32>
    %109 = arith.addf %108, %107 : vector<2x384xf32>
    %110 = arith.divf %108, %109 : vector<2x384xf32>
    %111 = vector.extract_strided_slice %110 {offsets = [0, 0], sizes = [2, 128], strides = [1, 1]} : vector<2x384xf32> to vector<2x128xf32>
    %112 = vector.extract_strided_slice %110 {offsets = [0, 128], sizes = [2, 128], strides = [1, 1]} : vector<2x384xf32> to vector<2x128xf32>
    %113 = vector.extract_strided_slice %110 {offsets = [0, 256], sizes = [2, 128], strides = [1, 1]} : vector<2x384xf32> to vector<2x128xf32>
    %114 = vector.extract_strided_slice %104 {offsets = [0, 384], sizes = [2, 128], strides = [1, 1]} : vector<2x512xf32> to vector<2x128xf32>
    %115 = math.tanh %114 : vector<2x128xf32>
    %116 = arith.mulf %112, %92 : vector<2x128xf32>
    %117 = arith.mulf %111, %115 : vector<2x128xf32>
    %118 = arith.addf %116, %117 : vector<2x128xf32>
    %119 = math.tanh %118 : vector<2x128xf32>
    %120 = arith.mulf %113, %119 : vector<2x128xf32>
    %121 = vector.extract_strided_slice %120 {offsets = [0, 0], sizes = [1, 128], strides = [1, 1]} : vector<2x128xf32> to vector<1x128xf32>
    %122 = vector.extract_strided_slice %120 {offsets = [1, 0], sizes = [1, 128], strides = [1, 1]} : vector<2x128xf32> to vector<1x128xf32>
    %123 = tpu.concatenate %120, %120 in 1 : vector<2x128xf32>, vector<2x128xf32> -> vector<2x256xf32>
    %124 = arith.mulf %123, %9 : vector<2x256xf32>
    %125 = arith.truncf %124 : vector<2x256xf32> to vector<2x256xbf16>
    %126 = vector.extract_strided_slice %19 {offsets = [4, 0], sizes = [1, 512], strides = [1, 1]} : vector<8x1024xf32> to vector<1x512xf32>
    %127 = vector.extract_strided_slice %19 {offsets = [3, 512], sizes = [1, 512], strides = [1, 1]} : vector<8x1024xf32> to vector<1x512xf32>
    %128 = tpu.concatenate %126, %127 in 0 : vector<1x512xf32>, vector<1x512xf32> -> vector<2x512xf32>
    %cst_20 = arith.constant dense<0.000000e+00> : vector<2x512xf32>
    %129 = tpu.matmul %125, %14, %cst_20 {dimension_numbers = #tpu.dot_dimension_numbers<[1], [0], [0], [1], [0, 0, 1, 1], [], []>} : vector<2x256xbf16>, vector<256x512xbf16>, vector<2x512xf32> -> vector<2x512xf32>
    %130 = arith.addf %128, %129 : vector<2x512xf32>
    %131 = vector.extract_strided_slice %130 {offsets = [0, 0], sizes = [2, 384], strides = [1, 1]} : vector<2x512xf32> to vector<2x384xf32>
    %132 = arith.negf %131 : vector<2x384xf32>
    %133 = math.exp %132 : vector<2x384xf32>
    %cst_21 = arith.constant 1.000000e+00 : f32
    %134 = vector.broadcast %cst_21 : f32 to vector<2x384xf32>
    %135 = arith.addf %134, %133 : vector<2x384xf32>
    %136 = arith.divf %134, %135 : vector<2x384xf32>
    %137 = vector.extract_strided_slice %136 {offsets = [0, 0], sizes = [2, 128], strides = [1, 1]} : vector<2x384xf32> to vector<2x128xf32>
    %138 = vector.extract_strided_slice %136 {offsets = [0, 128], sizes = [2, 128], strides = [1, 1]} : vector<2x384xf32> to vector<2x128xf32>
    %139 = vector.extract_strided_slice %136 {offsets = [0, 256], sizes = [2, 128], strides = [1, 1]} : vector<2x384xf32> to vector<2x128xf32>
    %140 = vector.extract_strided_slice %130 {offsets = [0, 384], sizes = [2, 128], strides = [1, 1]} : vector<2x512xf32> to vector<2x128xf32>
    %141 = math.tanh %140 : vector<2x128xf32>
    %142 = arith.mulf %138, %118 : vector<2x128xf32>
    %143 = arith.mulf %137, %141 : vector<2x128xf32>
    %144 = arith.addf %142, %143 : vector<2x128xf32>
    %145 = math.tanh %144 : vector<2x128xf32>
    %146 = arith.mulf %139, %145 : vector<2x128xf32>
    %147 = vector.extract_strided_slice %146 {offsets = [0, 0], sizes = [1, 128], strides = [1, 1]} : vector<2x128xf32> to vector<1x128xf32>
    %148 = vector.extract_strided_slice %146 {offsets = [1, 0], sizes = [1, 128], strides = [1, 1]} : vector<2x128xf32> to vector<1x128xf32>
    %149 = tpu.concatenate %146, %146 in 1 : vector<2x128xf32>, vector<2x128xf32> -> vector<2x256xf32>
    %150 = arith.mulf %149, %9 : vector<2x256xf32>
    %151 = arith.truncf %150 : vector<2x256xf32> to vector<2x256xbf16>
    %152 = vector.extract_strided_slice %19 {offsets = [5, 0], sizes = [1, 512], strides = [1, 1]} : vector<8x1024xf32> to vector<1x512xf32>
    %153 = vector.extract_strided_slice %19 {offsets = [2, 512], sizes = [1, 512], strides = [1, 1]} : vector<8x1024xf32> to vector<1x512xf32>
    %154 = tpu.concatenate %152, %153 in 0 : vector<1x512xf32>, vector<1x512xf32> -> vector<2x512xf32>
    %cst_22 = arith.constant dense<0.000000e+00> : vector<2x512xf32>
    %155 = tpu.matmul %151, %14, %cst_22 {dimension_numbers = #tpu.dot_dimension_numbers<[1], [0], [0], [1], [0, 0, 1, 1], [], []>} : vector<2x256xbf16>, vector<256x512xbf16>, vector<2x512xf32> -> vector<2x512xf32>
    %156 = arith.addf %154, %155 : vector<2x512xf32>
    %157 = vector.extract_strided_slice %156 {offsets = [0, 0], sizes = [2, 384], strides = [1, 1]} : vector<2x512xf32> to vector<2x384xf32>
    %158 = arith.negf %157 : vector<2x384xf32>
    %159 = math.exp %158 : vector<2x384xf32>
    %cst_23 = arith.constant 1.000000e+00 : f32
    %160 = vector.broadcast %cst_23 : f32 to vector<2x384xf32>
    %161 = arith.addf %160, %159 : vector<2x384xf32>
    %162 = arith.divf %160, %161 : vector<2x384xf32>
    %163 = vector.extract_strided_slice %162 {offsets = [0, 0], sizes = [2, 128], strides = [1, 1]} : vector<2x384xf32> to vector<2x128xf32>
    %164 = vector.extract_strided_slice %162 {offsets = [0, 128], sizes = [2, 128], strides = [1, 1]} : vector<2x384xf32> to vector<2x128xf32>
    %165 = vector.extract_strided_slice %162 {offsets = [0, 256], sizes = [2, 128], strides = [1, 1]} : vector<2x384xf32> to vector<2x128xf32>
    %166 = vector.extract_strided_slice %156 {offsets = [0, 384], sizes = [2, 128], strides = [1, 1]} : vector<2x512xf32> to vector<2x128xf32>
    %167 = math.tanh %166 : vector<2x128xf32>
    %168 = arith.mulf %164, %144 : vector<2x128xf32>
    %169 = arith.mulf %163, %167 : vector<2x128xf32>
    %170 = arith.addf %168, %169 : vector<2x128xf32>
    %171 = math.tanh %170 : vector<2x128xf32>
    %172 = arith.mulf %165, %171 : vector<2x128xf32>
    %173 = vector.extract_strided_slice %172 {offsets = [0, 0], sizes = [1, 128], strides = [1, 1]} : vector<2x128xf32> to vector<1x128xf32>
    %174 = vector.extract_strided_slice %172 {offsets = [1, 0], sizes = [1, 128], strides = [1, 1]} : vector<2x128xf32> to vector<1x128xf32>
    %175 = tpu.concatenate %172, %172 in 1 : vector<2x128xf32>, vector<2x128xf32> -> vector<2x256xf32>
    %176 = arith.mulf %175, %9 : vector<2x256xf32>
    %177 = arith.truncf %176 : vector<2x256xf32> to vector<2x256xbf16>
    %178 = vector.extract_strided_slice %19 {offsets = [6, 0], sizes = [1, 512], strides = [1, 1]} : vector<8x1024xf32> to vector<1x512xf32>
    %179 = vector.extract_strided_slice %19 {offsets = [1, 512], sizes = [1, 512], strides = [1, 1]} : vector<8x1024xf32> to vector<1x512xf32>
    %180 = tpu.concatenate %178, %179 in 0 : vector<1x512xf32>, vector<1x512xf32> -> vector<2x512xf32>
    %cst_24 = arith.constant dense<0.000000e+00> : vector<2x512xf32>
    %181 = tpu.matmul %177, %14, %cst_24 {dimension_numbers = #tpu.dot_dimension_numbers<[1], [0], [0], [1], [0, 0, 1, 1], [], []>} : vector<2x256xbf16>, vector<256x512xbf16>, vector<2x512xf32> -> vector<2x512xf32>
    %182 = arith.addf %180, %181 : vector<2x512xf32>
    %183 = vector.extract_strided_slice %182 {offsets = [0, 0], sizes = [2, 384], strides = [1, 1]} : vector<2x512xf32> to vector<2x384xf32>
    %184 = arith.negf %183 : vector<2x384xf32>
    %185 = math.exp %184 : vector<2x384xf32>
    %cst_25 = arith.constant 1.000000e+00 : f32
    %186 = vector.broadcast %cst_25 : f32 to vector<2x384xf32>
    %187 = arith.addf %186, %185 : vector<2x384xf32>
    %188 = arith.divf %186, %187 : vector<2x384xf32>
    %189 = vector.extract_strided_slice %188 {offsets = [0, 0], sizes = [2, 128], strides = [1, 1]} : vector<2x384xf32> to vector<2x128xf32>
    %190 = vector.extract_strided_slice %188 {offsets = [0, 128], sizes = [2, 128], strides = [1, 1]} : vector<2x384xf32> to vector<2x128xf32>
    %191 = vector.extract_strided_slice %188 {offsets = [0, 256], sizes = [2, 128], strides = [1, 1]} : vector<2x384xf32> to vector<2x128xf32>
    %192 = vector.extract_strided_slice %182 {offsets = [0, 384], sizes = [2, 128], strides = [1, 1]} : vector<2x512xf32> to vector<2x128xf32>
    %193 = math.tanh %192 : vector<2x128xf32>
    %194 = arith.mulf %190, %170 : vector<2x128xf32>
    %195 = arith.mulf %189, %193 : vector<2x128xf32>
    %196 = arith.addf %194, %195 : vector<2x128xf32>
    %197 = math.tanh %196 : vector<2x128xf32>
    %198 = arith.mulf %191, %197 : vector<2x128xf32>
    %199 = vector.extract_strided_slice %198 {offsets = [0, 0], sizes = [1, 128], strides = [1, 1]} : vector<2x128xf32> to vector<1x128xf32>
    %200 = vector.extract_strided_slice %198 {offsets = [1, 0], sizes = [1, 128], strides = [1, 1]} : vector<2x128xf32> to vector<1x128xf32>
    %201 = tpu.concatenate %198, %198 in 1 : vector<2x128xf32>, vector<2x128xf32> -> vector<2x256xf32>
    %202 = arith.mulf %201, %9 : vector<2x256xf32>
    %203 = arith.truncf %202 : vector<2x256xf32> to vector<2x256xbf16>
    %204 = vector.extract_strided_slice %19 {offsets = [7, 0], sizes = [1, 512], strides = [1, 1]} : vector<8x1024xf32> to vector<1x512xf32>
    %205 = vector.extract_strided_slice %19 {offsets = [0, 512], sizes = [1, 512], strides = [1, 1]} : vector<8x1024xf32> to vector<1x512xf32>
    %206 = tpu.concatenate %204, %205 in 0 : vector<1x512xf32>, vector<1x512xf32> -> vector<2x512xf32>
    %cst_26 = arith.constant dense<0.000000e+00> : vector<2x512xf32>
    %207 = tpu.matmul %203, %14, %cst_26 {dimension_numbers = #tpu.dot_dimension_numbers<[1], [0], [0], [1], [0, 0, 1, 1], [], []>} : vector<2x256xbf16>, vector<256x512xbf16>, vector<2x512xf32> -> vector<2x512xf32>
    %208 = arith.addf %206, %207 : vector<2x512xf32>
    %209 = vector.extract_strided_slice %208 {offsets = [0, 0], sizes = [2, 384], strides = [1, 1]} : vector<2x512xf32> to vector<2x384xf32>
    %210 = arith.negf %209 : vector<2x384xf32>
    %211 = math.exp %210 : vector<2x384xf32>
    %cst_27 = arith.constant 1.000000e+00 : f32
    %212 = vector.broadcast %cst_27 : f32 to vector<2x384xf32>
    %213 = arith.addf %212, %211 : vector<2x384xf32>
    %214 = arith.divf %212, %213 : vector<2x384xf32>
    %215 = vector.extract_strided_slice %214 {offsets = [0, 0], sizes = [2, 128], strides = [1, 1]} : vector<2x384xf32> to vector<2x128xf32>
    %216 = vector.extract_strided_slice %214 {offsets = [0, 128], sizes = [2, 128], strides = [1, 1]} : vector<2x384xf32> to vector<2x128xf32>
    %217 = vector.extract_strided_slice %214 {offsets = [0, 256], sizes = [2, 128], strides = [1, 1]} : vector<2x384xf32> to vector<2x128xf32>
    %218 = vector.extract_strided_slice %208 {offsets = [0, 384], sizes = [2, 128], strides = [1, 1]} : vector<2x512xf32> to vector<2x128xf32>
    %219 = math.tanh %218 : vector<2x128xf32>
    %220 = arith.mulf %216, %196 : vector<2x128xf32>
    %221 = arith.mulf %215, %219 : vector<2x128xf32>
    %222 = arith.addf %220, %221 : vector<2x128xf32>
    %223 = math.tanh %222 : vector<2x128xf32>
    %224 = arith.mulf %217, %223 : vector<2x128xf32>
    %225 = vector.extract_strided_slice %224 {offsets = [0, 0], sizes = [1, 128], strides = [1, 1]} : vector<2x128xf32> to vector<1x128xf32>
    %226 = vector.extract_strided_slice %224 {offsets = [1, 0], sizes = [1, 128], strides = [1, 1]} : vector<2x128xf32> to vector<1x128xf32>
    %227 = tpu.concatenate %43, %69, %95, %121, %147, %173, %199, %225 in 0 : vector<1x128xf32>, vector<1x128xf32>, vector<1x128xf32>, vector<1x128xf32>, vector<1x128xf32>, vector<1x128xf32>, vector<1x128xf32>, vector<1x128xf32> -> vector<8x128xf32>
    %228 = tpu.concatenate %226, %200, %174, %148, %122, %96, %70, %44 in 0 : vector<1x128xf32>, vector<1x128xf32>, vector<1x128xf32>, vector<1x128xf32>, vector<1x128xf32>, vector<1x128xf32>, vector<1x128xf32>, vector<1x128xf32> -> vector<8x128xf32>
    %229 = tpu.concatenate %227, %228 in 1 : vector<8x128xf32>, vector<8x128xf32> -> vector<8x256xf32>
    %c1 = arith.constant 1 : index
    %c0_28 = arith.constant 0 : index
    %c0_29 = arith.constant 0 : index
    %230 = vector.load %arg2[%c1, %c0_28, %c0_29] : memref<2x256x1024xbf16, #tpu.memory_space<vmem>>, vector<1x256x1024xbf16>
    %231 = vector.shape_cast %230 : vector<1x256x1024xbf16> to vector<256x1024xbf16>
    %c1_30 = arith.constant 1 : index
    %c0_31 = arith.constant 0 : index
    %c0_32 = arith.constant 0 : index
    %232 = vector.load %arg3[%c1_30, %c0_31, %c0_32] : memref<2x256x512xbf16, #tpu.memory_space<vmem>>, vector<1x256x512xbf16>
    %233 = vector.shape_cast %232 : vector<1x256x512xbf16> to vector<256x512xbf16>
    %c1_33 = arith.constant 1 : index
    %c0_34 = arith.constant 0 : index
    %234 = vector.load %arg4[%c1_33, %c0_34] : memref<2x1024xf32, #tpu.memory_space<vmem>>, vector<1x1024xf32>
    %235 = arith.truncf %229 : vector<8x256xf32> to vector<8x256xbf16>
    %cst_35 = arith.constant dense<0.000000e+00> : vector<8x1024xf32>
    %236 = tpu.matmul %235, %231, %cst_35 {dimension_numbers = #tpu.dot_dimension_numbers<[1], [0], [0], [1], [0, 0, 1, 1], [], []>} : vector<8x256xbf16>, vector<256x1024xbf16>, vector<8x1024xf32> -> vector<8x1024xf32>
    %237 = vector.broadcast %234 : vector<1x1024xf32> to vector<8x1024xf32>
    %238 = arith.addf %236, %237 : vector<8x1024xf32>
    %cst_36 = arith.constant 0.000000e+00 : bf16
    %239 = vector.broadcast %cst_36 : bf16 to vector<2x256xbf16>
    %cst_37 = arith.constant 0.000000e+00 : f32
    %240 = vector.broadcast %cst_37 : f32 to vector<2x128xf32>
    %241 = vector.extract_strided_slice %238 {offsets = [0, 0], sizes = [1, 512], strides = [1, 1]} : vector<8x1024xf32> to vector<1x512xf32>
    %242 = vector.extract_strided_slice %238 {offsets = [7, 512], sizes = [1, 512], strides = [1, 1]} : vector<8x1024xf32> to vector<1x512xf32>
    %243 = tpu.concatenate %241, %242 in 0 : vector<1x512xf32>, vector<1x512xf32> -> vector<2x512xf32>
    %cst_38 = arith.constant dense<0.000000e+00> : vector<2x512xf32>
    %244 = tpu.matmul %239, %233, %cst_38 {dimension_numbers = #tpu.dot_dimension_numbers<[1], [0], [0], [1], [0, 0, 1, 1], [], []>} : vector<2x256xbf16>, vector<256x512xbf16>, vector<2x512xf32> -> vector<2x512xf32>
    %245 = arith.addf %243, %244 : vector<2x512xf32>
    %246 = vector.extract_strided_slice %245 {offsets = [0, 0], sizes = [2, 384], strides = [1, 1]} : vector<2x512xf32> to vector<2x384xf32>
    %247 = arith.negf %246 : vector<2x384xf32>
    %248 = math.exp %247 : vector<2x384xf32>
    %cst_39 = arith.constant 1.000000e+00 : f32
    %249 = vector.broadcast %cst_39 : f32 to vector<2x384xf32>
    %250 = arith.addf %249, %248 : vector<2x384xf32>
    %251 = arith.divf %249, %250 : vector<2x384xf32>
    %252 = vector.extract_strided_slice %251 {offsets = [0, 0], sizes = [2, 128], strides = [1, 1]} : vector<2x384xf32> to vector<2x128xf32>
    %253 = vector.extract_strided_slice %251 {offsets = [0, 128], sizes = [2, 128], strides = [1, 1]} : vector<2x384xf32> to vector<2x128xf32>
    %254 = vector.extract_strided_slice %251 {offsets = [0, 256], sizes = [2, 128], strides = [1, 1]} : vector<2x384xf32> to vector<2x128xf32>
    %255 = vector.extract_strided_slice %245 {offsets = [0, 384], sizes = [2, 128], strides = [1, 1]} : vector<2x512xf32> to vector<2x128xf32>
    %256 = math.tanh %255 : vector<2x128xf32>
    %257 = arith.mulf %253, %240 : vector<2x128xf32>
    %258 = arith.mulf %252, %256 : vector<2x128xf32>
    %259 = arith.addf %257, %258 : vector<2x128xf32>
    %260 = math.tanh %259 : vector<2x128xf32>
    %261 = arith.mulf %254, %260 : vector<2x128xf32>
    %262 = vector.extract_strided_slice %261 {offsets = [0, 0], sizes = [1, 128], strides = [1, 1]} : vector<2x128xf32> to vector<1x128xf32>
    %263 = vector.extract_strided_slice %261 {offsets = [1, 0], sizes = [1, 128], strides = [1, 1]} : vector<2x128xf32> to vector<1x128xf32>
    %264 = tpu.concatenate %261, %261 in 1 : vector<2x128xf32>, vector<2x128xf32> -> vector<2x256xf32>
    %265 = arith.mulf %264, %9 : vector<2x256xf32>
    %266 = arith.truncf %265 : vector<2x256xf32> to vector<2x256xbf16>
    %267 = vector.extract_strided_slice %238 {offsets = [1, 0], sizes = [1, 512], strides = [1, 1]} : vector<8x1024xf32> to vector<1x512xf32>
    %268 = vector.extract_strided_slice %238 {offsets = [6, 512], sizes = [1, 512], strides = [1, 1]} : vector<8x1024xf32> to vector<1x512xf32>
    %269 = tpu.concatenate %267, %268 in 0 : vector<1x512xf32>, vector<1x512xf32> -> vector<2x512xf32>
    %cst_40 = arith.constant dense<0.000000e+00> : vector<2x512xf32>
    %270 = tpu.matmul %266, %233, %cst_40 {dimension_numbers = #tpu.dot_dimension_numbers<[1], [0], [0], [1], [0, 0, 1, 1], [], []>} : vector<2x256xbf16>, vector<256x512xbf16>, vector<2x512xf32> -> vector<2x512xf32>
    %271 = arith.addf %269, %270 : vector<2x512xf32>
    %272 = vector.extract_strided_slice %271 {offsets = [0, 0], sizes = [2, 384], strides = [1, 1]} : vector<2x512xf32> to vector<2x384xf32>
    %273 = arith.negf %272 : vector<2x384xf32>
    %274 = math.exp %273 : vector<2x384xf32>
    %cst_41 = arith.constant 1.000000e+00 : f32
    %275 = vector.broadcast %cst_41 : f32 to vector<2x384xf32>
    %276 = arith.addf %275, %274 : vector<2x384xf32>
    %277 = arith.divf %275, %276 : vector<2x384xf32>
    %278 = vector.extract_strided_slice %277 {offsets = [0, 0], sizes = [2, 128], strides = [1, 1]} : vector<2x384xf32> to vector<2x128xf32>
    %279 = vector.extract_strided_slice %277 {offsets = [0, 128], sizes = [2, 128], strides = [1, 1]} : vector<2x384xf32> to vector<2x128xf32>
    %280 = vector.extract_strided_slice %277 {offsets = [0, 256], sizes = [2, 128], strides = [1, 1]} : vector<2x384xf32> to vector<2x128xf32>
    %281 = vector.extract_strided_slice %271 {offsets = [0, 384], sizes = [2, 128], strides = [1, 1]} : vector<2x512xf32> to vector<2x128xf32>
    %282 = math.tanh %281 : vector<2x128xf32>
    %283 = arith.mulf %279, %259 : vector<2x128xf32>
    %284 = arith.mulf %278, %282 : vector<2x128xf32>
    %285 = arith.addf %283, %284 : vector<2x128xf32>
    %286 = math.tanh %285 : vector<2x128xf32>
    %287 = arith.mulf %280, %286 : vector<2x128xf32>
    %288 = vector.extract_strided_slice %287 {offsets = [0, 0], sizes = [1, 128], strides = [1, 1]} : vector<2x128xf32> to vector<1x128xf32>
    %289 = vector.extract_strided_slice %287 {offsets = [1, 0], sizes = [1, 128], strides = [1, 1]} : vector<2x128xf32> to vector<1x128xf32>
    %290 = tpu.concatenate %287, %287 in 1 : vector<2x128xf32>, vector<2x128xf32> -> vector<2x256xf32>
    %291 = arith.mulf %290, %9 : vector<2x256xf32>
    %292 = arith.truncf %291 : vector<2x256xf32> to vector<2x256xbf16>
    %293 = vector.extract_strided_slice %238 {offsets = [2, 0], sizes = [1, 512], strides = [1, 1]} : vector<8x1024xf32> to vector<1x512xf32>
    %294 = vector.extract_strided_slice %238 {offsets = [5, 512], sizes = [1, 512], strides = [1, 1]} : vector<8x1024xf32> to vector<1x512xf32>
    %295 = tpu.concatenate %293, %294 in 0 : vector<1x512xf32>, vector<1x512xf32> -> vector<2x512xf32>
    %cst_42 = arith.constant dense<0.000000e+00> : vector<2x512xf32>
    %296 = tpu.matmul %292, %233, %cst_42 {dimension_numbers = #tpu.dot_dimension_numbers<[1], [0], [0], [1], [0, 0, 1, 1], [], []>} : vector<2x256xbf16>, vector<256x512xbf16>, vector<2x512xf32> -> vector<2x512xf32>
    %297 = arith.addf %295, %296 : vector<2x512xf32>
    %298 = vector.extract_strided_slice %297 {offsets = [0, 0], sizes = [2, 384], strides = [1, 1]} : vector<2x512xf32> to vector<2x384xf32>
    %299 = arith.negf %298 : vector<2x384xf32>
    %300 = math.exp %299 : vector<2x384xf32>
    %cst_43 = arith.constant 1.000000e+00 : f32
    %301 = vector.broadcast %cst_43 : f32 to vector<2x384xf32>
    %302 = arith.addf %301, %300 : vector<2x384xf32>
    %303 = arith.divf %301, %302 : vector<2x384xf32>
    %304 = vector.extract_strided_slice %303 {offsets = [0, 0], sizes = [2, 128], strides = [1, 1]} : vector<2x384xf32> to vector<2x128xf32>
    %305 = vector.extract_strided_slice %303 {offsets = [0, 128], sizes = [2, 128], strides = [1, 1]} : vector<2x384xf32> to vector<2x128xf32>
    %306 = vector.extract_strided_slice %303 {offsets = [0, 256], sizes = [2, 128], strides = [1, 1]} : vector<2x384xf32> to vector<2x128xf32>
    %307 = vector.extract_strided_slice %297 {offsets = [0, 384], sizes = [2, 128], strides = [1, 1]} : vector<2x512xf32> to vector<2x128xf32>
    %308 = math.tanh %307 : vector<2x128xf32>
    %309 = arith.mulf %305, %285 : vector<2x128xf32>
    %310 = arith.mulf %304, %308 : vector<2x128xf32>
    %311 = arith.addf %309, %310 : vector<2x128xf32>
    %312 = math.tanh %311 : vector<2x128xf32>
    %313 = arith.mulf %306, %312 : vector<2x128xf32>
    %314 = vector.extract_strided_slice %313 {offsets = [0, 0], sizes = [1, 128], strides = [1, 1]} : vector<2x128xf32> to vector<1x128xf32>
    %315 = vector.extract_strided_slice %313 {offsets = [1, 0], sizes = [1, 128], strides = [1, 1]} : vector<2x128xf32> to vector<1x128xf32>
    %316 = tpu.concatenate %313, %313 in 1 : vector<2x128xf32>, vector<2x128xf32> -> vector<2x256xf32>
    %317 = arith.mulf %316, %9 : vector<2x256xf32>
    %318 = arith.truncf %317 : vector<2x256xf32> to vector<2x256xbf16>
    %319 = vector.extract_strided_slice %238 {offsets = [3, 0], sizes = [1, 512], strides = [1, 1]} : vector<8x1024xf32> to vector<1x512xf32>
    %320 = vector.extract_strided_slice %238 {offsets = [4, 512], sizes = [1, 512], strides = [1, 1]} : vector<8x1024xf32> to vector<1x512xf32>
    %321 = tpu.concatenate %319, %320 in 0 : vector<1x512xf32>, vector<1x512xf32> -> vector<2x512xf32>
    %cst_44 = arith.constant dense<0.000000e+00> : vector<2x512xf32>
    %322 = tpu.matmul %318, %233, %cst_44 {dimension_numbers = #tpu.dot_dimension_numbers<[1], [0], [0], [1], [0, 0, 1, 1], [], []>} : vector<2x256xbf16>, vector<256x512xbf16>, vector<2x512xf32> -> vector<2x512xf32>
    %323 = arith.addf %321, %322 : vector<2x512xf32>
    %324 = vector.extract_strided_slice %323 {offsets = [0, 0], sizes = [2, 384], strides = [1, 1]} : vector<2x512xf32> to vector<2x384xf32>
    %325 = arith.negf %324 : vector<2x384xf32>
    %326 = math.exp %325 : vector<2x384xf32>
    %cst_45 = arith.constant 1.000000e+00 : f32
    %327 = vector.broadcast %cst_45 : f32 to vector<2x384xf32>
    %328 = arith.addf %327, %326 : vector<2x384xf32>
    %329 = arith.divf %327, %328 : vector<2x384xf32>
    %330 = vector.extract_strided_slice %329 {offsets = [0, 0], sizes = [2, 128], strides = [1, 1]} : vector<2x384xf32> to vector<2x128xf32>
    %331 = vector.extract_strided_slice %329 {offsets = [0, 128], sizes = [2, 128], strides = [1, 1]} : vector<2x384xf32> to vector<2x128xf32>
    %332 = vector.extract_strided_slice %329 {offsets = [0, 256], sizes = [2, 128], strides = [1, 1]} : vector<2x384xf32> to vector<2x128xf32>
    %333 = vector.extract_strided_slice %323 {offsets = [0, 384], sizes = [2, 128], strides = [1, 1]} : vector<2x512xf32> to vector<2x128xf32>
    %334 = math.tanh %333 : vector<2x128xf32>
    %335 = arith.mulf %331, %311 : vector<2x128xf32>
    %336 = arith.mulf %330, %334 : vector<2x128xf32>
    %337 = arith.addf %335, %336 : vector<2x128xf32>
    %338 = math.tanh %337 : vector<2x128xf32>
    %339 = arith.mulf %332, %338 : vector<2x128xf32>
    %340 = vector.extract_strided_slice %339 {offsets = [0, 0], sizes = [1, 128], strides = [1, 1]} : vector<2x128xf32> to vector<1x128xf32>
    %341 = vector.extract_strided_slice %339 {offsets = [1, 0], sizes = [1, 128], strides = [1, 1]} : vector<2x128xf32> to vector<1x128xf32>
    %342 = tpu.concatenate %339, %339 in 1 : vector<2x128xf32>, vector<2x128xf32> -> vector<2x256xf32>
    %343 = arith.mulf %342, %9 : vector<2x256xf32>
    %344 = arith.truncf %343 : vector<2x256xf32> to vector<2x256xbf16>
    %345 = vector.extract_strided_slice %238 {offsets = [4, 0], sizes = [1, 512], strides = [1, 1]} : vector<8x1024xf32> to vector<1x512xf32>
    %346 = vector.extract_strided_slice %238 {offsets = [3, 512], sizes = [1, 512], strides = [1, 1]} : vector<8x1024xf32> to vector<1x512xf32>
    %347 = tpu.concatenate %345, %346 in 0 : vector<1x512xf32>, vector<1x512xf32> -> vector<2x512xf32>
    %cst_46 = arith.constant dense<0.000000e+00> : vector<2x512xf32>
    %348 = tpu.matmul %344, %233, %cst_46 {dimension_numbers = #tpu.dot_dimension_numbers<[1], [0], [0], [1], [0, 0, 1, 1], [], []>} : vector<2x256xbf16>, vector<256x512xbf16>, vector<2x512xf32> -> vector<2x512xf32>
    %349 = arith.addf %347, %348 : vector<2x512xf32>
    %350 = vector.extract_strided_slice %349 {offsets = [0, 0], sizes = [2, 384], strides = [1, 1]} : vector<2x512xf32> to vector<2x384xf32>
    %351 = arith.negf %350 : vector<2x384xf32>
    %352 = math.exp %351 : vector<2x384xf32>
    %cst_47 = arith.constant 1.000000e+00 : f32
    %353 = vector.broadcast %cst_47 : f32 to vector<2x384xf32>
    %354 = arith.addf %353, %352 : vector<2x384xf32>
    %355 = arith.divf %353, %354 : vector<2x384xf32>
    %356 = vector.extract_strided_slice %355 {offsets = [0, 0], sizes = [2, 128], strides = [1, 1]} : vector<2x384xf32> to vector<2x128xf32>
    %357 = vector.extract_strided_slice %355 {offsets = [0, 128], sizes = [2, 128], strides = [1, 1]} : vector<2x384xf32> to vector<2x128xf32>
    %358 = vector.extract_strided_slice %355 {offsets = [0, 256], sizes = [2, 128], strides = [1, 1]} : vector<2x384xf32> to vector<2x128xf32>
    %359 = vector.extract_strided_slice %349 {offsets = [0, 384], sizes = [2, 128], strides = [1, 1]} : vector<2x512xf32> to vector<2x128xf32>
    %360 = math.tanh %359 : vector<2x128xf32>
    %361 = arith.mulf %357, %337 : vector<2x128xf32>
    %362 = arith.mulf %356, %360 : vector<2x128xf32>
    %363 = arith.addf %361, %362 : vector<2x128xf32>
    %364 = math.tanh %363 : vector<2x128xf32>
    %365 = arith.mulf %358, %364 : vector<2x128xf32>
    %366 = vector.extract_strided_slice %365 {offsets = [0, 0], sizes = [1, 128], strides = [1, 1]} : vector<2x128xf32> to vector<1x128xf32>
    %367 = vector.extract_strided_slice %365 {offsets = [1, 0], sizes = [1, 128], strides = [1, 1]} : vector<2x128xf32> to vector<1x128xf32>
    %368 = tpu.concatenate %365, %365 in 1 : vector<2x128xf32>, vector<2x128xf32> -> vector<2x256xf32>
    %369 = arith.mulf %368, %9 : vector<2x256xf32>
    %370 = arith.truncf %369 : vector<2x256xf32> to vector<2x256xbf16>
    %371 = vector.extract_strided_slice %238 {offsets = [5, 0], sizes = [1, 512], strides = [1, 1]} : vector<8x1024xf32> to vector<1x512xf32>
    %372 = vector.extract_strided_slice %238 {offsets = [2, 512], sizes = [1, 512], strides = [1, 1]} : vector<8x1024xf32> to vector<1x512xf32>
    %373 = tpu.concatenate %371, %372 in 0 : vector<1x512xf32>, vector<1x512xf32> -> vector<2x512xf32>
    %cst_48 = arith.constant dense<0.000000e+00> : vector<2x512xf32>
    %374 = tpu.matmul %370, %233, %cst_48 {dimension_numbers = #tpu.dot_dimension_numbers<[1], [0], [0], [1], [0, 0, 1, 1], [], []>} : vector<2x256xbf16>, vector<256x512xbf16>, vector<2x512xf32> -> vector<2x512xf32>
    %375 = arith.addf %373, %374 : vector<2x512xf32>
    %376 = vector.extract_strided_slice %375 {offsets = [0, 0], sizes = [2, 384], strides = [1, 1]} : vector<2x512xf32> to vector<2x384xf32>
    %377 = arith.negf %376 : vector<2x384xf32>
    %378 = math.exp %377 : vector<2x384xf32>
    %cst_49 = arith.constant 1.000000e+00 : f32
    %379 = vector.broadcast %cst_49 : f32 to vector<2x384xf32>
    %380 = arith.addf %379, %378 : vector<2x384xf32>
    %381 = arith.divf %379, %380 : vector<2x384xf32>
    %382 = vector.extract_strided_slice %381 {offsets = [0, 0], sizes = [2, 128], strides = [1, 1]} : vector<2x384xf32> to vector<2x128xf32>
    %383 = vector.extract_strided_slice %381 {offsets = [0, 128], sizes = [2, 128], strides = [1, 1]} : vector<2x384xf32> to vector<2x128xf32>
    %384 = vector.extract_strided_slice %381 {offsets = [0, 256], sizes = [2, 128], strides = [1, 1]} : vector<2x384xf32> to vector<2x128xf32>
    %385 = vector.extract_strided_slice %375 {offsets = [0, 384], sizes = [2, 128], strides = [1, 1]} : vector<2x512xf32> to vector<2x128xf32>
    %386 = math.tanh %385 : vector<2x128xf32>
    %387 = arith.mulf %383, %363 : vector<2x128xf32>
    %388 = arith.mulf %382, %386 : vector<2x128xf32>
    %389 = arith.addf %387, %388 : vector<2x128xf32>
    %390 = math.tanh %389 : vector<2x128xf32>
    %391 = arith.mulf %384, %390 : vector<2x128xf32>
    %392 = vector.extract_strided_slice %391 {offsets = [0, 0], sizes = [1, 128], strides = [1, 1]} : vector<2x128xf32> to vector<1x128xf32>
    %393 = vector.extract_strided_slice %391 {offsets = [1, 0], sizes = [1, 128], strides = [1, 1]} : vector<2x128xf32> to vector<1x128xf32>
    %394 = tpu.concatenate %391, %391 in 1 : vector<2x128xf32>, vector<2x128xf32> -> vector<2x256xf32>
    %395 = arith.mulf %394, %9 : vector<2x256xf32>
    %396 = arith.truncf %395 : vector<2x256xf32> to vector<2x256xbf16>
    %397 = vector.extract_strided_slice %238 {offsets = [6, 0], sizes = [1, 512], strides = [1, 1]} : vector<8x1024xf32> to vector<1x512xf32>
    %398 = vector.extract_strided_slice %238 {offsets = [1, 512], sizes = [1, 512], strides = [1, 1]} : vector<8x1024xf32> to vector<1x512xf32>
    %399 = tpu.concatenate %397, %398 in 0 : vector<1x512xf32>, vector<1x512xf32> -> vector<2x512xf32>
    %cst_50 = arith.constant dense<0.000000e+00> : vector<2x512xf32>
    %400 = tpu.matmul %396, %233, %cst_50 {dimension_numbers = #tpu.dot_dimension_numbers<[1], [0], [0], [1], [0, 0, 1, 1], [], []>} : vector<2x256xbf16>, vector<256x512xbf16>, vector<2x512xf32> -> vector<2x512xf32>
    %401 = arith.addf %399, %400 : vector<2x512xf32>
    %402 = vector.extract_strided_slice %401 {offsets = [0, 0], sizes = [2, 384], strides = [1, 1]} : vector<2x512xf32> to vector<2x384xf32>
    %403 = arith.negf %402 : vector<2x384xf32>
    %404 = math.exp %403 : vector<2x384xf32>
    %cst_51 = arith.constant 1.000000e+00 : f32
    %405 = vector.broadcast %cst_51 : f32 to vector<2x384xf32>
    %406 = arith.addf %405, %404 : vector<2x384xf32>
    %407 = arith.divf %405, %406 : vector<2x384xf32>
    %408 = vector.extract_strided_slice %407 {offsets = [0, 0], sizes = [2, 128], strides = [1, 1]} : vector<2x384xf32> to vector<2x128xf32>
    %409 = vector.extract_strided_slice %407 {offsets = [0, 128], sizes = [2, 128], strides = [1, 1]} : vector<2x384xf32> to vector<2x128xf32>
    %410 = vector.extract_strided_slice %407 {offsets = [0, 256], sizes = [2, 128], strides = [1, 1]} : vector<2x384xf32> to vector<2x128xf32>
    %411 = vector.extract_strided_slice %401 {offsets = [0, 384], sizes = [2, 128], strides = [1, 1]} : vector<2x512xf32> to vector<2x128xf32>
    %412 = math.tanh %411 : vector<2x128xf32>
    %413 = arith.mulf %409, %389 : vector<2x128xf32>
    %414 = arith.mulf %408, %412 : vector<2x128xf32>
    %415 = arith.addf %413, %414 : vector<2x128xf32>
    %416 = math.tanh %415 : vector<2x128xf32>
    %417 = arith.mulf %410, %416 : vector<2x128xf32>
    %418 = vector.extract_strided_slice %417 {offsets = [0, 0], sizes = [1, 128], strides = [1, 1]} : vector<2x128xf32> to vector<1x128xf32>
    %419 = vector.extract_strided_slice %417 {offsets = [1, 0], sizes = [1, 128], strides = [1, 1]} : vector<2x128xf32> to vector<1x128xf32>
    %420 = tpu.concatenate %417, %417 in 1 : vector<2x128xf32>, vector<2x128xf32> -> vector<2x256xf32>
    %421 = arith.mulf %420, %9 : vector<2x256xf32>
    %422 = arith.truncf %421 : vector<2x256xf32> to vector<2x256xbf16>
    %423 = vector.extract_strided_slice %238 {offsets = [7, 0], sizes = [1, 512], strides = [1, 1]} : vector<8x1024xf32> to vector<1x512xf32>
    %424 = vector.extract_strided_slice %238 {offsets = [0, 512], sizes = [1, 512], strides = [1, 1]} : vector<8x1024xf32> to vector<1x512xf32>
    %425 = tpu.concatenate %423, %424 in 0 : vector<1x512xf32>, vector<1x512xf32> -> vector<2x512xf32>
    %cst_52 = arith.constant dense<0.000000e+00> : vector<2x512xf32>
    %426 = tpu.matmul %422, %233, %cst_52 {dimension_numbers = #tpu.dot_dimension_numbers<[1], [0], [0], [1], [0, 0, 1, 1], [], []>} : vector<2x256xbf16>, vector<256x512xbf16>, vector<2x512xf32> -> vector<2x512xf32>
    %427 = arith.addf %425, %426 : vector<2x512xf32>
    %428 = vector.extract_strided_slice %427 {offsets = [0, 0], sizes = [2, 384], strides = [1, 1]} : vector<2x512xf32> to vector<2x384xf32>
    %429 = arith.negf %428 : vector<2x384xf32>
    %430 = math.exp %429 : vector<2x384xf32>
    %cst_53 = arith.constant 1.000000e+00 : f32
    %431 = vector.broadcast %cst_53 : f32 to vector<2x384xf32>
    %432 = arith.addf %431, %430 : vector<2x384xf32>
    %433 = arith.divf %431, %432 : vector<2x384xf32>
    %434 = vector.extract_strided_slice %433 {offsets = [0, 0], sizes = [2, 128], strides = [1, 1]} : vector<2x384xf32> to vector<2x128xf32>
    %435 = vector.extract_strided_slice %433 {offsets = [0, 128], sizes = [2, 128], strides = [1, 1]} : vector<2x384xf32> to vector<2x128xf32>
    %436 = vector.extract_strided_slice %433 {offsets = [0, 256], sizes = [2, 128], strides = [1, 1]} : vector<2x384xf32> to vector<2x128xf32>
    %437 = vector.extract_strided_slice %427 {offsets = [0, 384], sizes = [2, 128], strides = [1, 1]} : vector<2x512xf32> to vector<2x128xf32>
    %438 = math.tanh %437 : vector<2x128xf32>
    %439 = arith.mulf %435, %415 : vector<2x128xf32>
    %440 = arith.mulf %434, %438 : vector<2x128xf32>
    %441 = arith.addf %439, %440 : vector<2x128xf32>
    %442 = math.tanh %441 : vector<2x128xf32>
    %443 = arith.mulf %436, %442 : vector<2x128xf32>
    %444 = vector.extract_strided_slice %443 {offsets = [0, 0], sizes = [1, 128], strides = [1, 1]} : vector<2x128xf32> to vector<1x128xf32>
    %445 = vector.extract_strided_slice %443 {offsets = [1, 0], sizes = [1, 128], strides = [1, 1]} : vector<2x128xf32> to vector<1x128xf32>
    %446 = tpu.concatenate %262, %288, %314, %340, %366, %392, %418, %444 in 0 : vector<1x128xf32>, vector<1x128xf32>, vector<1x128xf32>, vector<1x128xf32>, vector<1x128xf32>, vector<1x128xf32>, vector<1x128xf32>, vector<1x128xf32> -> vector<8x128xf32>
    %447 = tpu.concatenate %445, %419, %393, %367, %341, %315, %289, %263 in 0 : vector<1x128xf32>, vector<1x128xf32>, vector<1x128xf32>, vector<1x128xf32>, vector<1x128xf32>, vector<1x128xf32>, vector<1x128xf32>, vector<1x128xf32> -> vector<8x128xf32>
    %448 = tpu.concatenate %446, %447 in 1 : vector<8x128xf32>, vector<8x128xf32> -> vector<8x256xf32>
    %449 = arith.truncf %448 : vector<8x256xf32> to vector<8x256xbf16>
    %c0_54 = arith.constant 0 : index
    %c0_55 = arith.constant 0 : index
    %450 = vector.load %arg5[%c0_54, %c0_55] : memref<256x256xbf16, #tpu.memory_space<vmem>>, vector<256x256xbf16>
    %cst_56 = arith.constant dense<0.000000e+00> : vector<8x256xf32>
    %451 = tpu.matmul %449, %450, %cst_56 {dimension_numbers = #tpu.dot_dimension_numbers<[1], [0], [0], [1], [0, 0, 1, 1], [], []>} : vector<8x256xbf16>, vector<256x256xbf16>, vector<8x256xf32> -> vector<8x256xf32>
    %c0_57 = arith.constant 0 : index
    %c0_58 = arith.constant 0 : index
    %452 = vector.load %arg6[%c0_57, %c0_58] : memref<1x256xf32, #tpu.memory_space<vmem>>, vector<1x256xf32>
    %453 = vector.broadcast %452 : vector<1x256xf32> to vector<8x256xf32>
    %454 = arith.addf %451, %453 : vector<8x256xf32>
    %cst_59 = arith.constant 0.000000e+00 : f32
    %455 = vector.broadcast %cst_59 : f32 to vector<8x256xf32>
    %456 = arith.maximumf %454, %455 : vector<8x256xf32>
    %457 = arith.truncf %456 : vector<8x256xf32> to vector<8x256xbf16>
    %c0_60 = arith.constant 0 : index
    %c0_61 = arith.constant 0 : index
    %458 = vector.load %arg7[%c0_60, %c0_61] : memref<256x256xbf16, #tpu.memory_space<vmem>>, vector<256x256xbf16>
    %cst_62 = arith.constant dense<0.000000e+00> : vector<8x256xf32>
    %459 = tpu.matmul %457, %458, %cst_62 {dimension_numbers = #tpu.dot_dimension_numbers<[1], [0], [0], [1], [0, 0, 1, 1], [], []>} : vector<8x256xbf16>, vector<256x256xbf16>, vector<8x256xf32> -> vector<8x256xf32>
    %c0_63 = arith.constant 0 : index
    %c0_64 = arith.constant 0 : index
    %460 = vector.load %arg8[%c0_63, %c0_64] : memref<1x256xf32, #tpu.memory_space<vmem>>, vector<1x256xf32>
    %461 = vector.broadcast %460 : vector<1x256xf32> to vector<8x256xf32>
    %462 = arith.addf %459, %461 : vector<8x256xf32>
    %c0_65 = arith.constant 0 : index
    %c0_66 = arith.constant 0 : index
    %463 = vector.load %arg10[%c0_65, %c0_66] : memref<8x256xf32, #tpu.memory_space<vmem>>, vector<8x256xf32>
    tpu.vector_store %arg10[%c0_65, %c0_66], %462 {strides = array<i32>} : memref<8x256xf32, #tpu.memory_space<vmem>>, vector<8x256xf32>,
    %c0_67 = arith.constant 0 : index
    %464 = memref.load %arg0[%c0_67] : memref<8xi32, #tpu.memory_space<smem>>
    %465 = arith.index_cast %464 : i32 to index
    %c0_68 = arith.constant 0 : index
    %466 = vector.load %arg10[%465, %c0_68] : memref<8x256xf32, #tpu.memory_space<vmem>>, vector<1x256xf32>
    %c0_69 = arith.constant 0 : index
    %c0_70 = arith.constant 0 : index
    %467 = vector.load %arg9[%c0_69, %c0_70] : memref<8x256xf32, #tpu.memory_space<vmem>>, vector<1x256xf32>
    tpu.vector_store %arg9[%c0_69, %c0_70], %466 {strides = array<i32>} : memref<8x256xf32, #tpu.memory_space<vmem>>, vector<1x256xf32>,
    %c1_71 = arith.constant 1 : index
    %468 = memref.load %arg0[%c1_71] : memref<8xi32, #tpu.memory_space<smem>>
    %469 = arith.index_cast %468 : i32 to index
    %c0_72 = arith.constant 0 : index
    %470 = vector.load %arg10[%469, %c0_72] : memref<8x256xf32, #tpu.memory_space<vmem>>, vector<1x256xf32>
    %c1_73 = arith.constant 1 : index
    %c0_74 = arith.constant 0 : index
    %471 = vector.load %arg9[%c1_73, %c0_74] : memref<8x256xf32, #tpu.memory_space<vmem>>, vector<1x256xf32>
    tpu.vector_store %arg9[%c1_73, %c0_74], %470 {strides = array<i32>} : memref<8x256xf32, #tpu.memory_space<vmem>>, vector<1x256xf32>,
    %c2 = arith.constant 2 : index
    %472 = memref.load %arg0[%c2] : memref<8xi32, #tpu.memory_space<smem>>
    %473 = arith.index_cast %472 : i32 to index
    %c0_75 = arith.constant 0 : index
    %474 = vector.load %arg10[%473, %c0_75] : memref<8x256xf32, #tpu.memory_space<vmem>>, vector<1x256xf32>
    %c2_76 = arith.constant 2 : index
    %c0_77 = arith.constant 0 : index
    %475 = vector.load %arg9[%c2_76, %c0_77] : memref<8x256xf32, #tpu.memory_space<vmem>>, vector<1x256xf32>
    tpu.vector_store %arg9[%c2_76, %c0_77], %474 {strides = array<i32>} : memref<8x256xf32, #tpu.memory_space<vmem>>, vector<1x256xf32>,
    %c3 = arith.constant 3 : index
    %476 = memref.load %arg0[%c3] : memref<8xi32, #tpu.memory_space<smem>>
    %477 = arith.index_cast %476 : i32 to index
    %c0_78 = arith.constant 0 : index
    %478 = vector.load %arg10[%477, %c0_78] : memref<8x256xf32, #tpu.memory_space<vmem>>, vector<1x256xf32>
    %c3_79 = arith.constant 3 : index
    %c0_80 = arith.constant 0 : index
    %479 = vector.load %arg9[%c3_79, %c0_80] : memref<8x256xf32, #tpu.memory_space<vmem>>, vector<1x256xf32>
    tpu.vector_store %arg9[%c3_79, %c0_80], %478 {strides = array<i32>} : memref<8x256xf32, #tpu.memory_space<vmem>>, vector<1x256xf32>,
    %c4 = arith.constant 4 : index
    %480 = memref.load %arg0[%c4] : memref<8xi32, #tpu.memory_space<smem>>
    %481 = arith.index_cast %480 : i32 to index
    %c0_81 = arith.constant 0 : index
    %482 = vector.load %arg10[%481, %c0_81] : memref<8x256xf32, #tpu.memory_space<vmem>>, vector<1x256xf32>
    %c4_82 = arith.constant 4 : index
    %c0_83 = arith.constant 0 : index
    %483 = vector.load %arg9[%c4_82, %c0_83] : memref<8x256xf32, #tpu.memory_space<vmem>>, vector<1x256xf32>
    tpu.vector_store %arg9[%c4_82, %c0_83], %482 {strides = array<i32>} : memref<8x256xf32, #tpu.memory_space<vmem>>, vector<1x256xf32>,
    %c5 = arith.constant 5 : index
    %484 = memref.load %arg0[%c5] : memref<8xi32, #tpu.memory_space<smem>>
    %485 = arith.index_cast %484 : i32 to index
    %c0_84 = arith.constant 0 : index
    %486 = vector.load %arg10[%485, %c0_84] : memref<8x256xf32, #tpu.memory_space<vmem>>, vector<1x256xf32>
    %c5_85 = arith.constant 5 : index
    %c0_86 = arith.constant 0 : index
    %487 = vector.load %arg9[%c5_85, %c0_86] : memref<8x256xf32, #tpu.memory_space<vmem>>, vector<1x256xf32>
    tpu.vector_store %arg9[%c5_85, %c0_86], %486 {strides = array<i32>} : memref<8x256xf32, #tpu.memory_space<vmem>>, vector<1x256xf32>,
    %c6 = arith.constant 6 : index
    %488 = memref.load %arg0[%c6] : memref<8xi32, #tpu.memory_space<smem>>
    %489 = arith.index_cast %488 : i32 to index
    %c0_87 = arith.constant 0 : index
    %490 = vector.load %arg10[%489, %c0_87] : memref<8x256xf32, #tpu.memory_space<vmem>>, vector<1x256xf32>
    %c6_88 = arith.constant 6 : index
    %c0_89 = arith.constant 0 : index
    %491 = vector.load %arg9[%c6_88, %c0_89] : memref<8x256xf32, #tpu.memory_space<vmem>>, vector<1x256xf32>
    tpu.vector_store %arg9[%c6_88, %c0_89], %490 {strides = array<i32>} : memref<8x256xf32, #tpu.memory_space<vmem>>, vector<1x256xf32>,
    %c7 = arith.constant 7 : index
    %492 = memref.load %arg0[%c7] : memref<8xi32, #tpu.memory_space<smem>>
    %493 = arith.index_cast %492 : i32 to index
    %c0_90 = arith.constant 0 : index
    %494 = vector.load %arg10[%493, %c0_90] : memref<8x256xf32, #tpu.memory_space<vmem>>, vector<1x256xf32>
    %c7_91 = arith.constant 7 : index
    %c0_92 = arith.constant 0 : index
    %495 = vector.load %arg9[%c7_91, %c0_92] : memref<8x256xf32, #tpu.memory_space<vmem>>, vector<1x256xf32>
    tpu.vector_store %arg9[%c7_91, %c0_92], %494 {strides = array<i32>} : memref<8x256xf32, #tpu.memory_space<vmem>>, vector<1x256xf32>,
    return
  }
}

</mosaic_0001>

<bundles_post_ra>
// kernel: tpu_custom_call.1
= control target key start
LH: loop header
LB: loop body
LE: loop exit
PB: predicated region body
PF: predicated region fallthrough
CT: control target
= control target key end

     0   :  { %14 = vsyncpa [#allocation6], 0  ;;  %s9346_s0 = inlined_call_operand.hbm [shape: s32[8], index: 0, kind: input, shape index: {}]   ;;  %s9347_s1 = inlined_call_operand.hbm [shape: f32[8,256], index: 1, kind: input, shape index: {}]   ;;  %s9348_s2 = inlined_call_operand.hbm [shape: bf16[2,256,1024], index: 2, kind: input, shape index: {}]   ;;  %s9349_s3 = inlined_call_operand.hbm [shape: bf16[2,256,512], index: 3, kind: input, shape index: {}]   ;;  %s9350_s4 = inlined_call_operand.hbm [shape: f32[2,1024], index: 4, kind: input, shape index: {}]   ;;  %s9351_s5 = inlined_call_operand.hbm [shape: bf16[256,256], index: 5, kind: input, shape index: {}]   ;;  %s9352_s6 = inlined_call_operand.vmem [shape: f32[1,256], index: 6, kind: input, shape index: {}]   ;;  %s9353_s7 = inlined_call_operand.hbm [shape: bf16[256,256], index: 7, kind: input, shape index: {}]   ;;  %s9354_s8 = inlined_call_operand.vmem [shape: f32[1,256], index: 8, kind: input, shape index: {}]   ;;  %s9355_s9 = inlined_call_operand.hbm [shape: f32[8,256], index: 9, kind: output, shape index: {}]  }
   0x1   :  { %15 = vsyncpa [#allocation4], 0 }
   0x2   :  { %16 = vsyncpa [#allocation9], 0 }
   0x3   :  { %17 = vsyncpa [#allocation12], 0 }
   0x4   :  { %18 = vsyncpa [#allocation15], 0 }
   0x5   :  { %19 = vsyncpa [#allocation5], 0  ;;  %s7109_s30 = smov [#allocation8]  }
   0x6   :  { %s43_s10 = sshll.u32 %s7109_s30, 4  ;;  %s44_s10 = int_to_ptr.vmem [resolvable:$true] %s43_s10 }
   0x7   :  { %s6957_s11 = scalar_lea.vmem %s44_s10, 32768  ;;  %p6962_p1 = scmp.lt.s32.totalorder %s44_s10, %s44_s10 }
   0x8   :  { %p6958_p0 = scmp.ne.s32.totalorder %s44_s10, %s6957_s11  ;;  %p6963_p2 = scmp.lt.s32.totalorder %s6957_s11, %s6957_s11 }
   0xa   :  { %p6964_p3 = por %p6963_p2, %p6962_p1 }
   0xc   :  { %p6965_p4 = pnand %p6964_p3, %p6958_p0 }
   0xe   :  { %6968 = shalt.err (!%p6965_p4)
}
   0xf   :  { %s7110_s12 = smov 512   ;;  %s7111_s13 = smov 32  }
  0x10   :  { %49 = dma.hbm_to_vmem [thread:$0]  %s9348_s2, 32768, %s44_s10, [#allocation9], %s7110_s12, %s7110_s12, %s7111_s13  }
  0x11   :  { %s7112_s16 = smov [#allocation11]  }
  0x12   :  { %s68_s17 = sshll.u32 %s7112_s16, 4  ;;  %s69_s17 = int_to_ptr.vmem [resolvable:$true] %s68_s17 }
  0x13   :  { %s6977_s18 = scalar_lea.vmem %s69_s17, 256  ;;  %p6982_p6 = scmp.lt.s32.totalorder %s69_s17, %s69_s17 }
  0x14   :  { %p6978_p5 = scmp.ne.s32.totalorder %s69_s17, %s6977_s18  ;;  %p6983_p7 = scmp.lt.s32.totalorder %s6977_s18, %s6977_s18 }
  0x16   :  { %p6984_p8 = por %p6983_p7, %p6982_p6 }
  0x18   :  { %p6985_p9 = pnand %p6984_p8, %p6978_p5 }
  0x1a   :  { %6988 = shalt.err (!%p6985_p9)
}
  0x1b   :  { %71 = dma.hbm_to_vmem [thread:$0]  %s9350_s4, 256, %s69_s17, [#allocation12]  }
  0x1c   :  { %s7113_s21 = smov [#allocation3]   ;;  %s7114_s2 = smov [#allocation7]  }
  0x1d   :  { %27 = dma.hbm_to_smem %s9346_s0, 16, %s7113_s21, [#allocation6]  }
  0x1e   :  { %s34_s24 = sshll.u32 %s7114_s2, 4  ;;  %s7115_s25 = smov [#allocation10]   ;;  %s35_s24 = int_to_ptr.vmem [resolvable:$true] %s34_s24 }
  0x1f   :  { %s55_s26 = sshll.u32 %s7115_s25, 4  ;;  %s7005_s27 = scalar_lea.vmem %s35_s24, 256  ;;  %s56_s26 = int_to_ptr.vmem [resolvable:$true] %s55_s26 }
  0x20   :  { %p7006_p10 = scmp.ne.s32.totalorder %s35_s24, %s7005_s27  ;;  %p7010_p11 = scmp.lt.s32.totalorder %s35_s24, %s35_s24 }
  0x21   :  { %p7011_p12 = scmp.lt.s32.totalorder %s7005_s27, %s7005_s27 }
  0x23   :  { %p7012_p13 = por %p7011_p12, %p7010_p11 }
  0x25   :  { %p7013_p0 = pnand %p7012_p13, %p7006_p10 }
  0x27   :  { %7016 = shalt.err (!%p7013_p0)
}
  0x28   :  { %37 = dma.hbm_to_vmem [thread:$0]  %s9347_s1, 256, %s35_s24, [#allocation4]  }
  0x29   :  { %s7025_s4 = scalar_lea.vmem %s56_s26, 16384  ;;  %p7030_p2 = scmp.lt.s32.totalorder %s56_s26, %s56_s26 }
  0x2a   :  { %p7026_p1 = scmp.ne.s32.totalorder %s56_s26, %s7025_s4  ;;  %p7031_p3 = scmp.lt.s32.totalorder %s7025_s4, %s7025_s4 }
  0x2c   :  { %p7032_p4 = por %p7031_p3, %p7030_p2 }
  0x2e   :  { %p7033_p5 = pnand %p7032_p4, %p7026_p1 }
  0x30   :  { %7036 = shalt.err (!%p7033_p5)
}
  0x31   :  { %s7116_s0 = smov 256   ;;  %s7117_s30 = smov 16  }
  0x32   :  { %61 = dma.hbm_to_vmem [thread:$0]  %s9349_s3, 16384, %s56_s26, [#allocation9], %s7116_s0, %s7116_s0, %s7117_s30  }
  0x33   :  { %s7118_s12 = smov [#allocation13]  }
  0x34   :  { %s77_s13 = sshll.u32 %s7118_s12, 4  ;;  %s78_s13 = int_to_ptr.vmem [resolvable:$true] %s77_s13 }
  0x35   :  { %s7045_s14 = scalar_lea.vmem %s78_s13, 4096  ;;  %p7050_p7 = scmp.lt.s32.totalorder %s78_s13, %s78_s13 }
  0x36   :  { %p7046_p6 = scmp.ne.s32.totalorder %s78_s13, %s7045_s14  ;;  %p7051_p8 = scmp.lt.s32.totalorder %s7045_s14, %s7045_s14 }
  0x38   :  { %p7052_p9 = por %p7051_p8, %p7050_p7 }
  0x3a   :  { %p7053_p10 = pnand %p7052_p9, %p7046_p6 }
  0x3c   :  { %7056 = shalt.err (!%p7053_p10)
}
  0x3d   :  { %s7119_s1 = smov 128   ;;  %s7120_s15 = smov 8  }
  0x3e   :  { %83 = dma.hbm_to_vmem [thread:$0]  %s9351_s5, 4096, %s78_s13, [#allocation12], %s7119_s1, %s7119_s1, %s7120_s15  }
  0x3f   :  { %s7121_s18 = smov [#allocation14]  }
  0x40   :  { %s91_s19 = sshll.u32 %s7121_s18, 4  ;;  %s92_s19 = int_to_ptr.vmem [resolvable:$true] %s91_s19 }
  0x41   :  { %s7065_s3 = scalar_lea.vmem %s92_s19, 4096  ;;  %p7070_p12 = scmp.lt.s32.totalorder %s92_s19, %s92_s19 }
  0x42   :  { %p7066_p11 = scmp.ne.s32.totalorder %s92_s19, %s7065_s3  ;;  %p7071_p13 = scmp.lt.s32.totalorder %s7065_s3, %s7065_s3 }
  0x44   :  { %p7072_p0 = por %p7071_p13, %p7070_p12 }
  0x46   :  { %p7073_p1 = pnand %p7072_p0, %p7066_p11 }
  0x48   :  { %7076 = shalt.err (!%p7073_p1)
}
  0x49   :  { %97 = dma.hbm_to_vmem [thread:$0]  %s9353_s7, 4096, %s92_s19, [#allocation15], %s7119_s1, %s7119_s1, %s7120_s15  }
  0x4a   :  { %7097 = dma.done.wait [#allocation6], 16  }
  0x4b   :  { %7098 = vsyncadd [#allocation6], 4294967280 }
  0x4c   :  { %7099 = dma.done.wait [#allocation4], 256  }
  0x4d   :  { %7100 = vsyncadd [#allocation4], 4294967040 }
  0x4e   :  { %7101 = dma.done.wait [#allocation9], 49152  }
  0x4f   :  { %7102 = vsyncadd [#allocation9], 4294918144 }
  0x50   :  { %7103 = dma.done.wait [#allocation12], 4352  }
  0x51   :  { %7104 = vsyncadd [#allocation12], 4294962944 }
  0x52   :  { %7105 = dma.done.wait [#allocation15], 4096  }
  0x53   :  { %7106 = vsyncadd [#allocation15], 4294963200 }
  0x54   :  { %121 = sfence }
  0x55   :  { %v197_v0 = vld [vmem:[#allocation8 + $0x1c0] sm:$0xff]  ;;  %v198_v2 = vld [vmem:[#allocation8 + $0x1c8] sm:$0xff]  ;;  %v140_v53 = vld [vmem:[#allocation7 + $0x8] sm:$0xff]  ;;  %vm1193_vm0 = vcmask 1040384   ;;  %vm7123_vm2 = vmmov 1   ;;  %vm2584_vm6 = vcmask 1041408  }
  0x56   :  { %v201_v1 = vld [vmem:[#allocation8 + $0x1e0] sm:$0xff]  ;;  %v202_v4 = vld [vmem:[#allocation8 + $0x1e8] sm:$0xff]  ;;  %v7197_v57 = vpack.c.bf16 %v140_v53, %v140_v53  ;;  %vm2586_vm7 = vcmask 1042432   ;;  %vm2588_vm8 = vcmask 1043456   ;;  %vm2590_vm9 = vcmask 1044480   ;;  %s5581_s22 = sld [smem:[#allocation3]] }
  0x57   :  { %v5790_v3 = vcombine.high %v197_v0, %v201_v1  ;;  %v5789_v5 = vcombine.low %v197_v0, %v201_v1  ;;  %v189_v6 = vld [vmem:[#allocation8 + $0x180] sm:$0xff]  ;;  %v5792_v8 = vcombine.high %v198_v2, %v202_v4  ;;  %v5791_v9 = vcombine.low %v198_v2, %v202_v4  ;;  %v190_v11 = vld [vmem:[#allocation8 + $0x188] sm:$0xff]  ;;  %s6231_s23 = sld [smem:[#allocation3 + $0x1]]  ;;  %s7125_s15 = smov [#allocation16]  }
  0x58   :  { %v193_v7 = vld [vmem:[#allocation8 + $0x1a0] sm:$0xff]  ;;  %v194_v12 = vld [vmem:[#allocation8 + $0x1a8] sm:$0xff]  ;;  %1049 = vmatprep.mubr.bf16.mxu0 %v7197_v57  ;;  %1090 = vmatprep.mubr.bf16.mxu1 %v7197_v57  ;;  %vm2592_vm10 = vcmask 1045504   ;;  %vm2594_vm11 = vcmask 1046528   ;;  %s9286_s27 = sld [smem:[#allocation3 + $0x3]]  ;;  %s9304_s16 = sshll.u32 %s7125_s15, 4  ;;  %s5695_s16 = int_to_ptr.vmem [resolvable:$true] %s9304_s16 }
  0x59   :  { %v5782_v10 = vcombine.high %v189_v6, %v193_v7  ;;  %v181_v13 = vld [vmem:[#allocation8 + $0x140] sm:$0xff]  ;;  %1017 = vmatprep.subr.bf16.mxu0 %v5790_v3  ;;  %v5784_v14 = vcombine.high %v190_v11, %v194_v12  ;;  %v182_v16 = vld [vmem:[#allocation8 + $0x148] sm:$0xff]  ;;  %1058 = vmatprep.subr.bf16.mxu1 %v5792_v8  ;;  %v5781_v18 = vcombine.low %v189_v6, %v193_v7  ;;  %s9288_s28 = sld [smem:[#allocation3 + $0x4]]  ;;  %p7082_p3 = scmp.lt.s32.totalorder %s5695_s16, %s5695_s16 }
  0x5a   :  { %v185_v15 = vld [vmem:[#allocation8 + $0x160] sm:$0xff]  ;;  %v186_v17 = vld [vmem:[#allocation8 + $0x168] sm:$0xff]  ;;  %1018 = vmatpush1.bf16.msra.mxu0 %v5789_v5  ;;  %1059 = vmatpush1.bf16.msra.mxu1 %v5791_v9  ;;  %v5783_v19 = vcombine.low %v190_v11, %v194_v12  ;;  %s9292_s4 = sld [smem:[#allocation3 + $0x5]] }
  0x5b   :  { %1019 = vmatprep.subr.bf16.mxu0 %v5782_v10  ;;  %v5774_v20 = vcombine.high %v181_v13, %v185_v15  ;;  %1060 = vmatprep.subr.bf16.mxu1 %v5784_v14  ;;  %v5776_v21 = vcombine.high %v182_v16, %v186_v17  ;;  %v173_v22 = vld [vmem:[#allocation8 + $0x100] sm:$0xff]  ;;  %v174_v24 = vld [vmem:[#allocation8 + $0x108] sm:$0xff]  ;;  %v5773_v26 = vcombine.low %v181_v13, %v185_v15  ;;  %s9294_s10 = sld [smem:[#allocation3 + $0x6]] }
  0x5c   :  { %v177_v23 = vld [vmem:[#allocation8 + $0x120] sm:$0xff]  ;;  %v178_v25 = vld [vmem:[#allocation8 + $0x128] sm:$0xff]  ;;  %v5775_v27 = vcombine.low %v182_v16, %v186_v17  ;;  %s5582_s2 = sshra.s32 %s5581_s22, 3  ;;  %s5585_s24 = sand.u32 7, %s5581_s22 }
  0x5d   :  { %v5766_v28 = vcombine.high %v173_v22, %v177_v23  ;;  %v5768_v29 = vcombine.high %v174_v24, %v178_v25  ;;  %v165_v30 = vld [vmem:[#allocation8 + $0xc0] sm:$0xff]  ;;  %v166_v32 = vld [vmem:[#allocation8 + $0xc8] sm:$0xff]  ;;  %v5765_v34 = vcombine.low %v173_v22, %v177_v23  ;;  %v5767_v35 = vcombine.low %v174_v24, %v178_v25  ;;  %s6252_s25 = sshll.u32 %s5582_s2, 4  ;;  %s5598_s26 = sshra.s32 %s6231_s23, 3 }
  0x5e   :  { %1020 = vmatpush1.bf16.msra.mxu0 %v5781_v18  ;;  %1061 = vmatpush1.bf16.msra.mxu1 %v5783_v19  ;;  %v169_v31 = vld [vmem:[#allocation8 + $0xe0] sm:$0xff]  ;;  %v170_v33 = vld [vmem:[#allocation8 + $0xe8] sm:$0xff]  ;;  %s9290_s29 = sadd.s32 %s6252_s25, %s5585_s24  ;;  %s5601_s0 = sand.u32 7, %s6231_s23 }
  0x5f   :  { %1021 = vmatprep.subr.bf16.mxu0 %v5774_v20  ;;  %1062 = vmatprep.subr.bf16.mxu1 %v5776_v21  ;;  %v5758_v36 = vcombine.high %v165_v30, %v169_v31  ;;  %v5760_v37 = vcombine.high %v166_v32, %v170_v33  ;;  %v157_v38 = vld [vmem:[#allocation8 + $0x80] sm:$0xff]  ;;  %v158_v40 = vld [vmem:[#allocation8 + $0x88] sm:$0xff]  ;;  %v5757_v42 = vcombine.low %v165_v30, %v169_v31  ;;  %s6253_s30 = sshll.u32 %s5598_s26, 4  ;;  %s9299_s13 = sld [smem:[#allocation3 + $0x7]] }
  0x60   :  { %v161_v39 = vld [vmem:[#allocation8 + $0xa0] sm:$0xff]  ;;  %v162_v41 = vld [vmem:[#allocation8 + $0xa8] sm:$0xff]  ;;  %v5759_v43 = vcombine.low %v166_v32, %v170_v33  ;;  %s9301_s14 = sadd.s32 %s6253_s30, %s5601_s0  ;;  %s5624_s18 = sshra.s32 %s9286_s27, 3 }
  0x61   :  { %v5750_v44 = vcombine.high %v157_v38, %v161_v39  ;;  %v5752_v45 = vcombine.high %v158_v40, %v162_v41  ;;  %v149_v46 = vld [vmem:[#allocation8 + $0x40] sm:$0xff]  ;;  %v150_v48 = vld [vmem:[#allocation8 + $0x48] sm:$0xff]  ;;  %v5749_v50 = vcombine.low %v157_v38, %v161_v39  ;;  %v5751_v51 = vcombine.low %v158_v40, %v162_v41  ;;  %s5637_s3 = sshra.s32 %s9288_s28, 3  ;;  %s6255_s20 = sshll.u32 %s5624_s18, 4 }
  0x62   :  { %1022 = vmatpush1.bf16.msra.mxu0 %v5773_v26  ;;  %1063 = vmatpush1.bf16.msra.mxu1 %v5775_v27  ;;  %v153_v47 = vld [vmem:[#allocation8 + $0x60] sm:$0xff]  ;;  %v154_v49 = vld [vmem:[#allocation8 + $0x68] sm:$0xff]  ;;  %s5650_s21 = sshra.s32 %s9292_s4, 3  ;;  %s5640_s5 = sand.u32 7, %s9288_s28 }
  0x63   :  { %1023 = vmatprep.subr.bf16.mxu0 %v5766_v28  ;;  %1064 = vmatprep.subr.bf16.mxu1 %v5768_v29  ;;  %v5742_v52 = vcombine.high %v149_v46, %v153_v47  ;;  %v5744_v54 = vcombine.high %v150_v48, %v154_v49  ;;  %v141_v55 = vld [vmem:[#allocation8] sm:$0xff]  ;;  %v142_v58 = vld [vmem:[#allocation8 + $0x8] sm:$0xff]  ;;  %v5741_v60 = vcombine.low %v149_v46, %v153_v47  ;;  %s5663_s7 = sshra.s32 %s9294_s10, 3  ;;  %s6256_s22 = sshll.u32 %s5637_s3, 4 }
  0x64   :  { %v145_v56 = vld [vmem:[#allocation8 + $0x20] sm:$0xff]  ;;  %v146_v59 = vld [vmem:[#allocation8 + $0x28] sm:$0xff]  ;;  %v5743_v61 = vcombine.low %v150_v48, %v154_v49  ;;  %s5653_s2 = sand.u32 7, %s9292_s4  ;;  %s5666_s24 = sand.u32 7, %s9294_s10 }
  0x65   :  { %v5734_v62 = vcombine.high %v141_v55, %v145_v56  ;;  %v5736_v63 = vcombine.high %v142_v58, %v146_v59  ;;  %v261_v0 = vld [vmem:[#allocation8 + $0x3c0] sm:$0xff]  ;;  %v262_v2 = vld [vmem:[#allocation8 + $0x3c8] sm:$0xff]  ;;  %v5733_v4 = vcombine.low %v141_v55, %v145_v56  ;;  %v5735_v5 = vcombine.low %v142_v58, %v146_v59  ;;  %s5676_s23 = sshra.s32 %s9299_s13, 3  ;;  %s6258_s25 = sshll.u32 %s5663_s7, 4 }
  0x66   :  { %1024 = vmatpush1.bf16.msra.mxu0 %v5765_v34  ;;  %1065 = vmatpush1.bf16.msra.mxu1 %v5767_v35  ;;  %v265_v1 = vld [vmem:[#allocation8 + $0x3e0] sm:$0xff]  ;;  %v266_v3 = vld [vmem:[#allocation8 + $0x3e8] sm:$0xff]  ;;  %s5679_s26 = sand.u32 7, %s9299_s13  ;;  %s5643_s28 = sadd.s32 %s6256_s22, %s5640_s5 }
  0x67   :  { %1025 = vmatprep.subr.bf16.mxu0 %v5758_v36  ;;  %1066 = vmatprep.subr.bf16.mxu1 %v5760_v37  ;;  %v5854_v6 = vcombine.high %v261_v0, %v265_v1  ;;  %v5856_v7 = vcombine.high %v262_v2, %v266_v3  ;;  %v253_v8 = vld [vmem:[#allocation8 + $0x380] sm:$0xff]  ;;  %v254_v10 = vld [vmem:[#allocation8 + $0x388] sm:$0xff]  ;;  %v5853_v12 = vcombine.low %v261_v0, %v265_v1  ;;  %v199_v0 = vld [vmem:[#allocation8 + $0x1d0] sm:$0xff]  ;;  %s5669_s12 = sadd.s32 %s6258_s25, %s5666_s24  ;;  %s5589_s4 = scalar_lea.vmem [#allocation2], %s9290_s29 }
  0x68   :  { %v257_v9 = vld [vmem:[#allocation8 + $0x3a0] sm:$0xff]  ;;  %v258_v11 = vld [vmem:[#allocation8 + $0x3a8] sm:$0xff]  ;;  %v5855_v13 = vcombine.low %v262_v2, %v266_v3  ;;  %v203_v2 = vld [vmem:[#allocation8 + $0x1f0] sm:$0xff]  ;;  %s5605_s10 = scalar_lea.vmem [#allocation2], %s9301_s14  ;;  %s5644_s29 = scalar_lea.vmem [#allocation2], %s5643_s28 }
  0x69   :  { %v5846_v14 = vcombine.high %v253_v8, %v257_v9  ;;  %v5848_v15 = vcombine.high %v254_v10, %v258_v11  ;;  %v245_v16 = vld [vmem:[#allocation8 + $0x340] sm:$0xff]  ;;  %v246_v18 = vld [vmem:[#allocation8 + $0x348] sm:$0xff]  ;;  %v5845_v20 = vcombine.low %v253_v8, %v257_v9  ;;  %v5847_v21 = vcombine.low %v254_v10, %v258_v11  ;;  %v200_v3 = vld [vmem:[#allocation8 + $0x1d8] sm:$0xff] }
  0x6a   :  { %1026 = vmatpush1.bf16.msra.mxu0 %v5757_v42  ;;  %1067 = vmatpush1.bf16.msra.mxu1 %v5759_v43  ;;  %v249_v17 = vld [vmem:[#allocation8 + $0x360] sm:$0xff]  ;;  %v250_v19 = vld [vmem:[#allocation8 + $0x368] sm:$0xff]  ;;  %v5794_v8 = vcombine.high %v199_v0, %v203_v2  ;;  %v191_v9 = vld [vmem:[#allocation8 + $0x190] sm:$0xff] }
  0x6b   :  { %1027 = vmatprep.subr.bf16.mxu0 %v5750_v44  ;;  %1068 = vmatprep.subr.bf16.mxu1 %v5752_v45  ;;  %v5838_v22 = vcombine.high %v245_v16, %v249_v17  ;;  %v5840_v23 = vcombine.high %v246_v18, %v250_v19  ;;  %v237_v24 = vld [vmem:[#allocation8 + $0x300] sm:$0xff]  ;;  %v238_v26 = vld [vmem:[#allocation8 + $0x308] sm:$0xff]  ;;  %v5837_v28 = vcombine.low %v245_v16, %v249_v17  ;;  %v195_v10 = vld [vmem:[#allocation8 + $0x1b0] sm:$0xff] }
  0x6c   :  { %v241_v25 = vld [vmem:[#allocation8 + $0x320] sm:$0xff]  ;;  %v242_v27 = vld [vmem:[#allocation8 + $0x328] sm:$0xff]  ;;  %v5839_v29 = vcombine.low %v246_v18, %v250_v19  ;;  %v5786_v17 = vcombine.high %v191_v9, %v195_v10  ;;  %v183_v18 = vld [vmem:[#allocation8 + $0x150] sm:$0xff] }
  0x6d   :  { %v5830_v30 = vcombine.high %v237_v24, %v241_v25  ;;  %v5832_v31 = vcombine.high %v238_v26, %v242_v27  ;;  %v229_v32 = vld [vmem:[#allocation8 + $0x2c0] sm:$0xff]  ;;  %v230_v34 = vld [vmem:[#allocation8 + $0x2c8] sm:$0xff]  ;;  %v5829_v36 = vcombine.low %v237_v24, %v241_v25  ;;  %v5831_v37 = vcombine.low %v238_v26, %v242_v27  ;;  %v175_v26 = vld [vmem:[#allocation8 + $0x110] sm:$0xff] }
  0x6e   :  { %1028 = vmatpush1.bf16.msra.mxu0 %v5749_v50  ;;  %1069 = vmatpush1.bf16.msra.mxu1 %v5751_v51  ;;  %v233_v33 = vld [vmem:[#allocation8 + $0x2e0] sm:$0xff]  ;;  %v234_v35 = vld [vmem:[#allocation8 + $0x2e8] sm:$0xff]  ;;  %v179_v27 = vld [vmem:[#allocation8 + $0x130] sm:$0xff] }
  0x6f   :  { %1029 = vmatprep.subr.bf16.mxu0 %v5742_v52  ;;  %1070 = vmatprep.subr.bf16.mxu1 %v5744_v54  ;;  %v5822_v38 = vcombine.high %v229_v32, %v233_v33  ;;  %v221_v39 = vld [vmem:[#allocation8 + $0x280] sm:$0xff]  ;;  %v5824_v41 = vcombine.high %v230_v34, %v234_v35  ;;  %v222_v42 = vld [vmem:[#allocation8 + $0x288] sm:$0xff]  ;;  %v5821_v44 = vcombine.low %v229_v32, %v233_v33 }
  0x70   :  { %v225_v40 = vld [vmem:[#allocation8 + $0x2a0] sm:$0xff]  ;;  %v226_v43 = vld [vmem:[#allocation8 + $0x2a8] sm:$0xff]  ;;  %v5823_v45 = vcombine.low %v230_v34, %v234_v35  ;;  %v5770_v33 = vcombine.high %v175_v26, %v179_v27  ;;  %v167_v34 = vld [vmem:[#allocation8 + $0xd0] sm:$0xff] }
  0x71   :  { %v5814_v46 = vcombine.high %v221_v39, %v225_v40  ;;  %v213_v47 = vld [vmem:[#allocation8 + $0x240] sm:$0xff]  ;;  %v5816_v48 = vcombine.high %v222_v42, %v226_v43  ;;  %v214_v50 = vld [vmem:[#allocation8 + $0x248] sm:$0xff]  ;;  %v5813_v52 = vcombine.low %v221_v39, %v225_v40  ;;  %v5815_v53 = vcombine.low %v222_v42, %v226_v43  ;;  %v159_v42 = vld [vmem:[#allocation8 + $0x90] sm:$0xff] }
  0x72   :  { %1030 = vmatpush1.bf16.msra.mxu0 %v5741_v60  ;;  %1071 = vmatpush1.bf16.msra.mxu1 %v5743_v61  ;;  %v217_v49 = vld [vmem:[#allocation8 + $0x260] sm:$0xff]  ;;  %v218_v51 = vld [vmem:[#allocation8 + $0x268] sm:$0xff]  ;;  %v5769_v39 = vcombine.low %v175_v26, %v179_v27  ;;  %v243_v26 = vld [vmem:[#allocation8 + $0x330] sm:$0xff] }
  0x73   :  { %1031 = vmatprep.subr.bf16.mxu0 %v5734_v62  ;;  %1072 = vmatprep.subr.bf16.mxu1 %v5736_v63  ;;  %v5806_v54 = vcombine.high %v213_v47, %v217_v49  ;;  %v205_v55 = vld [vmem:[#allocation8 + $0x200] sm:$0xff]  ;;  %v5808_v58 = vcombine.high %v214_v50, %v218_v51  ;;  %v206_v59 = vld [vmem:[#allocation8 + $0x208] sm:$0xff]  ;;  %v5805_v61 = vcombine.low %v213_v47, %v217_v49  ;;  %v151_v49 = vld [vmem:[#allocation8 + $0x50] sm:$0xff] }
  0x74   :  { %v209_v56 = vld [vmem:[#allocation8 + $0x220] sm:$0xff]  ;;  %v210_v60 = vld [vmem:[#allocation8 + $0x228] sm:$0xff]  ;;  %v5807_v62 = vcombine.low %v214_v50, %v218_v51  ;;  %v155_v51 = vld [vmem:[#allocation8 + $0x70] sm:$0xff] }
  0x75   :  { %v5798_v63 = vcombine.high %v205_v55, %v209_v56  ;;  %v5800_v1 = vcombine.high %v206_v59, %v210_v60 }
  0x76   :  { %1032 = vmatpush1.bf16.msra.mxu0 %v5733_v4  ;;  %1073 = vmatpush1.bf16.msra.mxu1 %v5735_v5  ;;  %v204_v4 = vld [vmem:[#allocation8 + $0x1f8] sm:$0xff]  ;;  %v5797_v5 = vcombine.low %v205_v55, %v209_v56  ;;  %v5746_v56 = vcombine.high %v151_v49, %v155_v51 }
  0x77   :  { %1033 = vmatprep.subr.bf16.mxu0 %v5854_v6  ;;  %1074 = vmatprep.subr.bf16.mxu1 %v5856_v7  ;;  %v139_v6 = vld [vmem:[#allocation7] sm:$0xff]  ;;  %v5799_v7 = vcombine.low %v206_v59, %v210_v60  ;;  %v5796_v11 = vcombine.high %v200_v3, %v204_v4  ;;  %v5795_v16 = vcombine.low %v200_v3, %v204_v4  ;;  %v144_v60 = vld [vmem:[#allocation8 + $0x18] sm:$0xff] }
  0x78   :  { %v147_v59 = vld [vmem:[#allocation8 + $0x30] sm:$0xff]  ;;  %v264_v4 = vld [vmem:[#allocation8 + $0x3d8] sm:$0xff] }
  0x7a   :  { %1034 = vmatpush2.bf16.msra.mxu0 %v5853_v12  ;;  %1075 = vmatpush2.bf16.msra.mxu1 %v5855_v13  ;;  %v192_v12 = vld [vmem:[#allocation8 + $0x198] sm:$0xff]  ;;  %v7201_v13 = vpack.c.bf16 %v139_v6, %v139_v6 }
  0x7b   :  { %1035 = vmatprep.subr.bf16.mxu0 %v5846_v14  ;;  %1076 = vmatprep.subr.bf16.mxu1 %v5848_v15  ;;  %v196_v14 = vld [vmem:[#allocation8 + $0x1b8] sm:$0xff]  ;;  %v5793_v15 = vcombine.low %v199_v0, %v203_v2  ;;  %v263_v0 = vld [vmem:[#allocation8 + $0x3d0] sm:$0xff] }
  0x7c   :  { %v5788_v19 = vcombine.high %v192_v12, %v196_v14  ;;  %v5787_v24 = vcombine.low %v192_v12, %v196_v14  ;;  %v256_v12 = vld [vmem:[#allocation8 + $0x398] sm:$0xff] }
  0x7d   :  { %v260_v14 = vld [vmem:[#allocation8 + $0x3b8] sm:$0xff] }
  0x7e   :  { %1036 = vmatpush2.bf16.msra.mxu0 %v5845_v20  ;;  %1077 = vmatpush2.bf16.msra.mxu1 %v5847_v21  ;;  %v187_v20 = vld [vmem:[#allocation8 + $0x170] sm:$0xff]  ;;  %v184_v21 = vld [vmem:[#allocation8 + $0x158] sm:$0xff]  ;;  %v5851_v27 = vcombine.low %v256_v12, %v260_v14 }
  0x7f   :  { %1037 = vmatprep.subr.bf16.mxu0 %v5838_v22  ;;  %1078 = vmatprep.subr.bf16.mxu1 %v5840_v23  ;;  %v188_v22 = vld [vmem:[#allocation8 + $0x178] sm:$0xff]  ;;  %v5785_v23 = vcombine.low %v191_v9, %v195_v10  ;;  %v5778_v25 = vcombine.high %v183_v18, %v187_v20  ;;  %v259_v9 = vld [vmem:[#allocation8 + $0x3b0] sm:$0xff] }
  0x80   :  { %v5779_v32 = vcombine.low %v184_v21, %v188_v22 }
  0x82   :  { %1038 = vmatpush2.bf16.msra.mxu0 %v5837_v28  ;;  %1079 = vmatpush2.bf16.msra.mxu1 %v5839_v29  ;;  %v5780_v28 = vcombine.high %v184_v21, %v188_v22  ;;  %v176_v29 = vld [vmem:[#allocation8 + $0x118] sm:$0xff] }
  0x83   :  { %1039 = vmatprep.subr.bf16.mxu0 %v5830_v30  ;;  %1080 = vmatprep.subr.bf16.mxu1 %v5832_v31  ;;  %v180_v30 = vld [vmem:[#allocation8 + $0x138] sm:$0xff]  ;;  %v5777_v31 = vcombine.low %v183_v18, %v187_v20  ;;  %v251_v18 = vld [vmem:[#allocation8 + $0x370] sm:$0xff] }
  0x84   :  { %v5772_v35 = vcombine.high %v176_v29, %v180_v30  ;;  %v5771_v40 = vcombine.low %v176_v29, %v180_v30  ;;  %v248_v21 = vld [vmem:[#allocation8 + $0x358] sm:$0xff] }
  0x85   :  { %v252_v22 = vld [vmem:[#allocation8 + $0x378] sm:$0xff] }
  0x86   :  { %1040 = vmatpush2.bf16.msra.mxu0 %v5829_v36  ;;  %1081 = vmatpush2.bf16.msra.mxu1 %v5831_v37  ;;  %v171_v36 = vld [vmem:[#allocation8 + $0xf0] sm:$0xff]  ;;  %v168_v37 = vld [vmem:[#allocation8 + $0xd8] sm:$0xff] }
  0x87   :  { %1041 = vmatprep.subr.bf16.mxu0 %v5822_v38  ;;  %1082 = vmatprep.subr.bf16.mxu1 %v5824_v41  ;;  %v172_v38 = vld [vmem:[#allocation8 + $0xf8] sm:$0xff]  ;;  %v5762_v41 = vcombine.high %v167_v34, %v171_v36 }
  0x88   :  { %v5764_v43 = vcombine.high %v168_v37, %v172_v38  ;;  %v5763_v47 = vcombine.low %v168_v37, %v172_v38  ;;  %v240_v29 = vld [vmem:[#allocation8 + $0x318] sm:$0xff] }
  0x89   :  { %v244_v30 = vld [vmem:[#allocation8 + $0x338] sm:$0xff] }
  0x8a   :  { %1042 = vmatpush2.bf16.msra.mxu0 %v5821_v44  ;;  %1083 = vmatpush2.bf16.msra.mxu1 %v5823_v45  ;;  %v160_v44 = vld [vmem:[#allocation8 + $0x98] sm:$0xff] }
  0x8b   :  { %1043 = vmatprep.subr.bf16.mxu0 %v5814_v46  ;;  %1084 = vmatprep.subr.bf16.mxu1 %v5816_v48  ;;  %v164_v45 = vld [vmem:[#allocation8 + $0xb8] sm:$0xff]  ;;  %v5761_v46 = vcombine.low %v167_v34, %v171_v36  ;;  %v235_v34 = vld [vmem:[#allocation8 + $0x2f0] sm:$0xff] }
  0x8c   :  { %v5756_v50 = vcombine.high %v160_v44, %v164_v45  ;;  %v5755_v55 = vcombine.low %v160_v44, %v164_v45  ;;  %v232_v37 = vld [vmem:[#allocation8 + $0x2d8] sm:$0xff] }
  0x8d   :  { %v236_v38 = vld [vmem:[#allocation8 + $0x2f8] sm:$0xff] }
  0x8e   :  { %1044 = vmatpush2.bf16.msra.mxu0 %v5813_v52  ;;  %1085 = vmatpush2.bf16.msra.mxu1 %v5815_v53  ;;  %v152_v52 = vld [vmem:[#allocation8 + $0x58] sm:$0xff] }
  0x8f   :  { %1045 = vmatprep.subr.bf16.mxu0 %v5806_v54  ;;  %1086 = vmatprep.subr.bf16.mxu1 %v5808_v58  ;;  %v156_v53 = vld [vmem:[#allocation8 + $0x78] sm:$0xff]  ;;  %v143_v58 = vld [vmem:[#allocation8 + $0x10] sm:$0xff] }
  0x90   :  { %v5747_v2 = vcombine.low %v152_v52, %v156_v53  ;;  %v5738_v3 = vcombine.high %v143_v58, %v147_v59  ;;  %v224_v44 = vld [vmem:[#allocation8 + $0x298] sm:$0xff] }
  0x91   :  { %v228_v45 = vld [vmem:[#allocation8 + $0x2b8] sm:$0xff] }
  0x92   :  { %1046 = vmatpush2.bf16.msra.mxu0 %v5805_v61  ;;  %1087 = vmatpush2.bf16.msra.mxu1 %v5807_v62  ;;  %v5748_v61 = vcombine.high %v152_v52, %v156_v53  ;;  %v148_v62 = vld [vmem:[#allocation8 + $0x38] sm:$0xff] }
  0x93   :  { %1047 = vmatprep.subr.bf16.mxu0 %v5798_v63  ;;  %1088 = vmatprep.subr.bf16.mxu1 %v5800_v1  ;;  %v5745_v63 = vcombine.low %v151_v49, %v155_v51  ;;  %v267_v1 = vld [vmem:[#allocation8 + $0x3f0] sm:$0xff]  ;;  %v5740_v6 = vcombine.high %v144_v60, %v148_v62  ;;  %v5739_v10 = vcombine.low %v144_v60, %v148_v62  ;;  %v216_v52 = vld [vmem:[#allocation8 + $0x258] sm:$0xff] }
  0x94   :  { %v219_v49 = vld [vmem:[#allocation8 + $0x270] sm:$0xff]  ;;  %v220_v53 = vld [vmem:[#allocation8 + $0x278] sm:$0xff] }
  0x95   :  { %v212_v62 = vld [vmem:[#allocation8 + $0x238] sm:$0xff] }
  0x96   :  { %1048 = vmatpush2.bf16.msra.mxu0 %v5797_v5  ;;  %1089 = vmatpush2.bf16.msra.mxu1 %v5799_v7  ;;  %v268_v5 = vld [vmem:[#allocation8 + $0x3f8] sm:$0xff]  ;;  %v5737_v7 = vcombine.low %v143_v58, %v147_v59  ;;  %v211_v58 = vld [vmem:[#allocation8 + $0x230] sm:$0xff]  ;;  %v5819_v59 = vcombine.low %v224_v44, %v228_v45 }
  0x97   :  { %1099 = vmatprep.subr.bf16.mxu0 %v5794_v8  ;;  %1140 = vmatprep.subr.bf16.mxu1 %v5796_v11  ;;  %v255_v8 = vld [vmem:[#allocation8 + $0x390] sm:$0xff]  ;;  %v5858_v11 = vcombine.high %v263_v0, %v267_v1 }
  0x98   :  { %v5850_v20 = vcombine.high %v255_v8, %v259_v9 }
  0x99   :  { %1050 = vmatmul.mubr.bf16.vlgmr.msra.gmra.mxu0 %v7201_v13  ;;  %1091 = vmatmul.mubr.bf16.vlgmr.msra.gmra.mxu1 %v7201_v13 }
  0x9a   :  { %1100 = vmatpush1.bf16.msra.mxu0 %v5793_v15  ;;  %1141 = vmatpush1.bf16.msra.mxu1 %v5795_v16  ;;  %v5860_v15 = vcombine.high %v264_v4, %v268_v5  ;;  %v5857_v16 = vcombine.low %v263_v0, %v267_v1  ;;  %v5811_v1 = vcombine.low %v216_v52, %v220_v53 }
  0x9b   :  { %1101 = vmatprep.subr.bf16.mxu0 %v5786_v17  ;;  %1142 = vmatprep.subr.bf16.mxu1 %v5788_v19  ;;  %v247_v17 = vld [vmem:[#allocation8 + $0x350] sm:$0xff]  ;;  %v5859_v19 = vcombine.low %v264_v4, %v268_v5 }
  0x9c   :  { %1131 = vmatprep.mubr.bf16.mxu0 %v7197_v57  ;;  %1172 = vmatprep.mubr.bf16.mxu1 %v7197_v57  ;;  %v163_v57 = vld [vmem:[#allocation8 + $0xb0] sm:$0xff] }
  0x9d   :  { %v5754_v48 = vcombine.high %v159_v42, %v163_v57  ;;  %v5753_v54 = vcombine.low %v159_v42, %v163_v57  ;;  %v227_v42 = vld [vmem:[#allocation8 + $0x2b0] sm:$0xff]  ;;  %v5835_v57 = vcombine.low %v240_v29, %v244_v30 }
  0x9e   :  { %1102 = vmatpush1.bf16.msra.mxu0 %v5785_v23  ;;  %1143 = vmatpush1.bf16.msra.mxu1 %v5787_v24  ;;  %v5852_v23 = vcombine.high %v256_v12, %v260_v14  ;;  %v5849_v24 = vcombine.low %v255_v8, %v259_v9  ;;  %v7207_v4 = vld [vmem:[#allocation10 + $0xe4] ss:$16 sps:$4 sm:$0xff]   ;;  %v7211_v8 = vld [vmem:[#allocation10 + $0xe0] ss:$16 sps:$4 sm:$0xff]   ;;  %v7214_v9 = vld [vmem:[#allocation10 + $0xe8] ss:$16 sps:$4 sm:$0xff]  }
  0x9f   :  { %1103 = vmatprep.subr.bf16.mxu0 %v5778_v25  ;;  %1144 = vmatprep.subr.bf16.mxu1 %v5780_v28  ;;  %v239_v25 = vld [vmem:[#allocation8 + $0x310] sm:$0xff]  ;;  %v5842_v28 = vcombine.high %v247_v17, %v251_v18  ;;  %9647 = vst [vmem:[#allocation23_spill] sm:$0xff] %v7207_v4  ;;  %v7228_v14 = vld [vmem:[#allocation10 + $0xc8] ss:$16 sps:$4 sm:$0xff]  }
  0xa0   :  { %v5834_v36 = vcombine.high %v239_v25, %v243_v26  ;;  %v7224_v12 = vld [vmem:[#allocation10 + $0xc0] ss:$16 sps:$4 sm:$0xff]  }
  0xa2   :  { %1104 = vmatpush1.bf16.msra.mxu0 %v5777_v31  ;;  %1145 = vmatpush1.bf16.msra.mxu1 %v5779_v32  ;;  %v5844_v31 = vcombine.high %v248_v21, %v252_v22  ;;  %v5841_v32 = vcombine.low %v247_v17, %v251_v18  ;;  %v9356_v17 = vmov 0   ;;  %v7242_v18 = vld [vmem:[#allocation10 + $0xa8] ss:$16 sps:$4 sm:$0xff]  }
  0xa3   :  { %1105 = vmatprep.subr.bf16.mxu0 %v5770_v33  ;;  %1146 = vmatprep.subr.bf16.mxu1 %v5772_v35  ;;  %v231_v33 = vld [vmem:[#allocation8 + $0x2d0] sm:$0xff]  ;;  %v5843_v35 = vcombine.low %v248_v21, %v252_v22  ;;  %v7254_v22 = vld [vmem:[#allocation10 + $0x88] ss:$16 sps:$4 sm:$0xff]  }
  0xa4   :  { %v7250_v21 = vld [vmem:[#allocation10 + $0x80] ss:$16 sps:$4 sm:$0xff]  }
  0xa6   :  { %1106 = vmatpush1.bf16.msra.mxu0 %v5769_v39  ;;  %1147 = vmatpush1.bf16.msra.mxu1 %v5771_v40  ;;  %v5836_v39 = vcombine.high %v240_v29, %v244_v30  ;;  %v5833_v40 = vcombine.low %v239_v25, %v243_v26  ;;  %v7262_v25 = vld [vmem:[#allocation10 + $0x60] ss:$16 sps:$4 sm:$0xff]   ;;  %v7266_v26 = vld [vmem:[#allocation10 + $0x68] ss:$16 sps:$4 sm:$0xff]  }
  0xa7   :  { %1107 = vmatprep.subr.bf16.mxu0 %v5762_v41  ;;  %1148 = vmatprep.subr.bf16.mxu1 %v5764_v43  ;;  %v223_v41 = vld [vmem:[#allocation8 + $0x290] sm:$0xff]  ;;  %v5826_v43 = vcombine.high %v231_v33, %v235_v34  ;;  %v7278_v30 = vld [vmem:[#allocation10 + $0x48] ss:$16 sps:$4 sm:$0xff]  }
  0xa8   :  { %v5818_v51 = vcombine.high %v223_v41, %v227_v42  ;;  %v7274_v29 = vld [vmem:[#allocation10 + $0x40] ss:$16 sps:$4 sm:$0xff]  }
  0xaa   :  { %1108 = vmatpush1.bf16.msra.mxu0 %v5761_v46  ;;  %1149 = vmatpush1.bf16.msra.mxu1 %v5763_v47  ;;  %v5828_v46 = vcombine.high %v232_v37, %v236_v38  ;;  %v5825_v47 = vcombine.low %v231_v33, %v235_v34  ;;  %v7286_v33 = vld [vmem:[#allocation10 + $0x20] ss:$16 sps:$4 sm:$0xff]   ;;  %v7290_v34 = vld [vmem:[#allocation10 + $0x28] ss:$16 sps:$4 sm:$0xff]  }
  0xab   :  { %1109 = vmatprep.subr.bf16.mxu0 %v5754_v48  ;;  %1150 = vmatprep.subr.bf16.mxu1 %v5756_v50  ;;  %v215_v48 = vld [vmem:[#allocation8 + $0x250] sm:$0xff]  ;;  %v5827_v50 = vcombine.low %v232_v37, %v236_v38  ;;  %v7302_v38 = vld [vmem:[#allocation10 + $0x8] ss:$16 sps:$4 sm:$0xff]  }
  0xac   :  { %v5810_v60 = vcombine.high %v215_v48, %v219_v49  ;;  %v5809_v0 = vcombine.low %v215_v48, %v219_v49  ;;  %v7298_v37 = vld [vmem:[#allocation10] ss:$16 sps:$4 sm:$0xff]   ;;  %v7338_v49 = vld [vmem:[#allocation10 + $0x1a8] ss:$16 sps:$4 sm:$0xff]  }
  0xad   :  { %v7334_v48 = vld [vmem:[#allocation10 + $0x1a0] ss:$16 sps:$4 sm:$0xff]   ;;  %9653 = vst [vmem:[#allocation29_spill] sm:$0xff] %v7338_v49 }
  0xae   :  { %1110 = vmatpush1.bf16.msra.mxu0 %v5753_v54  ;;  %1151 = vmatpush1.bf16.msra.mxu1 %v5755_v55  ;;  %v5820_v54 = vcombine.high %v224_v44, %v228_v45  ;;  %v5817_v55 = vcombine.low %v223_v41, %v227_v42  ;;  %v7310_v41 = vld [vmem:[#allocation10 + $0x1e0] ss:$16 sps:$4 sm:$0xff]   ;;  %v7314_v42 = vld [vmem:[#allocation10 + $0x1e8] ss:$16 sps:$4 sm:$0xff]   ;;  %9652 = vst [vmem:[#allocation28_spill] sm:$0xff] %v7334_v48 }
  0xaf   :  { %1111 = vmatprep.subr.bf16.mxu0 %v5746_v56  ;;  %1152 = vmatprep.subr.bf16.mxu1 %v5748_v61  ;;  %v207_v56 = vld [vmem:[#allocation8 + $0x210] sm:$0xff]  ;;  %v208_v61 = vld [vmem:[#allocation8 + $0x218] sm:$0xff] }
  0xb0   :  { %v5801_v5 = vcombine.low %v207_v56, %v211_v58  ;;  %v7322_v44 = vld [vmem:[#allocation10 + $0x1c0] ss:$16 sps:$4 sm:$0xff]   ;;  %v7326_v45 = vld [vmem:[#allocation10 + $0x1c8] ss:$16 sps:$4 sm:$0xff]  }
  0xb1   :  { %9649 = vst [vmem:[#allocation25_spill] sm:$0xff] %v7326_v45 }
  0xb2   :  { %1112 = vmatpush1.bf16.msra.mxu0 %v5745_v63  ;;  %1153 = vmatpush1.bf16.msra.mxu1 %v5747_v2  ;;  %v5812_v63 = vcombine.high %v216_v52, %v220_v53  ;;  %v5802_v2 = vcombine.high %v207_v56, %v211_v58  ;;  %v7346_v52 = vld [vmem:[#allocation10 + $0x180] ss:$16 sps:$4 sm:$0xff]   ;;  %v7350_v53 = vld [vmem:[#allocation10 + $0x188] ss:$16 sps:$4 sm:$0xff]  }
  0xb3   :  { %1113 = vmatprep.subr.bf16.mxu0 %v5738_v3  ;;  %1154 = vmatprep.subr.bf16.mxu1 %v5740_v6  ;;  %v5804_v3 = vcombine.high %v208_v61, %v212_v62  ;;  %v7209_v6 = vld [vmem:[#allocation10 + $0xec] ss:$16 sps:$4 sm:$0xff]   ;;  %9656 = vst [vmem:[#allocation32_spill] sm:$0xff] %v7346_v52  ;;  %9657 = vst [vmem:[#allocation33_spill] sm:$0xff] %v7350_v53  ;;  %v7358_v56 = vld [vmem:[#allocation10 + $0x160] ss:$16 sps:$4 sm:$0xff]  }
  0xb4   :  { %9648 = vst [vmem:[#allocation24_spill] sm:$0xff] %v7209_v6  ;;  %9660 = vst [vmem:[#allocation36_spill] sm:$0xff] %v7358_v56  ;;  %v7362_v58 = vld [vmem:[#allocation10 + $0x168] ss:$16 sps:$4 sm:$0xff]  }
  0xb5   :  { %9661 = vst [vmem:[#allocation37_spill] sm:$0xff] %v7362_v58 }
  0xb6   :  { %1114 = vmatpush1.bf16.msra.mxu0 %v5737_v7  ;;  %1155 = vmatpush1.bf16.msra.mxu1 %v5739_v10  ;;  %v5803_v7 = vcombine.low %v208_v61, %v212_v62  ;;  %v7216_v10 = vld [vmem:[#allocation10 + $0xc4] ss:$16 sps:$4 sm:$0xff]   ;;  %v7370_v61 = vld [vmem:[#allocation10 + $0x140] ss:$16 sps:$4 sm:$0xff]   ;;  %v7374_v62 = vld [vmem:[#allocation10 + $0x148] ss:$16 sps:$4 sm:$0xff]  }
  0xb7   :  { %1115 = vmatprep.subr.bf16.mxu0 %v5858_v11  ;;  %1156 = vmatprep.subr.bf16.mxu1 %v5860_v15  ;;  %v7219_v11 = vld [vmem:[#allocation10 + $0xcc] ss:$16 sps:$4 sm:$0xff]   ;;  %v7230_v15 = vld [vmem:[#allocation10 + $0xa4] ss:$16 sps:$4 sm:$0xff]   ;;  %9664 = vst [vmem:[#allocation40_spill] sm:$0xff] %v7370_v61  ;;  %9665 = vst [vmem:[#allocation41_spill] sm:$0xff] %v7374_v62 }
  0xba   :  { %1116 = vmatpush2.bf16.msra.mxu0 %v5857_v16  ;;  %1157 = vmatpush2.bf16.msra.mxu1 %v5859_v19  ;;  %v7233_v16 = vld [vmem:[#allocation10 + $0xac] ss:$16 sps:$4 sm:$0xff]   ;;  %v7244_v19 = vld [vmem:[#allocation10 + $0x84] ss:$16 sps:$4 sm:$0xff]  }
  0xbb   :  { %1117 = vmatprep.subr.bf16.mxu0 %v5850_v20  ;;  %1158 = vmatprep.subr.bf16.mxu1 %v5852_v23  ;;  %v7247_v20 = vld [vmem:[#allocation10 + $0x8c] ss:$16 sps:$4 sm:$0xff]   ;;  %v7256_v23 = vld [vmem:[#allocation10 + $0x64] ss:$16 sps:$4 sm:$0xff]  }
  0xbe   :  { %1118 = vmatpush2.bf16.msra.mxu0 %v5849_v24  ;;  %1159 = vmatpush2.bf16.msra.mxu1 %v5851_v27  ;;  %v7259_v24 = vld [vmem:[#allocation10 + $0x6c] ss:$16 sps:$4 sm:$0xff]   ;;  %v7268_v27 = vld [vmem:[#allocation10 + $0x44] ss:$16 sps:$4 sm:$0xff]  }
  0xbf   :  { %1119 = vmatprep.subr.bf16.mxu0 %v5842_v28  ;;  %1160 = vmatprep.subr.bf16.mxu1 %v5844_v31  ;;  %v7271_v28 = vld [vmem:[#allocation10 + $0x4c] ss:$16 sps:$4 sm:$0xff]   ;;  %v7280_v31 = vld [vmem:[#allocation10 + $0x24] ss:$16 sps:$4 sm:$0xff]  }
  0xc2   :  { %1120 = vmatpush2.bf16.msra.mxu0 %v5841_v32  ;;  %1161 = vmatpush2.bf16.msra.mxu1 %v5843_v35  ;;  %v7283_v32 = vld [vmem:[#allocation10 + $0x2c] ss:$16 sps:$4 sm:$0xff]   ;;  %v7292_v35 = vld [vmem:[#allocation10 + $0x4] ss:$16 sps:$4 sm:$0xff]  }
  0xc3   :  { %1121 = vmatprep.subr.bf16.mxu0 %v5834_v36  ;;  %1162 = vmatprep.subr.bf16.mxu1 %v5836_v39  ;;  %v7295_v36 = vld [vmem:[#allocation10 + $0xc] ss:$16 sps:$4 sm:$0xff]   ;;  %v7304_v39 = vld [vmem:[#allocation10 + $0x1e4] ss:$16 sps:$4 sm:$0xff]  }
  0xc6   :  { %1122 = vmatpush2.bf16.msra.mxu0 %v5833_v40  ;;  %1163 = vmatpush2.bf16.msra.mxu1 %v5835_v57  ;;  %v7307_v40 = vld [vmem:[#allocation10 + $0x1ec] ss:$16 sps:$4 sm:$0xff]   ;;  %v7316_v57 = vld [vmem:[#allocation10 + $0x1c4] ss:$16 sps:$4 sm:$0xff]  }
  0xc7   :  { %1123 = vmatprep.subr.bf16.mxu0 %v5826_v43  ;;  %1164 = vmatprep.subr.bf16.mxu1 %v5828_v46  ;;  %v7319_v43 = vld [vmem:[#allocation10 + $0x1cc] ss:$16 sps:$4 sm:$0xff]   ;;  %v7328_v46 = vld [vmem:[#allocation10 + $0x1a4] ss:$16 sps:$4 sm:$0xff]  }
  0xc8   :  { %9650 = vst [vmem:[#allocation26_spill] sm:$0xff] %v7328_v46 }
  0xca   :  { %1124 = vmatpush2.bf16.msra.mxu0 %v5825_v47  ;;  %1165 = vmatpush2.bf16.msra.mxu1 %v5827_v50  ;;  %v7331_v47 = vld [vmem:[#allocation10 + $0x1ac] ss:$16 sps:$4 sm:$0xff]   ;;  %v7340_v50 = vld [vmem:[#allocation10 + $0x184] ss:$16 sps:$4 sm:$0xff]  }
  0xcb   :  { %1125 = vmatprep.subr.bf16.mxu0 %v5818_v51  ;;  %1166 = vmatprep.subr.bf16.mxu1 %v5820_v54  ;;  %9651 = vst [vmem:[#allocation27_spill] sm:$0xff] %v7331_v47  ;;  %9654 = vst [vmem:[#allocation30_spill] sm:$0xff] %v7340_v50  ;;  %v7343_v51 = vld [vmem:[#allocation10 + $0x18c] ss:$16 sps:$4 sm:$0xff]   ;;  %v7352_v54 = vld [vmem:[#allocation10 + $0x164] ss:$16 sps:$4 sm:$0xff]  }
  0xcc   :  { %9655 = vst [vmem:[#allocation31_spill] sm:$0xff] %v7343_v51  ;;  %9658 = vst [vmem:[#allocation34_spill] sm:$0xff] %v7352_v54 }
  0xce   :  { %1126 = vmatpush2.bf16.msra.mxu0 %v5817_v55  ;;  %1167 = vmatpush2.bf16.msra.mxu1 %v5819_v59  ;;  %v7355_v55 = vld [vmem:[#allocation10 + $0x16c] ss:$16 sps:$4 sm:$0xff]   ;;  %v7364_v59 = vld [vmem:[#allocation10 + $0x144] ss:$16 sps:$4 sm:$0xff]  }
  0xcf   :  { %1127 = vmatprep.subr.bf16.mxu0 %v5810_v60  ;;  %1168 = vmatprep.subr.bf16.mxu1 %v5812_v63  ;;  %9659 = vst [vmem:[#allocation35_spill] sm:$0xff] %v7355_v55  ;;  %9662 = vst [vmem:[#allocation38_spill] sm:$0xff] %v7364_v59  ;;  %v7367_v60 = vld [vmem:[#allocation10 + $0x14c] ss:$16 sps:$4 sm:$0xff]   ;;  %v7376_v63 = vld [vmem:[#allocation10 + $0x124] ss:$16 sps:$4 sm:$0xff]  }
  0xd0   :  { %9663 = vst [vmem:[#allocation39_spill] sm:$0xff] %v7367_v60  ;;  %9666 = vst [vmem:[#allocation42_spill] sm:$0xff] %v7376_v63 }
  0xd2   :  { %1128 = vmatpush2.bf16.msra.mxu0 %v5809_v0  ;;  %1169 = vmatpush2.bf16.msra.mxu1 %v5811_v1  ;;  %v7379_v0 = vld [vmem:[#allocation10 + $0x12c] ss:$16 sps:$4 sm:$0xff]   ;;  %v7382_v1 = vld [vmem:[#allocation10 + $0x120] ss:$16 sps:$4 sm:$0xff]  }
  0xd3   :  { %1129 = vmatprep.subr.bf16.mxu0 %v5802_v2  ;;  %1170 = vmatprep.subr.bf16.mxu1 %v5804_v3  ;;  %9667 = vst [vmem:[#allocation43_spill] sm:$0xff] %v7379_v0  ;;  %9668 = vst [vmem:[#allocation44_spill] sm:$0xff] %v7382_v1  ;;  %v7386_v2 = vld [vmem:[#allocation10 + $0x128] ss:$16 sps:$4 sm:$0xff]   ;;  %v7388_v3 = vld [vmem:[#allocation10 + $0x104] ss:$16 sps:$4 sm:$0xff]  }
  0xd4   :  { %9669 = vst [vmem:[#allocation45_spill] sm:$0xff] %v7386_v2  ;;  %9670 = vst [vmem:[#allocation46_spill] sm:$0xff] %v7388_v3 }
  0xd6   :  { %1130 = vmatpush2.bf16.msra.mxu0 %v5801_v5  ;;  %1171 = vmatpush2.bf16.msra.mxu1 %v5803_v7  ;;  %v7391_v5 = vld [vmem:[#allocation10 + $0x10c] ss:$16 sps:$4 sm:$0xff]   ;;  %v7394_v7 = vld [vmem:[#allocation10 + $0x100] ss:$16 sps:$4 sm:$0xff]  }
  0xd7   :  { %1518 = vmatprep.subr.bf16.mxu0 %v7207_v4  ;;  %1559 = vmatprep.subr.bf16.mxu1 %v7209_v6  ;;  %9671 = vst [vmem:[#allocation47_spill] sm:$0xff] %v7391_v5  ;;  %9672 = vst [vmem:[#allocation48_spill] sm:$0xff] %v7394_v7 }
  0xd9   :  { %1132 = vmatmul.mubr.bf16.vlgmr.msra.gmra.mxu0 %v7201_v13  ;;  %1173 = vmatmul.mubr.bf16.vlgmr.msra.gmra.mxu1 %v7201_v13  ;;  %v7238_v13 = vld [vmem:[#allocation10 + $0xa0] ss:$16 sps:$4 sm:$0xff]  }
  0xda   :  { %1519 = vmatpush1.bf16.msra.mxu0 %v7211_v8  ;;  %1560 = vmatpush1.bf16.msra.mxu1 %v7214_v9 }
  0xdb   :  { %1520 = vmatprep.subr.bf16.mxu0 %v7216_v10  ;;  %1561 = vmatprep.subr.bf16.mxu1 %v7219_v11 }
  0xdc   :  { %1550 = vmatprep.mubr.bf16.mxu0 %v9356_v17  ;;  %1591 = vmatprep.mubr.bf16.mxu1 %v9356_v17  ;;  %v7398_v17 = vld [vmem:[#allocation10 + $0x108] ss:$16 sps:$4 sm:$0xff]  }
  0xdd   :  { %9673 = vst [vmem:[#allocation49_spill] sm:$0xff] %v7398_v17 }
  0xde   :  { %1521 = vmatpush1.bf16.msra.mxu0 %v7224_v12  ;;  %1562 = vmatpush1.bf16.msra.mxu1 %v7228_v14 }
  0xdf   :  { %1522 = vmatprep.subr.bf16.mxu0 %v7230_v15  ;;  %1563 = vmatprep.subr.bf16.mxu1 %v7233_v16 }
  0xe2   :  { %1523 = vmatpush1.bf16.msra.mxu0 %v7238_v13  ;;  %1564 = vmatpush1.bf16.msra.mxu1 %v7242_v18 }
  0xe3   :  { %1524 = vmatprep.subr.bf16.mxu0 %v7244_v19  ;;  %1565 = vmatprep.subr.bf16.mxu1 %v7247_v20 }
  0xe6   :  { %1525 = vmatpush1.bf16.msra.mxu0 %v7250_v21  ;;  %1566 = vmatpush1.bf16.msra.mxu1 %v7254_v22 }
  0xe7   :  { %1526 = vmatprep.subr.bf16.mxu0 %v7256_v23  ;;  %1567 = vmatprep.subr.bf16.mxu1 %v7259_v24 }
  0xea   :  { %1527 = vmatpush1.bf16.msra.mxu0 %v7262_v25  ;;  %1568 = vmatpush1.bf16.msra.mxu1 %v7266_v26 }
  0xeb   :  { %1528 = vmatprep.subr.bf16.mxu0 %v7268_v27  ;;  %1569 = vmatprep.subr.bf16.mxu1 %v7271_v28 }
  0xee   :  { %1529 = vmatpush1.bf16.msra.mxu0 %v7274_v29  ;;  %1570 = vmatpush1.bf16.msra.mxu1 %v7278_v30 }
  0xef   :  { %1530 = vmatprep.subr.bf16.mxu0 %v7280_v31  ;;  %1571 = vmatprep.subr.bf16.mxu1 %v7283_v32 }
  0xf2   :  { %1531 = vmatpush1.bf16.msra.mxu0 %v7286_v33  ;;  %1572 = vmatpush1.bf16.msra.mxu1 %v7290_v34 }
  0xf3   :  { %1532 = vmatprep.subr.bf16.mxu0 %v7292_v35  ;;  %1573 = vmatprep.subr.bf16.mxu1 %v7295_v36 }
  0xf6   :  { %1533 = vmatpush1.bf16.msra.mxu0 %v7298_v37  ;;  %1574 = vmatpush1.bf16.msra.mxu1 %v7302_v38 }
  0xf7   :  { %1534 = vmatprep.subr.bf16.mxu0 %v7304_v39  ;;  %1575 = vmatprep.subr.bf16.mxu1 %v7307_v40 }
  0xfa   :  { %1535 = vmatpush2.bf16.msra.mxu0 %v7310_v41  ;;  %1576 = vmatpush2.bf16.msra.mxu1 %v7314_v42 }
  0xfb   :  { %1536 = vmatprep.subr.bf16.mxu0 %v7316_v57  ;;  %1577 = vmatprep.subr.bf16.mxu1 %v7319_v43 }
  0xfe   :  { %1537 = vmatpush2.bf16.msra.mxu0 %v7322_v44  ;;  %1578 = vmatpush2.bf16.msra.mxu1 %v7326_v45 }
  0xff   :  { %1538 = vmatprep.subr.bf16.mxu0 %v7328_v46  ;;  %1579 = vmatprep.subr.bf16.mxu1 %v7331_v47 }
 0x102   :  { %1539 = vmatpush2.bf16.msra.mxu0 %v7334_v48  ;;  %1580 = vmatpush2.bf16.msra.mxu1 %v7338_v49 }
 0x103   :  { %1540 = vmatprep.subr.bf16.mxu0 %v7340_v50  ;;  %1581 = vmatprep.subr.bf16.mxu1 %v7343_v51 }
 0x106   :  { %1541 = vmatpush2.bf16.msra.mxu0 %v7346_v52  ;;  %1582 = vmatpush2.bf16.msra.mxu1 %v7350_v53 }
 0x107   :  { %1542 = vmatprep.subr.bf16.mxu0 %v7352_v54  ;;  %1583 = vmatprep.subr.bf16.mxu1 %v7355_v55 }
 0x10a   :  { %1543 = vmatpush2.bf16.msra.mxu0 %v7358_v56  ;;  %1584 = vmatpush2.bf16.msra.mxu1 %v7362_v58 }
 0x10b   :  { %1544 = vmatprep.subr.bf16.mxu0 %v7364_v59  ;;  %1585 = vmatprep.subr.bf16.mxu1 %v7367_v60 }
 0x10e   :  { %1545 = vmatpush2.bf16.msra.mxu0 %v7370_v61  ;;  %1586 = vmatpush2.bf16.msra.mxu1 %v7374_v62 }
 0x10f   :  { %1546 = vmatprep.subr.bf16.mxu0 %v7376_v63  ;;  %1587 = vmatprep.subr.bf16.mxu1 %v7379_v0  ;;  %v9674_v0 = vmov 0  }
 0x112   :  { %1547 = vmatpush2.bf16.msra.mxu0 %v7382_v1  ;;  %1588 = vmatpush2.bf16.msra.mxu1 %v7386_v2 }
 0x113   :  { %1548 = vmatprep.subr.bf16.mxu0 %v7388_v3  ;;  %1589 = vmatprep.subr.bf16.mxu1 %v7391_v5 }
 0x116   :  { %1549 = vmatpush2.bf16.msra.mxu0 %v7394_v7  ;;  %1590 = vmatpush2.bf16.msra.mxu1 %v7398_v17 }
 0x117   :  { %1656 = vmatprep.subr.bf16.mxu0 %v7207_v4  ;;  %1697 = vmatprep.subr.bf16.mxu1 %v7209_v6 }
 0x119   :  { %1551 = vmatmul.mubr.bf16.vlgmr.msra.gmra.mxu0 %v9674_v0  ;;  %1592 = vmatmul.mubr.bf16.vlgmr.msra.gmra.mxu1 %v9674_v0  ;;  %v9675_v0 = vld [vmem:[#allocation43_spill] sm:$0xff] }
 0x11a   :  { %1657 = vmatpush1.bf16.msra.mxu0 %v7211_v8  ;;  %1698 = vmatpush1.bf16.msra.mxu1 %v7214_v9 }
 0x11b   :  { %1658 = vmatprep.subr.bf16.mxu0 %v7216_v10  ;;  %1699 = vmatprep.subr.bf16.mxu1 %v7219_v11 }
 0x11e   :  { %1659 = vmatpush1.bf16.msra.mxu0 %v7224_v12  ;;  %1700 = vmatpush1.bf16.msra.mxu1 %v7228_v14 }
 0x11f   :  { %1660 = vmatprep.subr.bf16.mxu0 %v7230_v15  ;;  %1701 = vmatprep.subr.bf16.mxu1 %v7233_v16 }
 0x122   :  { %1661 = vmatpush1.bf16.msra.mxu0 %v7238_v13  ;;  %1702 = vmatpush1.bf16.msra.mxu1 %v7242_v18 }
 0x123   :  { %1662 = vmatprep.subr.bf16.mxu0 %v7244_v19  ;;  %1703 = vmatprep.subr.bf16.mxu1 %v7247_v20 }
 0x126   :  { %1663 = vmatpush1.bf16.msra.mxu0 %v7250_v21  ;;  %1704 = vmatpush1.bf16.msra.mxu1 %v7254_v22 }
 0x127   :  { %1664 = vmatprep.subr.bf16.mxu0 %v7256_v23  ;;  %1705 = vmatprep.subr.bf16.mxu1 %v7259_v24 }
 0x12a   :  { %1665 = vmatpush1.bf16.msra.mxu0 %v7262_v25  ;;  %1706 = vmatpush1.bf16.msra.mxu1 %v7266_v26 }
 0x12b   :  { %1666 = vmatprep.subr.bf16.mxu0 %v7268_v27  ;;  %1707 = vmatprep.subr.bf16.mxu1 %v7271_v28 }
 0x12e   :  { %1667 = vmatpush1.bf16.msra.mxu0 %v7274_v29  ;;  %1708 = vmatpush1.bf16.msra.mxu1 %v7278_v30 }
 0x12f   :  { %1668 = vmatprep.subr.bf16.mxu0 %v7280_v31  ;;  %1709 = vmatprep.subr.bf16.mxu1 %v7283_v32 }
 0x132   :  { %1669 = vmatpush1.bf16.msra.mxu0 %v7286_v33  ;;  %1710 = vmatpush1.bf16.msra.mxu1 %v7290_v34 }
 0x133   :  { %1670 = vmatprep.subr.bf16.mxu0 %v7292_v35  ;;  %1711 = vmatprep.subr.bf16.mxu1 %v7295_v36 }
 0x136   :  { %1671 = vmatpush1.bf16.msra.mxu0 %v7298_v37  ;;  %1712 = vmatpush1.bf16.msra.mxu1 %v7302_v38 }
 0x137   :  { %1672 = vmatprep.subr.bf16.mxu0 %v7304_v39  ;;  %1713 = vmatprep.subr.bf16.mxu1 %v7307_v40 }
 0x13a   :  { %1673 = vmatpush2.bf16.msra.mxu0 %v7310_v41  ;;  %1714 = vmatpush2.bf16.msra.mxu1 %v7314_v42 }
 0x13b   :  { %1674 = vmatprep.subr.bf16.mxu0 %v7316_v57  ;;  %1715 = vmatprep.subr.bf16.mxu1 %v7319_v43 }
 0x13e   :  { %1675 = vmatpush2.bf16.msra.mxu0 %v7322_v44  ;;  %1716 = vmatpush2.bf16.msra.mxu1 %v7326_v45 }
 0x13f   :  { %1676 = vmatprep.subr.bf16.mxu0 %v7328_v46  ;;  %1717 = vmatprep.subr.bf16.mxu1 %v7331_v47 }
 0x142   :  { %1677 = vmatpush2.bf16.msra.mxu0 %v7334_v48  ;;  %1718 = vmatpush2.bf16.msra.mxu1 %v7338_v49 }
 0x143   :  { %1678 = vmatprep.subr.bf16.mxu0 %v7340_v50  ;;  %1719 = vmatprep.subr.bf16.mxu1 %v7343_v51 }
 0x146   :  { %1679 = vmatpush2.bf16.msra.mxu0 %v7346_v52  ;;  %1720 = vmatpush2.bf16.msra.mxu1 %v7350_v53  ;;  %v9397_v53 = vlaneseq }
 0x147   :  { %1680 = vmatprep.subr.bf16.mxu0 %v7352_v54  ;;  %1721 = vmatprep.subr.bf16.mxu1 %v7355_v55 }
 0x14a   :  { %1681 = vmatpush2.bf16.msra.mxu0 %v7358_v56  ;;  %1722 = vmatpush2.bf16.msra.mxu1 %v7362_v58 }
 0x14b   :  { %1682 = vmatprep.subr.bf16.mxu0 %v7364_v59  ;;  %1723 = vmatprep.subr.bf16.mxu1 %v7367_v60 }
 0x14e   :  { %1683 = vmatpush2.bf16.msra.mxu0 %v7370_v61  ;;  %1724 = vmatpush2.bf16.msra.mxu1 %v7374_v62 }
 0x14f   :  { %1684 = vmatprep.subr.bf16.mxu0 %v7376_v63  ;;  %1725 = vmatprep.subr.bf16.mxu1 %v9675_v0 }
 0x152   :  { %1685 = vmatpush2.bf16.msra.mxu0 %v7382_v1  ;;  %1726 = vmatpush2.bf16.msra.mxu1 %v7386_v2 }
 0x153   :  { %1686 = vmatprep.subr.bf16.mxu0 %v7388_v3  ;;  %1727 = vmatprep.subr.bf16.mxu1 %v7391_v5 }
 0x156   :  { %1687 = vmatpush2.bf16.msra.mxu0 %v7394_v7  ;;  %1728 = vmatpush2.bf16.msra.mxu1 %v7398_v17 }
 0x157   :  { %1790 = vmatprep.subr.bf16.mxu0 %v7207_v4  ;;  %1831 = vmatprep.subr.bf16.mxu1 %v7209_v6  ;;  %v7472_v4 = vshrl.u32 %v9397_v53, 7 }
 0x159   :  { %v1051_v62 = vpop.f32.mrf.mxu0  ;;  %v1092_v63 = vpop.f32.mrf.mxu1  ;;  %9676 = vst [vmem:[#allocation50_spill] sm:$0xff] %v7472_v4  ;;  %v9400_v6 = vsub.s32 4, %v7472_v4  ;;  %v9405_v52 = vsub.s32 5, %v7472_v4  ;;  %v9414_v53 = vsub.s32 6, %v7472_v4  ;;  %v9423_v46 = vsub.s32 3, %v7472_v4 }
 0x15a   :  { %vm130_vm1 = vcmp.eq.s32.totalorder %v7472_v4, 1 }
 0x15b   :  { %v1053_v61 = vpop.f32.mrf.mxu0  ;;  %v1094_v0 = vpop.f32.mrf.mxu1  ;;  %vm132_vm3 = vmxor %vm7123_vm2, %vm130_vm1 }
 0x15c   :  { %vm133_vm4 = vmxor %vm130_vm1, %vm7123_vm2 }
 0x15d   :  { %v1055_v60 = vpop.f32.mrf.mxu0  ;;  %v1096_v1 = vpop.f32.mrf.mxu1  ;;  %vm134_vm5 = vmxor %vm132_vm3, %vm7123_vm2 }
 0x15e   :  { %v333_v60 = vld [vmem:[#allocation11] ss:$2 sm:$0xff]  ;;  %v7479_v1 = vsub.s32 0, %v7472_v4 }
 0x15f   :  { %v1056_v59 = vpop.f32.mrf.mxu0  ;;  %v1097_v2 = vpop.f32.mrf.mxu1 }
 0x160   :  { %v356_v59 = vrot.slane %v333_v60, %v9400_v6  ;;  %9677 = vst [vmem:[#allocation51_spill] sm:$0xff] %v7479_v1  ;;  %v340_v2 = vrot.slane %v333_v60, %v7479_v1 }
 0x162   :  { %v7494_v50 = vadd.f32 %v1051_v62, %v340_v2 }
 0x164   :  { %9681 = vst [vmem:[#allocation55_spill] sm:$0xff] %v7494_v50 }
 0x199   :  { %v1133_v58 = vpop.f32.mrf.mxu0  ;;  %v1174_v3 = vpop.f32.mrf.mxu1 }
 0x19b   :  { %v1135_v56 = vpop.f32.mrf.mxu0  ;;  %v1176_v5 = vpop.f32.mrf.mxu1 }
 0x19d   :  { %v1137_v55 = vpop.f32.mrf.mxu0  ;;  %v1178_v7 = vpop.f32.mrf.mxu1 }
 0x19e   :  { %v360_v55 = vrot.slane %v333_v60, %v9405_v52  ;;  %v364_v52 = vrot.slane %v333_v60, %v9414_v53 }
 0x19f   :  { %v1138_v54 = vpop.f32.mrf.mxu0  ;;  %v1179_v17 = vpop.f32.mrf.mxu1 }
 0x1a0   :  { %v7484_v17 = vsub.s32 1, %v7472_v4  ;;  %v7486_v54 = vadd.f32 %v1133_v58, %v356_v59  ;;  %v7489_v7 = vadd.f32 %v1135_v56, %v360_v55  ;;  %v9425_v55 = vsub.s32 2, %v7472_v4 }
 0x1a2   :  { %9678 = vst [vmem:[#allocation52_spill] sm:$0xff] %v7484_v17  ;;  %9679 = vst [vmem:[#allocation53_spill] sm:$0xff] %v7486_v54  ;;  %v344_v51 = vrot.slane %v333_v60, %v7484_v17  ;;  %v1185_v6 = vrot.slane %v7486_v54, 6  ;;  %v1186_v49 = vrot.slane %v7489_v7, 6  ;;  %v9424_v17 = vsub.s32 7, %v7472_v4  ;;  %v9701_v4 = vld [vmem:[#allocation42_spill] sm:$0xff] }
 0x1a3   :  { %9680 = vst [vmem:[#allocation54_spill] sm:$0xff] %v7489_v7  ;;  %v7507_v7 = vadd.f32 %v1174_v3, %v364_v52 }
 0x1a4   :  { %v7499_v58 = vadd.f32 %v1053_v61, %v344_v51  ;;  %v1194_v56 = vsel %vm1193_vm0, %v7494_v50, %v1185_v6  ;;  %v348_v6 = vrot.slane %v333_v60, %v9425_v55  ;;  %v368_v50 = vrot.slane %v333_v60, %v9424_v17  ;;  %v9699_v17 = vld [vmem:[#allocation40_spill] sm:$0xff]  ;;  %v9700_v55 = vld [vmem:[#allocation41_spill] sm:$0xff] }
 0x1a6   :  { %v1195_v62 = vsel %vm1193_vm0, %v7499_v58, %v1186_v49  ;;  %v1187_v49 = vrot.slane %v7507_v7, 6  ;;  %v7515_v3 = vadd.f32 %v1092_v63, %v348_v6 }
 0x1d9   :  { %v1552_v59 = vpop.f32.mrf.mxu0  ;;  %v1593_v54 = vpop.f32.mrf.mxu1 }
 0x1da   :  { %v1600_v1 = vadd.f32 %v1552_v59, %v1194_v56 }
 0x1db   :  { %v1554_v2 = vpop.f32.mrf.mxu0  ;;  %v1595_v51 = vpop.f32.mrf.mxu1 }
 0x1dc   :  { %v5925_v53 = vmul.f32 -1.442695, %v1600_v1  ;;  %v1601_v48 = vadd.f32 %v1554_v2, %v1195_v62  ;;  %v7517_v1 = vadd.f32 %v1176_v5, %v368_v50  ;;  %v352_v62 = vrot.slane %v333_v60, %v9423_v46  ;;  %v9698_v46 = vld [vmem:[#allocation39_spill] sm:$0xff] }
 0x1dd   :  { %v1556_v61 = vpop.f32.mrf.mxu0  ;;  %v1597_v56 = vpop.f32.mrf.mxu1  ;;  %v1196_v2 = vsel %vm1193_vm0, %v7515_v3, %v1187_v49 }
 0x1de   :  { %6565 = vpow2.f32 %v5925_v53  ;;  %v5926_v47 = vmul.f32 -1.442695, %v1601_v48  ;;  %v1602_v53 = vadd.f32 %v1593_v54, %v1196_v2  ;;  %v1188_v48 = vrot.slane %v7517_v1, 6 }
 0x1df   :  { %v1557_v59 = vpop.f32.mrf.mxu0  ;;  %v1598_v52 = vpop.f32.mrf.mxu1  ;;  %v7524_v61 = vadd.f32 %v1094_v0, %v352_v62 }
 0x1e0   :  { %6567 = vpow2.f32 %v5926_v47  ;;  %v5927_v56 = vmul.f32 -1.442695, %v1602_v53 }
 0x1e1   :  { %v1197_v47 = vsel %vm1193_vm0, %v7524_v61, %v1188_v48 }
 0x1e2   :  { %v1603_v63 = vadd.f32 %v1595_v51, %v1197_v47  ;;  %6569 = vpow2.f32 %v5927_v56  ;;  %v7124_v56 = vmov 0.0  }
 0x1e3   :  { %v7532_v47 = vsel %vm133_vm4, 1.0, %v7124_v56 }
 0x1e4   :  { %9682 = vst [vmem:[#allocation56_spill] sm:$0xff] %v7532_v47 }
 0x1eb   :  { %v6566_v59 = vpop.eup %6565 }
 0x1ec   :  { %v1613_v6 = vadd.f32 1.0, %v6566_v59  ;;  %v7534_v59 = vsel %vm134_vm5, 1.0, %v7124_v56  ;;  %v9693_v56 = vld [vmem:[#allocation34_spill] sm:$0xff] }
 0x1ed   :  { %v6568_v50 = vpop.eup %6567  ;;  %9683 = vst [vmem:[#allocation57_spill] sm:$0xff] %v7534_v59 }
 0x1ee   :  { %6571 = vrcp.f32 %v1613_v6  ;;  %v1614_v5 = vadd.f32 1.0, %v6568_v50 }
 0x1ef   :  { %6573 = vtanh.f32 %v1603_v63  ;;  %v6570_v60 = vpop.eup %6569 }
 0x1f0   :  { %6575 = vrcp.f32 %v1614_v5  ;;  %v1615_v2 = vadd.f32 1.0, %v6570_v60 }
 0x1f2   :  { %6577 = vrcp.f32 %v1615_v2  ;;  %v9688_v2 = vld [vmem:[#allocation29_spill] sm:$0xff] }
 0x1fb   :  { %v6572_v49 = vpop.eup %6571 }
 0x1fc   :  { %v6574_v54 = vpop.eup %6573 }
 0x1fd   :  { %v6576_v52 = vpop.eup %6575  ;;  %v1624_v62 = vmul.f32 %v6574_v54, %v6572_v49  ;;  %v9685_v49 = vld [vmem:[#allocation26_spill] sm:$0xff]  ;;  %v9686_v54 = vld [vmem:[#allocation27_spill] sm:$0xff] }
 0x1fe   :  { %v1623_v0 = vmul.f32 0.0, %v6576_v52  ;;  %v9687_v52 = vld [vmem:[#allocation28_spill] sm:$0xff] }
 0x1ff   :  { %v6578_v51 = vpop.eup %6577 }
 0x200   :  { %v7528_v53 = vadd.f32 %v1624_v62, %v1623_v0  ;;  %v9689_v0 = vld [vmem:[#allocation30_spill] sm:$0xff]  ;;  %v9690_v62 = vld [vmem:[#allocation31_spill] sm:$0xff] }
 0x202   :  { %6579 = vtanh.f32 %v7528_v53 }
 0x20f   :  { %v6580_v48 = vpop.eup %6579 }
 0x210   :  { %v7536_v63 = vmul.f32 %v6580_v48, %v6578_v51  ;;  %v9691_v51 = vld [vmem:[#allocation32_spill] sm:$0xff]  ;;  %v9692_v48 = vld [vmem:[#allocation33_spill] sm:$0xff] }
 0x212   :  { %9684 = vst [vmem:[#allocation58_spill] sm:$0xff] %v7536_v63  ;;  %v1629_v6 = vmul.f32 %v7534_v59, %v7536_v63  ;;  %v1628_v50 = vmul.f32 %v7532_v47, %v7536_v63  ;;  %v9702_v63 = vld [vmem:[#allocation43_spill] sm:$0xff] }
 0x214   :  { %v1631_v5 = vpack.c.bf16 %v1629_v6, %v1629_v6  ;;  %v1630_v60 = vpack.c.bf16 %v1628_v50, %v1628_v50  ;;  %v9694_v6 = vld [vmem:[#allocation35_spill] sm:$0xff]  ;;  %v9695_v50 = vld [vmem:[#allocation36_spill] sm:$0xff] }
 0x216   :  { %1688 = vmatprep.mubr.bf16.mxu0 %v1631_v5  ;;  %1729 = vmatprep.mubr.bf16.mxu1 %v1631_v5  ;;  %v9696_v5 = vld [vmem:[#allocation37_spill] sm:$0xff] }
 0x217   :  { %1689 = vmatmul.mubr.bf16.vlgmr.msra.gmra.mxu0 %v1630_v60  ;;  %1730 = vmatmul.mubr.bf16.vlgmr.msra.gmra.mxu1 %v1630_v60  ;;  %v9697_v60 = vld [vmem:[#allocation38_spill] sm:$0xff] }
 0x218   :  { %1791 = vmatpush1.bf16.msra.mxu0 %v7211_v8  ;;  %1832 = vmatpush1.bf16.msra.mxu1 %v7214_v9 }
 0x219   :  { %1792 = vmatprep.subr.bf16.mxu0 %v7216_v10  ;;  %1833 = vmatprep.subr.bf16.mxu1 %v7219_v11 }
 0x21c   :  { %1793 = vmatpush1.bf16.msra.mxu0 %v7224_v12  ;;  %1834 = vmatpush1.bf16.msra.mxu1 %v7228_v14 }
 0x21d   :  { %1794 = vmatprep.subr.bf16.mxu0 %v7230_v15  ;;  %1835 = vmatprep.subr.bf16.mxu1 %v7233_v16 }
 0x220   :  { %1795 = vmatpush1.bf16.msra.mxu0 %v7238_v13  ;;  %1836 = vmatpush1.bf16.msra.mxu1 %v7242_v18 }
 0x221   :  { %1796 = vmatprep.subr.bf16.mxu0 %v7244_v19  ;;  %1837 = vmatprep.subr.bf16.mxu1 %v7247_v20 }
 0x224   :  { %1797 = vmatpush1.bf16.msra.mxu0 %v7250_v21  ;;  %1838 = vmatpush1.bf16.msra.mxu1 %v7254_v22 }
 0x225   :  { %1798 = vmatprep.subr.bf16.mxu0 %v7256_v23  ;;  %1839 = vmatprep.subr.bf16.mxu1 %v7259_v24 }
 0x228   :  { %1799 = vmatpush1.bf16.msra.mxu0 %v7262_v25  ;;  %1840 = vmatpush1.bf16.msra.mxu1 %v7266_v26 }
 0x229   :  { %1800 = vmatprep.subr.bf16.mxu0 %v7268_v27  ;;  %1841 = vmatprep.subr.bf16.mxu1 %v7271_v28 }
 0x22c   :  { %1801 = vmatpush1.bf16.msra.mxu0 %v7274_v29  ;;  %1842 = vmatpush1.bf16.msra.mxu1 %v7278_v30 }
 0x22d   :  { %1802 = vmatprep.subr.bf16.mxu0 %v7280_v31  ;;  %1843 = vmatprep.subr.bf16.mxu1 %v7283_v32 }
 0x230   :  { %1803 = vmatpush1.bf16.msra.mxu0 %v7286_v33  ;;  %1844 = vmatpush1.bf16.msra.mxu1 %v7290_v34 }
 0x231   :  { %1804 = vmatprep.subr.bf16.mxu0 %v7292_v35  ;;  %1845 = vmatprep.subr.bf16.mxu1 %v7295_v36 }
 0x234   :  { %1805 = vmatpush1.bf16.msra.mxu0 %v7298_v37  ;;  %1846 = vmatpush1.bf16.msra.mxu1 %v7302_v38 }
 0x235   :  { %1806 = vmatprep.subr.bf16.mxu0 %v7304_v39  ;;  %1847 = vmatprep.subr.bf16.mxu1 %v7307_v40 }
 0x238   :  { %1807 = vmatpush2.bf16.msra.mxu0 %v7310_v41  ;;  %1848 = vmatpush2.bf16.msra.mxu1 %v7314_v42 }
 0x239   :  { %1808 = vmatprep.subr.bf16.mxu0 %v7316_v57  ;;  %1849 = vmatprep.subr.bf16.mxu1 %v7319_v43 }
 0x23c   :  { %1809 = vmatpush2.bf16.msra.mxu0 %v7322_v44  ;;  %1850 = vmatpush2.bf16.msra.mxu1 %v7326_v45 }
 0x23d   :  { %1810 = vmatprep.subr.bf16.mxu0 %v9685_v49  ;;  %1851 = vmatprep.subr.bf16.mxu1 %v9686_v54 }
 0x240   :  { %1811 = vmatpush2.bf16.msra.mxu0 %v9687_v52  ;;  %1852 = vmatpush2.bf16.msra.mxu1 %v9688_v2 }
 0x241   :  { %1812 = vmatprep.subr.bf16.mxu0 %v9689_v0  ;;  %1853 = vmatprep.subr.bf16.mxu1 %v9690_v62  ;;  %v9713_v62 = vld [vmem:[#allocation54_spill] sm:$0xff] }
 0x244   :  { %1813 = vmatpush2.bf16.msra.mxu0 %v9691_v51  ;;  %1854 = vmatpush2.bf16.msra.mxu1 %v9692_v48  ;;  %v9703_v48 = vld [vmem:[#allocation44_spill] sm:$0xff]  ;;  %v9712_v51 = vld [vmem:[#allocation55_spill] sm:$0xff] }
 0x245   :  { %1814 = vmatprep.subr.bf16.mxu0 %v9693_v56  ;;  %1855 = vmatprep.subr.bf16.mxu1 %v9694_v6  ;;  %v9704_v56 = vld [vmem:[#allocation45_spill] sm:$0xff]  ;;  %v9705_v6 = vld [vmem:[#allocation46_spill] sm:$0xff] }
 0x248   :  { %1815 = vmatpush2.bf16.msra.mxu0 %v9695_v50  ;;  %1856 = vmatpush2.bf16.msra.mxu1 %v9696_v5  ;;  %v9706_v50 = vld [vmem:[#allocation47_spill] sm:$0xff]  ;;  %v9707_v5 = vld [vmem:[#allocation48_spill] sm:$0xff] }
 0x249   :  { %1816 = vmatprep.subr.bf16.mxu0 %v9697_v60  ;;  %1857 = vmatprep.subr.bf16.mxu1 %v9698_v46  ;;  %v9708_v60 = vld [vmem:[#allocation49_spill] sm:$0xff]  ;;  %v9709_v46 = vld [vmem:[#allocation23_spill] sm:$0xff] }
 0x24c   :  { %1817 = vmatpush2.bf16.msra.mxu0 %v9699_v17  ;;  %1858 = vmatpush2.bf16.msra.mxu1 %v9700_v55  ;;  %v9710_v17 = vld [vmem:[#allocation24_spill] sm:$0xff]  ;;  %v9711_v55 = vld [vmem:[#allocation53_spill] sm:$0xff] }
 0x24d   :  { %1818 = vmatprep.subr.bf16.mxu0 %v9701_v4  ;;  %1859 = vmatprep.subr.bf16.mxu1 %v9702_v63  ;;  %v1644_v4 = vrot.slane %v9711_v55, 5  ;;  %v1636_v63 = vrot.slane %v9712_v51, 1  ;;  %v1646_v51 = vrot.slane %v7507_v7, 5 }
 0x250   :  { %1819 = vmatpush2.bf16.msra.mxu0 %v9703_v48  ;;  %1860 = vmatpush2.bf16.msra.mxu1 %v9704_v56  ;;  %v1645_v48 = vrot.slane %v9713_v62, 5  ;;  %v1652_v56 = vsel %vm1193_vm0, %v1636_v63, %v1644_v4  ;;  %v1638_v4 = vrot.slane %v7515_v3, 1 }
 0x251   :  { %1820 = vmatprep.subr.bf16.mxu0 %v9705_v6  ;;  %1861 = vmatprep.subr.bf16.mxu1 %v9706_v50  ;;  %v1637_v50 = vrot.slane %v7499_v58, 1 }
 0x252   :  { %v1654_v63 = vsel %vm1193_vm0, %v1638_v4, %v1646_v51 }
 0x254   :  { %1821 = vmatpush2.bf16.msra.mxu0 %v9707_v5  ;;  %1862 = vmatpush2.bf16.msra.mxu1 %v9708_v60  ;;  %v1653_v5 = vsel %vm1193_vm0, %v1637_v50, %v1645_v48  ;;  %v1647_v48 = vrot.slane %v7517_v1, 5 }
 0x255   :  { %1924 = vmatprep.subr.bf16.mxu0 %v9709_v46  ;;  %1965 = vmatprep.subr.bf16.mxu1 %v9710_v17 }
 0x2d7   :  { %v1690_v0 = vpop.f32.mrf.mxu0  ;;  %v1731_v6 = vpop.f32.mrf.mxu1 }
 0x2d8   :  { %v1738_v2 = vadd.f32 %v1690_v0, %v1652_v56  ;;  %v1740_v0 = vadd.f32 %v1731_v6, %v1654_v63  ;;  %v1639_v56 = vrot.slane %v7524_v61, 1 }
 0x2d9   :  { %v1692_v60 = vpop.f32.mrf.mxu0  ;;  %v1733_v52 = vpop.f32.mrf.mxu1 }
 0x2da   :  { %v5928_v46 = vmul.f32 -1.442695, %v1738_v2  ;;  %v1739_v54 = vadd.f32 %v1692_v60, %v1653_v5  ;;  %v5930_v2 = vmul.f32 -1.442695, %v1740_v0  ;;  %v1655_v50 = vsel %vm1193_vm0, %v1639_v56, %v1647_v48 }
 0x2db   :  { %v1694_v17 = vpop.f32.mrf.mxu0  ;;  %v1735_v49 = vpop.f32.mrf.mxu1 }
 0x2dc   :  { %6581 = vpow2.f32 %v5928_v46  ;;  %v5929_v55 = vmul.f32 -1.442695, %v1739_v54  ;;  %v1741_v49 = vadd.f32 %v1733_v52, %v1655_v50 }
 0x2dd   :  { %v1695_v62 = vpop.f32.mrf.mxu0  ;;  %v1736_v45 = vpop.f32.mrf.mxu1 }
 0x2de   :  { %6583 = vpow2.f32 %v5929_v55 }
 0x2df   :  { %6585 = vpow2.f32 %v5930_v2 }
 0x2e0   :  { %6587 = vtanh.f32 %v1741_v49 }
 0x2e9   :  { %v6582_v5 = vpop.eup %6581 }
 0x2ea   :  { %v1751_v54 = vadd.f32 1.0, %v6582_v5 }
 0x2eb   :  { %v6584_v60 = vpop.eup %6583 }
 0x2ec   :  { %6589 = vrcp.f32 %v1751_v54  ;;  %v1752_v45 = vadd.f32 1.0, %v6584_v60  ;;  %v6586_v55 = vpop.eup %6585 }
 0x2ed   :  { %v6588_v62 = vpop.eup %6587  ;;  %v1753_v17 = vadd.f32 1.0, %v6586_v55 }
 0x2ee   :  { %6591 = vrcp.f32 %v1752_v45 }
 0x2ef   :  { %6593 = vrcp.f32 %v1753_v17 }
 0x2f9   :  { %v6590_v51 = vpop.eup %6589 }
 0x2fa   :  { %v1762_v6 = vmul.f32 %v6590_v51, %v6588_v62 }
 0x2fb   :  { %v6592_v46 = vpop.eup %6591 }
 0x2fc   :  { %v1761_v4 = vmul.f32 %v6592_v46, %v7528_v53  ;;  %v6594_v52 = vpop.eup %6593  ;;  %v1780_v46 = vrot.slane %v7507_v7, 4 }
 0x2fe   :  { %v7619_v63 = vadd.f32 %v1762_v6, %v1761_v4 }
 0x300   :  { %6595 = vtanh.f32 %v7619_v63 }
 0x30d   :  { %v6596_v0 = vpop.eup %6595 }
 0x30e   :  { %v7622_v48 = vmul.f32 %v6596_v0, %v6594_v52  ;;  %v1772_v52 = vrot.slane %v7515_v3, 2 }
 0x310   :  { %9714 = vst [vmem:[#allocation23_spill] sm:$0xff] %v7622_v48  ;;  %v1767_v56 = vmul.f32 %v7534_v59, %v7622_v48  ;;  %v1766_v2 = vmul.f32 %v7532_v47, %v7622_v48  ;;  %v1788_v0 = vsel %vm1193_vm0, %v1772_v52, %v1780_v46 }
 0x312   :  { %v1769_v50 = vpack.c.bf16 %v1767_v56, %v1767_v56  ;;  %v1768_v49 = vpack.c.bf16 %v1766_v2, %v1766_v2  ;;  %v1781_v2 = vrot.slane %v7517_v1, 4 }
 0x314   :  { %1822 = vmatprep.mubr.bf16.mxu0 %v1769_v50  ;;  %1863 = vmatprep.mubr.bf16.mxu1 %v1769_v50  ;;  %v1773_v50 = vrot.slane %v7524_v61, 2 }
 0x315   :  { %1823 = vmatmul.mubr.bf16.vlgmr.msra.gmra.mxu0 %v1768_v49  ;;  %1864 = vmatmul.mubr.bf16.vlgmr.msra.gmra.mxu1 %v1768_v49 }
 0x316   :  { %1925 = vmatpush1.bf16.msra.mxu0 %v7211_v8  ;;  %1966 = vmatpush1.bf16.msra.mxu1 %v7214_v9  ;;  %v9715_v8 = vld [vmem:[#allocation25_spill] sm:$0xff]  ;;  %v9716_v9 = vld [vmem:[#allocation26_spill] sm:$0xff] }
 0x317   :  { %1926 = vmatprep.subr.bf16.mxu0 %v7216_v10  ;;  %1967 = vmatprep.subr.bf16.mxu1 %v7219_v11  ;;  %v9717_v10 = vld [vmem:[#allocation27_spill] sm:$0xff]  ;;  %v9718_v11 = vld [vmem:[#allocation28_spill] sm:$0xff] }
 0x31a   :  { %1927 = vmatpush1.bf16.msra.mxu0 %v7224_v12  ;;  %1968 = vmatpush1.bf16.msra.mxu1 %v7228_v14  ;;  %v9719_v12 = vld [vmem:[#allocation29_spill] sm:$0xff]  ;;  %v9720_v14 = vld [vmem:[#allocation30_spill] sm:$0xff] }
 0x31b   :  { %1928 = vmatprep.subr.bf16.mxu0 %v7230_v15  ;;  %1969 = vmatprep.subr.bf16.mxu1 %v7233_v16  ;;  %v9721_v15 = vld [vmem:[#allocation31_spill] sm:$0xff]  ;;  %v9722_v16 = vld [vmem:[#allocation32_spill] sm:$0xff] }
 0x31e   :  { %1929 = vmatpush1.bf16.msra.mxu0 %v7238_v13  ;;  %1970 = vmatpush1.bf16.msra.mxu1 %v7242_v18  ;;  %v9723_v13 = vld [vmem:[#allocation33_spill] sm:$0xff]  ;;  %v9724_v18 = vld [vmem:[#allocation34_spill] sm:$0xff] }
 0x31f   :  { %1930 = vmatprep.subr.bf16.mxu0 %v7244_v19  ;;  %1971 = vmatprep.subr.bf16.mxu1 %v7247_v20  ;;  %v9725_v19 = vld [vmem:[#allocation35_spill] sm:$0xff]  ;;  %v9726_v20 = vld [vmem:[#allocation36_spill] sm:$0xff] }
 0x322   :  { %1931 = vmatpush1.bf16.msra.mxu0 %v7250_v21  ;;  %1972 = vmatpush1.bf16.msra.mxu1 %v7254_v22  ;;  %v9727_v21 = vld [vmem:[#allocation37_spill] sm:$0xff]  ;;  %v9728_v22 = vld [vmem:[#allocation38_spill] sm:$0xff] }
 0x323   :  { %1932 = vmatprep.subr.bf16.mxu0 %v7256_v23  ;;  %1973 = vmatprep.subr.bf16.mxu1 %v7259_v24  ;;  %v9729_v23 = vld [vmem:[#allocation39_spill] sm:$0xff]  ;;  %v9730_v24 = vld [vmem:[#allocation40_spill] sm:$0xff] }
 0x326   :  { %1933 = vmatpush1.bf16.msra.mxu0 %v7262_v25  ;;  %1974 = vmatpush1.bf16.msra.mxu1 %v7266_v26  ;;  %v9731_v25 = vld [vmem:[#allocation41_spill] sm:$0xff]  ;;  %v9732_v26 = vld [vmem:[#allocation42_spill] sm:$0xff] }
 0x327   :  { %1934 = vmatprep.subr.bf16.mxu0 %v7268_v27  ;;  %1975 = vmatprep.subr.bf16.mxu1 %v7271_v28  ;;  %v9733_v27 = vld [vmem:[#allocation43_spill] sm:$0xff]  ;;  %v9734_v28 = vld [vmem:[#allocation44_spill] sm:$0xff] }
 0x32a   :  { %1935 = vmatpush1.bf16.msra.mxu0 %v7274_v29  ;;  %1976 = vmatpush1.bf16.msra.mxu1 %v7278_v30  ;;  %v9735_v29 = vld [vmem:[#allocation45_spill] sm:$0xff]  ;;  %v9736_v30 = vld [vmem:[#allocation46_spill] sm:$0xff] }
 0x32b   :  { %1936 = vmatprep.subr.bf16.mxu0 %v7280_v31  ;;  %1977 = vmatprep.subr.bf16.mxu1 %v7283_v32  ;;  %v9737_v31 = vld [vmem:[#allocation47_spill] sm:$0xff]  ;;  %v9738_v32 = vld [vmem:[#allocation48_spill] sm:$0xff] }
 0x32e   :  { %1937 = vmatpush1.bf16.msra.mxu0 %v7286_v33  ;;  %1978 = vmatpush1.bf16.msra.mxu1 %v7290_v34  ;;  %v9739_v33 = vld [vmem:[#allocation49_spill] sm:$0xff] }
 0x32f   :  { %1938 = vmatprep.subr.bf16.mxu0 %v7292_v35  ;;  %1979 = vmatprep.subr.bf16.mxu1 %v7295_v36  ;;  %v7690_v34 = vld [vmem:[#allocation10 + $0xe4] ss:$16 sps:$4 sm:$0xff]   ;;  %v7693_v35 = vld [vmem:[#allocation10 + $0xec] ss:$16 sps:$4 sm:$0xff]  }
 0x330   :  { %9740 = vst [vmem:[#allocation24_spill] sm:$0xff] %v7690_v34  ;;  %9741 = vst [vmem:[#allocation25_spill] sm:$0xff] %v7693_v35  ;;  %v9742_v36 = vld [vmem:[#allocation53_spill] sm:$0xff] }
 0x332   :  { %1939 = vmatpush1.bf16.msra.mxu0 %v7298_v37  ;;  %1980 = vmatpush1.bf16.msra.mxu1 %v7302_v38  ;;  %v1778_v37 = vrot.slane %v9742_v36, 4  ;;  %v9743_v38 = vld [vmem:[#allocation55_spill] sm:$0xff] }
 0x333   :  { %1940 = vmatprep.subr.bf16.mxu0 %v7304_v39  ;;  %1981 = vmatprep.subr.bf16.mxu1 %v7307_v40  ;;  %v1770_v39 = vrot.slane %v9743_v38, 2  ;;  %v9744_v40 = vld [vmem:[#allocation54_spill] sm:$0xff] }
 0x336   :  { %1941 = vmatpush2.bf16.msra.mxu0 %v7310_v41  ;;  %1982 = vmatpush2.bf16.msra.mxu1 %v7314_v42  ;;  %v1779_v41 = vrot.slane %v9744_v40, 4  ;;  %v1786_v42 = vsel %vm1193_vm0, %v1770_v39, %v1778_v37 }
 0x337   :  { %1942 = vmatprep.subr.bf16.mxu0 %v7316_v57  ;;  %1983 = vmatprep.subr.bf16.mxu1 %v7319_v43 }
 0x33a   :  { %1943 = vmatpush2.bf16.msra.mxu0 %v7322_v44  ;;  %1984 = vmatpush2.bf16.msra.mxu1 %v9715_v8  ;;  %v1771_v44 = vrot.slane %v7499_v58, 2  ;;  %v1789_v8 = vsel %vm1193_vm0, %v1773_v50, %v1781_v2  ;;  %v7725_v50 = vld [vmem:[#allocation10 + $0xe0] ss:$16 sps:$4 sm:$0xff]  }
 0x33b   :  { %1944 = vmatprep.subr.bf16.mxu0 %v9716_v9  ;;  %1985 = vmatprep.subr.bf16.mxu1 %v9717_v10 }
 0x33c   :  { %v1787_v5 = vsel %vm1193_vm0, %v1771_v44, %v1779_v41 }
 0x33e   :  { %1945 = vmatpush2.bf16.msra.mxu0 %v9718_v11  ;;  %1986 = vmatpush2.bf16.msra.mxu1 %v9719_v12 }
 0x33f   :  { %1946 = vmatprep.subr.bf16.mxu0 %v9720_v14  ;;  %1987 = vmatprep.subr.bf16.mxu1 %v9721_v15 }
 0x342   :  { %1947 = vmatpush2.bf16.msra.mxu0 %v9722_v16  ;;  %1988 = vmatpush2.bf16.msra.mxu1 %v9723_v13 }
 0x343   :  { %1948 = vmatprep.subr.bf16.mxu0 %v9724_v18  ;;  %1989 = vmatprep.subr.bf16.mxu1 %v9725_v19 }
 0x346   :  { %1949 = vmatpush2.bf16.msra.mxu0 %v9726_v20  ;;  %1990 = vmatpush2.bf16.msra.mxu1 %v9727_v21 }
 0x347   :  { %1950 = vmatprep.subr.bf16.mxu0 %v9728_v22  ;;  %1991 = vmatprep.subr.bf16.mxu1 %v9729_v23 }
 0x34a   :  { %1951 = vmatpush2.bf16.msra.mxu0 %v9730_v24  ;;  %1992 = vmatpush2.bf16.msra.mxu1 %v9731_v25 }
 0x34b   :  { %1952 = vmatprep.subr.bf16.mxu0 %v9732_v26  ;;  %1993 = vmatprep.subr.bf16.mxu1 %v9733_v27 }
 0x34e   :  { %1953 = vmatpush2.bf16.msra.mxu0 %v9734_v28  ;;  %1994 = vmatpush2.bf16.msra.mxu1 %v9735_v29 }
 0x34f   :  { %1954 = vmatprep.subr.bf16.mxu0 %v9736_v30  ;;  %1995 = vmatprep.subr.bf16.mxu1 %v9737_v31 }
 0x352   :  { %1955 = vmatpush2.bf16.msra.mxu0 %v9738_v32  ;;  %1996 = vmatpush2.bf16.msra.mxu1 %v9739_v33 }
 0x353   :  { %2058 = vmatprep.subr.bf16.mxu0 %v7690_v34  ;;  %2099 = vmatprep.subr.bf16.mxu1 %v7693_v35 }
 0x3d5   :  { %v1824_v57 = vpop.f32.mrf.mxu0  ;;  %v1865_v43 = vpop.f32.mrf.mxu1 }
 0x3d6   :  { %v1872_v53 = vadd.f32 %v1824_v57, %v1786_v42  ;;  %v1874_v56 = vadd.f32 %v1865_v43, %v1788_v0 }
 0x3d7   :  { %v1826_v54 = vpop.f32.mrf.mxu0  ;;  %v1867_v60 = vpop.f32.mrf.mxu1 }
 0x3d8   :  { %v5931_v45 = vmul.f32 -1.442695, %v1872_v53  ;;  %v1873_v55 = vadd.f32 %v1826_v54, %v1787_v5  ;;  %v5933_v49 = vmul.f32 -1.442695, %v1874_v56  ;;  %v1875_v9 = vadd.f32 %v1867_v60, %v1789_v8  ;;  %v7731_v8 = vld [vmem:[#allocation10 + $0xc4] ss:$16 sps:$4 sm:$0xff]  }
 0x3d9   :  { %v1828_v62 = vpop.f32.mrf.mxu0  ;;  %v1869_v51 = vpop.f32.mrf.mxu1 }
 0x3da   :  { %6597 = vpow2.f32 %v5931_v45  ;;  %v5932_v6 = vmul.f32 -1.442695, %v1873_v55  ;;  %v2563_v51 = vrot.slane %v7622_v48, 7  ;;  %v7800_v48 = vld [vmem:[#allocation10 + $0x28] ss:$16 sps:$4 sm:$0xff]  }
 0x3db   :  { %v1829_v17 = vpop.f32.mrf.mxu0  ;;  %v1870_v4 = vpop.f32.mrf.mxu1  ;;  %9751 = vst [vmem:[#allocation31_spill] sm:$0xff] %v7800_v48 }
 0x3dc   :  { %6599 = vpow2.f32 %v5932_v6  ;;  %v9746_v4 = vld [vmem:[#allocation58_spill] sm:$0xff] }
 0x3dd   :  { %6601 = vpow2.f32 %v5933_v49  ;;  %v2583_v52 = vsel %vm1193_vm0, %v9746_v4, %v2563_v51  ;;  %v7728_v49 = vld [vmem:[#allocation10 + $0xe8] ss:$16 sps:$4 sm:$0xff]   ;;  %v7797_v4 = vld [vmem:[#allocation10 + $0x20] ss:$16 sps:$4 sm:$0xff]  }
 0x3de   :  { %6603 = vtanh.f32 %v1875_v9  ;;  %v7734_v9 = vld [vmem:[#allocation10 + $0xcc] ss:$16 sps:$4 sm:$0xff]   ;;  %v7776_v51 = vld [vmem:[#allocation10 + $0x68] ss:$16 sps:$4 sm:$0xff]   ;;  %9750 = vst [vmem:[#allocation30_spill] sm:$0xff] %v7797_v4 }
 0x3e7   :  { %v6598_v37 = vpop.eup %6597 }
 0x3e8   :  { %v1885_v39 = vadd.f32 1.0, %v6598_v37  ;;  %v7737_v37 = vld [vmem:[#allocation10 + $0xc0] ss:$16 sps:$4 sm:$0xff]  }
 0x3e9   :  { %v6600_v41 = vpop.eup %6599 }
 0x3ea   :  { %6605 = vrcp.f32 %v1885_v39  ;;  %v1886_v42 = vadd.f32 1.0, %v6600_v41  ;;  %v6602_v57 = vpop.eup %6601  ;;  %v7740_v39 = vld [vmem:[#allocation10 + $0xc8] ss:$16 sps:$4 sm:$0xff]   ;;  %v7743_v41 = vld [vmem:[#allocation10 + $0xa4] ss:$16 sps:$4 sm:$0xff]  }
 0x3eb   :  { %v6604_v44 = vpop.eup %6603  ;;  %v1887_v54 = vadd.f32 1.0, %v6602_v57  ;;  %v7749_v57 = vld [vmem:[#allocation10 + $0xa0] ss:$16 sps:$4 sm:$0xff]  }
 0x3ec   :  { %6607 = vrcp.f32 %v1886_v42  ;;  %v7746_v42 = vld [vmem:[#allocation10 + $0xac] ss:$16 sps:$4 sm:$0xff]  }
 0x3ed   :  { %6609 = vrcp.f32 %v1887_v54  ;;  %v7764_v54 = vld [vmem:[#allocation10 + $0x88] ss:$16 sps:$4 sm:$0xff]  }
 0x3f7   :  { %v6606_v53 = vpop.eup %6605 }
 0x3f8   :  { %v1896_v43 = vmul.f32 %v6606_v53, %v6604_v44  ;;  %v7752_v44 = vld [vmem:[#allocation10 + $0xa8] ss:$16 sps:$4 sm:$0xff]   ;;  %v7755_v53 = vld [vmem:[#allocation10 + $0x84] ss:$16 sps:$4 sm:$0xff]  }
 0x3f9   :  { %v6608_v5 = vpop.eup %6607 }
 0x3fa   :  { %v1895_v45 = vmul.f32 %v6608_v5, %v7619_v63  ;;  %v6610_v60 = vpop.eup %6609  ;;  %v7761_v5 = vld [vmem:[#allocation10 + $0x80] ss:$16 sps:$4 sm:$0xff]  }
 0x3fc   :  { %v7709_v55 = vadd.f32 %v1896_v43, %v1895_v45  ;;  %v7758_v43 = vld [vmem:[#allocation10 + $0x8c] ss:$16 sps:$4 sm:$0xff]   ;;  %v7767_v45 = vld [vmem:[#allocation10 + $0x64] ss:$16 sps:$4 sm:$0xff]  }
 0x3fe   :  { %6611 = vtanh.f32 %v7709_v55 }
 0x40b   :  { %v6612_v62 = vpop.eup %6611 }
 0x40c   :  { %v7713_v6 = vmul.f32 %v6612_v62, %v6610_v60  ;;  %v7770_v60 = vld [vmem:[#allocation10 + $0x6c] ss:$16 sps:$4 sm:$0xff]   ;;  %v7773_v62 = vld [vmem:[#allocation10 + $0x60] ss:$16 sps:$4 sm:$0xff]  }
 0x40e   :  { %9745 = vst [vmem:[#allocation26_spill] sm:$0xff] %v7713_v6  ;;  %v1901_v46 = vmul.f32 %v7534_v59, %v7713_v6  ;;  %v2566_v17 = vrot.slane %v7713_v6, 6  ;;  %v1900_v63 = vmul.f32 %v7532_v47, %v7713_v6  ;;  %v7803_v6 = vld [vmem:[#allocation10 + $0x4] ss:$16 sps:$4 sm:$0xff]  }
 0x40f   :  { %9752 = vst [vmem:[#allocation32_spill] sm:$0xff] %v7803_v6 }
 0x410   :  { %v1903_v0 = vpack.c.bf16 %v1901_v46, %v1901_v46  ;;  %v1902_v56 = vpack.c.bf16 %v1900_v63, %v1900_v63  ;;  %v7723_v2 = vsel %vm2584_vm6, %v2583_v52, %v2566_v17  ;;  %v7779_v46 = vld [vmem:[#allocation10 + $0x44] ss:$16 sps:$4 sm:$0xff]   ;;  %v7782_v17 = vld [vmem:[#allocation10 + $0x4c] ss:$16 sps:$4 sm:$0xff]   ;;  %v7785_v63 = vld [vmem:[#allocation10 + $0x40] ss:$16 sps:$4 sm:$0xff]  }
 0x411   :  { %v7788_v52 = vld [vmem:[#allocation10 + $0x48] ss:$16 sps:$4 sm:$0xff]  }
 0x412   :  { %1956 = vmatprep.mubr.bf16.mxu0 %v1903_v0  ;;  %1997 = vmatprep.mubr.bf16.mxu1 %v1903_v0  ;;  %9747 = vst [vmem:[#allocation27_spill] sm:$0xff] %v7788_v52  ;;  %v7791_v0 = vld [vmem:[#allocation10 + $0x24] ss:$16 sps:$4 sm:$0xff]  }
 0x413   :  { %1957 = vmatmul.mubr.bf16.vlgmr.msra.gmra.mxu0 %v1902_v56  ;;  %1998 = vmatmul.mubr.bf16.vlgmr.msra.gmra.mxu1 %v1902_v56  ;;  %9748 = vst [vmem:[#allocation28_spill] sm:$0xff] %v7791_v0  ;;  %v7794_v56 = vld [vmem:[#allocation10 + $0x2c] ss:$16 sps:$4 sm:$0xff]  }
 0x414   :  { %2059 = vmatpush1.bf16.msra.mxu0 %v7725_v50  ;;  %2100 = vmatpush1.bf16.msra.mxu1 %v7728_v49  ;;  %9749 = vst [vmem:[#allocation29_spill] sm:$0xff] %v7794_v56 }
 0x415   :  { %2060 = vmatprep.subr.bf16.mxu0 %v7731_v8  ;;  %2101 = vmatprep.subr.bf16.mxu1 %v7734_v9 }
 0x418   :  { %2061 = vmatpush1.bf16.msra.mxu0 %v7737_v37  ;;  %2102 = vmatpush1.bf16.msra.mxu1 %v7740_v39 }
 0x419   :  { %2062 = vmatprep.subr.bf16.mxu0 %v7743_v41  ;;  %2103 = vmatprep.subr.bf16.mxu1 %v7746_v42 }
 0x41c   :  { %2063 = vmatpush1.bf16.msra.mxu0 %v7749_v57  ;;  %2104 = vmatpush1.bf16.msra.mxu1 %v7752_v44 }
 0x41d   :  { %2064 = vmatprep.subr.bf16.mxu0 %v7755_v53  ;;  %2105 = vmatprep.subr.bf16.mxu1 %v7758_v43 }
 0x420   :  { %2065 = vmatpush1.bf16.msra.mxu0 %v7761_v5  ;;  %2106 = vmatpush1.bf16.msra.mxu1 %v7764_v54 }
 0x421   :  { %2066 = vmatprep.subr.bf16.mxu0 %v7767_v45  ;;  %2107 = vmatprep.subr.bf16.mxu1 %v7770_v60 }
 0x424   :  { %2067 = vmatpush1.bf16.msra.mxu0 %v7773_v62  ;;  %2108 = vmatpush1.bf16.msra.mxu1 %v7776_v51 }
 0x425   :  { %2068 = vmatprep.subr.bf16.mxu0 %v7779_v46  ;;  %2109 = vmatprep.subr.bf16.mxu1 %v7782_v17 }
 0x428   :  { %2069 = vmatpush1.bf16.msra.mxu0 %v7785_v63  ;;  %2110 = vmatpush1.bf16.msra.mxu1 %v7788_v52  ;;  %v7806_v52 = vld [vmem:[#allocation10 + $0xc] ss:$16 sps:$4 sm:$0xff]  }
 0x429   :  { %2070 = vmatprep.subr.bf16.mxu0 %v7791_v0  ;;  %2111 = vmatprep.subr.bf16.mxu1 %v7794_v56  ;;  %9753 = vst [vmem:[#allocation33_spill] sm:$0xff] %v7806_v52  ;;  %v7809_v0 = vld [vmem:[#allocation10] ss:$16 sps:$4 sm:$0xff]   ;;  %v7812_v56 = vld [vmem:[#allocation10 + $0x8] ss:$16 sps:$4 sm:$0xff]  }
 0x42a   :  { %9754 = vst [vmem:[#allocation34_spill] sm:$0xff] %v7809_v0  ;;  %9755 = vst [vmem:[#allocation35_spill] sm:$0xff] %v7812_v56 }
 0x42c   :  { %2071 = vmatpush1.bf16.msra.mxu0 %v7797_v4  ;;  %2112 = vmatpush1.bf16.msra.mxu1 %v7800_v48  ;;  %v7815_v4 = vld [vmem:[#allocation10 + $0x1e4] ss:$16 sps:$4 sm:$0xff]   ;;  %v7818_v48 = vld [vmem:[#allocation10 + $0x1ec] ss:$16 sps:$4 sm:$0xff]  }
 0x42d   :  { %2072 = vmatprep.subr.bf16.mxu0 %v7803_v6  ;;  %2113 = vmatprep.subr.bf16.mxu1 %v7806_v52  ;;  %9756 = vst [vmem:[#allocation36_spill] sm:$0xff] %v7815_v4  ;;  %9757 = vst [vmem:[#allocation37_spill] sm:$0xff] %v7818_v48  ;;  %v7821_v6 = vld [vmem:[#allocation10 + $0x1e0] ss:$16 sps:$4 sm:$0xff]   ;;  %v7824_v52 = vld [vmem:[#allocation10 + $0x1e8] ss:$16 sps:$4 sm:$0xff]  }
 0x42e   :  { %9758 = vst [vmem:[#allocation38_spill] sm:$0xff] %v7821_v6 }
 0x430   :  { %2073 = vmatpush1.bf16.msra.mxu0 %v7809_v0  ;;  %2114 = vmatpush1.bf16.msra.mxu1 %v7812_v56  ;;  %v7827_v0 = vld [vmem:[#allocation10 + $0x1c4] ss:$16 sps:$4 sm:$0xff]   ;;  %v7830_v56 = vld [vmem:[#allocation10 + $0x1cc] ss:$16 sps:$4 sm:$0xff]  }
 0x431   :  { %2074 = vmatprep.subr.bf16.mxu0 %v7815_v4  ;;  %2115 = vmatprep.subr.bf16.mxu1 %v7818_v48  ;;  %v7833_v4 = vld [vmem:[#allocation10 + $0x1c0] ss:$16 sps:$4 sm:$0xff]   ;;  %v7836_v48 = vld [vmem:[#allocation10 + $0x1c8] ss:$16 sps:$4 sm:$0xff]  }
 0x432   :  { %9759 = vst [vmem:[#allocation39_spill] sm:$0xff] %v7833_v4  ;;  %9760 = vst [vmem:[#allocation40_spill] sm:$0xff] %v7836_v48 }
 0x434   :  { %2075 = vmatpush2.bf16.msra.mxu0 %v7821_v6  ;;  %2116 = vmatpush2.bf16.msra.mxu1 %v7824_v52  ;;  %v7839_v6 = vld [vmem:[#allocation10 + $0x1a4] ss:$16 sps:$4 sm:$0xff]  }
 0x435   :  { %2076 = vmatprep.subr.bf16.mxu0 %v7827_v0  ;;  %2117 = vmatprep.subr.bf16.mxu1 %v7830_v56  ;;  %9761 = vst [vmem:[#allocation41_spill] sm:$0xff] %v7839_v6 }
 0x438   :  { %2077 = vmatpush2.bf16.msra.mxu0 %v7833_v4  ;;  %2118 = vmatpush2.bf16.msra.mxu1 %v7836_v48 }
 0x439   :  { %2078 = vmatprep.subr.bf16.mxu0 %v7839_v6  ;;  %2119 = vmatprep.subr.bf16.mxu1 %v9717_v10  ;;  %v1912_v10 = vrot.slane %v9742_v36, 3 }
 0x43c   :  { %2079 = vmatpush2.bf16.msra.mxu0 %v9718_v11  ;;  %2120 = vmatpush2.bf16.msra.mxu1 %v9719_v12  ;;  %v1904_v11 = vrot.slane %v9743_v38, 3  ;;  %v1913_v12 = vrot.slane %v9744_v40, 3 }
 0x43d   :  { %2080 = vmatprep.subr.bf16.mxu0 %v9720_v14  ;;  %2121 = vmatprep.subr.bf16.mxu1 %v9721_v15 }
 0x43e   :  { %v1920_v14 = vsel %vm1193_vm0, %v1904_v11, %v1912_v10  ;;  %v1907_v10 = vrot.slane %v7524_v61, 3 }
 0x440   :  { %2081 = vmatpush2.bf16.msra.mxu0 %v9722_v16  ;;  %2122 = vmatpush2.bf16.msra.mxu1 %v9723_v13  ;;  %v1905_v13 = vrot.slane %v7499_v58, 3 }
 0x441   :  { %2082 = vmatprep.subr.bf16.mxu0 %v9724_v18  ;;  %2123 = vmatprep.subr.bf16.mxu1 %v9725_v19 }
 0x442   :  { %v1921_v19 = vsel %vm1193_vm0, %v1905_v13, %v1913_v12 }
 0x444   :  { %2083 = vmatpush2.bf16.msra.mxu0 %v9726_v20  ;;  %2124 = vmatpush2.bf16.msra.mxu1 %v9727_v21 }
 0x445   :  { %2084 = vmatprep.subr.bf16.mxu0 %v9728_v22  ;;  %2125 = vmatprep.subr.bf16.mxu1 %v9729_v23 }
 0x448   :  { %2085 = vmatpush2.bf16.msra.mxu0 %v9730_v24  ;;  %2126 = vmatpush2.bf16.msra.mxu1 %v9731_v25 }
 0x449   :  { %2086 = vmatprep.subr.bf16.mxu0 %v9732_v26  ;;  %2127 = vmatprep.subr.bf16.mxu1 %v9733_v27  ;;  %v1914_v27 = vrot.slane %v7507_v7, 3 }
 0x44c   :  { %2087 = vmatpush2.bf16.msra.mxu0 %v9734_v28  ;;  %2128 = vmatpush2.bf16.msra.mxu1 %v9735_v29 }
 0x44d   :  { %2088 = vmatprep.subr.bf16.mxu0 %v9736_v30  ;;  %2129 = vmatprep.subr.bf16.mxu1 %v9737_v31  ;;  %v1906_v30 = vrot.slane %v7515_v3, 3 }
 0x44f   :  { %v1922_v31 = vsel %vm1193_vm0, %v1906_v30, %v1914_v27 }
 0x450   :  { %2089 = vmatpush2.bf16.msra.mxu0 %v9738_v32  ;;  %2130 = vmatpush2.bf16.msra.mxu1 %v9739_v33  ;;  %v1915_v33 = vrot.slane %v7517_v1, 3 }
 0x451   :  { %2192 = vmatprep.subr.bf16.mxu0 %v7690_v34  ;;  %2233 = vmatprep.subr.bf16.mxu1 %v7693_v35 }
 0x452   :  { %v1923_v12 = vsel %vm1193_vm0, %v1907_v10, %v1915_v33 }
 0x4d3   :  { %v1958_v15 = vpop.f32.mrf.mxu0  ;;  %v1999_v16 = vpop.f32.mrf.mxu1 }
 0x4d4   :  { %v2006_v18 = vadd.f32 %v1958_v15, %v1920_v14  ;;  %v2008_v32 = vadd.f32 %v1999_v16, %v1922_v31 }
 0x4d5   :  { %v1960_v20 = vpop.f32.mrf.mxu0  ;;  %v2001_v21 = vpop.f32.mrf.mxu1 }
 0x4d6   :  { %v5934_v22 = vmul.f32 -1.442695, %v2006_v18  ;;  %v2007_v23 = vadd.f32 %v1960_v20, %v1921_v19  ;;  %v5936_v11 = vmul.f32 -1.442695, %v2008_v32  ;;  %v2009_v14 = vadd.f32 %v2001_v21, %v1923_v12  ;;  %v9765_v12 = vld [vmem:[#allocation29_spill] sm:$0xff] }
 0x4d7   :  { %v1962_v24 = vpop.f32.mrf.mxu0  ;;  %v2003_v25 = vpop.f32.mrf.mxu1 }
 0x4d8   :  { %6613 = vpow2.f32 %v5934_v22  ;;  %v5935_v26 = vmul.f32 -1.442695, %v2007_v23 }
 0x4d9   :  { %v1963_v28 = vpop.f32.mrf.mxu0  ;;  %v2004_v29 = vpop.f32.mrf.mxu1 }
 0x4da   :  { %6615 = vpow2.f32 %v5935_v26 }
 0x4db   :  { %6617 = vpow2.f32 %v5936_v11  ;;  %v9764_v11 = vld [vmem:[#allocation28_spill] sm:$0xff] }
 0x4dc   :  { %6619 = vtanh.f32 %v2009_v14  ;;  %v9766_v14 = vld [vmem:[#allocation30_spill] sm:$0xff] }
 0x4e5   :  { %v6614_v15 = vpop.eup %6613 }
 0x4e6   :  { %v2019_v13 = vadd.f32 1.0, %v6614_v15  ;;  %v9767_v15 = vld [vmem:[#allocation31_spill] sm:$0xff] }
 0x4e7   :  { %v6616_v18 = vpop.eup %6615 }
 0x4e8   :  { %6621 = vrcp.f32 %v2019_v13  ;;  %v2020_v19 = vadd.f32 1.0, %v6616_v18  ;;  %v6618_v20 = vpop.eup %6617  ;;  %v9768_v13 = vld [vmem:[#allocation32_spill] sm:$0xff]  ;;  %v9769_v18 = vld [vmem:[#allocation33_spill] sm:$0xff] }
 0x4e9   :  { %v6620_v22 = vpop.eup %6619  ;;  %v2021_v25 = vadd.f32 1.0, %v6618_v20  ;;  %v9771_v20 = vld [vmem:[#allocation35_spill] sm:$0xff] }
 0x4ea   :  { %6623 = vrcp.f32 %v2020_v19  ;;  %v9770_v19 = vld [vmem:[#allocation34_spill] sm:$0xff] }
 0x4eb   :  { %6625 = vrcp.f32 %v2021_v25  ;;  %v7938_v25 = vld [vmem:[#allocation10 + $0x1a0] ss:$16 sps:$4 sm:$0xff]  }
 0x4ec   :  { %9776 = vst [vmem:[#allocation44_spill] sm:$0xff] %v7938_v25 }
 0x4f5   :  { %v6622_v23 = vpop.eup %6621 }
 0x4f6   :  { %v2030_v16 = vmul.f32 %v6622_v23, %v6620_v22  ;;  %v9772_v22 = vld [vmem:[#allocation36_spill] sm:$0xff]  ;;  %v9773_v23 = vld [vmem:[#allocation37_spill] sm:$0xff] }
 0x4f7   :  { %v6624_v24 = vpop.eup %6623 }
 0x4f8   :  { %v2029_v26 = vmul.f32 %v6624_v24, %v7709_v55  ;;  %v6626_v21 = vpop.eup %6625  ;;  %v7935_v24 = vld [vmem:[#allocation10 + $0x1ac] ss:$16 sps:$4 sm:$0xff]  }
 0x4f9   :  { %9775 = vst [vmem:[#allocation43_spill] sm:$0xff] %v7935_v24 }
 0x4fa   :  { %v7880_v27 = vadd.f32 %v2030_v16, %v2029_v26  ;;  %v9774_v16 = vld [vmem:[#allocation38_spill] sm:$0xff] }
 0x4fb   :  { %v7941_v26 = vld [vmem:[#allocation10 + $0x1a8] ss:$16 sps:$4 sm:$0xff]  }
 0x4fc   :  { %6627 = vtanh.f32 %v7880_v27  ;;  %9777 = vst [vmem:[#allocation45_spill] sm:$0xff] %v7941_v26 }
 0x509   :  { %v6628_v28 = vpop.eup %6627 }
 0x50a   :  { %v7883_v29 = vmul.f32 %v6628_v28, %v6626_v21  ;;  %v7944_v21 = vld [vmem:[#allocation10 + $0x184] ss:$16 sps:$4 sm:$0xff]   ;;  %v7947_v28 = vld [vmem:[#allocation10 + $0x18c] ss:$16 sps:$4 sm:$0xff]  }
 0x50b   :  { %9778 = vst [vmem:[#allocation46_spill] sm:$0xff] %v7944_v21  ;;  %9779 = vst [vmem:[#allocation47_spill] sm:$0xff] %v7947_v28 }
 0x50c   :  { %9762 = vst [vmem:[#allocation42_spill] sm:$0xff] %v7883_v29  ;;  %v2035_v30 = vmul.f32 %v7534_v59, %v7883_v29  ;;  %v9457_v31 = vrot.slane %v7883_v29, 5  ;;  %v2034_v32 = vmul.f32 %v7532_v47, %v7883_v29  ;;  %v7965_v29 = vld [vmem:[#allocation10 + $0x168] ss:$16 sps:$4 sm:$0xff]  }
 0x50d   :  { %9785 = vst [vmem:[#allocation30_spill] sm:$0xff] %v7965_v29 }
 0x50e   :  { %v2037_v33 = vpack.c.bf16 %v2035_v30, %v2035_v30  ;;  %v2036_v55 = vpack.c.bf16 %v2034_v32, %v2034_v32  ;;  %v7894_v10 = vsel %vm2586_vm7, %v7723_v2, %v9457_v31  ;;  %v9763_v2 = vld [vmem:[#allocation27_spill] sm:$0xff]  ;;  %v7953_v32 = vld [vmem:[#allocation10 + $0x188] ss:$16 sps:$4 sm:$0xff]  }
 0x50f   :  { %v7950_v30 = vld [vmem:[#allocation10 + $0x180] ss:$16 sps:$4 sm:$0xff]   ;;  %9781 = vst [vmem:[#allocation49_spill] sm:$0xff] %v7953_v32 }
 0x510   :  { %2090 = vmatprep.mubr.bf16.mxu0 %v2037_v33  ;;  %2131 = vmatprep.mubr.bf16.mxu1 %v2037_v33  ;;  %9780 = vst [vmem:[#allocation48_spill] sm:$0xff] %v7950_v30  ;;  %v7956_v33 = vld [vmem:[#allocation10 + $0x164] ss:$16 sps:$4 sm:$0xff]   ;;  %v7962_v31 = vld [vmem:[#allocation10 + $0x160] ss:$16 sps:$4 sm:$0xff]  }
 0x511   :  { %2091 = vmatmul.mubr.bf16.vlgmr.msra.gmra.mxu0 %v2036_v55  ;;  %2132 = vmatmul.mubr.bf16.vlgmr.msra.gmra.mxu1 %v2036_v55  ;;  %9782 = vst [vmem:[#allocation27_spill] sm:$0xff] %v7956_v33  ;;  %v7959_v55 = vld [vmem:[#allocation10 + $0x16c] ss:$16 sps:$4 sm:$0xff]   ;;  %9784 = vst [vmem:[#allocation29_spill] sm:$0xff] %v7962_v31 }
 0x512   :  { %2193 = vmatpush1.bf16.msra.mxu0 %v7725_v50  ;;  %2234 = vmatpush1.bf16.msra.mxu1 %v7728_v49  ;;  %9783 = vst [vmem:[#allocation28_spill] sm:$0xff] %v7959_v55 }
 0x513   :  { %2194 = vmatprep.subr.bf16.mxu0 %v7731_v8  ;;  %2235 = vmatprep.subr.bf16.mxu1 %v7734_v9 }
 0x516   :  { %2195 = vmatpush1.bf16.msra.mxu0 %v7737_v37  ;;  %2236 = vmatpush1.bf16.msra.mxu1 %v7740_v39 }
 0x517   :  { %2196 = vmatprep.subr.bf16.mxu0 %v7743_v41  ;;  %2237 = vmatprep.subr.bf16.mxu1 %v7746_v42 }
 0x51a   :  { %2197 = vmatpush1.bf16.msra.mxu0 %v7749_v57  ;;  %2238 = vmatpush1.bf16.msra.mxu1 %v7752_v44 }
 0x51b   :  { %2198 = vmatprep.subr.bf16.mxu0 %v7755_v53  ;;  %2239 = vmatprep.subr.bf16.mxu1 %v7758_v43 }
 0x51e   :  { %2199 = vmatpush1.bf16.msra.mxu0 %v7761_v5  ;;  %2240 = vmatpush1.bf16.msra.mxu1 %v7764_v54 }
 0x51f   :  { %2200 = vmatprep.subr.bf16.mxu0 %v7767_v45  ;;  %2241 = vmatprep.subr.bf16.mxu1 %v7770_v60 }
 0x522   :  { %2201 = vmatpush1.bf16.msra.mxu0 %v7773_v62  ;;  %2242 = vmatpush1.bf16.msra.mxu1 %v7776_v51 }
 0x523   :  { %2202 = vmatprep.subr.bf16.mxu0 %v7779_v46  ;;  %2243 = vmatprep.subr.bf16.mxu1 %v7782_v17 }
 0x526   :  { %2203 = vmatpush1.bf16.msra.mxu0 %v7785_v63  ;;  %2244 = vmatpush1.bf16.msra.mxu1 %v9763_v2 }
 0x527   :  { %2204 = vmatprep.subr.bf16.mxu0 %v9764_v11  ;;  %2245 = vmatprep.subr.bf16.mxu1 %v9765_v12 }
 0x52a   :  { %2205 = vmatpush1.bf16.msra.mxu0 %v9766_v14  ;;  %2246 = vmatpush1.bf16.msra.mxu1 %v9767_v15 }
 0x52b   :  { %2206 = vmatprep.subr.bf16.mxu0 %v9768_v13  ;;  %2247 = vmatprep.subr.bf16.mxu1 %v9769_v18 }
 0x52e   :  { %2207 = vmatpush1.bf16.msra.mxu0 %v9770_v19  ;;  %2248 = vmatpush1.bf16.msra.mxu1 %v9771_v20 }
 0x52f   :  { %2208 = vmatprep.subr.bf16.mxu0 %v9772_v22  ;;  %2249 = vmatprep.subr.bf16.mxu1 %v9773_v23 }
 0x532   :  { %2209 = vmatpush2.bf16.msra.mxu0 %v9774_v16  ;;  %2250 = vmatpush2.bf16.msra.mxu1 %v7824_v52 }
 0x533   :  { %2210 = vmatprep.subr.bf16.mxu0 %v7827_v0  ;;  %2251 = vmatprep.subr.bf16.mxu1 %v7830_v56 }
 0x536   :  { %2211 = vmatpush2.bf16.msra.mxu0 %v7833_v4  ;;  %2252 = vmatpush2.bf16.msra.mxu1 %v7836_v48 }
 0x537   :  { %2212 = vmatprep.subr.bf16.mxu0 %v7839_v6  ;;  %2253 = vmatprep.subr.bf16.mxu1 %v7935_v24 }
 0x53a   :  { %2213 = vmatpush2.bf16.msra.mxu0 %v7938_v25  ;;  %2254 = vmatpush2.bf16.msra.mxu1 %v7941_v26 }
 0x53b   :  { %2214 = vmatprep.subr.bf16.mxu0 %v7944_v21  ;;  %2255 = vmatprep.subr.bf16.mxu1 %v7947_v28 }
 0x53e   :  { %2215 = vmatpush2.bf16.msra.mxu0 %v7950_v30  ;;  %2256 = vmatpush2.bf16.msra.mxu1 %v7953_v32  ;;  %v7968_v30 = vld [vmem:[#allocation10 + $0x144] ss:$16 sps:$4 sm:$0xff]   ;;  %v7971_v32 = vld [vmem:[#allocation10 + $0x14c] ss:$16 sps:$4 sm:$0xff]  }
 0x53f   :  { %2216 = vmatprep.subr.bf16.mxu0 %v7956_v33  ;;  %2257 = vmatprep.subr.bf16.mxu1 %v7959_v55  ;;  %9786 = vst [vmem:[#allocation31_spill] sm:$0xff] %v7968_v30  ;;  %9787 = vst [vmem:[#allocation32_spill] sm:$0xff] %v7971_v32  ;;  %v7974_v33 = vld [vmem:[#allocation10 + $0x140] ss:$16 sps:$4 sm:$0xff]   ;;  %v7977_v55 = vld [vmem:[#allocation10 + $0x148] ss:$16 sps:$4 sm:$0xff]  }
 0x540   :  { %9788 = vst [vmem:[#allocation33_spill] sm:$0xff] %v7974_v33  ;;  %9789 = vst [vmem:[#allocation34_spill] sm:$0xff] %v7977_v55 }
 0x542   :  { %2217 = vmatpush2.bf16.msra.mxu0 %v7962_v31  ;;  %2258 = vmatpush2.bf16.msra.mxu1 %v7965_v29  ;;  %v7980_v31 = vld [vmem:[#allocation10 + $0x124] ss:$16 sps:$4 sm:$0xff]   ;;  %v7983_v29 = vld [vmem:[#allocation10 + $0x12c] ss:$16 sps:$4 sm:$0xff]  }
 0x543   :  { %2218 = vmatprep.subr.bf16.mxu0 %v7968_v30  ;;  %2259 = vmatprep.subr.bf16.mxu1 %v7971_v32  ;;  %9790 = vst [vmem:[#allocation35_spill] sm:$0xff] %v7980_v31  ;;  %9791 = vst [vmem:[#allocation36_spill] sm:$0xff] %v7983_v29  ;;  %v7986_v30 = vld [vmem:[#allocation10 + $0x120] ss:$16 sps:$4 sm:$0xff]   ;;  %v7989_v32 = vld [vmem:[#allocation10 + $0x128] ss:$16 sps:$4 sm:$0xff]  }
 0x544   :  { %9792 = vst [vmem:[#allocation37_spill] sm:$0xff] %v7986_v30  ;;  %9793 = vst [vmem:[#allocation38_spill] sm:$0xff] %v7989_v32 }
 0x546   :  { %2219 = vmatpush2.bf16.msra.mxu0 %v7974_v33  ;;  %2260 = vmatpush2.bf16.msra.mxu1 %v7977_v55  ;;  %v7992_v33 = vld [vmem:[#allocation10 + $0x104] ss:$16 sps:$4 sm:$0xff]   ;;  %v7995_v55 = vld [vmem:[#allocation10 + $0x10c] ss:$16 sps:$4 sm:$0xff]  }
 0x547   :  { %2220 = vmatprep.subr.bf16.mxu0 %v7980_v31  ;;  %2261 = vmatprep.subr.bf16.mxu1 %v7983_v29  ;;  %9794 = vst [vmem:[#allocation59_spill] sm:$0xff] %v7992_v33  ;;  %9795 = vst [vmem:[#allocation60_spill] sm:$0xff] %v7995_v55  ;;  %v7998_v31 = vld [vmem:[#allocation10 + $0x100] ss:$16 sps:$4 sm:$0xff]   ;;  %v8001_v29 = vld [vmem:[#allocation10 + $0x108] ss:$16 sps:$4 sm:$0xff]  }
 0x548   :  { %9796 = vst [vmem:[#allocation61_spill] sm:$0xff] %v7998_v31  ;;  %9797 = vst [vmem:[#allocation62_spill] sm:$0xff] %v8001_v29 }
 0x54a   :  { %2221 = vmatpush2.bf16.msra.mxu0 %v7986_v30  ;;  %2262 = vmatpush2.bf16.msra.mxu1 %v7989_v32  ;;  %v2046_v32 = vrot.slane %v9742_v36, 2  ;;  %v2047_v30 = vrot.slane %v9744_v40, 2 }
 0x54b   :  { %2222 = vmatprep.subr.bf16.mxu0 %v7992_v33  ;;  %2263 = vmatprep.subr.bf16.mxu1 %v7995_v55  ;;  %v2038_v33 = vrot.slane %v9743_v38, 4  ;;  %v2048_v38 = vrot.slane %v7507_v7, 2 }
 0x54d   :  { %v2054_v55 = vsel %vm1193_vm0, %v2038_v33, %v2046_v32  ;;  %v2040_v32 = vrot.slane %v7515_v3, 4 }
 0x54e   :  { %2223 = vmatpush2.bf16.msra.mxu0 %v7998_v31  ;;  %2264 = vmatpush2.bf16.msra.mxu1 %v8001_v29  ;;  %v2039_v31 = vrot.slane %v7499_v58, 4 }
 0x54f   :  { %2318 = vmatprep.subr.bf16.mxu0 %v7690_v34  ;;  %2359 = vmatprep.subr.bf16.mxu1 %v7693_v35  ;;  %v2056_v33 = vsel %vm1193_vm0, %v2040_v32, %v2048_v38 }
 0x550   :  { %v2055_v25 = vsel %vm1193_vm0, %v2039_v31, %v2047_v30  ;;  %v2049_v31 = vrot.slane %v7517_v1, 2  ;;  %v2041_v30 = vrot.slane %v7524_v61, 4 }
 0x5d1   :  { %v2092_v28 = vpop.f32.mrf.mxu0  ;;  %v2133_v21 = vpop.f32.mrf.mxu1 }
 0x5d2   :  { %v2140_v26 = vadd.f32 %v2092_v28, %v2054_v55  ;;  %v2142_v28 = vadd.f32 %v2133_v21, %v2056_v33 }
 0x5d3   :  { %v2094_v29 = vpop.f32.mrf.mxu0  ;;  %v2135_v24 = vpop.f32.mrf.mxu1 }
 0x5d4   :  { %v5937_v34 = vmul.f32 -1.442695, %v2140_v26  ;;  %v2141_v6 = vadd.f32 %v2094_v29, %v2055_v25  ;;  %v5939_v26 = vmul.f32 -1.442695, %v2142_v28 }
 0x5d5   :  { %v2096_v35 = vpop.f32.mrf.mxu0  ;;  %v2137_v48 = vpop.f32.mrf.mxu1 }
 0x5d6   :  { %6629 = vpow2.f32 %v5937_v34  ;;  %v5938_v36 = vmul.f32 -1.442695, %v2141_v6  ;;  %v2057_v35 = vsel %vm1193_vm0, %v2041_v30, %v2049_v31 }
 0x5d7   :  { %v2097_v40 = vpop.f32.mrf.mxu0  ;;  %v2138_v4 = vpop.f32.mrf.mxu1  ;;  %v2143_v48 = vadd.f32 %v2135_v24, %v2057_v35 }
 0x5d8   :  { %6631 = vpow2.f32 %v5938_v36 }
 0x5d9   :  { %6633 = vpow2.f32 %v5939_v26 }
 0x5da   :  { %6635 = vtanh.f32 %v2143_v48 }
 0x5e3   :  { %v6630_v34 = vpop.eup %6629 }
 0x5e4   :  { %v2153_v6 = vadd.f32 1.0, %v6630_v34 }
 0x5e5   :  { %v6632_v29 = vpop.eup %6631 }
 0x5e6   :  { %6637 = vrcp.f32 %v2153_v6  ;;  %v2154_v36 = vadd.f32 1.0, %v6632_v29  ;;  %v6634_v40 = vpop.eup %6633  ;;  %v9800_v6 = vld [vmem:[#allocation40_spill] sm:$0xff]  ;;  %v9801_v29 = vld [vmem:[#allocation41_spill] sm:$0xff] }
 0x5e7   :  { %v6636_v4 = vpop.eup %6635  ;;  %v2155_v55 = vadd.f32 1.0, %v6634_v40  ;;  %v9803_v40 = vld [vmem:[#allocation44_spill] sm:$0xff] }
 0x5e8   :  { %6639 = vrcp.f32 %v2154_v36  ;;  %v9802_v36 = vld [vmem:[#allocation43_spill] sm:$0xff] }
 0x5e9   :  { %6641 = vrcp.f32 %v2155_v55  ;;  %v9808_v55 = vld [vmem:[#allocation49_spill] sm:$0xff] }
 0x5f3   :  { %v6638_v38 = vpop.eup %6637 }
 0x5f4   :  { %v2164_v25 = vmul.f32 %v6638_v38, %v6636_v4  ;;  %v9804_v4 = vld [vmem:[#allocation45_spill] sm:$0xff]  ;;  %v9805_v38 = vld [vmem:[#allocation46_spill] sm:$0xff] }
 0x5f5   :  { %v6640_v21 = vpop.eup %6639 }
 0x5f6   :  { %v2163_v32 = vmul.f32 %v6640_v21, %v7880_v27  ;;  %v6642_v24 = vpop.eup %6641  ;;  %v9807_v21 = vld [vmem:[#allocation48_spill] sm:$0xff] }
 0x5f8   :  { %v8019_v33 = vadd.f32 %v2164_v25, %v2163_v32  ;;  %v9806_v25 = vld [vmem:[#allocation47_spill] sm:$0xff] }
 0x5f9   :  { %v9809_v32 = vld [vmem:[#allocation27_spill] sm:$0xff] }
 0x5fa   :  { %6643 = vtanh.f32 %v8019_v33 }
 0x607   :  { %v6644_v28 = vpop.eup %6643 }
 0x608   :  { %v8022_v31 = vmul.f32 %v6644_v28, %v6642_v24  ;;  %v9810_v24 = vld [vmem:[#allocation28_spill] sm:$0xff]  ;;  %v9811_v28 = vld [vmem:[#allocation29_spill] sm:$0xff] }
 0x60a   :  { %9798 = vst [vmem:[#allocation63_spill] sm:$0xff] %v8022_v31  ;;  %v2169_v30 = vmul.f32 %v7534_v59, %v8022_v31  ;;  %v2168_v26 = vmul.f32 %v7532_v47, %v8022_v31  ;;  %v2572_v35 = vrot.slane %v8022_v31, 4  ;;  %v9817_v31 = vld [vmem:[#allocation35_spill] sm:$0xff] }
 0x60c   :  { %v2171_v48 = vpack.c.bf16 %v2169_v30, %v2169_v30  ;;  %v2170_v27 = vpack.c.bf16 %v2168_v26, %v2168_v26  ;;  %v8031_v34 = vsel %vm2588_vm8, %v7894_v10, %v2572_v35  ;;  %v9799_v10 = vld [vmem:[#allocation39_spill] sm:$0xff]  ;;  %v9812_v30 = vld [vmem:[#allocation30_spill] sm:$0xff]  ;;  %v9814_v35 = vld [vmem:[#allocation32_spill] sm:$0xff] }
 0x60d   :  { %v9813_v26 = vld [vmem:[#allocation31_spill] sm:$0xff] }
 0x60e   :  { %2224 = vmatprep.mubr.bf16.mxu0 %v2171_v48  ;;  %2265 = vmatprep.mubr.bf16.mxu1 %v2171_v48  ;;  %v9815_v48 = vld [vmem:[#allocation33_spill] sm:$0xff] }
 0x60f   :  { %2225 = vmatmul.mubr.bf16.vlgmr.msra.gmra.mxu0 %v2170_v27  ;;  %2266 = vmatmul.mubr.bf16.vlgmr.msra.gmra.mxu1 %v2170_v27  ;;  %v9816_v27 = vld [vmem:[#allocation34_spill] sm:$0xff] }
 0x610   :  { %2319 = vmatpush1.bf16.msra.mxu0 %v7725_v50  ;;  %2360 = vmatpush1.bf16.msra.mxu1 %v7728_v49 }
 0x611   :  { %2320 = vmatprep.subr.bf16.mxu0 %v7731_v8  ;;  %2361 = vmatprep.subr.bf16.mxu1 %v7734_v9 }
 0x614   :  { %2321 = vmatpush1.bf16.msra.mxu0 %v7737_v37  ;;  %2362 = vmatpush1.bf16.msra.mxu1 %v7740_v39 }
 0x615   :  { %2322 = vmatprep.subr.bf16.mxu0 %v7743_v41  ;;  %2363 = vmatprep.subr.bf16.mxu1 %v7746_v42 }
 0x618   :  { %2323 = vmatpush1.bf16.msra.mxu0 %v7749_v57  ;;  %2364 = vmatpush1.bf16.msra.mxu1 %v7752_v44 }
 0x619   :  { %2324 = vmatprep.subr.bf16.mxu0 %v7755_v53  ;;  %2365 = vmatprep.subr.bf16.mxu1 %v7758_v43 }
 0x61c   :  { %2325 = vmatpush1.bf16.msra.mxu0 %v7761_v5  ;;  %2366 = vmatpush1.bf16.msra.mxu1 %v7764_v54 }
 0x61d   :  { %2326 = vmatprep.subr.bf16.mxu0 %v7767_v45  ;;  %2367 = vmatprep.subr.bf16.mxu1 %v7770_v60 }
 0x620   :  { %2327 = vmatpush1.bf16.msra.mxu0 %v7773_v62  ;;  %2368 = vmatpush1.bf16.msra.mxu1 %v7776_v51 }
 0x621   :  { %2328 = vmatprep.subr.bf16.mxu0 %v7779_v46  ;;  %2369 = vmatprep.subr.bf16.mxu1 %v7782_v17 }
 0x624   :  { %2329 = vmatpush1.bf16.msra.mxu0 %v7785_v63  ;;  %2370 = vmatpush1.bf16.msra.mxu1 %v9763_v2 }
 0x625   :  { %2330 = vmatprep.subr.bf16.mxu0 %v9764_v11  ;;  %2371 = vmatprep.subr.bf16.mxu1 %v9765_v12 }
 0x628   :  { %2331 = vmatpush1.bf16.msra.mxu0 %v9766_v14  ;;  %2372 = vmatpush1.bf16.msra.mxu1 %v9767_v15 }
 0x629   :  { %2332 = vmatprep.subr.bf16.mxu0 %v9768_v13  ;;  %2373 = vmatprep.subr.bf16.mxu1 %v9769_v18 }
 0x62c   :  { %2333 = vmatpush1.bf16.msra.mxu0 %v9770_v19  ;;  %2374 = vmatpush1.bf16.msra.mxu1 %v9771_v20 }
 0x62d   :  { %2334 = vmatprep.subr.bf16.mxu0 %v9772_v22  ;;  %2375 = vmatprep.subr.bf16.mxu1 %v9773_v23 }
 0x630   :  { %2335 = vmatpush2.bf16.msra.mxu0 %v9774_v16  ;;  %2376 = vmatpush2.bf16.msra.mxu1 %v7824_v52 }
 0x631   :  { %2336 = vmatprep.subr.bf16.mxu0 %v7827_v0  ;;  %2377 = vmatprep.subr.bf16.mxu1 %v7830_v56 }
 0x634   :  { %2337 = vmatpush2.bf16.msra.mxu0 %v9799_v10  ;;  %2378 = vmatpush2.bf16.msra.mxu1 %v9800_v6 }
 0x635   :  { %2338 = vmatprep.subr.bf16.mxu0 %v9801_v29  ;;  %2379 = vmatprep.subr.bf16.mxu1 %v9802_v36 }
 0x638   :  { %2339 = vmatpush2.bf16.msra.mxu0 %v9803_v40  ;;  %2380 = vmatpush2.bf16.msra.mxu1 %v9804_v4 }
 0x639   :  { %2340 = vmatprep.subr.bf16.mxu0 %v9805_v38  ;;  %2381 = vmatprep.subr.bf16.mxu1 %v9806_v25  ;;  %v9828_v25 = vld [vmem:[#allocation55_spill] sm:$0xff]  ;;  %v9829_v38 = vld [vmem:[#allocation54_spill] sm:$0xff] }
 0x63c   :  { %2341 = vmatpush2.bf16.msra.mxu0 %v9807_v21  ;;  %2382 = vmatpush2.bf16.msra.mxu1 %v9808_v55  ;;  %v9818_v21 = vld [vmem:[#allocation36_spill] sm:$0xff]  ;;  %v9819_v55 = vld [vmem:[#allocation37_spill] sm:$0xff] }
 0x63d   :  { %2342 = vmatprep.subr.bf16.mxu0 %v9809_v32  ;;  %2383 = vmatprep.subr.bf16.mxu1 %v9810_v24  ;;  %v9820_v32 = vld [vmem:[#allocation38_spill] sm:$0xff]  ;;  %v9821_v24 = vld [vmem:[#allocation59_spill] sm:$0xff] }
 0x640   :  { %2343 = vmatpush2.bf16.msra.mxu0 %v9811_v28  ;;  %2384 = vmatpush2.bf16.msra.mxu1 %v9812_v30  ;;  %v9822_v28 = vld [vmem:[#allocation60_spill] sm:$0xff]  ;;  %v9823_v30 = vld [vmem:[#allocation61_spill] sm:$0xff] }
 0x641   :  { %2344 = vmatprep.subr.bf16.mxu0 %v9813_v26  ;;  %2385 = vmatprep.subr.bf16.mxu1 %v9814_v35  ;;  %v9824_v26 = vld [vmem:[#allocation62_spill] sm:$0xff]  ;;  %v9825_v35 = vld [vmem:[#allocation24_spill] sm:$0xff] }
 0x644   :  { %2345 = vmatpush2.bf16.msra.mxu0 %v9815_v48  ;;  %2386 = vmatpush2.bf16.msra.mxu1 %v9816_v27  ;;  %v9826_v48 = vld [vmem:[#allocation25_spill] sm:$0xff] }
 0x645   :  { %2346 = vmatprep.subr.bf16.mxu0 %v9817_v31  ;;  %2387 = vmatprep.subr.bf16.mxu1 %v9818_v21  ;;  %v9827_v27 = vld [vmem:[#allocation53_spill] sm:$0xff]  ;;  %v2172_v21 = vrot.slane %v9828_v25, 5  ;;  %v2182_v25 = vrot.slane %v7507_v7, 1 }
 0x646   :  { %v2180_v31 = vrot.slane %v9827_v27, 1 }
 0x648   :  { %2347 = vmatpush2.bf16.msra.mxu0 %v9819_v55  ;;  %2388 = vmatpush2.bf16.msra.mxu1 %v9820_v32  ;;  %v2181_v55 = vrot.slane %v9829_v38, 1  ;;  %v2188_v32 = vsel %vm1193_vm0, %v2172_v21, %v2180_v31  ;;  %v2174_v31 = vrot.slane %v7515_v3, 5 }
 0x649   :  { %2348 = vmatprep.subr.bf16.mxu0 %v9821_v24  ;;  %2389 = vmatprep.subr.bf16.mxu1 %v9822_v28  ;;  %v2173_v28 = vrot.slane %v7499_v58, 5 }
 0x64a   :  { %v2190_v21 = vsel %vm1193_vm0, %v2174_v31, %v2182_v25 }
 0x64c   :  { %2349 = vmatpush2.bf16.msra.mxu0 %v9823_v30  ;;  %2390 = vmatpush2.bf16.msra.mxu1 %v9824_v26  ;;  %v2189_v30 = vsel %vm1193_vm0, %v2173_v28, %v2181_v55  ;;  %v2183_v55 = vrot.slane %v7517_v1, 1 }
 0x64d   :  { %2452 = vmatprep.subr.bf16.mxu0 %v9825_v35  ;;  %2493 = vmatprep.subr.bf16.mxu1 %v9826_v48 }
 0x6cf   :  { %v2226_v4 = vpop.f32.mrf.mxu0  ;;  %v2267_v24 = vpop.f32.mrf.mxu1 }
 0x6d0   :  { %v2274_v40 = vadd.f32 %v2226_v4, %v2188_v32  ;;  %v2276_v4 = vadd.f32 %v2267_v24, %v2190_v21  ;;  %v2175_v32 = vrot.slane %v7524_v61, 5 }
 0x6d1   :  { %v2228_v26 = vpop.f32.mrf.mxu0  ;;  %v2269_v36 = vpop.f32.mrf.mxu1 }
 0x6d2   :  { %v5940_v35 = vmul.f32 -1.442695, %v2274_v40  ;;  %v2275_v29 = vadd.f32 %v2228_v26, %v2189_v30  ;;  %v5942_v40 = vmul.f32 -1.442695, %v2276_v4  ;;  %v2191_v28 = vsel %vm1193_vm0, %v2175_v32, %v2183_v55 }
 0x6d3   :  { %v2230_v48 = vpop.f32.mrf.mxu0  ;;  %v2271_v6 = vpop.f32.mrf.mxu1 }
 0x6d4   :  { %6645 = vpow2.f32 %v5940_v35  ;;  %v5941_v27 = vmul.f32 -1.442695, %v2275_v29  ;;  %v2277_v6 = vadd.f32 %v2269_v36, %v2191_v28 }
 0x6d5   :  { %v2231_v38 = vpop.f32.mrf.mxu0  ;;  %v2272_v10 = vpop.f32.mrf.mxu1 }
 0x6d6   :  { %6647 = vpow2.f32 %v5941_v27 }
 0x6d7   :  { %6649 = vpow2.f32 %v5942_v40 }
 0x6d8   :  { %6651 = vtanh.f32 %v2277_v6 }
 0x6e1   :  { %v6646_v30 = vpop.eup %6645 }
 0x6e2   :  { %v2287_v29 = vadd.f32 1.0, %v6646_v30 }
 0x6e3   :  { %v6648_v26 = vpop.eup %6647 }
 0x6e4   :  { %6653 = vrcp.f32 %v2287_v29  ;;  %v2288_v10 = vadd.f32 1.0, %v6648_v26  ;;  %v6650_v38 = vpop.eup %6649 }
 0x6e5   :  { %v6652_v27 = vpop.eup %6651  ;;  %v2289_v48 = vadd.f32 1.0, %v6650_v38 }
 0x6e6   :  { %6655 = vrcp.f32 %v2288_v10 }
 0x6e7   :  { %6657 = vrcp.f32 %v2289_v48  ;;  %v2308_v48 = vrot.slane %v7515_v3, 6 }
 0x6f1   :  { %v6654_v25 = vpop.eup %6653 }
 0x6f2   :  { %v2298_v24 = vmul.f32 %v6654_v25, %v6652_v27 }
 0x6f3   :  { %v6656_v35 = vpop.eup %6655 }
 0x6f4   :  { %v2297_v31 = vmul.f32 %v6656_v35, %v8019_v33  ;;  %v6658_v36 = vpop.eup %6657 }
 0x6f6   :  { %v8110_v21 = vadd.f32 %v2298_v24, %v2297_v31  ;;  %v2316_v31 = vsel %vm1193_vm0, %v2308_v48, %v7507_v7  ;;  %v2648_v48 = vld [vmem:[#allocation8 + $0x508] sm:$0xff] }
 0x6f8   :  { %6659 = vtanh.f32 %v8110_v21 }
 0x705   :  { %v6660_v4 = vpop.eup %6659 }
 0x706   :  { %v8113_v55 = vmul.f32 %v6660_v4, %v6658_v36  ;;  %v2309_v4 = vrot.slane %v7524_v61, 6 }
 0x708   :  { %v2303_v32 = vmul.f32 %v7534_v59, %v8113_v55  ;;  %v2302_v40 = vmul.f32 %v7532_v47, %v8113_v55  ;;  %v2575_v28 = vrot.slane %v8113_v55, 3 }
 0x70a   :  { %v2305_v6 = vpack.c.bf16 %v2303_v32, %v2303_v32  ;;  %v2304_v33 = vpack.c.bf16 %v2302_v40, %v2302_v40  ;;  %v8122_v30 = vsel %vm2590_vm9, %v8031_v34, %v2575_v28  ;;  %v2317_v40 = vsel %vm1193_vm0, %v2309_v4, %v7517_v1 }
 0x70c   :  { %2350 = vmatprep.mubr.bf16.mxu0 %v2305_v6  ;;  %2391 = vmatprep.mubr.bf16.mxu1 %v2305_v6 }
 0x70d   :  { %2351 = vmatmul.mubr.bf16.vlgmr.msra.gmra.mxu0 %v2304_v33  ;;  %2392 = vmatmul.mubr.bf16.vlgmr.msra.gmra.mxu1 %v2304_v33 }
 0x70e   :  { %2453 = vmatpush1.bf16.msra.mxu0 %v7725_v50  ;;  %2494 = vmatpush1.bf16.msra.mxu1 %v7728_v49  ;;  %v9830_v50 = vld [vmem:[#allocation39_spill] sm:$0xff]  ;;  %v9831_v49 = vld [vmem:[#allocation40_spill] sm:$0xff] }
 0x70f   :  { %2454 = vmatprep.subr.bf16.mxu0 %v7731_v8  ;;  %2495 = vmatprep.subr.bf16.mxu1 %v7734_v9  ;;  %v9832_v8 = vld [vmem:[#allocation41_spill] sm:$0xff]  ;;  %v9833_v9 = vld [vmem:[#allocation43_spill] sm:$0xff] }
 0x712   :  { %2455 = vmatpush1.bf16.msra.mxu0 %v7737_v37  ;;  %2496 = vmatpush1.bf16.msra.mxu1 %v7740_v39  ;;  %v9834_v37 = vld [vmem:[#allocation44_spill] sm:$0xff]  ;;  %v9835_v39 = vld [vmem:[#allocation45_spill] sm:$0xff] }
 0x713   :  { %2456 = vmatprep.subr.bf16.mxu0 %v7743_v41  ;;  %2497 = vmatprep.subr.bf16.mxu1 %v7746_v42  ;;  %v9836_v41 = vld [vmem:[#allocation46_spill] sm:$0xff]  ;;  %v9837_v42 = vld [vmem:[#allocation47_spill] sm:$0xff] }
 0x716   :  { %2457 = vmatpush1.bf16.msra.mxu0 %v7749_v57  ;;  %2498 = vmatpush1.bf16.msra.mxu1 %v7752_v44  ;;  %v9838_v57 = vld [vmem:[#allocation48_spill] sm:$0xff]  ;;  %v9839_v44 = vld [vmem:[#allocation49_spill] sm:$0xff] }
 0x717   :  { %2458 = vmatprep.subr.bf16.mxu0 %v7755_v53  ;;  %2499 = vmatprep.subr.bf16.mxu1 %v7758_v43  ;;  %v9840_v53 = vld [vmem:[#allocation27_spill] sm:$0xff]  ;;  %v9841_v43 = vld [vmem:[#allocation28_spill] sm:$0xff] }
 0x71a   :  { %2459 = vmatpush1.bf16.msra.mxu0 %v7761_v5  ;;  %2500 = vmatpush1.bf16.msra.mxu1 %v7764_v54  ;;  %v9842_v5 = vld [vmem:[#allocation29_spill] sm:$0xff]  ;;  %v9843_v54 = vld [vmem:[#allocation30_spill] sm:$0xff] }
 0x71b   :  { %2460 = vmatprep.subr.bf16.mxu0 %v7767_v45  ;;  %2501 = vmatprep.subr.bf16.mxu1 %v7770_v60  ;;  %v9844_v45 = vld [vmem:[#allocation31_spill] sm:$0xff]  ;;  %v9845_v60 = vld [vmem:[#allocation32_spill] sm:$0xff] }
 0x71e   :  { %2461 = vmatpush1.bf16.msra.mxu0 %v7773_v62  ;;  %2502 = vmatpush1.bf16.msra.mxu1 %v7776_v51  ;;  %v9846_v62 = vld [vmem:[#allocation33_spill] sm:$0xff]  ;;  %v9847_v51 = vld [vmem:[#allocation34_spill] sm:$0xff] }
 0x71f   :  { %2462 = vmatprep.subr.bf16.mxu0 %v7779_v46  ;;  %2503 = vmatprep.subr.bf16.mxu1 %v7782_v17  ;;  %v9848_v46 = vld [vmem:[#allocation35_spill] sm:$0xff]  ;;  %v9849_v17 = vld [vmem:[#allocation36_spill] sm:$0xff] }
 0x722   :  { %2463 = vmatpush1.bf16.msra.mxu0 %v7785_v63  ;;  %2504 = vmatpush1.bf16.msra.mxu1 %v9763_v2  ;;  %v9850_v63 = vld [vmem:[#allocation37_spill] sm:$0xff] }
 0x723   :  { %2464 = vmatprep.subr.bf16.mxu0 %v9764_v11  ;;  %2505 = vmatprep.subr.bf16.mxu1 %v9765_v12  ;;  %v9854_v2 = vld [vmem:[#allocation61_spill] sm:$0xff]  ;;  %v9855_v11 = vld [vmem:[#allocation62_spill] sm:$0xff]  ;;  %v9856_v12 = vld [vmem:[#allocation55_spill] sm:$0xff] }
 0x726   :  { %2465 = vmatpush1.bf16.msra.mxu0 %v9766_v14  ;;  %2506 = vmatpush1.bf16.msra.mxu1 %v9767_v15  ;;  %v2306_v14 = vrot.slane %v9856_v12, 6  ;;  %v9857_v15 = vld [vmem:[#allocation53_spill] sm:$0xff] }
 0x727   :  { %2466 = vmatprep.subr.bf16.mxu0 %v9768_v13  ;;  %2507 = vmatprep.subr.bf16.mxu1 %v9769_v18 }
 0x728   :  { %v2314_v13 = vsel %vm1193_vm0, %v2306_v14, %v9857_v15  ;;  %v2664_v14 = vld [vmem:[#allocation8 + $0x588] sm:$0xff] }
 0x72a   :  { %2467 = vmatpush1.bf16.msra.mxu0 %v9770_v19  ;;  %2508 = vmatpush1.bf16.msra.mxu1 %v9771_v20  ;;  %v2307_v20 = vrot.slane %v7499_v58, 6 }
 0x72b   :  { %2468 = vmatprep.subr.bf16.mxu0 %v9772_v22  ;;  %2509 = vmatprep.subr.bf16.mxu1 %v9773_v23  ;;  %v9858_v23 = vld [vmem:[#allocation54_spill] sm:$0xff] }
 0x72e   :  { %2469 = vmatpush2.bf16.msra.mxu0 %v9774_v16  ;;  %2510 = vmatpush2.bf16.msra.mxu1 %v7824_v52  ;;  %v9851_v52 = vld [vmem:[#allocation38_spill] sm:$0xff]  ;;  %v2315_v16 = vsel %vm1193_vm0, %v2307_v20, %v9858_v23 }
 0x72f   :  { %2470 = vmatprep.subr.bf16.mxu0 %v7827_v0  ;;  %2511 = vmatprep.subr.bf16.mxu1 %v7830_v56  ;;  %v9852_v0 = vld [vmem:[#allocation59_spill] sm:$0xff]  ;;  %v9853_v56 = vld [vmem:[#allocation60_spill] sm:$0xff] }
 0x732   :  { %2471 = vmatpush2.bf16.msra.mxu0 %v9830_v50  ;;  %2512 = vmatpush2.bf16.msra.mxu1 %v9831_v49 }
 0x733   :  { %2472 = vmatprep.subr.bf16.mxu0 %v9832_v8  ;;  %2513 = vmatprep.subr.bf16.mxu1 %v9833_v9 }
 0x736   :  { %2473 = vmatpush2.bf16.msra.mxu0 %v9834_v37  ;;  %2514 = vmatpush2.bf16.msra.mxu1 %v9835_v39 }
 0x737   :  { %2474 = vmatprep.subr.bf16.mxu0 %v9836_v41  ;;  %2515 = vmatprep.subr.bf16.mxu1 %v9837_v42 }
 0x73a   :  { %2475 = vmatpush2.bf16.msra.mxu0 %v9838_v57  ;;  %2516 = vmatpush2.bf16.msra.mxu1 %v9839_v44 }
 0x73b   :  { %2476 = vmatprep.subr.bf16.mxu0 %v9840_v53  ;;  %2517 = vmatprep.subr.bf16.mxu1 %v9841_v43 }
 0x73e   :  { %2477 = vmatpush2.bf16.msra.mxu0 %v9842_v5  ;;  %2518 = vmatpush2.bf16.msra.mxu1 %v9843_v54 }
 0x73f   :  { %2478 = vmatprep.subr.bf16.mxu0 %v9844_v45  ;;  %2519 = vmatprep.subr.bf16.mxu1 %v9845_v60 }
 0x742   :  { %2479 = vmatpush2.bf16.msra.mxu0 %v9846_v62  ;;  %2520 = vmatpush2.bf16.msra.mxu1 %v9847_v51  ;;  %v2675_v51 = vld [vmem:[#allocation8 + $0x5e0] sm:$0xff] }
 0x743   :  { %2480 = vmatprep.subr.bf16.mxu0 %v9848_v46  ;;  %2521 = vmatprep.subr.bf16.mxu1 %v9849_v17  ;;  %v2672_v46 = vld [vmem:[#allocation8 + $0x5c8] sm:$0xff] }
 0x746   :  { %2481 = vmatpush2.bf16.msra.mxu0 %v9850_v63  ;;  %2522 = vmatpush2.bf16.msra.mxu1 %v9851_v52  ;;  %v2676_v63 = vld [vmem:[#allocation8 + $0x5e8] sm:$0xff] }
 0x747   :  { %2482 = vmatprep.subr.bf16.mxu0 %v9852_v0  ;;  %2523 = vmatprep.subr.bf16.mxu1 %v9853_v56  ;;  %v6007_v0 = vcombine.low %v2672_v46, %v2676_v63  ;;  %v6008_v56 = vcombine.high %v2672_v46, %v2676_v63  ;;  %v2628_v46 = vld [vmem:[#allocation8 + $0x468] sm:$0xff] }
 0x74a   :  { %2483 = vmatpush2.bf16.msra.mxu0 %v9854_v2  ;;  %2524 = vmatpush2.bf16.msra.mxu1 %v9855_v11  ;;  %v2663_v2 = vld [vmem:[#allocation8 + $0x580] sm:$0xff] }
 0x74b   :  { %3534 = vmatprep.subr.bf16.mxu1 %v6008_v56  ;;  %v2667_v11 = vld [vmem:[#allocation8 + $0x5a0] sm:$0xff] }
 0x74c   :  { %v2619_v56 = vld [vmem:[#allocation8 + $0x420] sm:$0xff] }
 0x7cd   :  { %v2352_v18 = vpop.f32.mrf.mxu0  ;;  %v2393_v19 = vpop.f32.mrf.mxu1 }
 0x7ce   :  { %v2400_v22 = vadd.f32 %v2352_v18, %v2314_v13  ;;  %v2402_v36 = vadd.f32 %v2393_v19, %v2316_v31  ;;  %v5998_v13 = vcombine.high %v2663_v2, %v2667_v11  ;;  %v2668_v18 = vld [vmem:[#allocation8 + $0x5a8] sm:$0xff]  ;;  %v5997_v19 = vcombine.low %v2663_v2, %v2667_v11 }
 0x7cf   :  { %v2354_v34 = vpop.f32.mrf.mxu0  ;;  %v2395_v29 = vpop.f32.mrf.mxu1  ;;  %v5999_v20 = vcombine.low %v2664_v14, %v2668_v18  ;;  %v2616_v2 = vld [vmem:[#allocation8 + $0x408] sm:$0xff] }
 0x7d0   :  { %v5943_v26 = vmul.f32 -1.442695, %v2400_v22  ;;  %v2401_v10 = vadd.f32 %v2354_v34, %v2315_v16  ;;  %v5945_v32 = vmul.f32 -1.442695, %v2402_v36  ;;  %v2403_v28 = vadd.f32 %v2395_v29, %v2317_v40  ;;  %v2655_v16 = vld [vmem:[#allocation8 + $0x540] sm:$0xff]  ;;  %v2656_v29 = vld [vmem:[#allocation8 + $0x548] sm:$0xff] }
 0x7d1   :  { %v2356_v38 = vpop.f32.mrf.mxu0  ;;  %v2397_v27 = vpop.f32.mrf.mxu1  ;;  %v6000_v22 = vcombine.high %v2664_v14, %v2668_v18  ;;  %v2659_v34 = vld [vmem:[#allocation8 + $0x560] sm:$0xff]  ;;  %v2652_v36 = vld [vmem:[#allocation8 + $0x528] sm:$0xff] }
 0x7d2   :  { %6661 = vpow2.f32 %v5943_v26  ;;  %v5944_v25 = vmul.f32 -1.442695, %v2401_v10  ;;  %v5990_v26 = vcombine.high %v2655_v16, %v2659_v34  ;;  %v2660_v10 = vld [vmem:[#allocation8 + $0x568] sm:$0xff]  ;;  %v5989_v38 = vcombine.low %v2655_v16, %v2659_v34  ;;  %v2735_v18 = vld [vmem:[#allocation8 + $0x7c0] sm:$0xff] }
 0x7d3   :  { %v2357_v24 = vpop.f32.mrf.mxu0  ;;  %v2398_v35 = vpop.f32.mrf.mxu1  ;;  %v5991_v27 = vcombine.low %v2656_v29, %v2660_v10  ;;  %v5984_v40 = vcombine.high %v2648_v48, %v2652_v36  ;;  %v2736_v34 = vld [vmem:[#allocation8 + $0x7c8] sm:$0xff] }
 0x7d4   :  { %6663 = vpow2.f32 %v5944_v25  ;;  %v5992_v25 = vcombine.high %v2656_v29, %v2660_v10  ;;  %v2647_v24 = vld [vmem:[#allocation8 + $0x500] sm:$0xff]  ;;  %v2740_v29 = vld [vmem:[#allocation8 + $0x7e8] sm:$0xff] }
 0x7d5   :  { %6665 = vpow2.f32 %v5945_v32  ;;  %v2651_v35 = vld [vmem:[#allocation8 + $0x520] sm:$0xff]  ;;  %v5983_v32 = vcombine.low %v2648_v48, %v2652_v36 }
 0x7d6   :  { %6667 = vtanh.f32 %v2403_v28  ;;  %v5982_v31 = vcombine.high %v2647_v24, %v2651_v35  ;;  %v5981_v4 = vcombine.low %v2647_v24, %v2651_v35  ;;  %v2639_v28 = vld [vmem:[#allocation8 + $0x4c0] sm:$0xff]  ;;  %v6071_v35 = vcombine.low %v2736_v34, %v2740_v29 }
 0x7d7   :  { %v2727_v10 = vld [vmem:[#allocation8 + $0x780] sm:$0xff] }
 0x7d8   :  { %v2719_v36 = vld [vmem:[#allocation8 + $0x740] sm:$0xff] }
 0x7df   :  { %v6662_v6 = vpop.eup %6661 }
 0x7e0   :  { %v2413_v33 = vadd.f32 1.0, %v6662_v6  ;;  %v2643_v6 = vld [vmem:[#allocation8 + $0x4e0] sm:$0xff] }
 0x7e1   :  { %v6664_v50 = vpop.eup %6663 }
 0x7e2   :  { %6669 = vrcp.f32 %v2413_v33  ;;  %v2414_v49 = vadd.f32 1.0, %v6664_v50  ;;  %v6666_v8 = vpop.eup %6665  ;;  %v2640_v33 = vld [vmem:[#allocation8 + $0x4c8] sm:$0xff]  ;;  %v5974_v50 = vcombine.high %v2639_v28, %v2643_v6 }
 0x7e3   :  { %v6668_v9 = vpop.eup %6667  ;;  %v2415_v42 = vadd.f32 1.0, %v6666_v8  ;;  %v5973_v8 = vcombine.low %v2639_v28, %v2643_v6 }
 0x7e4   :  { %6671 = vrcp.f32 %v2414_v49  ;;  %v2644_v49 = vld [vmem:[#allocation8 + $0x4e8] sm:$0xff] }
 0x7e5   :  { %6673 = vrcp.f32 %v2415_v42  ;;  %v2632_v42 = vld [vmem:[#allocation8 + $0x488] sm:$0xff] }
 0x7ef   :  { %v6670_v37 = vpop.eup %6669 }
 0x7f0   :  { %v2424_v39 = vmul.f32 %v6670_v37, %v6668_v9  ;;  %v5975_v9 = vcombine.low %v2640_v33, %v2644_v49  ;;  %v5976_v37 = vcombine.high %v2640_v33, %v2644_v49  ;;  %v2711_v49 = vld [vmem:[#allocation8 + $0x700] sm:$0xff] }
 0x7f1   :  { %v6672_v41 = vpop.eup %6671 }
 0x7f2   :  { %v2423_v57 = vmul.f32 %v6672_v41, %v8110_v21  ;;  %v6674_v53 = vpop.eup %6673  ;;  %v2671_v21 = vld [vmem:[#allocation8 + $0x5c0] sm:$0xff] }
 0x7f3   :  { %v6006_v17 = vcombine.high %v2671_v21, %v2675_v51  ;;  %v6005_v52 = vcombine.low %v2671_v21, %v2675_v51  ;;  %v2635_v41 = vld [vmem:[#allocation8 + $0x4a0] sm:$0xff]  ;;  %v2624_v21 = vld [vmem:[#allocation8 + $0x448] sm:$0xff] }
 0x7f4   :  { %v8199_v44 = vadd.f32 %v2424_v39, %v2423_v57  ;;  %v2631_v39 = vld [vmem:[#allocation8 + $0x480] sm:$0xff]  ;;  %v5959_v63 = vcombine.low %v2624_v21, %v2628_v46 }
 0x7f5   :  { %3493 = vmatprep.subr.bf16.mxu0 %v6006_v17  ;;  %v5966_v57 = vcombine.high %v2631_v39, %v2635_v41 }
 0x7f6   :  { %6675 = vtanh.f32 %v8199_v44 }
 0x803   :  { %v6676_v43 = vpop.eup %6675 }
 0x804   :  { %v8202_v5 = vmul.f32 %v6676_v43, %v6674_v53  ;;  %v2636_v53 = vld [vmem:[#allocation8 + $0x4a8] sm:$0xff]  ;;  %v5965_v43 = vcombine.low %v2631_v39, %v2635_v41 }
 0x806   :  { %v2429_v54 = vmul.f32 %v7534_v59, %v8202_v5  ;;  %v2428_v45 = vmul.f32 %v7532_v47, %v8202_v5  ;;  %v8450_v47 = vld [vmem:[#allocation10 + $0x30c] ss:$16 sps:$4 sm:$0xff]   ;;  %v8454_v59 = vld [vmem:[#allocation10 + $0x300] ss:$16 sps:$4 sm:$0xff]  }
 0x807   :  { %9890 = vst [vmem:[#allocation59_spill] sm:$0xff] %v8450_v47  ;;  %9891 = vst [vmem:[#allocation60_spill] sm:$0xff] %v8454_v59 }
 0x808   :  { %v2431_v60 = vpack.c.bf16 %v2429_v54, %v2429_v54  ;;  %v2430_v62 = vpack.c.bf16 %v2428_v45, %v2428_v45  ;;  %v5967_v54 = vcombine.low %v2632_v42, %v2636_v53  ;;  %v5968_v45 = vcombine.high %v2632_v42, %v2636_v53  ;;  %v2703_v53 = vld [vmem:[#allocation8 + $0x6c0] sm:$0xff] }
 0x80a   :  { %2484 = vmatprep.mubr.bf16.mxu0 %v2431_v60  ;;  %2525 = vmatprep.mubr.bf16.mxu1 %v2431_v60  ;;  %v2623_v60 = vld [vmem:[#allocation8 + $0x440] sm:$0xff] }
 0x80b   :  { %2485 = vmatmul.mubr.bf16.vlgmr.msra.gmra.mxu0 %v2430_v62  ;;  %2526 = vmatmul.mubr.bf16.vlgmr.msra.gmra.mxu1 %v2430_v62  ;;  %v2627_v62 = vld [vmem:[#allocation8 + $0x460] sm:$0xff] }
 0x80c   :  { %3494 = vmatpush1.bf16.msra.mxu0 %v6005_v52  ;;  %3535 = vmatpush1.bf16.msra.mxu1 %v6007_v0  ;;  %v5958_v51 = vcombine.high %v2623_v60, %v2627_v62  ;;  %v5957_v17 = vcombine.low %v2623_v60, %v2627_v62  ;;  %v5960_v52 = vcombine.high %v2624_v21, %v2628_v46  ;;  %v2615_v0 = vld [vmem:[#allocation8 + $0x400] sm:$0xff] }
 0x80d   :  { %3495 = vmatprep.subr.bf16.mxu0 %v5998_v13  ;;  %3536 = vmatprep.subr.bf16.mxu1 %v6000_v22  ;;  %v5949_v11 = vcombine.low %v2615_v0, %v2619_v56  ;;  %v5950_v14 = vcombine.high %v2615_v0, %v2619_v56  ;;  %v2620_v13 = vld [vmem:[#allocation8 + $0x428] sm:$0xff]  ;;  %v2695_v46 = vld [vmem:[#allocation8 + $0x680] sm:$0xff] }
 0x80e   :  { %v5952_v22 = vcombine.high %v2616_v2, %v2620_v13 }
 0x810   :  { %3496 = vmatpush1.bf16.msra.mxu0 %v5997_v19  ;;  %3537 = vmatpush1.bf16.msra.mxu1 %v5999_v20  ;;  %v2739_v19 = vld [vmem:[#allocation8 + $0x7e0] sm:$0xff]  ;;  %v5951_v20 = vcombine.low %v2616_v2, %v2620_v13 }
 0x811   :  { %3497 = vmatprep.subr.bf16.mxu0 %v5990_v26  ;;  %3538 = vmatprep.subr.bf16.mxu1 %v5992_v25  ;;  %v6070_v16 = vcombine.high %v2735_v18, %v2739_v19  ;;  %v6072_v26 = vcombine.high %v2736_v34, %v2740_v29  ;;  %v2732_v25 = vld [vmem:[#allocation8 + $0x7a8] sm:$0xff]  ;;  %v6069_v24 = vcombine.low %v2735_v18, %v2739_v19  ;;  %v2691_v13 = vld [vmem:[#allocation8 + $0x660] sm:$0xff] }
 0x812   :  { %v2688_v18 = vld [vmem:[#allocation8 + $0x648] sm:$0xff]  ;;  %v2679_v34 = vld [vmem:[#allocation8 + $0x600] sm:$0xff] }
 0x813   :  { %v2692_v19 = vld [vmem:[#allocation8 + $0x668] sm:$0xff]  ;;  %v2683_v29 = vld [vmem:[#allocation8 + $0x620] sm:$0xff] }
 0x814   :  { %3498 = vmatpush1.bf16.msra.mxu0 %v5989_v38  ;;  %3539 = vmatpush1.bf16.msra.mxu1 %v5991_v27  ;;  %v2731_v38 = vld [vmem:[#allocation8 + $0x7a0] sm:$0xff]  ;;  %v2728_v27 = vld [vmem:[#allocation8 + $0x788] sm:$0xff] }
 0x815   :  { %3499 = vmatprep.subr.bf16.mxu0 %v5982_v31  ;;  %3540 = vmatprep.subr.bf16.mxu1 %v5984_v40  ;;  %v6062_v48 = vcombine.high %v2727_v10, %v2731_v38  ;;  %v6064_v31 = vcombine.high %v2728_v27, %v2732_v25  ;;  %v2724_v40 = vld [vmem:[#allocation8 + $0x768] sm:$0xff]  ;;  %v6061_v28 = vcombine.low %v2727_v10, %v2731_v38  ;;  %v8208_v10 = vld [vmem:[#allocation8 + $0x5d0] sm:$0xff] }
 0x816   :  { %v6063_v6 = vcombine.low %v2728_v27, %v2732_v25  ;;  %v8210_v38 = vld [vmem:[#allocation8 + $0x5f0] sm:$0xff]  ;;  %v8212_v27 = vld [vmem:[#allocation8 + $0x5d8] sm:$0xff]  ;;  %v2680_v25 = vld [vmem:[#allocation8 + $0x608] sm:$0xff] }
 0x818   :  { %3500 = vmatpush1.bf16.msra.mxu0 %v5981_v4  ;;  %3541 = vmatpush1.bf16.msra.mxu1 %v5983_v32  ;;  %v2723_v4 = vld [vmem:[#allocation8 + $0x760] sm:$0xff]  ;;  %v2720_v32 = vld [vmem:[#allocation8 + $0x748] sm:$0xff] }
 0x819   :  { %3501 = vmatprep.subr.bf16.mxu0 %v5974_v50  ;;  %3542 = vmatprep.subr.bf16.mxu1 %v5976_v37  ;;  %v6054_v33 = vcombine.high %v2719_v36, %v2723_v4  ;;  %v6056_v50 = vcombine.high %v2720_v32, %v2724_v40  ;;  %v2716_v37 = vld [vmem:[#allocation8 + $0x728] sm:$0xff]  ;;  %v6053_v39 = vcombine.low %v2719_v36, %v2723_v4 }
 0x81a   :  { %v6055_v41 = vcombine.low %v2720_v32, %v2724_v40  ;;  %v6023_v4 = vcombine.low %v2688_v18, %v2692_v19  ;;  %v6014_v32 = vcombine.high %v2679_v34, %v2683_v29 }
 0x81c   :  { %3502 = vmatpush1.bf16.msra.mxu0 %v5973_v8  ;;  %3543 = vmatpush1.bf16.msra.mxu1 %v5975_v9  ;;  %v2715_v8 = vld [vmem:[#allocation8 + $0x720] sm:$0xff]  ;;  %v2712_v9 = vld [vmem:[#allocation8 + $0x708] sm:$0xff] }
 0x81d   :  { %3503 = vmatprep.subr.bf16.mxu0 %v5966_v57  ;;  %3544 = vmatprep.subr.bf16.mxu1 %v5968_v45  ;;  %v6046_v42 = vcombine.high %v2711_v49, %v2715_v8  ;;  %v6048_v57 = vcombine.high %v2712_v9, %v2716_v37  ;;  %v2708_v45 = vld [vmem:[#allocation8 + $0x6e8] sm:$0xff]  ;;  %v6045_v60 = vcombine.low %v2711_v49, %v2715_v8  ;;  %v2440_v49 = vrot.slane %v9857_v15, 7 }
 0x81e   :  { %v6047_v62 = vcombine.low %v2712_v9, %v2716_v37  ;;  %v2432_v8 = vrot.slane %v9856_v12, 7  ;;  %v2441_v9 = vrot.slane %v9858_v23, 7  ;;  %v2442_v12 = vrot.slane %v7507_v7, 7 }
 0x820   :  { %3504 = vmatpush1.bf16.msra.mxu0 %v5965_v43  ;;  %3545 = vmatpush1.bf16.msra.mxu1 %v5967_v54  ;;  %v2707_v43 = vld [vmem:[#allocation8 + $0x6e0] sm:$0xff]  ;;  %v2704_v54 = vld [vmem:[#allocation8 + $0x6c8] sm:$0xff]  ;;  %v2448_v37 = vsel %vm1193_vm0, %v2432_v8, %v2440_v49 }
 0x821   :  { %3505 = vmatprep.subr.bf16.mxu0 %v5958_v51  ;;  %3546 = vmatprep.subr.bf16.mxu1 %v5960_v52  ;;  %v6038_v21 = vcombine.high %v2703_v53, %v2707_v43  ;;  %v6040_v51 = vcombine.high %v2704_v54, %v2708_v45  ;;  %v2700_v52 = vld [vmem:[#allocation8 + $0x6a8] sm:$0xff]  ;;  %v6037_v0 = vcombine.low %v2703_v53, %v2707_v43  ;;  %v9861_v8 = vld [vmem:[#allocation23_spill] sm:$0xff] }
 0x822   :  { %v6039_v56 = vcombine.low %v2704_v54, %v2708_v45 }
 0x824   :  { %3506 = vmatpush1.bf16.msra.mxu0 %v5957_v17  ;;  %3547 = vmatpush1.bf16.msra.mxu1 %v5959_v63  ;;  %v2699_v17 = vld [vmem:[#allocation8 + $0x6a0] sm:$0xff]  ;;  %v2696_v63 = vld [vmem:[#allocation8 + $0x688] sm:$0xff] }
 0x825   :  { %3507 = vmatprep.subr.bf16.mxu0 %v5950_v14  ;;  %3548 = vmatprep.subr.bf16.mxu1 %v5952_v22  ;;  %v6030_v2 = vcombine.high %v2695_v46, %v2699_v17  ;;  %v2687_v14 = vld [vmem:[#allocation8 + $0x640] sm:$0xff]  ;;  %v6031_v22 = vcombine.low %v2696_v63, %v2700_v52 }
 0x828   :  { %3508 = vmatpush1.bf16.msra.mxu0 %v5949_v11  ;;  %3549 = vmatpush1.bf16.msra.mxu1 %v5951_v20  ;;  %v6032_v11 = vcombine.high %v2696_v63, %v2700_v52  ;;  %v6029_v20 = vcombine.low %v2695_v46, %v2699_v17  ;;  %v2434_v46 = vrot.slane %v7515_v3, 7  ;;  %v2443_v63 = vrot.slane %v7517_v1, 7 }
 0x829   :  { %3509 = vmatprep.subr.bf16.mxu0 %v6070_v16  ;;  %3550 = vmatprep.subr.bf16.mxu1 %v6072_v26  ;;  %v6022_v16 = vcombine.high %v2687_v14, %v2691_v13  ;;  %v6024_v26 = vcombine.high %v2688_v18, %v2692_v19  ;;  %v2435_v52 = vrot.slane %v7524_v61, 7 }
 0x82c   :  { %3510 = vmatpush2.bf16.msra.mxu0 %v6069_v24  ;;  %3551 = vmatpush2.bf16.msra.mxu1 %v6071_v35  ;;  %v2684_v24 = vld [vmem:[#allocation8 + $0x628] sm:$0xff]  ;;  %v6009_v35 = vcombine.low %v8208_v10, %v8210_v38 }
 0x82d   :  { %3511 = vmatprep.subr.bf16.mxu0 %v6062_v48  ;;  %3552 = vmatprep.subr.bf16.mxu1 %v6064_v31  ;;  %v8216_v48 = vld [vmem:[#allocation8 + $0x5f8] sm:$0xff]  ;;  %v6021_v31 = vcombine.low %v2687_v14, %v2691_v13  ;;  %v6016_v40 = vcombine.high %v2680_v25, %v2684_v24 }
 0x82e   :  { %v6011_v36 = vcombine.low %v8212_v27, %v8216_v48 }
 0x830   :  { %3512 = vmatpush2.bf16.msra.mxu0 %v6061_v28  ;;  %3553 = vmatpush2.bf16.msra.mxu1 %v6063_v6  ;;  %v6013_v28 = vcombine.low %v2679_v34, %v2683_v29  ;;  %v6015_v6 = vcombine.low %v2680_v25, %v2684_v24 }
 0x831   :  { %3513 = vmatprep.subr.bf16.mxu0 %v6054_v33  ;;  %3554 = vmatprep.subr.bf16.mxu1 %v6056_v50  ;;  %v6010_v33 = vcombine.high %v8208_v10, %v8210_v38  ;;  %v6012_v50 = vcombine.high %v8212_v27, %v8216_v48  ;;  %v2641_v48 = vld [vmem:[#allocation8 + $0x4d0] sm:$0xff] }
 0x834   :  { %3514 = vmatpush2.bf16.msra.mxu0 %v6053_v39  ;;  %3555 = vmatpush2.bf16.msra.mxu1 %v6055_v41 }
 0x835   :  { %3515 = vmatprep.subr.bf16.mxu0 %v6046_v42  ;;  %3556 = vmatprep.subr.bf16.mxu1 %v6048_v57  ;;  %v2433_v42 = vrot.slane %v7499_v58, 7  ;;  %v2450_v58 = vsel %vm1193_vm0, %v2434_v46, %v2442_v12  ;;  %v2662_v46 = vld [vmem:[#allocation8 + $0x578] sm:$0xff] }
 0x837   :  { %v2449_v53 = vsel %vm1193_vm0, %v2433_v42, %v2441_v9  ;;  %v2602_v9 = vrot.slane %v9861_v8, 3 }
 0x838   :  { %3516 = vmatpush2.bf16.msra.mxu0 %v6045_v60  ;;  %3557 = vmatpush2.bf16.msra.mxu1 %v6047_v62 }
 0x839   :  { %3517 = vmatprep.subr.bf16.mxu0 %v6038_v21  ;;  %3558 = vmatprep.subr.bf16.mxu1 %v6040_v51 }
 0x83c   :  { %3518 = vmatpush2.bf16.msra.mxu0 %v6037_v0  ;;  %3559 = vmatpush2.bf16.msra.mxu1 %v6039_v56  ;;  %v2451_v56 = vsel %vm1193_vm0, %v2435_v52, %v2443_v63 }
 0x83d   :  { %3519 = vmatprep.subr.bf16.mxu0 %v6030_v2  ;;  %3560 = vmatprep.subr.bf16.mxu1 %v6032_v11 }
 0x840   :  { %3520 = vmatpush2.bf16.msra.mxu0 %v6029_v20  ;;  %3561 = vmatpush2.bf16.msra.mxu1 %v6031_v22 }
 0x841   :  { %3521 = vmatprep.subr.bf16.mxu0 %v6022_v16  ;;  %3562 = vmatprep.subr.bf16.mxu1 %v6024_v26  ;;  %v2578_v26 = vrot.slane %v8202_v5, 2 }
 0x844   :  { %3522 = vmatpush2.bf16.msra.mxu0 %v6021_v31  ;;  %3563 = vmatpush2.bf16.msra.mxu1 %v6023_v4  ;;  %v2596_v31 = vrot.slane %v8113_v55, 7  ;;  %v2593_v4 = vsel %vm2592_vm10, %v8122_v30, %v2578_v26  ;;  %v9864_v30 = vld [vmem:[#allocation58_spill] sm:$0xff] }
 0x845   :  { %3523 = vmatprep.subr.bf16.mxu0 %v6014_v32  ;;  %3564 = vmatprep.subr.bf16.mxu1 %v6016_v40  ;;  %v9859_v32 = vld [vmem:[#allocation63_spill] sm:$0xff] }
 0x846   :  { %v2598_v40 = vrot.slane %v9859_v32, 6 }
 0x848   :  { %3524 = vmatpush2.bf16.msra.mxu0 %v6013_v28  ;;  %3565 = vmatpush2.bf16.msra.mxu1 %v6015_v6 }
 0x849   :  { %3575 = vmatprep.subr.bf16.mxu0 %v6010_v33  ;;  %3616 = vmatprep.subr.bf16.mxu1 %v6012_v50  ;;  %v9860_v33 = vld [vmem:[#allocation26_spill] sm:$0xff] }
 0x84a   :  { %v2600_v50 = vrot.slane %v9860_v33, 4  ;;  %v2621_v33 = vld [vmem:[#allocation8 + $0x430] sm:$0xff] }
 0x8cb   :  { %v2486_v39 = vpop.f32.mrf.mxu0  ;;  %v2527_v41 = vpop.f32.mrf.mxu1 }
 0x8cc   :  { %v2534_v57 = vadd.f32 %v2486_v39, %v2448_v37  ;;  %v2536_v17 = vadd.f32 %v2527_v41, %v2450_v58  ;;  %v9862_v37 = vld [vmem:[#allocation42_spill] sm:$0xff]  ;;  %v2605_v41 = vrot.slane %v9864_v30, 2  ;;  %v2741_v30 = vld [vmem:[#allocation8 + $0x7f0] sm:$0xff] }
 0x8cd   :  { %v2488_v43 = vpop.f32.mrf.mxu0  ;;  %v2529_v54 = vpop.f32.mrf.mxu1  ;;  %v9863_v55 = vrot.slane %v9862_v37, 5 }
 0x8ce   :  { %v5946_v45 = vmul.f32 -1.442695, %v2534_v57  ;;  %v2535_v60 = vadd.f32 %v2488_v43, %v2449_v53  ;;  %v5948_v0 = vmul.f32 -1.442695, %v2536_v17  ;;  %v2537_v2 = vadd.f32 %v2529_v54, %v2451_v56  ;;  %v2665_v57 = vld [vmem:[#allocation8 + $0x590] sm:$0xff]  ;;  %v2666_v54 = vld [vmem:[#allocation8 + $0x598] sm:$0xff] }
 0x8cf   :  { %v2490_v62 = vpop.f32.mrf.mxu0  ;;  %v2531_v21 = vpop.f32.mrf.mxu1  ;;  %v2669_v43 = vld [vmem:[#allocation8 + $0x5b0] sm:$0xff] }
 0x8d0   :  { %6677 = vpow2.f32 %v5946_v45  ;;  %v5947_v15 = vmul.f32 -1.442695, %v2535_v60  ;;  %v2670_v45 = vld [vmem:[#allocation8 + $0x5b8] sm:$0xff]  ;;  %v2657_v21 = vld [vmem:[#allocation8 + $0x550] sm:$0xff]  ;;  %v6001_v58 = vcombine.low %v2665_v57, %v2669_v43 }
 0x8d1   :  { %v2491_v23 = vpop.f32.mrf.mxu0  ;;  %v2532_v51 = vpop.f32.mrf.mxu1  ;;  %v6004_v12 = vcombine.high %v2666_v54, %v2670_v45  ;;  %v6003_v17 = vcombine.low %v2666_v54, %v2670_v45  ;;  %v2653_v56 = vld [vmem:[#allocation8 + $0x530] sm:$0xff] }
 0x8d2   :  { %6679 = vpow2.f32 %v5947_v15  ;;  %v6002_v15 = vcombine.high %v2665_v57, %v2669_v43  ;;  %v2661_v23 = vld [vmem:[#allocation8 + $0x570] sm:$0xff]  ;;  %v2658_v51 = vld [vmem:[#allocation8 + $0x558] sm:$0xff] }
 0x8d3   :  { %6681 = vpow2.f32 %v5948_v0  ;;  %v5994_v63 = vcombine.high %v2657_v21, %v2661_v23  ;;  %v5996_v52 = vcombine.high %v2658_v51, %v2662_v46  ;;  %v2649_v0 = vld [vmem:[#allocation8 + $0x510] sm:$0xff]  ;;  %v5993_v10 = vcombine.low %v2657_v21, %v2661_v23  ;;  %v2734_v21 = vld [vmem:[#allocation8 + $0x7b8] sm:$0xff] }
 0x8d4   :  { %6683 = vtanh.f32 %v2537_v2  ;;  %v2650_v2 = vld [vmem:[#allocation8 + $0x518] sm:$0xff]  ;;  %v5995_v38 = vcombine.low %v2658_v51, %v2662_v46  ;;  %v5986_v27 = vcombine.high %v2649_v0, %v2653_v56  ;;  %v2729_v54 = vld [vmem:[#allocation8 + $0x790] sm:$0xff] }
 0x8d5   :  { %v2733_v45 = vld [vmem:[#allocation8 + $0x7b0] sm:$0xff] }
 0x8d6   :  { %v6066_v23 = vcombine.high %v2729_v54, %v2733_v45  ;;  %v2721_v46 = vld [vmem:[#allocation8 + $0x750] sm:$0xff] }
 0x8dd   :  { %v6678_v11 = vpop.eup %6677 }
 0x8de   :  { %v2547_v14 = vadd.f32 1.0, %v6678_v11  ;;  %v2654_v11 = vld [vmem:[#allocation8 + $0x538] sm:$0xff] }
 0x8df   :  { %v6680_v7 = vpop.eup %6679 }
 0x8e0   :  { %6685 = vrcp.f32 %v2547_v14  ;;  %v2548_v13 = vadd.f32 1.0, %v6680_v7  ;;  %v6682_v3 = vpop.eup %6681  ;;  %v2642_v14 = vld [vmem:[#allocation8 + $0x4d8] sm:$0xff] }
 0x8e1   :  { %v6684_v18 = vpop.eup %6683  ;;  %v2549_v1 = vadd.f32 1.0, %v6682_v3  ;;  %v2646_v7 = vld [vmem:[#allocation8 + $0x4f8] sm:$0xff]  ;;  %v5987_v3 = vcombine.low %v2650_v2, %v2654_v11 }
 0x8e2   :  { %6687 = vrcp.f32 %v2548_v13  ;;  %v5985_v13 = vcombine.low %v2649_v0, %v2653_v56 }
 0x8e3   :  { %6689 = vrcp.f32 %v2549_v1  ;;  %v2634_v1 = vld [vmem:[#allocation8 + $0x498] sm:$0xff] }
 0x8ed   :  { %v6686_v19 = vpop.eup %6685 }
 0x8ee   :  { %v2558_v20 = vmul.f32 %v6686_v19, %v6684_v18  ;;  %v5980_v19 = vcombine.high %v2642_v14, %v2646_v7 }
 0x8ef   :  { %v6688_v22 = vpop.eup %6687 }
 0x8f0   :  { %v2557_v61 = vmul.f32 %v6688_v22, %v8199_v44  ;;  %v6690_v34 = vpop.eup %6689  ;;  %v2637_v22 = vld [vmem:[#allocation8 + $0x4b0] sm:$0xff] }
 0x8f2   :  { %v2559_v16 = vadd.f32 %v2558_v20, %v2557_v61  ;;  %v2633_v20 = vld [vmem:[#allocation8 + $0x490] sm:$0xff]  ;;  %v2638_v61 = vld [vmem:[#allocation8 + $0x4b8] sm:$0xff] }
 0x8f3   :  { %v5972_v26 = vcombine.high %v2634_v1, %v2638_v61  ;;  %v5969_v32 = vcombine.low %v2633_v20, %v2637_v22 }
 0x8f4   :  { %6691 = vtanh.f32 %v2559_v16 }
 0x901   :  { %v6692_v29 = vpop.eup %6691 }
 0x902   :  { %v2561_v25 = vmul.f32 %v6692_v29, %v6690_v34  ;;  %v5979_v34 = vcombine.low %v2642_v14, %v2646_v7  ;;  %v5970_v29 = vcombine.high %v2633_v20, %v2637_v22  ;;  %v2705_v7 = vld [vmem:[#allocation8 + $0x6d0] sm:$0xff] }
 0x904   :  { %v2581_v24 = vrot.slane %v2561_v25, 1  ;;  %v2625_v25 = vld [vmem:[#allocation8 + $0x450] sm:$0xff] }
 0x906   :  { %v2607_v44 = vsel %vm1193_vm0, %v2581_v24, %v8202_v5  ;;  %v2595_v28 = vsel %vm2594_vm11, %v2593_v4, %v2581_v24  ;;  %v2629_v24 = vld [vmem:[#allocation8 + $0x470] sm:$0xff]  ;;  %v2630_v4 = vld [vmem:[#allocation8 + $0x478] sm:$0xff] }
 0x907   :  { %v2608_v6 = vsel %vm2584_vm6, %v2607_v44, %v2596_v31  ;;  %v8256_v62 = vpack.c.bf16 %v2595_v28, %v2595_v28  ;;  %v2626_v31 = vld [vmem:[#allocation8 + $0x458] sm:$0xff]  ;;  %v5962_v44 = vcombine.high %v2625_v25, %v2629_v24  ;;  %v5961_v8 = vcombine.low %v2625_v25, %v2629_v24 }
 0x908   :  { %v2609_v49 = vsel %vm2586_vm7, %v2608_v6, %v2598_v40  ;;  %v5971_v40 = vcombine.low %v2634_v1, %v2638_v61  ;;  %v5964_v28 = vcombine.high %v2626_v31, %v2630_v4  ;;  %v2617_v6 = vld [vmem:[#allocation8 + $0x410] sm:$0xff] }
 0x909   :  { %v2610_v39 = vsel %vm2588_vm8, %v2609_v49, %v9863_v55  ;;  %v2622_v49 = vld [vmem:[#allocation8 + $0x438] sm:$0xff]  ;;  %v5954_v37 = vcombine.high %v2617_v6, %v2621_v33  ;;  %v2697_v61 = vld [vmem:[#allocation8 + $0x690] sm:$0xff] }
 0x90a   :  { %v2611_v42 = vsel %vm2590_vm9, %v2610_v39, %v2600_v50  ;;  %v2618_v50 = vld [vmem:[#allocation8 + $0x418] sm:$0xff]  ;;  %v2737_v39 = vld [vmem:[#allocation8 + $0x7d0] sm:$0xff] }
 0x90b   :  { %v2612_v5 = vsel %vm2592_vm10, %v2611_v42, %v2602_v9  ;;  %v5963_v9 = vcombine.low %v2626_v31, %v2630_v4  ;;  %v5956_v55 = vcombine.high %v2618_v50, %v2622_v49  ;;  %v2742_v42 = vld [vmem:[#allocation8 + $0x7f8] sm:$0xff]  ;;  %v5955_v57 = vcombine.low %v2618_v50, %v2622_v49  ;;  %v2689_v4 = vld [vmem:[#allocation8 + $0x650] sm:$0xff] }
 0x90c   :  { %v2613_v53 = vsel %vm2594_vm11, %v2612_v5, %v2605_v41  ;;  %v2738_v41 = vld [vmem:[#allocation8 + $0x7d8] sm:$0xff]  ;;  %v5953_v5 = vcombine.low %v2617_v6, %v2621_v33  ;;  %v2681_v49 = vld [vmem:[#allocation8 + $0x610] sm:$0xff] }
 0x90d   :  { %v2811_v60 = vpack.c.bf16 %v2613_v53, %v2613_v53  ;;  %v6074_v53 = vcombine.high %v2737_v39, %v2741_v30  ;;  %v6076_v43 = vcombine.high %v2738_v41, %v2742_v42 }
 0x90f   :  { %3525 = vmatprep.mubr.bf16.mxu0 %v2811_v60  ;;  %3566 = vmatprep.mubr.bf16.mxu1 %v2811_v60 }
 0x910   :  { %3526 = vmatmul.mubr.bf16.vlgmr.msra.gmra.mxu0 %v8256_v62  ;;  %3567 = vmatmul.mubr.bf16.vlgmr.msra.gmra.mxu1 %v8256_v62 }
 0x911   :  { %3576 = vmatpush1.bf16.msra.mxu0 %v6009_v35  ;;  %3617 = vmatpush1.bf16.msra.mxu1 %v6011_v36  ;;  %v5988_v35 = vcombine.high %v2650_v2, %v2654_v11  ;;  %v2645_v36 = vld [vmem:[#allocation8 + $0x4f0] sm:$0xff] }
 0x912   :  { %3607 = vmatprep.mubr.bf16.mxu0 %v2811_v60  ;;  %3648 = vmatprep.mubr.bf16.mxu1 %v2811_v60  ;;  %v5978_v18 = vcombine.high %v2641_v48, %v2645_v36  ;;  %v5977_v16 = vcombine.low %v2641_v48, %v2645_v36  ;;  %v2730_v60 = vld [vmem:[#allocation8 + $0x798] sm:$0xff]  ;;  %v2713_v11 = vld [vmem:[#allocation8 + $0x710] sm:$0xff] }
 0x913   :  { %3577 = vmatprep.subr.bf16.mxu0 %v6002_v15  ;;  %3618 = vmatprep.subr.bf16.mxu1 %v6004_v12  ;;  %v6073_v15 = vcombine.low %v2737_v39, %v2741_v30  ;;  %v6075_v12 = vcombine.low %v2738_v41, %v2742_v42  ;;  %v6068_v51 = vcombine.high %v2730_v60, %v2734_v21 }
 0x914   :  { %v6067_v0 = vcombine.low %v2730_v60, %v2734_v21  ;;  %v8278_v60 = vld [vmem:[#allocation10 + $0x2cc] ss:$16 sps:$4 sm:$0xff]   ;;  %v8284_v21 = vld [vmem:[#allocation10 + $0x2c0] ss:$16 sps:$4 sm:$0xff]  }
 0x915   :  { %3578 = vmatpush1.bf16.msra.mxu0 %v6001_v58  ;;  %3619 = vmatpush1.bf16.msra.mxu1 %v6003_v17  ;;  %v2725_v58 = vld [vmem:[#allocation8 + $0x770] sm:$0xff]  ;;  %v2722_v17 = vld [vmem:[#allocation8 + $0x758] sm:$0xff] }
 0x916   :  { %3579 = vmatprep.subr.bf16.mxu0 %v5994_v63  ;;  %3620 = vmatprep.subr.bf16.mxu1 %v5996_v52  ;;  %v2726_v63 = vld [vmem:[#allocation8 + $0x778] sm:$0xff]  ;;  %v6065_v52 = vcombine.low %v2729_v54, %v2733_v45  ;;  %v6058_v56 = vcombine.high %v2721_v46, %v2725_v58  ;;  %v8276_v45 = vld [vmem:[#allocation10 + $0x2c4] ss:$16 sps:$4 sm:$0xff]  }
 0x917   :  { %v6060_v2 = vcombine.high %v2722_v17, %v2726_v63  ;;  %v6059_v48 = vcombine.low %v2722_v17, %v2726_v63  ;;  %v8272_v54 = vld [vmem:[#allocation10 + $0x2e8] ss:$16 sps:$4 sm:$0xff]   ;;  %v8306_v17 = vld [vmem:[#allocation10 + $0x28c] ss:$16 sps:$4 sm:$0xff]   ;;  %v8310_v63 = vld [vmem:[#allocation10 + $0x280] ss:$16 sps:$4 sm:$0xff]  }
 0x919   :  { %3580 = vmatpush1.bf16.msra.mxu0 %v5993_v10  ;;  %3621 = vmatpush1.bf16.msra.mxu1 %v5995_v38  ;;  %v2717_v10 = vld [vmem:[#allocation8 + $0x730] sm:$0xff]  ;;  %v2714_v38 = vld [vmem:[#allocation8 + $0x718] sm:$0xff] }
 0x91a   :  { %3581 = vmatprep.subr.bf16.mxu0 %v5986_v27  ;;  %3622 = vmatprep.subr.bf16.mxu1 %v5988_v35  ;;  %v2718_v27 = vld [vmem:[#allocation8 + $0x738] sm:$0xff]  ;;  %v6057_v35 = vcombine.low %v2721_v46, %v2725_v58  ;;  %v6050_v36 = vcombine.high %v2713_v11, %v2717_v10  ;;  %v8304_v58 = vld [vmem:[#allocation10 + $0x284] ss:$16 sps:$4 sm:$0xff]  }
 0x91b   :  { %v6052_v14 = vcombine.high %v2714_v38, %v2718_v27  ;;  %v6051_v20 = vcombine.low %v2714_v38, %v2718_v27  ;;  %v8300_v46 = vld [vmem:[#allocation10 + $0x2a8] ss:$16 sps:$4 sm:$0xff]   ;;  %v8330_v38 = vld [vmem:[#allocation10 + $0x24c] ss:$16 sps:$4 sm:$0xff]   ;;  %v8334_v27 = vld [vmem:[#allocation10 + $0x240] ss:$16 sps:$4 sm:$0xff]  }
 0x91d   :  { %3582 = vmatpush1.bf16.msra.mxu0 %v5985_v13  ;;  %3623 = vmatpush1.bf16.msra.mxu1 %v5987_v3  ;;  %v2709_v13 = vld [vmem:[#allocation8 + $0x6f0] sm:$0xff]  ;;  %v2706_v3 = vld [vmem:[#allocation8 + $0x6d8] sm:$0xff] }
 0x91e   :  { %3583 = vmatprep.subr.bf16.mxu0 %v5978_v18  ;;  %3624 = vmatprep.subr.bf16.mxu1 %v5980_v19  ;;  %v2710_v18 = vld [vmem:[#allocation8 + $0x6f8] sm:$0xff]  ;;  %v6049_v19 = vcombine.low %v2713_v11, %v2717_v10  ;;  %v6042_v22 = vcombine.high %v2705_v7, %v2709_v13  ;;  %v8328_v10 = vld [vmem:[#allocation10 + $0x244] ss:$16 sps:$4 sm:$0xff]  }
 0x91f   :  { %v6044_v1 = vcombine.high %v2706_v3, %v2710_v18  ;;  %v6043_v25 = vcombine.low %v2706_v3, %v2710_v18  ;;  %v8324_v11 = vld [vmem:[#allocation10 + $0x268] ss:$16 sps:$4 sm:$0xff]   ;;  %v8354_v3 = vld [vmem:[#allocation10 + $0x20c] ss:$16 sps:$4 sm:$0xff]   ;;  %v8358_v18 = vld [vmem:[#allocation10 + $0x200] ss:$16 sps:$4 sm:$0xff]  }
 0x921   :  { %3584 = vmatpush1.bf16.msra.mxu0 %v5977_v16  ;;  %3625 = vmatpush1.bf16.msra.mxu1 %v5979_v34  ;;  %v2701_v16 = vld [vmem:[#allocation8 + $0x6b0] sm:$0xff]  ;;  %v2698_v34 = vld [vmem:[#allocation8 + $0x698] sm:$0xff] }
 0x922   :  { %3585 = vmatprep.subr.bf16.mxu0 %v5970_v29  ;;  %3626 = vmatprep.subr.bf16.mxu1 %v5972_v26  ;;  %v2702_v29 = vld [vmem:[#allocation8 + $0x6b8] sm:$0xff]  ;;  %v6041_v26 = vcombine.low %v2705_v7, %v2709_v13  ;;  %v6034_v24 = vcombine.high %v2697_v61, %v2701_v16  ;;  %v8352_v13 = vld [vmem:[#allocation10 + $0x204] ss:$16 sps:$4 sm:$0xff]  }
 0x923   :  { %v6036_v31 = vcombine.high %v2698_v34, %v2702_v29  ;;  %v6035_v6 = vcombine.low %v2698_v34, %v2702_v29  ;;  %v8348_v7 = vld [vmem:[#allocation10 + $0x228] ss:$16 sps:$4 sm:$0xff]   ;;  %v8378_v34 = vld [vmem:[#allocation10 + $0x3cc] ss:$16 sps:$4 sm:$0xff]   ;;  %v8382_v29 = vld [vmem:[#allocation10 + $0x3c0] ss:$16 sps:$4 sm:$0xff]  }
 0x925   :  { %3586 = vmatpush1.bf16.msra.mxu0 %v5969_v32  ;;  %3627 = vmatpush1.bf16.msra.mxu1 %v5971_v40  ;;  %v2693_v32 = vld [vmem:[#allocation8 + $0x670] sm:$0xff]  ;;  %v2690_v40 = vld [vmem:[#allocation8 + $0x658] sm:$0xff] }
 0x926   :  { %3587 = vmatprep.subr.bf16.mxu0 %v5962_v44  ;;  %3628 = vmatprep.subr.bf16.mxu1 %v5964_v28  ;;  %v2694_v44 = vld [vmem:[#allocation8 + $0x678] sm:$0xff]  ;;  %v6033_v28 = vcombine.low %v2697_v61, %v2701_v16  ;;  %v6026_v33 = vcombine.high %v2689_v4, %v2693_v32  ;;  %v8376_v16 = vld [vmem:[#allocation10 + $0x3c4] ss:$16 sps:$4 sm:$0xff]  }
 0x927   :  { %v6028_v50 = vcombine.high %v2690_v40, %v2694_v44  ;;  %v6027_v39 = vcombine.low %v2690_v40, %v2694_v44  ;;  %v8372_v61 = vld [vmem:[#allocation10 + $0x3e8] ss:$16 sps:$4 sm:$0xff]   ;;  %v8402_v40 = vld [vmem:[#allocation10 + $0x38c] ss:$16 sps:$4 sm:$0xff]   ;;  %v8406_v44 = vld [vmem:[#allocation10 + $0x380] ss:$16 sps:$4 sm:$0xff]  }
 0x928   :  { %9874 = vst [vmem:[#allocation46_spill] sm:$0xff] %v8402_v40  ;;  %9875 = vst [vmem:[#allocation47_spill] sm:$0xff] %v8406_v44 }
 0x929   :  { %3588 = vmatpush1.bf16.msra.mxu0 %v5961_v8  ;;  %3629 = vmatpush1.bf16.msra.mxu1 %v5963_v9  ;;  %v2685_v8 = vld [vmem:[#allocation8 + $0x630] sm:$0xff]  ;;  %v2682_v9 = vld [vmem:[#allocation8 + $0x618] sm:$0xff] }
 0x92a   :  { %3589 = vmatprep.subr.bf16.mxu0 %v5954_v37  ;;  %3630 = vmatprep.subr.bf16.mxu1 %v5956_v55  ;;  %v2686_v37 = vld [vmem:[#allocation8 + $0x638] sm:$0xff]  ;;  %v6025_v55 = vcombine.low %v2689_v4, %v2693_v32  ;;  %v6018_v30 = vcombine.high %v2681_v49, %v2685_v8  ;;  %v6017_v42 = vcombine.low %v2681_v49, %v2685_v8  ;;  %v8400_v32 = vld [vmem:[#allocation10 + $0x384] ss:$16 sps:$4 sm:$0xff]  }
 0x92b   :  { %v6020_v41 = vcombine.high %v2682_v9, %v2686_v37  ;;  %v8396_v4 = vld [vmem:[#allocation10 + $0x3a8] ss:$16 sps:$4 sm:$0xff]   ;;  %9873 = vst [vmem:[#allocation45_spill] sm:$0xff] %v8400_v32  ;;  %v8424_v8 = vld [vmem:[#allocation10 + $0x344] ss:$16 sps:$4 sm:$0xff]  }
 0x92c   :  { %9872 = vst [vmem:[#allocation44_spill] sm:$0xff] %v8396_v4  ;;  %v8420_v49 = vld [vmem:[#allocation10 + $0x368] ss:$16 sps:$4 sm:$0xff]   ;;  %9881 = vst [vmem:[#allocation30_spill] sm:$0xff] %v8424_v8 }
 0x92d   :  { %3590 = vmatpush1.bf16.msra.mxu0 %v5953_v5  ;;  %3631 = vmatpush1.bf16.msra.mxu1 %v5955_v57  ;;  %v6019_v5 = vcombine.low %v2682_v9, %v2686_v37  ;;  %v8266_v57 = vld [vmem:[#allocation10 + $0x2e4] ss:$16 sps:$4 sm:$0xff]   ;;  %9880 = vst [vmem:[#allocation29_spill] sm:$0xff] %v8420_v49  ;;  %v8426_v9 = vld [vmem:[#allocation10 + $0x34c] ss:$16 sps:$4 sm:$0xff]  }
 0x92e   :  { %3591 = vmatprep.subr.bf16.mxu0 %v6074_v53  ;;  %3632 = vmatprep.subr.bf16.mxu1 %v6076_v43  ;;  %9865 = vst [vmem:[#allocation24_spill] sm:$0xff] %v8266_v57  ;;  %v8268_v53 = vld [vmem:[#allocation10 + $0x2ec] ss:$16 sps:$4 sm:$0xff]   ;;  %v8270_v43 = vld [vmem:[#allocation10 + $0x2e0] ss:$16 sps:$4 sm:$0xff]   ;;  %9882 = vst [vmem:[#allocation31_spill] sm:$0xff] %v8426_v9 }
 0x92f   :  { %9866 = vst [vmem:[#allocation25_spill] sm:$0xff] %v8268_v53  ;;  %v8430_v37 = vld [vmem:[#allocation10 + $0x340] ss:$16 sps:$4 sm:$0xff]  }
 0x930   :  { %9883 = vst [vmem:[#allocation32_spill] sm:$0xff] %v8430_v37 }
 0x931   :  { %3592 = vmatpush2.bf16.msra.mxu0 %v6073_v15  ;;  %3633 = vmatpush2.bf16.msra.mxu1 %v6075_v12  ;;  %v8286_v15 = vld [vmem:[#allocation10 + $0x2c8] ss:$16 sps:$4 sm:$0xff]   ;;  %v8290_v12 = vld [vmem:[#allocation10 + $0x2a4] ss:$16 sps:$4 sm:$0xff]  }
 0x932   :  { %3593 = vmatprep.subr.bf16.mxu0 %v6066_v23  ;;  %3634 = vmatprep.subr.bf16.mxu1 %v6068_v51  ;;  %v8292_v23 = vld [vmem:[#allocation10 + $0x2ac] ss:$16 sps:$4 sm:$0xff]   ;;  %v9867_v51 = vmov 0  }
 0x935   :  { %3594 = vmatpush2.bf16.msra.mxu0 %v6065_v52  ;;  %3635 = vmatpush2.bf16.msra.mxu1 %v6067_v0  ;;  %v8312_v52 = vld [vmem:[#allocation10 + $0x288] ss:$16 sps:$4 sm:$0xff]   ;;  %v8316_v0 = vld [vmem:[#allocation10 + $0x264] ss:$16 sps:$4 sm:$0xff]  }
 0x936   :  { %3595 = vmatprep.subr.bf16.mxu0 %v6058_v56  ;;  %3636 = vmatprep.subr.bf16.mxu1 %v6060_v2  ;;  %v8318_v56 = vld [vmem:[#allocation10 + $0x26c] ss:$16 sps:$4 sm:$0xff]   ;;  %v8322_v2 = vld [vmem:[#allocation10 + $0x260] ss:$16 sps:$4 sm:$0xff]  }
 0x939   :  { %3596 = vmatpush2.bf16.msra.mxu0 %v6057_v35  ;;  %3637 = vmatpush2.bf16.msra.mxu1 %v6059_v48  ;;  %v8336_v35 = vld [vmem:[#allocation10 + $0x248] ss:$16 sps:$4 sm:$0xff]   ;;  %v8340_v48 = vld [vmem:[#allocation10 + $0x224] ss:$16 sps:$4 sm:$0xff]  }
 0x93a   :  { %3597 = vmatprep.subr.bf16.mxu0 %v6050_v36  ;;  %3638 = vmatprep.subr.bf16.mxu1 %v6052_v14  ;;  %v8342_v36 = vld [vmem:[#allocation10 + $0x22c] ss:$16 sps:$4 sm:$0xff]   ;;  %v8346_v14 = vld [vmem:[#allocation10 + $0x220] ss:$16 sps:$4 sm:$0xff]  }
 0x93d   :  { %3598 = vmatpush2.bf16.msra.mxu0 %v6049_v19  ;;  %3639 = vmatpush2.bf16.msra.mxu1 %v6051_v20  ;;  %v8360_v19 = vld [vmem:[#allocation10 + $0x208] ss:$16 sps:$4 sm:$0xff]   ;;  %v8364_v20 = vld [vmem:[#allocation10 + $0x3e4] ss:$16 sps:$4 sm:$0xff]  }
 0x93e   :  { %3599 = vmatprep.subr.bf16.mxu0 %v6042_v22  ;;  %3640 = vmatprep.subr.bf16.mxu1 %v6044_v1  ;;  %v8366_v22 = vld [vmem:[#allocation10 + $0x3ec] ss:$16 sps:$4 sm:$0xff]   ;;  %v8370_v1 = vld [vmem:[#allocation10 + $0x3e0] ss:$16 sps:$4 sm:$0xff]  }
 0x941   :  { %3600 = vmatpush2.bf16.msra.mxu0 %v6041_v26  ;;  %3641 = vmatpush2.bf16.msra.mxu1 %v6043_v25  ;;  %v8384_v26 = vld [vmem:[#allocation10 + $0x3c8] ss:$16 sps:$4 sm:$0xff]   ;;  %v8388_v25 = vld [vmem:[#allocation10 + $0x3a4] ss:$16 sps:$4 sm:$0xff]  }
 0x942   :  { %3601 = vmatprep.subr.bf16.mxu0 %v6034_v24  ;;  %3642 = vmatprep.subr.bf16.mxu1 %v6036_v31  ;;  %9868 = vst [vmem:[#allocation39_spill] sm:$0xff] %v8384_v26  ;;  %9869 = vst [vmem:[#allocation40_spill] sm:$0xff] %v8388_v25  ;;  %v8390_v24 = vld [vmem:[#allocation10 + $0x3ac] ss:$16 sps:$4 sm:$0xff]   ;;  %v8394_v31 = vld [vmem:[#allocation10 + $0x3a0] ss:$16 sps:$4 sm:$0xff]  }
 0x943   :  { %9870 = vst [vmem:[#allocation41_spill] sm:$0xff] %v8390_v24  ;;  %9871 = vst [vmem:[#allocation43_spill] sm:$0xff] %v8394_v31 }
 0x945   :  { %3602 = vmatpush2.bf16.msra.mxu0 %v6033_v28  ;;  %3643 = vmatpush2.bf16.msra.mxu1 %v6035_v6  ;;  %v8408_v28 = vld [vmem:[#allocation10 + $0x388] ss:$16 sps:$4 sm:$0xff]   ;;  %v8412_v6 = vld [vmem:[#allocation10 + $0x364] ss:$16 sps:$4 sm:$0xff]  }
 0x946   :  { %3603 = vmatprep.subr.bf16.mxu0 %v6026_v33  ;;  %3644 = vmatprep.subr.bf16.mxu1 %v6028_v50  ;;  %9876 = vst [vmem:[#allocation48_spill] sm:$0xff] %v8408_v28  ;;  %9877 = vst [vmem:[#allocation49_spill] sm:$0xff] %v8412_v6  ;;  %v8414_v33 = vld [vmem:[#allocation10 + $0x36c] ss:$16 sps:$4 sm:$0xff]   ;;  %v8418_v50 = vld [vmem:[#allocation10 + $0x360] ss:$16 sps:$4 sm:$0xff]  }
 0x947   :  { %9878 = vst [vmem:[#allocation27_spill] sm:$0xff] %v8414_v33  ;;  %9879 = vst [vmem:[#allocation28_spill] sm:$0xff] %v8418_v50 }
 0x949   :  { %3604 = vmatpush2.bf16.msra.mxu0 %v6025_v55  ;;  %3645 = vmatpush2.bf16.msra.mxu1 %v6027_v39  ;;  %v8432_v55 = vld [vmem:[#allocation10 + $0x348] ss:$16 sps:$4 sm:$0xff]   ;;  %v8436_v39 = vld [vmem:[#allocation10 + $0x324] ss:$16 sps:$4 sm:$0xff]  }
 0x94a   :  { %3605 = vmatprep.subr.bf16.mxu0 %v6018_v30  ;;  %3646 = vmatprep.subr.bf16.mxu1 %v6020_v41  ;;  %9884 = vst [vmem:[#allocation33_spill] sm:$0xff] %v8432_v55  ;;  %9885 = vst [vmem:[#allocation34_spill] sm:$0xff] %v8436_v39  ;;  %v8438_v30 = vld [vmem:[#allocation10 + $0x32c] ss:$16 sps:$4 sm:$0xff]   ;;  %v8442_v41 = vld [vmem:[#allocation10 + $0x320] ss:$16 sps:$4 sm:$0xff]  }
 0x94b   :  { %9886 = vst [vmem:[#allocation35_spill] sm:$0xff] %v8438_v30  ;;  %9887 = vst [vmem:[#allocation36_spill] sm:$0xff] %v8442_v41 }
 0x94d   :  { %3606 = vmatpush2.bf16.msra.mxu0 %v6017_v42  ;;  %3647 = vmatpush2.bf16.msra.mxu1 %v6019_v5  ;;  %v8444_v42 = vld [vmem:[#allocation10 + $0x328] ss:$16 sps:$4 sm:$0xff]   ;;  %v8448_v5 = vld [vmem:[#allocation10 + $0x304] ss:$16 sps:$4 sm:$0xff]  }
 0x94e   :  { %3993 = vmatprep.subr.bf16.mxu0 %v8266_v57  ;;  %4034 = vmatprep.subr.bf16.mxu1 %v8268_v53  ;;  %9888 = vst [vmem:[#allocation37_spill] sm:$0xff] %v8444_v42  ;;  %9889 = vst [vmem:[#allocation38_spill] sm:$0xff] %v8448_v5 }
 0x950   :  { %3608 = vmatmul.mubr.bf16.vlgmr.msra.gmra.mxu0 %v8256_v62  ;;  %3649 = vmatmul.mubr.bf16.vlgmr.msra.gmra.mxu1 %v8256_v62  ;;  %v8298_v62 = vld [vmem:[#allocation10 + $0x2a0] ss:$16 sps:$4 sm:$0xff]  }
 0x951   :  { %3994 = vmatpush1.bf16.msra.mxu0 %v8270_v43  ;;  %4035 = vmatpush1.bf16.msra.mxu1 %v8272_v54 }
 0x952   :  { %3995 = vmatprep.subr.bf16.mxu0 %v8276_v45  ;;  %4036 = vmatprep.subr.bf16.mxu1 %v8278_v60 }
 0x953   :  { %4025 = vmatprep.mubr.bf16.mxu0 %v9867_v51  ;;  %4066 = vmatprep.mubr.bf16.mxu1 %v9867_v51 }
 0x955   :  { %3996 = vmatpush1.bf16.msra.mxu0 %v8284_v21  ;;  %4037 = vmatpush1.bf16.msra.mxu1 %v8286_v15 }
 0x956   :  { %3997 = vmatprep.subr.bf16.mxu0 %v8290_v12  ;;  %4038 = vmatprep.subr.bf16.mxu1 %v8292_v23 }
 0x959   :  { %3998 = vmatpush1.bf16.msra.mxu0 %v8298_v62  ;;  %4039 = vmatpush1.bf16.msra.mxu1 %v8300_v46 }
 0x95a   :  { %3999 = vmatprep.subr.bf16.mxu0 %v8304_v58  ;;  %4040 = vmatprep.subr.bf16.mxu1 %v8306_v17 }
 0x95d   :  { %4000 = vmatpush1.bf16.msra.mxu0 %v8310_v63  ;;  %4041 = vmatpush1.bf16.msra.mxu1 %v8312_v52 }
 0x95e   :  { %4001 = vmatprep.subr.bf16.mxu0 %v8316_v0  ;;  %4042 = vmatprep.subr.bf16.mxu1 %v8318_v56 }
 0x961   :  { %4002 = vmatpush1.bf16.msra.mxu0 %v8322_v2  ;;  %4043 = vmatpush1.bf16.msra.mxu1 %v8324_v11 }
 0x962   :  { %4003 = vmatprep.subr.bf16.mxu0 %v8328_v10  ;;  %4044 = vmatprep.subr.bf16.mxu1 %v8330_v38 }
 0x965   :  { %4004 = vmatpush1.bf16.msra.mxu0 %v8334_v27  ;;  %4045 = vmatpush1.bf16.msra.mxu1 %v8336_v35 }
 0x966   :  { %4005 = vmatprep.subr.bf16.mxu0 %v8340_v48  ;;  %4046 = vmatprep.subr.bf16.mxu1 %v8342_v36 }
 0x969   :  { %4006 = vmatpush1.bf16.msra.mxu0 %v8346_v14  ;;  %4047 = vmatpush1.bf16.msra.mxu1 %v8348_v7 }
 0x96a   :  { %4007 = vmatprep.subr.bf16.mxu0 %v8352_v13  ;;  %4048 = vmatprep.subr.bf16.mxu1 %v8354_v3 }
 0x96d   :  { %4008 = vmatpush1.bf16.msra.mxu0 %v8358_v18  ;;  %4049 = vmatpush1.bf16.msra.mxu1 %v8360_v19 }
 0x96e   :  { %4009 = vmatprep.subr.bf16.mxu0 %v8364_v20  ;;  %4050 = vmatprep.subr.bf16.mxu1 %v8366_v22 }
 0x971   :  { %4010 = vmatpush2.bf16.msra.mxu0 %v8370_v1  ;;  %4051 = vmatpush2.bf16.msra.mxu1 %v8372_v61 }
 0x972   :  { %4011 = vmatprep.subr.bf16.mxu0 %v8376_v16  ;;  %4052 = vmatprep.subr.bf16.mxu1 %v8378_v34 }
 0x975   :  { %4012 = vmatpush2.bf16.msra.mxu0 %v8382_v29  ;;  %4053 = vmatpush2.bf16.msra.mxu1 %v8384_v26 }
 0x976   :  { %4013 = vmatprep.subr.bf16.mxu0 %v8388_v25  ;;  %4054 = vmatprep.subr.bf16.mxu1 %v8390_v24 }
 0x979   :  { %4014 = vmatpush2.bf16.msra.mxu0 %v8394_v31  ;;  %4055 = vmatpush2.bf16.msra.mxu1 %v8396_v4 }
 0x97a   :  { %4015 = vmatprep.subr.bf16.mxu0 %v8400_v32  ;;  %4056 = vmatprep.subr.bf16.mxu1 %v8402_v40 }
 0x97d   :  { %4016 = vmatpush2.bf16.msra.mxu0 %v8406_v44  ;;  %4057 = vmatpush2.bf16.msra.mxu1 %v8408_v28 }
 0x97e   :  { %4017 = vmatprep.subr.bf16.mxu0 %v8412_v6  ;;  %4058 = vmatprep.subr.bf16.mxu1 %v8414_v33 }
 0x981   :  { %4018 = vmatpush2.bf16.msra.mxu0 %v8418_v50  ;;  %4059 = vmatpush2.bf16.msra.mxu1 %v8420_v49 }
 0x982   :  { %4019 = vmatprep.subr.bf16.mxu0 %v8424_v8  ;;  %4060 = vmatprep.subr.bf16.mxu1 %v8426_v9 }
 0x985   :  { %4020 = vmatpush2.bf16.msra.mxu0 %v8430_v37  ;;  %4061 = vmatpush2.bf16.msra.mxu1 %v8432_v55  ;;  %v8456_v37 = vld [vmem:[#allocation10 + $0x308] ss:$16 sps:$4 sm:$0xff]  }
 0x986   :  { %4021 = vmatprep.subr.bf16.mxu0 %v8436_v39  ;;  %4062 = vmatprep.subr.bf16.mxu1 %v8438_v30  ;;  %9892 = vst [vmem:[#allocation61_spill] sm:$0xff] %v8456_v37 }
 0x989   :  { %4022 = vmatpush2.bf16.msra.mxu0 %v8442_v41  ;;  %4063 = vmatpush2.bf16.msra.mxu1 %v8444_v42 }
 0x98a   :  { %4023 = vmatprep.subr.bf16.mxu0 %v8448_v5  ;;  %4064 = vmatprep.subr.bf16.mxu1 %v8450_v47 }
 0x98d   :  { %4024 = vmatpush2.bf16.msra.mxu0 %v8454_v59  ;;  %4065 = vmatpush2.bf16.msra.mxu1 %v8456_v37 }
 0x98e   :  { %4131 = vmatprep.subr.bf16.mxu0 %v8266_v57  ;;  %4172 = vmatprep.subr.bf16.mxu1 %v8268_v53 }
 0x990   :  { %4026 = vmatmul.mubr.bf16.vlgmr.msra.gmra.mxu0 %v9867_v51  ;;  %4067 = vmatmul.mubr.bf16.vlgmr.msra.gmra.mxu1 %v9867_v51  ;;  %v9893_v51 = vld [vmem:[#allocation32_spill] sm:$0xff] }
 0x991   :  { %4132 = vmatpush1.bf16.msra.mxu0 %v8270_v43  ;;  %4173 = vmatpush1.bf16.msra.mxu1 %v8272_v54 }
 0x992   :  { %4133 = vmatprep.subr.bf16.mxu0 %v8276_v45  ;;  %4174 = vmatprep.subr.bf16.mxu1 %v8278_v60 }
 0x995   :  { %4134 = vmatpush1.bf16.msra.mxu0 %v8284_v21  ;;  %4175 = vmatpush1.bf16.msra.mxu1 %v8286_v15 }
 0x996   :  { %4135 = vmatprep.subr.bf16.mxu0 %v8290_v12  ;;  %4176 = vmatprep.subr.bf16.mxu1 %v8292_v23 }
 0x999   :  { %4136 = vmatpush1.bf16.msra.mxu0 %v8298_v62  ;;  %4177 = vmatpush1.bf16.msra.mxu1 %v8300_v46 }
 0x99a   :  { %4137 = vmatprep.subr.bf16.mxu0 %v8304_v58  ;;  %4178 = vmatprep.subr.bf16.mxu1 %v8306_v17 }
 0x99d   :  { %4138 = vmatpush1.bf16.msra.mxu0 %v8310_v63  ;;  %4179 = vmatpush1.bf16.msra.mxu1 %v8312_v52 }
 0x99e   :  { %4139 = vmatprep.subr.bf16.mxu0 %v8316_v0  ;;  %4180 = vmatprep.subr.bf16.mxu1 %v8318_v56 }
 0x9a1   :  { %4140 = vmatpush1.bf16.msra.mxu0 %v8322_v2  ;;  %4181 = vmatpush1.bf16.msra.mxu1 %v8324_v11 }
 0x9a2   :  { %4141 = vmatprep.subr.bf16.mxu0 %v8328_v10  ;;  %4182 = vmatprep.subr.bf16.mxu1 %v8330_v38 }
 0x9a5   :  { %4142 = vmatpush1.bf16.msra.mxu0 %v8334_v27  ;;  %4183 = vmatpush1.bf16.msra.mxu1 %v8336_v35 }
 0x9a6   :  { %4143 = vmatprep.subr.bf16.mxu0 %v8340_v48  ;;  %4184 = vmatprep.subr.bf16.mxu1 %v8342_v36 }
 0x9a9   :  { %4144 = vmatpush1.bf16.msra.mxu0 %v8346_v14  ;;  %4185 = vmatpush1.bf16.msra.mxu1 %v8348_v7 }
 0x9aa   :  { %4145 = vmatprep.subr.bf16.mxu0 %v8352_v13  ;;  %4186 = vmatprep.subr.bf16.mxu1 %v8354_v3 }
 0x9ad   :  { %4146 = vmatpush1.bf16.msra.mxu0 %v8358_v18  ;;  %4187 = vmatpush1.bf16.msra.mxu1 %v8360_v19 }
 0x9ae   :  { %4147 = vmatprep.subr.bf16.mxu0 %v8364_v20  ;;  %4188 = vmatprep.subr.bf16.mxu1 %v8366_v22 }
 0x9b1   :  { %4148 = vmatpush2.bf16.msra.mxu0 %v8370_v1  ;;  %4189 = vmatpush2.bf16.msra.mxu1 %v8372_v61 }
 0x9b2   :  { %4149 = vmatprep.subr.bf16.mxu0 %v8376_v16  ;;  %4190 = vmatprep.subr.bf16.mxu1 %v8378_v34 }
 0x9b5   :  { %4150 = vmatpush2.bf16.msra.mxu0 %v8382_v29  ;;  %4191 = vmatpush2.bf16.msra.mxu1 %v8384_v26 }
 0x9b6   :  { %4151 = vmatprep.subr.bf16.mxu0 %v8388_v25  ;;  %4192 = vmatprep.subr.bf16.mxu1 %v8390_v24 }
 0x9b9   :  { %4152 = vmatpush2.bf16.msra.mxu0 %v8394_v31  ;;  %4193 = vmatpush2.bf16.msra.mxu1 %v8396_v4 }
 0x9ba   :  { %4153 = vmatprep.subr.bf16.mxu0 %v8400_v32  ;;  %4194 = vmatprep.subr.bf16.mxu1 %v8402_v40 }
 0x9bd   :  { %4154 = vmatpush2.bf16.msra.mxu0 %v8406_v44  ;;  %4195 = vmatpush2.bf16.msra.mxu1 %v8408_v28  ;;  %v2809_v28 = vld [vmem:[#allocation11 + $0x1] ss:$2 sm:$0xff] }
 0x9be   :  { %4155 = vmatprep.subr.bf16.mxu0 %v8412_v6  ;;  %4196 = vmatprep.subr.bf16.mxu1 %v8414_v33 }
 0x9c1   :  { %4156 = vmatpush2.bf16.msra.mxu0 %v8418_v50  ;;  %4197 = vmatpush2.bf16.msra.mxu1 %v8420_v49 }
 0x9c2   :  { %4157 = vmatprep.subr.bf16.mxu0 %v8424_v8  ;;  %4198 = vmatprep.subr.bf16.mxu1 %v8426_v9 }
 0x9c5   :  { %4158 = vmatpush2.bf16.msra.mxu0 %v9893_v51  ;;  %4199 = vmatpush2.bf16.msra.mxu1 %v8432_v55 }
 0x9c6   :  { %4159 = vmatprep.subr.bf16.mxu0 %v8436_v39  ;;  %4200 = vmatprep.subr.bf16.mxu1 %v8438_v30 }
 0x9c9   :  { %4160 = vmatpush2.bf16.msra.mxu0 %v8442_v41  ;;  %4201 = vmatpush2.bf16.msra.mxu1 %v8444_v42 }
 0x9ca   :  { %4161 = vmatprep.subr.bf16.mxu0 %v8448_v5  ;;  %4202 = vmatprep.subr.bf16.mxu1 %v8450_v47 }
 0x9cd   :  { %4162 = vmatpush2.bf16.msra.mxu0 %v8454_v59  ;;  %4203 = vmatpush2.bf16.msra.mxu1 %v8456_v37 }
 0x9ce   :  { %4265 = vmatprep.subr.bf16.mxu0 %v8266_v57  ;;  %4306 = vmatprep.subr.bf16.mxu1 %v8268_v53  ;;  %v9894_v57 = vld [vmem:[#allocation50_spill] sm:$0xff] }
 0x9cf   :  { %v9895_v44 = vsub.s32 4, %v9894_v57  ;;  %v9896_v40 = vsub.s32 5, %v9894_v57 }
 0x9d0   :  { %v3527_v55 = vpop.f32.mrf.mxu0  ;;  %v3568_v39 = vpop.f32.mrf.mxu1 }
 0x9d1   :  { %v2832_v53 = vrot.slane %v2809_v28, %v9895_v44  ;;  %v2836_v32 = vrot.slane %v2809_v28, %v9896_v40 }
 0x9d2   :  { %v3529_v51 = vpop.f32.mrf.mxu0  ;;  %v3570_v30 = vpop.f32.mrf.mxu1 }
 0x9d4   :  { %v3531_v9 = vpop.f32.mrf.mxu0  ;;  %v3572_v41 = vpop.f32.mrf.mxu1 }
 0x9d5   :  { %v9898_v9 = vld [vmem:[#allocation51_spill] sm:$0xff] }
 0x9d6   :  { %v3532_v8 = vpop.f32.mrf.mxu0  ;;  %v3573_v42 = vpop.f32.mrf.mxu1 }
 0x9d7   :  { %v2816_v8 = vrot.slane %v2809_v28, %v9898_v9  ;;  %v9900_v42 = vld [vmem:[#allocation52_spill] sm:$0xff] }
 0x9d8   :  { %v2820_v31 = vrot.slane %v2809_v28, %v9900_v42 }
 0x9da   :  { %v8546_v24 = vadd.f32 %v3529_v51, %v2820_v31  ;;  %v9904_v31 = vsub.s32 2, %v9894_v57 }
 0x9dc   :  { %9903 = vst [vmem:[#allocation54_spill] sm:$0xff] %v8546_v24  ;;  %v2824_v51 = vrot.slane %v2809_v28, %v9904_v31 }
 0xa10   :  { %v3609_v49 = vpop.f32.mrf.mxu0  ;;  %v3650_v5 = vpop.f32.mrf.mxu1 }
 0xa11   :  { %v8534_v4 = vadd.f32 %v3609_v49, %v2832_v53 }
 0xa12   :  { %v3611_v50 = vpop.f32.mrf.mxu0  ;;  %v3652_v47 = vpop.f32.mrf.mxu1 }
 0xa13   :  { %9897 = vst [vmem:[#allocation62_spill] sm:$0xff] %v8534_v4  ;;  %v8537_v41 = vadd.f32 %v3611_v50, %v2836_v32 }
 0xa14   :  { %v3613_v33 = vpop.f32.mrf.mxu0  ;;  %v3654_v59 = vpop.f32.mrf.mxu1 }
 0xa15   :  { %9899 = vst [vmem:[#allocation55_spill] sm:$0xff] %v8537_v41  ;;  %v3661_v33 = vrot.slane %v8534_v4, 6  ;;  %v8541_v59 = vadd.f32 %v3527_v55, %v2816_v8 }
 0xa16   :  { %v3614_v6 = vpop.f32.mrf.mxu0  ;;  %v3655_v37 = vpop.f32.mrf.mxu1 }
 0xa17   :  { %9901 = vst [vmem:[#allocation53_spill] sm:$0xff] %v8541_v59  ;;  %v3662_v6 = vrot.slane %v8537_v41, 6  ;;  %v9902_v37 = vsub.s32 6, %v9894_v57  ;;  %v3669_v53 = vsel %vm1193_vm0, %v8541_v59, %v3661_v33 }
 0xa19   :  { %v2840_v44 = vrot.slane %v2809_v28, %v9902_v37  ;;  %v3670_v50 = vsel %vm1193_vm0, %v8546_v24, %v3662_v6  ;;  %v9905_v37 = vsub.s32 7, %v9894_v57  ;;  %v8559_v24 = vadd.f32 %v3568_v39, %v2824_v51 }
 0xa1b   :  { %v8552_v55 = vadd.f32 %v3650_v5, %v2840_v44  ;;  %v2844_v33 = vrot.slane %v2809_v28, %v9905_v37 }
 0xa1d   :  { %v3663_v6 = vrot.slane %v8552_v55, 6  ;;  %v8561_v5 = vadd.f32 %v3652_v47, %v2844_v33 }
 0xa50   :  { %v4027_v40 = vpop.f32.mrf.mxu0  ;;  %v4068_v49 = vpop.f32.mrf.mxu1 }
 0xa51   :  { %v4075_v32 = vadd.f32 %v4027_v40, %v3669_v53 }
 0xa52   :  { %v4029_v42 = vpop.f32.mrf.mxu0  ;;  %v4070_v9 = vpop.f32.mrf.mxu1 }
 0xa53   :  { %v6141_v8 = vmul.f32 -1.442695, %v4075_v32  ;;  %v4076_v41 = vadd.f32 %v4029_v42, %v3670_v50  ;;  %v3671_v42 = vsel %vm1193_vm0, %v8559_v24, %v3663_v6  ;;  %v3664_v32 = vrot.slane %v8561_v5, 6 }
 0xa54   :  { %v4031_v4 = vpop.f32.mrf.mxu0  ;;  %v4072_v25 = vpop.f32.mrf.mxu1  ;;  %v4077_v44 = vadd.f32 %v4068_v49, %v3671_v42 }
 0xa55   :  { %6693 = vpow2.f32 %v6141_v8  ;;  %v6142_v59 = vmul.f32 -1.442695, %v4076_v41  ;;  %v9906_v4 = vsub.s32 3, %v9894_v57 }
 0xa56   :  { %v4032_v53 = vpop.f32.mrf.mxu0  ;;  %v4073_v40 = vpop.f32.mrf.mxu1  ;;  %v6143_v41 = vmul.f32 -1.442695, %v4077_v44  ;;  %v9909_v44 = vld [vmem:[#allocation56_spill] sm:$0xff] }
 0xa57   :  { %6695 = vpow2.f32 %v6142_v59  ;;  %v2828_v25 = vrot.slane %v2809_v28, %v9906_v4 }
 0xa58   :  { %6697 = vpow2.f32 %v6143_v41 }
 0xa59   :  { %v8568_v50 = vadd.f32 %v3570_v30, %v2828_v25  ;;  %v9908_v25 = vld [vmem:[#allocation57_spill] sm:$0xff] }
 0xa5b   :  { %v3672_v8 = vsel %vm1193_vm0, %v8568_v50, %v3664_v32 }
 0xa5c   :  { %v4078_v39 = vadd.f32 %v4070_v9, %v3672_v8 }
 0xa62   :  { %v6694_v59 = vpop.eup %6693 }
 0xa63   :  { %v4088_v31 = vadd.f32 1.0, %v6694_v59  ;;  %v9910_v59 = vld [vmem:[#allocation40_spill] sm:$0xff] }
 0xa64   :  { %v6696_v47 = vpop.eup %6695 }
 0xa65   :  { %6699 = vrcp.f32 %v4088_v31  ;;  %v4089_v57 = vadd.f32 1.0, %v6696_v47  ;;  %v6698_v28 = vpop.eup %6697  ;;  %v9912_v31 = vld [vmem:[#allocation43_spill] sm:$0xff]  ;;  %v9913_v47 = vld [vmem:[#allocation44_spill] sm:$0xff] }
 0xa66   :  { %6701 = vtanh.f32 %v4078_v39  ;;  %v4090_v33 = vadd.f32 1.0, %v6698_v28  ;;  %v9911_v39 = vld [vmem:[#allocation41_spill] sm:$0xff]  ;;  %v9915_v28 = vld [vmem:[#allocation46_spill] sm:$0xff] }
 0xa67   :  { %6703 = vrcp.f32 %v4089_v57  ;;  %v9914_v57 = vld [vmem:[#allocation45_spill] sm:$0xff] }
 0xa68   :  { %6705 = vrcp.f32 %v4090_v33  ;;  %v9919_v33 = vld [vmem:[#allocation27_spill] sm:$0xff] }
 0xa72   :  { %v6700_v51 = vpop.eup %6699 }
 0xa73   :  { %v6702_v49 = vpop.eup %6701 }
 0xa74   :  { %v6704_v37 = vpop.eup %6703  ;;  %v4099_v53 = vmul.f32 %v6702_v49, %v6700_v51  ;;  %v9916_v51 = vld [vmem:[#allocation47_spill] sm:$0xff]  ;;  %v9917_v49 = vld [vmem:[#allocation48_spill] sm:$0xff] }
 0xa75   :  { %v4098_v30 = vmul.f32 0.0, %v6704_v37  ;;  %v6706_v9 = vpop.eup %6705  ;;  %v9918_v37 = vld [vmem:[#allocation49_spill] sm:$0xff] }
 0xa77   :  { %v8572_v40 = vadd.f32 %v4099_v53, %v4098_v30  ;;  %v9920_v30 = vld [vmem:[#allocation28_spill] sm:$0xff]  ;;  %v9921_v53 = vld [vmem:[#allocation29_spill] sm:$0xff] }
 0xa79   :  { %6707 = vtanh.f32 %v8572_v40 }
 0xa86   :  { %v6708_v6 = vpop.eup %6707 }
 0xa87   :  { %v8575_v4 = vmul.f32 %v6708_v6, %v6706_v9  ;;  %v9922_v9 = vld [vmem:[#allocation30_spill] sm:$0xff]  ;;  %v9923_v6 = vld [vmem:[#allocation31_spill] sm:$0xff] }
 0xa89   :  { %9907 = vst [vmem:[#allocation63_spill] sm:$0xff] %v8575_v4  ;;  %v4104_v42 = vmul.f32 %v9908_v25, %v8575_v4  ;;  %v4103_v32 = vmul.f32 %v9909_v44, %v8575_v4  ;;  %v9928_v4 = vld [vmem:[#allocation36_spill] sm:$0xff] }
 0xa8b   :  { %v4106_v41 = vpack.c.bf16 %v4104_v42, %v4104_v42  ;;  %v4105_v8 = vpack.c.bf16 %v4103_v32, %v4103_v32  ;;  %v9924_v42 = vld [vmem:[#allocation32_spill] sm:$0xff]  ;;  %v9925_v32 = vld [vmem:[#allocation33_spill] sm:$0xff] }
 0xa8d   :  { %4163 = vmatprep.mubr.bf16.mxu0 %v4106_v41  ;;  %4204 = vmatprep.mubr.bf16.mxu1 %v4106_v41  ;;  %v9926_v41 = vld [vmem:[#allocation34_spill] sm:$0xff] }
 0xa8e   :  { %4164 = vmatmul.mubr.bf16.vlgmr.msra.gmra.mxu0 %v4105_v8  ;;  %4205 = vmatmul.mubr.bf16.vlgmr.msra.gmra.mxu1 %v4105_v8  ;;  %v9927_v8 = vld [vmem:[#allocation35_spill] sm:$0xff] }
 0xa8f   :  { %4266 = vmatpush1.bf16.msra.mxu0 %v8270_v43  ;;  %4307 = vmatpush1.bf16.msra.mxu1 %v8272_v54 }
 0xa90   :  { %4267 = vmatprep.subr.bf16.mxu0 %v8276_v45  ;;  %4308 = vmatprep.subr.bf16.mxu1 %v8278_v60 }
 0xa93   :  { %4268 = vmatpush1.bf16.msra.mxu0 %v8284_v21  ;;  %4309 = vmatpush1.bf16.msra.mxu1 %v8286_v15 }
 0xa94   :  { %4269 = vmatprep.subr.bf16.mxu0 %v8290_v12  ;;  %4310 = vmatprep.subr.bf16.mxu1 %v8292_v23 }
 0xa97   :  { %4270 = vmatpush1.bf16.msra.mxu0 %v8298_v62  ;;  %4311 = vmatpush1.bf16.msra.mxu1 %v8300_v46 }
 0xa98   :  { %4271 = vmatprep.subr.bf16.mxu0 %v8304_v58  ;;  %4312 = vmatprep.subr.bf16.mxu1 %v8306_v17 }
 0xa9b   :  { %4272 = vmatpush1.bf16.msra.mxu0 %v8310_v63  ;;  %4313 = vmatpush1.bf16.msra.mxu1 %v8312_v52 }
 0xa9c   :  { %4273 = vmatprep.subr.bf16.mxu0 %v8316_v0  ;;  %4314 = vmatprep.subr.bf16.mxu1 %v8318_v56 }
 0xa9f   :  { %4274 = vmatpush1.bf16.msra.mxu0 %v8322_v2  ;;  %4315 = vmatpush1.bf16.msra.mxu1 %v8324_v11 }
 0xaa0   :  { %4275 = vmatprep.subr.bf16.mxu0 %v8328_v10  ;;  %4316 = vmatprep.subr.bf16.mxu1 %v8330_v38 }
 0xaa3   :  { %4276 = vmatpush1.bf16.msra.mxu0 %v8334_v27  ;;  %4317 = vmatpush1.bf16.msra.mxu1 %v8336_v35 }
 0xaa4   :  { %4277 = vmatprep.subr.bf16.mxu0 %v8340_v48  ;;  %4318 = vmatprep.subr.bf16.mxu1 %v8342_v36 }
 0xaa7   :  { %4278 = vmatpush1.bf16.msra.mxu0 %v8346_v14  ;;  %4319 = vmatpush1.bf16.msra.mxu1 %v8348_v7 }
 0xaa8   :  { %4279 = vmatprep.subr.bf16.mxu0 %v8352_v13  ;;  %4320 = vmatprep.subr.bf16.mxu1 %v8354_v3 }
 0xaab   :  { %4280 = vmatpush1.bf16.msra.mxu0 %v8358_v18  ;;  %4321 = vmatpush1.bf16.msra.mxu1 %v8360_v19 }
 0xaac   :  { %4281 = vmatprep.subr.bf16.mxu0 %v8364_v20  ;;  %4322 = vmatprep.subr.bf16.mxu1 %v8366_v22 }
 0xaaf   :  { %4282 = vmatpush2.bf16.msra.mxu0 %v8370_v1  ;;  %4323 = vmatpush2.bf16.msra.mxu1 %v8372_v61 }
 0xab0   :  { %4283 = vmatprep.subr.bf16.mxu0 %v8376_v16  ;;  %4324 = vmatprep.subr.bf16.mxu1 %v8378_v34 }
 0xab3   :  { %4284 = vmatpush2.bf16.msra.mxu0 %v8382_v29  ;;  %4325 = vmatpush2.bf16.msra.mxu1 %v8384_v26 }
 0xab4   :  { %4285 = vmatprep.subr.bf16.mxu0 %v9910_v59  ;;  %4326 = vmatprep.subr.bf16.mxu1 %v9911_v39 }
 0xab7   :  { %4286 = vmatpush2.bf16.msra.mxu0 %v9912_v31  ;;  %4327 = vmatpush2.bf16.msra.mxu1 %v9913_v47 }
 0xab8   :  { %4287 = vmatprep.subr.bf16.mxu0 %v9914_v57  ;;  %4328 = vmatprep.subr.bf16.mxu1 %v9915_v28  ;;  %v9939_v57 = vld [vmem:[#allocation54_spill] sm:$0xff] }
 0xabb   :  { %4288 = vmatpush2.bf16.msra.mxu0 %v9916_v51  ;;  %4329 = vmatpush2.bf16.msra.mxu1 %v9917_v49  ;;  %v9937_v49 = vld [vmem:[#allocation53_spill] sm:$0xff]  ;;  %v9938_v51 = vld [vmem:[#allocation55_spill] sm:$0xff] }
 0xabc   :  { %4289 = vmatprep.subr.bf16.mxu0 %v9918_v37  ;;  %4330 = vmatprep.subr.bf16.mxu1 %v9919_v33  ;;  %v9929_v37 = vld [vmem:[#allocation37_spill] sm:$0xff]  ;;  %v9930_v33 = vld [vmem:[#allocation38_spill] sm:$0xff] }
 0xabf   :  { %4290 = vmatpush2.bf16.msra.mxu0 %v9920_v30  ;;  %4331 = vmatpush2.bf16.msra.mxu1 %v9921_v53  ;;  %v9931_v30 = vld [vmem:[#allocation59_spill] sm:$0xff]  ;;  %v9932_v53 = vld [vmem:[#allocation60_spill] sm:$0xff] }
 0xac0   :  { %4291 = vmatprep.subr.bf16.mxu0 %v9922_v9  ;;  %4332 = vmatprep.subr.bf16.mxu1 %v9923_v6  ;;  %v9933_v9 = vld [vmem:[#allocation61_spill] sm:$0xff]  ;;  %v9934_v6 = vld [vmem:[#allocation24_spill] sm:$0xff] }
 0xac3   :  { %4292 = vmatpush2.bf16.msra.mxu0 %v9924_v42  ;;  %4333 = vmatpush2.bf16.msra.mxu1 %v9925_v32  ;;  %v9935_v42 = vld [vmem:[#allocation25_spill] sm:$0xff]  ;;  %v9936_v32 = vld [vmem:[#allocation62_spill] sm:$0xff] }
 0xac4   :  { %4293 = vmatprep.subr.bf16.mxu0 %v9926_v41  ;;  %4334 = vmatprep.subr.bf16.mxu1 %v9927_v8  ;;  %v4119_v41 = vrot.slane %v9936_v32, 5  ;;  %v4111_v8 = vrot.slane %v9937_v49, 1  ;;  %v4121_v49 = vrot.slane %v8552_v55, 5 }
 0xac7   :  { %4294 = vmatpush2.bf16.msra.mxu0 %v9928_v4  ;;  %4335 = vmatpush2.bf16.msra.mxu1 %v9929_v37  ;;  %v4120_v4 = vrot.slane %v9938_v51, 5  ;;  %v4127_v37 = vsel %vm1193_vm0, %v4111_v8, %v4119_v41  ;;  %v4113_v41 = vrot.slane %v8559_v24, 1 }
 0xac8   :  { %4295 = vmatprep.subr.bf16.mxu0 %v9930_v33  ;;  %4336 = vmatprep.subr.bf16.mxu1 %v9931_v30  ;;  %v4112_v30 = vrot.slane %v9939_v57, 1 }
 0xac9   :  { %v4129_v8 = vsel %vm1193_vm0, %v4113_v41, %v4121_v49 }
 0xacb   :  { %4296 = vmatpush2.bf16.msra.mxu0 %v9932_v53  ;;  %4337 = vmatpush2.bf16.msra.mxu1 %v9933_v9  ;;  %v4128_v53 = vsel %vm1193_vm0, %v4112_v30, %v4120_v4  ;;  %v4122_v4 = vrot.slane %v8561_v5, 5 }
 0xacc   :  { %4399 = vmatprep.subr.bf16.mxu0 %v9934_v6  ;;  %4440 = vmatprep.subr.bf16.mxu1 %v9935_v42 }
 0xb4e   :  { %v4165_v28 = vpop.f32.mrf.mxu0  ;;  %v4206_v33 = vpop.f32.mrf.mxu1 }
 0xb4f   :  { %v4213_v47 = vadd.f32 %v4165_v28, %v4127_v37  ;;  %v4215_v28 = vadd.f32 %v4206_v33, %v4129_v8  ;;  %v4114_v37 = vrot.slane %v8568_v50, 1 }
 0xb50   :  { %v4167_v9 = vpop.f32.mrf.mxu0  ;;  %v4208_v31 = vpop.f32.mrf.mxu1 }
 0xb51   :  { %v6144_v6 = vmul.f32 -1.442695, %v4213_v47  ;;  %v4214_v39 = vadd.f32 %v4167_v9, %v4128_v53  ;;  %v6146_v47 = vmul.f32 -1.442695, %v4215_v28  ;;  %v4130_v30 = vsel %vm1193_vm0, %v4114_v37, %v4122_v4 }
 0xb52   :  { %v4169_v42 = vpop.f32.mrf.mxu0  ;;  %v4210_v59 = vpop.f32.mrf.mxu1 }
 0xb53   :  { %6709 = vpow2.f32 %v6144_v6  ;;  %v6145_v32 = vmul.f32 -1.442695, %v4214_v39  ;;  %v4216_v59 = vadd.f32 %v4208_v31, %v4130_v30 }
 0xb54   :  { %v4170_v51 = vpop.f32.mrf.mxu0  ;;  %v4211_v26 = vpop.f32.mrf.mxu1 }
 0xb55   :  { %6711 = vpow2.f32 %v6145_v32 }
 0xb56   :  { %6713 = vpow2.f32 %v6146_v47 }
 0xb57   :  { %6715 = vtanh.f32 %v4216_v59 }
 0xb60   :  { %v6710_v53 = vpop.eup %6709 }
 0xb61   :  { %v4226_v39 = vadd.f32 1.0, %v6710_v53  ;;  %v9960_v53 = vld [vmem:[#allocation36_spill] sm:$0xff] }
 0xb62   :  { %v6712_v9 = vpop.eup %6711 }
 0xb63   :  { %6717 = vrcp.f32 %v4226_v39  ;;  %v4227_v26 = vadd.f32 1.0, %v6712_v9  ;;  %v6714_v51 = vpop.eup %6713  ;;  %v9961_v39 = vld [vmem:[#allocation37_spill] sm:$0xff]  ;;  %v9962_v9 = vld [vmem:[#allocation38_spill] sm:$0xff] }
 0xb64   :  { %v6716_v6 = vpop.eup %6715  ;;  %v4228_v32 = vadd.f32 1.0, %v6714_v51  ;;  %v9964_v51 = vld [vmem:[#allocation60_spill] sm:$0xff] }
 0xb65   :  { %6719 = vrcp.f32 %v4227_v26  ;;  %v9963_v26 = vld [vmem:[#allocation59_spill] sm:$0xff] }
 0xb66   :  { %6721 = vrcp.f32 %v4228_v32 }
 0xb70   :  { %v6718_v49 = vpop.eup %6717 }
 0xb71   :  { %v4237_v33 = vmul.f32 %v6718_v49, %v6716_v6  ;;  %v9965_v6 = vld [vmem:[#allocation61_spill] sm:$0xff]  ;;  %v9966_v49 = vld [vmem:[#allocation24_spill] sm:$0xff] }
 0xb72   :  { %v6720_v42 = vpop.eup %6719 }
 0xb73   :  { %v4236_v41 = vmul.f32 %v6720_v42, %v8572_v40  ;;  %v6722_v31 = vpop.eup %6721  ;;  %v9959_v40 = vld [vmem:[#allocation35_spill] sm:$0xff]  ;;  %v9968_v42 = vld [vmem:[#allocation62_spill] sm:$0xff] }
 0xb74   :  { %v4253_v32 = vrot.slane %v9968_v42, 4 }
 0xb75   :  { %v8658_v8 = vadd.f32 %v4237_v33, %v4236_v41  ;;  %v9967_v33 = vld [vmem:[#allocation25_spill] sm:$0xff] }
 0xb76   :  { %v9969_v41 = vld [vmem:[#allocation53_spill] sm:$0xff] }
 0xb77   :  { %6723 = vtanh.f32 %v8658_v8 }
 0xb84   :  { %v6724_v28 = vpop.eup %6723 }
 0xb85   :  { %v8661_v4 = vmul.f32 %v6724_v28, %v6722_v31  ;;  %v4245_v31 = vrot.slane %v9969_v41, 2  ;;  %v9970_v28 = vld [vmem:[#allocation55_spill] sm:$0xff]  ;;  %v4255_v41 = vrot.slane %v8552_v55, 4 }
 0xb87   :  { %9940 = vst [vmem:[#allocation26_spill] sm:$0xff] %v8661_v4  ;;  %v4242_v37 = vmul.f32 %v9908_v25, %v8661_v4  ;;  %v4241_v47 = vmul.f32 %v9909_v44, %v8661_v4 }
 0xb89   :  { %v4244_v30 = vpack.c.bf16 %v4242_v37, %v4242_v37  ;;  %v4243_v59 = vpack.c.bf16 %v4241_v47, %v4241_v47  ;;  %v4254_v37 = vrot.slane %v9970_v28, 4  ;;  %v4261_v47 = vsel %vm1193_vm0, %v4245_v31, %v4253_v32 }
 0xb8a   :  { %v4247_v32 = vrot.slane %v8559_v24, 2 }
 0xb8b   :  { %4297 = vmatprep.mubr.bf16.mxu0 %v4244_v30  ;;  %4338 = vmatprep.mubr.bf16.mxu1 %v4244_v30 }
 0xb8c   :  { %4298 = vmatmul.mubr.bf16.vlgmr.msra.gmra.mxu0 %v4243_v59  ;;  %4339 = vmatmul.mubr.bf16.vlgmr.msra.gmra.mxu1 %v4243_v59  ;;  %v4263_v31 = vsel %vm1193_vm0, %v4247_v32, %v4255_v41 }
 0xb8d   :  { %4400 = vmatpush1.bf16.msra.mxu0 %v8270_v43  ;;  %4441 = vmatpush1.bf16.msra.mxu1 %v8272_v54  ;;  %v9941_v43 = vld [vmem:[#allocation39_spill] sm:$0xff]  ;;  %v9942_v54 = vld [vmem:[#allocation40_spill] sm:$0xff] }
 0xb8e   :  { %4401 = vmatprep.subr.bf16.mxu0 %v8276_v45  ;;  %4442 = vmatprep.subr.bf16.mxu1 %v8278_v60  ;;  %v9943_v45 = vld [vmem:[#allocation41_spill] sm:$0xff]  ;;  %v9944_v60 = vld [vmem:[#allocation43_spill] sm:$0xff] }
 0xb91   :  { %4402 = vmatpush1.bf16.msra.mxu0 %v8284_v21  ;;  %4443 = vmatpush1.bf16.msra.mxu1 %v8286_v15  ;;  %v9945_v21 = vld [vmem:[#allocation44_spill] sm:$0xff]  ;;  %v9946_v15 = vld [vmem:[#allocation45_spill] sm:$0xff] }
 0xb92   :  { %4403 = vmatprep.subr.bf16.mxu0 %v8290_v12  ;;  %4444 = vmatprep.subr.bf16.mxu1 %v8292_v23  ;;  %v9947_v12 = vld [vmem:[#allocation46_spill] sm:$0xff]  ;;  %v9948_v23 = vld [vmem:[#allocation47_spill] sm:$0xff] }
 0xb95   :  { %4404 = vmatpush1.bf16.msra.mxu0 %v8298_v62  ;;  %4445 = vmatpush1.bf16.msra.mxu1 %v8300_v46  ;;  %v9949_v62 = vld [vmem:[#allocation48_spill] sm:$0xff]  ;;  %v9950_v46 = vld [vmem:[#allocation49_spill] sm:$0xff] }
 0xb96   :  { %4405 = vmatprep.subr.bf16.mxu0 %v8304_v58  ;;  %4446 = vmatprep.subr.bf16.mxu1 %v8306_v17  ;;  %v9951_v58 = vld [vmem:[#allocation27_spill] sm:$0xff]  ;;  %v9952_v17 = vld [vmem:[#allocation28_spill] sm:$0xff] }
 0xb99   :  { %4406 = vmatpush1.bf16.msra.mxu0 %v8310_v63  ;;  %4447 = vmatpush1.bf16.msra.mxu1 %v8312_v52  ;;  %v9953_v63 = vld [vmem:[#allocation29_spill] sm:$0xff]  ;;  %v9954_v52 = vld [vmem:[#allocation30_spill] sm:$0xff] }
 0xb9a   :  { %4407 = vmatprep.subr.bf16.mxu0 %v8316_v0  ;;  %4448 = vmatprep.subr.bf16.mxu1 %v8318_v56  ;;  %v9955_v0 = vld [vmem:[#allocation31_spill] sm:$0xff]  ;;  %v9956_v56 = vld [vmem:[#allocation32_spill] sm:$0xff] }
 0xb9d   :  { %4408 = vmatpush1.bf16.msra.mxu0 %v8322_v2  ;;  %4449 = vmatpush1.bf16.msra.mxu1 %v8324_v11  ;;  %v9957_v2 = vld [vmem:[#allocation33_spill] sm:$0xff]  ;;  %v9958_v11 = vld [vmem:[#allocation34_spill] sm:$0xff] }
 0xb9e   :  { %4409 = vmatprep.subr.bf16.mxu0 %v8328_v10  ;;  %4450 = vmatprep.subr.bf16.mxu1 %v8330_v38 }
 0xba1   :  { %4410 = vmatpush1.bf16.msra.mxu0 %v8334_v27  ;;  %4451 = vmatpush1.bf16.msra.mxu1 %v8336_v35 }
 0xba2   :  { %4411 = vmatprep.subr.bf16.mxu0 %v8340_v48  ;;  %4452 = vmatprep.subr.bf16.mxu1 %v8342_v36 }
 0xba5   :  { %4412 = vmatpush1.bf16.msra.mxu0 %v8346_v14  ;;  %4453 = vmatpush1.bf16.msra.mxu1 %v8348_v7 }
 0xba6   :  { %4413 = vmatprep.subr.bf16.mxu0 %v8352_v13  ;;  %4454 = vmatprep.subr.bf16.mxu1 %v8354_v3 }
 0xba9   :  { %4414 = vmatpush1.bf16.msra.mxu0 %v8358_v18  ;;  %4455 = vmatpush1.bf16.msra.mxu1 %v8360_v19 }
 0xbaa   :  { %4415 = vmatprep.subr.bf16.mxu0 %v8364_v20  ;;  %4456 = vmatprep.subr.bf16.mxu1 %v8366_v22 }
 0xbad   :  { %4416 = vmatpush2.bf16.msra.mxu0 %v8370_v1  ;;  %4457 = vmatpush2.bf16.msra.mxu1 %v8372_v61 }
 0xbae   :  { %4417 = vmatprep.subr.bf16.mxu0 %v8376_v16  ;;  %4458 = vmatprep.subr.bf16.mxu1 %v8378_v34 }
 0xbb1   :  { %4418 = vmatpush2.bf16.msra.mxu0 %v8382_v29  ;;  %4459 = vmatpush2.bf16.msra.mxu1 %v9941_v43 }
 0xbb2   :  { %4419 = vmatprep.subr.bf16.mxu0 %v9942_v54  ;;  %4460 = vmatprep.subr.bf16.mxu1 %v9943_v45 }
 0xbb5   :  { %4420 = vmatpush2.bf16.msra.mxu0 %v9944_v60  ;;  %4461 = vmatpush2.bf16.msra.mxu1 %v9945_v21 }
 0xbb6   :  { %4421 = vmatprep.subr.bf16.mxu0 %v9946_v15  ;;  %4462 = vmatprep.subr.bf16.mxu1 %v9947_v12 }
 0xbb9   :  { %4422 = vmatpush2.bf16.msra.mxu0 %v9948_v23  ;;  %4463 = vmatpush2.bf16.msra.mxu1 %v9949_v62 }
 0xbba   :  { %4423 = vmatprep.subr.bf16.mxu0 %v9950_v46  ;;  %4464 = vmatprep.subr.bf16.mxu1 %v9951_v58 }
 0xbbd   :  { %4424 = vmatpush2.bf16.msra.mxu0 %v9952_v17  ;;  %4465 = vmatpush2.bf16.msra.mxu1 %v9953_v63 }
 0xbbe   :  { %4425 = vmatprep.subr.bf16.mxu0 %v9954_v52  ;;  %4466 = vmatprep.subr.bf16.mxu1 %v9955_v0 }
 0xbc1   :  { %4426 = vmatpush2.bf16.msra.mxu0 %v9956_v56  ;;  %4467 = vmatpush2.bf16.msra.mxu1 %v9957_v2 }
 0xbc2   :  { %4427 = vmatprep.subr.bf16.mxu0 %v9958_v11  ;;  %4468 = vmatprep.subr.bf16.mxu1 %v9959_v40 }
 0xbc5   :  { %4428 = vmatpush2.bf16.msra.mxu0 %v9960_v53  ;;  %4469 = vmatpush2.bf16.msra.mxu1 %v9961_v39 }
 0xbc6   :  { %4429 = vmatprep.subr.bf16.mxu0 %v9962_v9  ;;  %4470 = vmatprep.subr.bf16.mxu1 %v9963_v26  ;;  %v4246_v26 = vrot.slane %v9939_v57, 2 }
 0xbc9   :  { %4430 = vmatpush2.bf16.msra.mxu0 %v9964_v51  ;;  %4471 = vmatpush2.bf16.msra.mxu1 %v9965_v6  ;;  %v4262_v51 = vsel %vm1193_vm0, %v4246_v26, %v4254_v37  ;;  %v4256_v26 = vrot.slane %v8561_v5, 4  ;;  %v4248_v37 = vrot.slane %v8568_v50, 2 }
 0xbca   :  { %4533 = vmatprep.subr.bf16.mxu0 %v9966_v49  ;;  %4574 = vmatprep.subr.bf16.mxu1 %v9967_v33 }
 0xc4c   :  { %v4299_v30 = vpop.f32.mrf.mxu0  ;;  %v4340_v59 = vpop.f32.mrf.mxu1 }
 0xc4d   :  { %v4347_v9 = vadd.f32 %v4299_v30, %v4261_v47  ;;  %v4349_v47 = vadd.f32 %v4340_v59, %v4263_v31 }
 0xc4e   :  { %v4301_v6 = vpop.f32.mrf.mxu0  ;;  %v4342_v39 = vpop.f32.mrf.mxu1 }
 0xc4f   :  { %v6147_v49 = vmul.f32 -1.442695, %v4347_v9  ;;  %v4348_v53 = vadd.f32 %v4301_v6, %v4262_v51  ;;  %v6149_v9 = vmul.f32 -1.442695, %v4349_v47  ;;  %v4264_v51 = vsel %vm1193_vm0, %v4248_v37, %v4256_v26 }
 0xc50   :  { %v4303_v33 = vpop.f32.mrf.mxu0  ;;  %v4344_v40 = vpop.f32.mrf.mxu1  ;;  %v5038_v26 = vrot.slane %v8661_v4, 7  ;;  %v8811_v4 = vld [vmem:[#allocation10 + $0x268] ss:$16 sps:$4 sm:$0xff]  }
 0xc51   :  { %6725 = vpow2.f32 %v6147_v49  ;;  %v6148_v42 = vmul.f32 -1.442695, %v4348_v53  ;;  %v4350_v40 = vadd.f32 %v4342_v39, %v4264_v51 }
 0xc52   :  { %v4304_v28 = vpop.f32.mrf.mxu0  ;;  %v4345_v11 = vpop.f32.mrf.mxu1 }
 0xc53   :  { %6727 = vpow2.f32 %v6148_v42 }
 0xc54   :  { %6729 = vpow2.f32 %v6149_v9 }
 0xc55   :  { %6731 = vtanh.f32 %v4350_v40 }
 0xc5e   :  { %v6726_v6 = vpop.eup %6725 }
 0xc5f   :  { %v4360_v53 = vadd.f32 1.0, %v6726_v6 }
 0xc60   :  { %v6728_v30 = vpop.eup %6727 }
 0xc61   :  { %6733 = vrcp.f32 %v4360_v53  ;;  %v4361_v11 = vadd.f32 1.0, %v6728_v30  ;;  %v6730_v42 = vpop.eup %6729 }
 0xc62   :  { %v6732_v28 = vpop.eup %6731  ;;  %v4362_v33 = vadd.f32 1.0, %v6730_v42  ;;  %v8760_v42 = vld [vmem:[#allocation10 + $0x2e0] ss:$16 sps:$4 sm:$0xff]  }
 0xc63   :  { %6735 = vrcp.f32 %v4361_v11 }
 0xc64   :  { %6737 = vrcp.f32 %v4362_v33  ;;  %v8775_v33 = vld [vmem:[#allocation10 + $0x2c8] ss:$16 sps:$4 sm:$0xff]  }
 0xc6e   :  { %v6734_v41 = vpop.eup %6733 }
 0xc6f   :  { %v4371_v59 = vmul.f32 %v6734_v41, %v6732_v28  ;;  %v8763_v28 = vld [vmem:[#allocation10 + $0x2e8] ss:$16 sps:$4 sm:$0xff]   ;;  %v8766_v41 = vld [vmem:[#allocation10 + $0x2c4] ss:$16 sps:$4 sm:$0xff]  }
 0xc70   :  { %v6736_v49 = vpop.eup %6735 }
 0xc71   :  { %v4370_v32 = vmul.f32 %v6736_v49, %v8658_v8  ;;  %v6738_v39 = vpop.eup %6737  ;;  %v9972_v8 = vld [vmem:[#allocation63_spill] sm:$0xff] }
 0xc72   :  { %v5058_v6 = vsel %vm1193_vm0, %v9972_v8, %v5038_v26  ;;  %v8772_v49 = vld [vmem:[#allocation10 + $0x2c0] ss:$16 sps:$4 sm:$0xff]   ;;  %v8787_v26 = vld [vmem:[#allocation10 + $0x2a8] ss:$16 sps:$4 sm:$0xff]  }
 0xc73   :  { %v8744_v31 = vadd.f32 %v4371_v59, %v4370_v32  ;;  %v8769_v59 = vld [vmem:[#allocation10 + $0x2cc] ss:$16 sps:$4 sm:$0xff]   ;;  %v8778_v32 = vld [vmem:[#allocation10 + $0x2a4] ss:$16 sps:$4 sm:$0xff]   ;;  %v8808_v8 = vld [vmem:[#allocation10 + $0x260] ss:$16 sps:$4 sm:$0xff]  }
 0xc75   :  { %6739 = vtanh.f32 %v8744_v31 }
 0xc82   :  { %v6740_v47 = vpop.eup %6739 }
 0xc83   :  { %v8748_v37 = vmul.f32 %v6740_v47, %v6738_v39  ;;  %v8781_v39 = vld [vmem:[#allocation10 + $0x2ac] ss:$16 sps:$4 sm:$0xff]   ;;  %v8784_v47 = vld [vmem:[#allocation10 + $0x2a0] ss:$16 sps:$4 sm:$0xff]  }
 0xc85   :  { %9971 = vst [vmem:[#allocation23_spill] sm:$0xff] %v8748_v37  ;;  %v4376_v9 = vmul.f32 %v9908_v25, %v8748_v37  ;;  %v5041_v51 = vrot.slane %v8748_v37, 6  ;;  %v4375_v40 = vmul.f32 %v9909_v44, %v8748_v37  ;;  %v9004_v37 = vld [vmem:[#allocation10 + $0x368] ss:$16 sps:$4 sm:$0xff]  }
 0xc86   :  { %10000 = vst [vmem:[#allocation27_spill] sm:$0xff] %v9004_v37 }
 0xc87   :  { %v4378_v53 = vpack.c.bf16 %v4376_v9, %v4376_v9  ;;  %v4377_v30 = vpack.c.bf16 %v4375_v40, %v4375_v40  ;;  %v8758_v11 = vsel %vm2584_vm6, %v5058_v6, %v5041_v51  ;;  %v8790_v9 = vld [vmem:[#allocation10 + $0x284] ss:$16 sps:$4 sm:$0xff]   ;;  %v8793_v51 = vld [vmem:[#allocation10 + $0x28c] ss:$16 sps:$4 sm:$0xff]   ;;  %v8796_v40 = vld [vmem:[#allocation10 + $0x280] ss:$16 sps:$4 sm:$0xff]  }
 0xc88   :  { %v8799_v6 = vld [vmem:[#allocation10 + $0x288] ss:$16 sps:$4 sm:$0xff]  }
 0xc89   :  { %4431 = vmatprep.mubr.bf16.mxu0 %v4378_v53  ;;  %4472 = vmatprep.mubr.bf16.mxu1 %v4378_v53  ;;  %v8802_v53 = vld [vmem:[#allocation10 + $0x264] ss:$16 sps:$4 sm:$0xff]  }
 0xc8a   :  { %4432 = vmatmul.mubr.bf16.vlgmr.msra.gmra.mxu0 %v4377_v30  ;;  %4473 = vmatmul.mubr.bf16.vlgmr.msra.gmra.mxu1 %v4377_v30  ;;  %v8805_v30 = vld [vmem:[#allocation10 + $0x26c] ss:$16 sps:$4 sm:$0xff]  }
 0xc8b   :  { %4534 = vmatpush1.bf16.msra.mxu0 %v8760_v42  ;;  %4575 = vmatpush1.bf16.msra.mxu1 %v8763_v28 }
 0xc8c   :  { %4535 = vmatprep.subr.bf16.mxu0 %v8766_v41  ;;  %4576 = vmatprep.subr.bf16.mxu1 %v8769_v59 }
 0xc8f   :  { %4536 = vmatpush1.bf16.msra.mxu0 %v8772_v49  ;;  %4577 = vmatpush1.bf16.msra.mxu1 %v8775_v33 }
 0xc90   :  { %4537 = vmatprep.subr.bf16.mxu0 %v8778_v32  ;;  %4578 = vmatprep.subr.bf16.mxu1 %v8781_v39 }
 0xc93   :  { %4538 = vmatpush1.bf16.msra.mxu0 %v8784_v47  ;;  %4579 = vmatpush1.bf16.msra.mxu1 %v8787_v26 }
 0xc94   :  { %4539 = vmatprep.subr.bf16.mxu0 %v8790_v9  ;;  %4580 = vmatprep.subr.bf16.mxu1 %v8793_v51 }
 0xc97   :  { %4540 = vmatpush1.bf16.msra.mxu0 %v8796_v40  ;;  %4581 = vmatpush1.bf16.msra.mxu1 %v8799_v6 }
 0xc98   :  { %4541 = vmatprep.subr.bf16.mxu0 %v8802_v53  ;;  %4582 = vmatprep.subr.bf16.mxu1 %v8805_v30 }
 0xc9b   :  { %4542 = vmatpush1.bf16.msra.mxu0 %v8808_v8  ;;  %4583 = vmatpush1.bf16.msra.mxu1 %v8811_v4 }
 0xc9c   :  { %4543 = vmatprep.subr.bf16.mxu0 %v8328_v10  ;;  %4584 = vmatprep.subr.bf16.mxu1 %v8330_v38  ;;  %v9973_v10 = vld [vmem:[#allocation34_spill] sm:$0xff]  ;;  %v9974_v38 = vld [vmem:[#allocation35_spill] sm:$0xff] }
 0xc9f   :  { %4544 = vmatpush1.bf16.msra.mxu0 %v8334_v27  ;;  %4585 = vmatpush1.bf16.msra.mxu1 %v8336_v35  ;;  %v9975_v27 = vld [vmem:[#allocation36_spill] sm:$0xff]  ;;  %v9976_v35 = vld [vmem:[#allocation37_spill] sm:$0xff] }
 0xca0   :  { %4545 = vmatprep.subr.bf16.mxu0 %v8340_v48  ;;  %4586 = vmatprep.subr.bf16.mxu1 %v8342_v36  ;;  %v9977_v48 = vld [vmem:[#allocation38_spill] sm:$0xff]  ;;  %v9978_v36 = vld [vmem:[#allocation59_spill] sm:$0xff] }
 0xca3   :  { %4546 = vmatpush1.bf16.msra.mxu0 %v8346_v14  ;;  %4587 = vmatpush1.bf16.msra.mxu1 %v8348_v7  ;;  %v9979_v14 = vld [vmem:[#allocation60_spill] sm:$0xff]  ;;  %v9980_v7 = vld [vmem:[#allocation61_spill] sm:$0xff] }
 0xca4   :  { %4547 = vmatprep.subr.bf16.mxu0 %v8352_v13  ;;  %4588 = vmatprep.subr.bf16.mxu1 %v8354_v3  ;;  %v8858_v13 = vld [vmem:[#allocation10 + $0x2e4] ss:$16 sps:$4 sm:$0xff]   ;;  %v8861_v3 = vld [vmem:[#allocation10 + $0x2ec] ss:$16 sps:$4 sm:$0xff]  }
 0xca5   :  { %9981 = vst [vmem:[#allocation42_spill] sm:$0xff] %v8858_v13  ;;  %9982 = vst [vmem:[#allocation58_spill] sm:$0xff] %v8861_v3 }
 0xca7   :  { %4548 = vmatpush1.bf16.msra.mxu0 %v8358_v18  ;;  %4589 = vmatpush1.bf16.msra.mxu1 %v8360_v19  ;;  %v9983_v18 = vld [vmem:[#allocation62_spill] sm:$0xff] }
 0xca8   :  { %4549 = vmatprep.subr.bf16.mxu0 %v8364_v20  ;;  %4590 = vmatprep.subr.bf16.mxu1 %v8366_v22  ;;  %v4387_v19 = vrot.slane %v9983_v18, 3  ;;  %v9984_v20 = vld [vmem:[#allocation53_spill] sm:$0xff] }
 0xca9   :  { %v4379_v22 = vrot.slane %v9984_v20, 3 }
 0xcab   :  { %4550 = vmatpush2.bf16.msra.mxu0 %v8370_v1  ;;  %4591 = vmatpush2.bf16.msra.mxu1 %v8372_v61  ;;  %v9985_v1 = vld [vmem:[#allocation55_spill] sm:$0xff] }
 0xcac   :  { %4551 = vmatprep.subr.bf16.mxu0 %v8376_v16  ;;  %4592 = vmatprep.subr.bf16.mxu1 %v8378_v34  ;;  %v4388_v61 = vrot.slane %v9985_v1, 3  ;;  %v4395_v16 = vsel %vm1193_vm0, %v4379_v22, %v4387_v19 }
 0xcaf   :  { %4552 = vmatpush2.bf16.msra.mxu0 %v8382_v29  ;;  %4593 = vmatpush2.bf16.msra.mxu1 %v9941_v43  ;;  %v4380_v43 = vrot.slane %v9939_v57, 3 }
 0xcb0   :  { %4553 = vmatprep.subr.bf16.mxu0 %v9942_v54  ;;  %4594 = vmatprep.subr.bf16.mxu1 %v9943_v45 }
 0xcb1   :  { %v4396_v45 = vsel %vm1193_vm0, %v4380_v43, %v4388_v61 }
 0xcb3   :  { %4554 = vmatpush2.bf16.msra.mxu0 %v9944_v60  ;;  %4595 = vmatpush2.bf16.msra.mxu1 %v9945_v21 }
 0xcb4   :  { %4555 = vmatprep.subr.bf16.mxu0 %v9946_v15  ;;  %4596 = vmatprep.subr.bf16.mxu1 %v9947_v12 }
 0xcb7   :  { %4556 = vmatpush2.bf16.msra.mxu0 %v9948_v23  ;;  %4597 = vmatpush2.bf16.msra.mxu1 %v9949_v62 }
 0xcb8   :  { %4557 = vmatprep.subr.bf16.mxu0 %v9950_v46  ;;  %4598 = vmatprep.subr.bf16.mxu1 %v9951_v58  ;;  %v4389_v58 = vrot.slane %v8552_v55, 3 }
 0xcbb   :  { %4558 = vmatpush2.bf16.msra.mxu0 %v9952_v17  ;;  %4599 = vmatpush2.bf16.msra.mxu1 %v9953_v63 }
 0xcbc   :  { %4559 = vmatprep.subr.bf16.mxu0 %v9954_v52  ;;  %4600 = vmatprep.subr.bf16.mxu1 %v9955_v0  ;;  %v4381_v52 = vrot.slane %v8559_v24, 3 }
 0xcbe   :  { %v4397_v0 = vsel %vm1193_vm0, %v4381_v52, %v4389_v58  ;;  %v8914_v58 = vld [vmem:[#allocation10 + $0x24c] ss:$16 sps:$4 sm:$0xff]   ;;  %v8923_v52 = vld [vmem:[#allocation10 + $0x224] ss:$16 sps:$4 sm:$0xff]  }
 0xcbf   :  { %4560 = vmatpush2.bf16.msra.mxu0 %v9956_v56  ;;  %4601 = vmatpush2.bf16.msra.mxu1 %v9957_v2  ;;  %v4390_v2 = vrot.slane %v8561_v5, 3 }
 0xcc0   :  { %4561 = vmatprep.subr.bf16.mxu0 %v9973_v10  ;;  %4602 = vmatprep.subr.bf16.mxu1 %v9974_v38  ;;  %v4382_v10 = vrot.slane %v8568_v50, 3 }
 0xcc3   :  { %4562 = vmatpush2.bf16.msra.mxu0 %v9975_v27  ;;  %4603 = vmatpush2.bf16.msra.mxu1 %v9976_v35  ;;  %v4398_v27 = vsel %vm1193_vm0, %v4382_v10, %v4390_v2  ;;  %v8932_v2 = vld [vmem:[#allocation10 + $0x228] ss:$16 sps:$4 sm:$0xff]   ;;  %v8935_v10 = vld [vmem:[#allocation10 + $0x204] ss:$16 sps:$4 sm:$0xff]  }
 0xcc4   :  { %4563 = vmatprep.subr.bf16.mxu0 %v9977_v48  ;;  %4604 = vmatprep.subr.bf16.mxu1 %v9978_v36 }
 0xcc7   :  { %4564 = vmatpush2.bf16.msra.mxu0 %v9979_v14  ;;  %4605 = vmatpush2.bf16.msra.mxu1 %v9980_v7 }
 0xcc8   :  { %4667 = vmatprep.subr.bf16.mxu0 %v8858_v13  ;;  %4708 = vmatprep.subr.bf16.mxu1 %v8861_v3 }
 0xd4a   :  { %v4433_v34 = vpop.f32.mrf.mxu0  ;;  %v4474_v29 = vpop.f32.mrf.mxu1 }
 0xd4b   :  { %v4481_v54 = vadd.f32 %v4433_v34, %v4395_v16  ;;  %v4483_v56 = vadd.f32 %v4474_v29, %v4397_v0  ;;  %v8926_v0 = vld [vmem:[#allocation10 + $0x22c] ss:$16 sps:$4 sm:$0xff]  }
 0xd4c   :  { %v4435_v60 = vpop.f32.mrf.mxu0  ;;  %v4476_v21 = vpop.f32.mrf.mxu1 }
 0xd4d   :  { %v6150_v15 = vmul.f32 -1.442695, %v4481_v54  ;;  %v4482_v12 = vadd.f32 %v4435_v60, %v4396_v45  ;;  %v6152_v38 = vmul.f32 -1.442695, %v4483_v56  ;;  %v4484_v35 = vadd.f32 %v4476_v21, %v4398_v27  ;;  %v8929_v56 = vld [vmem:[#allocation10 + $0x220] ss:$16 sps:$4 sm:$0xff]  }
 0xd4e   :  { %v4437_v23 = vpop.f32.mrf.mxu0  ;;  %v4478_v62 = vpop.f32.mrf.mxu1  ;;  %v8941_v27 = vld [vmem:[#allocation10 + $0x200] ss:$16 sps:$4 sm:$0xff]  }
 0xd4f   :  { %6741 = vpow2.f32 %v6150_v15  ;;  %v6151_v46 = vmul.f32 -1.442695, %v4482_v12 }
 0xd50   :  { %v4438_v17 = vpop.f32.mrf.mxu0  ;;  %v4479_v63 = vpop.f32.mrf.mxu1 }
 0xd51   :  { %6743 = vpow2.f32 %v6151_v46  ;;  %v8917_v17 = vld [vmem:[#allocation10 + $0x240] ss:$16 sps:$4 sm:$0xff]   ;;  %v8920_v63 = vld [vmem:[#allocation10 + $0x248] ss:$16 sps:$4 sm:$0xff]  }
 0xd52   :  { %6745 = vpow2.f32 %v6152_v38  ;;  %v8938_v38 = vld [vmem:[#allocation10 + $0x20c] ss:$16 sps:$4 sm:$0xff]  }
 0xd53   :  { %6747 = vtanh.f32 %v4484_v35  ;;  %v8944_v35 = vld [vmem:[#allocation10 + $0x208] ss:$16 sps:$4 sm:$0xff]  }
 0xd5c   :  { %v6742_v48 = vpop.eup %6741 }
 0xd5d   :  { %v4494_v36 = vadd.f32 1.0, %v6742_v48  ;;  %v8947_v48 = vld [vmem:[#allocation10 + $0x3e4] ss:$16 sps:$4 sm:$0xff]  }
 0xd5e   :  { %v6744_v14 = vpop.eup %6743 }
 0xd5f   :  { %6749 = vrcp.f32 %v4494_v36  ;;  %v4495_v7 = vadd.f32 1.0, %v6744_v14  ;;  %v6746_v19 = vpop.eup %6745  ;;  %v8950_v36 = vld [vmem:[#allocation10 + $0x3ec] ss:$16 sps:$4 sm:$0xff]   ;;  %v8953_v14 = vld [vmem:[#allocation10 + $0x3e0] ss:$16 sps:$4 sm:$0xff]  }
 0xd60   :  { %v6748_v22 = vpop.eup %6747  ;;  %v4496_v29 = vadd.f32 1.0, %v6746_v19  ;;  %v8959_v19 = vld [vmem:[#allocation10 + $0x3c4] ss:$16 sps:$4 sm:$0xff]  }
 0xd61   :  { %6751 = vrcp.f32 %v4495_v7  ;;  %v8956_v7 = vld [vmem:[#allocation10 + $0x3e8] ss:$16 sps:$4 sm:$0xff]  }
 0xd62   :  { %6753 = vrcp.f32 %v4496_v29  ;;  %v8974_v29 = vld [vmem:[#allocation10 + $0x3ac] ss:$16 sps:$4 sm:$0xff]  }
 0xd63   :  { %9990 = vst [vmem:[#allocation39_spill] sm:$0xff] %v8974_v29 }
 0xd6c   :  { %v6750_v61 = vpop.eup %6749 }
 0xd6d   :  { %v4505_v16 = vmul.f32 %v6750_v61, %v6748_v22  ;;  %v8962_v22 = vld [vmem:[#allocation10 + $0x3cc] ss:$16 sps:$4 sm:$0xff]   ;;  %v8965_v61 = vld [vmem:[#allocation10 + $0x3c0] ss:$16 sps:$4 sm:$0xff]  }
 0xd6e   :  { %v6752_v34 = vpop.eup %6751  ;;  %9987 = vst [vmem:[#allocation57_spill] sm:$0xff] %v8965_v61 }
 0xd6f   :  { %v4504_v43 = vmul.f32 %v6752_v34, %v8744_v31  ;;  %v6754_v45 = vpop.eup %6753  ;;  %v8971_v34 = vld [vmem:[#allocation10 + $0x3a4] ss:$16 sps:$4 sm:$0xff]  }
 0xd70   :  { %9989 = vst [vmem:[#allocation54_spill] sm:$0xff] %v8971_v34 }
 0xd71   :  { %v8877_v54 = vadd.f32 %v4505_v16, %v4504_v43  ;;  %v8968_v16 = vld [vmem:[#allocation10 + $0x3c8] ss:$16 sps:$4 sm:$0xff]   ;;  %v8977_v43 = vld [vmem:[#allocation10 + $0x3a0] ss:$16 sps:$4 sm:$0xff]  }
 0xd72   :  { %9988 = vst [vmem:[#allocation56_spill] sm:$0xff] %v8968_v16  ;;  %9991 = vst [vmem:[#allocation40_spill] sm:$0xff] %v8977_v43 }
 0xd73   :  { %6755 = vtanh.f32 %v8877_v54 }
 0xd80   :  { %v6756_v60 = vpop.eup %6755 }
 0xd81   :  { %v8880_v21 = vmul.f32 %v6756_v60, %v6754_v45  ;;  %v8980_v45 = vld [vmem:[#allocation10 + $0x3a8] ss:$16 sps:$4 sm:$0xff]   ;;  %v8983_v60 = vld [vmem:[#allocation10 + $0x384] ss:$16 sps:$4 sm:$0xff]  }
 0xd82   :  { %9992 = vst [vmem:[#allocation41_spill] sm:$0xff] %v8980_v45  ;;  %9993 = vst [vmem:[#allocation43_spill] sm:$0xff] %v8983_v60 }
 0xd83   :  { %9986 = vst [vmem:[#allocation50_spill] sm:$0xff] %v8880_v21  ;;  %v4510_v15 = vmul.f32 %v9908_v25, %v8880_v21  ;;  %v9586_v12 = vrot.slane %v8880_v21, 5  ;;  %v4509_v23 = vmul.f32 %v9909_v44, %v8880_v21  ;;  %v9001_v21 = vld [vmem:[#allocation10 + $0x360] ss:$16 sps:$4 sm:$0xff]  }
 0xd84   :  { %9999 = vst [vmem:[#allocation49_spill] sm:$0xff] %v9001_v21 }
 0xd85   :  { %v4512_v62 = vpack.c.bf16 %v4510_v15, %v4510_v15  ;;  %v4511_v46 = vpack.c.bf16 %v4509_v23, %v4509_v23  ;;  %v8891_v31 = vsel %vm2586_vm7, %v8758_v11, %v9586_v12  ;;  %v8911_v11 = vld [vmem:[#allocation10 + $0x244] ss:$16 sps:$4 sm:$0xff]   ;;  %v8986_v15 = vld [vmem:[#allocation10 + $0x38c] ss:$16 sps:$4 sm:$0xff]   ;;  %v8989_v23 = vld [vmem:[#allocation10 + $0x380] ss:$16 sps:$4 sm:$0xff]  }
 0xd86   :  { %9994 = vst [vmem:[#allocation44_spill] sm:$0xff] %v8986_v15  ;;  %9995 = vst [vmem:[#allocation45_spill] sm:$0xff] %v8989_v23  ;;  %v8998_v12 = vld [vmem:[#allocation10 + $0x36c] ss:$16 sps:$4 sm:$0xff]  }
 0xd87   :  { %4565 = vmatprep.mubr.bf16.mxu0 %v4512_v62  ;;  %4606 = vmatprep.mubr.bf16.mxu1 %v4512_v62  ;;  %v8992_v62 = vld [vmem:[#allocation10 + $0x388] ss:$16 sps:$4 sm:$0xff]   ;;  %9998 = vst [vmem:[#allocation48_spill] sm:$0xff] %v8998_v12 }
 0xd88   :  { %4566 = vmatmul.mubr.bf16.vlgmr.msra.gmra.mxu0 %v4511_v46  ;;  %4607 = vmatmul.mubr.bf16.vlgmr.msra.gmra.mxu1 %v4511_v46  ;;  %9996 = vst [vmem:[#allocation46_spill] sm:$0xff] %v8992_v62  ;;  %v8995_v46 = vld [vmem:[#allocation10 + $0x364] ss:$16 sps:$4 sm:$0xff]  }
 0xd89   :  { %4668 = vmatpush1.bf16.msra.mxu0 %v8760_v42  ;;  %4709 = vmatpush1.bf16.msra.mxu1 %v8763_v28  ;;  %9997 = vst [vmem:[#allocation47_spill] sm:$0xff] %v8995_v46 }
 0xd8a   :  { %4669 = vmatprep.subr.bf16.mxu0 %v8766_v41  ;;  %4710 = vmatprep.subr.bf16.mxu1 %v8769_v59 }
 0xd8d   :  { %4670 = vmatpush1.bf16.msra.mxu0 %v8772_v49  ;;  %4711 = vmatpush1.bf16.msra.mxu1 %v8775_v33 }
 0xd8e   :  { %4671 = vmatprep.subr.bf16.mxu0 %v8778_v32  ;;  %4712 = vmatprep.subr.bf16.mxu1 %v8781_v39 }
 0xd91   :  { %4672 = vmatpush1.bf16.msra.mxu0 %v8784_v47  ;;  %4713 = vmatpush1.bf16.msra.mxu1 %v8787_v26 }
 0xd92   :  { %4673 = vmatprep.subr.bf16.mxu0 %v8790_v9  ;;  %4714 = vmatprep.subr.bf16.mxu1 %v8793_v51 }
 0xd95   :  { %4674 = vmatpush1.bf16.msra.mxu0 %v8796_v40  ;;  %4715 = vmatpush1.bf16.msra.mxu1 %v8799_v6 }
 0xd96   :  { %4675 = vmatprep.subr.bf16.mxu0 %v8802_v53  ;;  %4716 = vmatprep.subr.bf16.mxu1 %v8805_v30 }
 0xd99   :  { %4676 = vmatpush1.bf16.msra.mxu0 %v8808_v8  ;;  %4717 = vmatpush1.bf16.msra.mxu1 %v8811_v4 }
 0xd9a   :  { %4677 = vmatprep.subr.bf16.mxu0 %v8911_v11  ;;  %4718 = vmatprep.subr.bf16.mxu1 %v8914_v58 }
 0xd9d   :  { %4678 = vmatpush1.bf16.msra.mxu0 %v8917_v17  ;;  %4719 = vmatpush1.bf16.msra.mxu1 %v8920_v63 }
 0xd9e   :  { %4679 = vmatprep.subr.bf16.mxu0 %v8923_v52  ;;  %4720 = vmatprep.subr.bf16.mxu1 %v8926_v0 }
 0xda1   :  { %4680 = vmatpush1.bf16.msra.mxu0 %v8929_v56  ;;  %4721 = vmatpush1.bf16.msra.mxu1 %v8932_v2 }
 0xda2   :  { %4681 = vmatprep.subr.bf16.mxu0 %v8935_v10  ;;  %4722 = vmatprep.subr.bf16.mxu1 %v8938_v38 }
 0xda5   :  { %4682 = vmatpush1.bf16.msra.mxu0 %v8941_v27  ;;  %4723 = vmatpush1.bf16.msra.mxu1 %v8944_v35 }
 0xda6   :  { %4683 = vmatprep.subr.bf16.mxu0 %v8947_v48  ;;  %4724 = vmatprep.subr.bf16.mxu1 %v8950_v36 }
 0xda9   :  { %4684 = vmatpush2.bf16.msra.mxu0 %v8953_v14  ;;  %4725 = vmatpush2.bf16.msra.mxu1 %v8956_v7 }
 0xdaa   :  { %4685 = vmatprep.subr.bf16.mxu0 %v8959_v19  ;;  %4726 = vmatprep.subr.bf16.mxu1 %v8962_v22 }
 0xdad   :  { %4686 = vmatpush2.bf16.msra.mxu0 %v8965_v61  ;;  %4727 = vmatpush2.bf16.msra.mxu1 %v8968_v16 }
 0xdae   :  { %4687 = vmatprep.subr.bf16.mxu0 %v8971_v34  ;;  %4728 = vmatprep.subr.bf16.mxu1 %v8974_v29 }
 0xdb1   :  { %4688 = vmatpush2.bf16.msra.mxu0 %v8977_v43  ;;  %4729 = vmatpush2.bf16.msra.mxu1 %v8980_v45 }
 0xdb2   :  { %4689 = vmatprep.subr.bf16.mxu0 %v8983_v60  ;;  %4730 = vmatprep.subr.bf16.mxu1 %v8986_v15 }
 0xdb5   :  { %4690 = vmatpush2.bf16.msra.mxu0 %v8989_v23  ;;  %4731 = vmatpush2.bf16.msra.mxu1 %v8992_v62  ;;  %v9007_v23 = vld [vmem:[#allocation10 + $0x344] ss:$16 sps:$4 sm:$0xff]   ;;  %v9010_v62 = vld [vmem:[#allocation10 + $0x34c] ss:$16 sps:$4 sm:$0xff]  }
 0xdb6   :  { %4691 = vmatprep.subr.bf16.mxu0 %v8995_v46  ;;  %4732 = vmatprep.subr.bf16.mxu1 %v8998_v12  ;;  %10001 = vst [vmem:[#allocation28_spill] sm:$0xff] %v9007_v23  ;;  %10002 = vst [vmem:[#allocation29_spill] sm:$0xff] %v9010_v62  ;;  %v9013_v46 = vld [vmem:[#allocation10 + $0x340] ss:$16 sps:$4 sm:$0xff]   ;;  %v9016_v12 = vld [vmem:[#allocation10 + $0x348] ss:$16 sps:$4 sm:$0xff]  }
 0xdb7   :  { %10003 = vst [vmem:[#allocation30_spill] sm:$0xff] %v9013_v46  ;;  %10004 = vst [vmem:[#allocation31_spill] sm:$0xff] %v9016_v12 }
 0xdb9   :  { %4692 = vmatpush2.bf16.msra.mxu0 %v9001_v21  ;;  %4733 = vmatpush2.bf16.msra.mxu1 %v9004_v37  ;;  %v9019_v21 = vld [vmem:[#allocation10 + $0x324] ss:$16 sps:$4 sm:$0xff]   ;;  %v9022_v37 = vld [vmem:[#allocation10 + $0x32c] ss:$16 sps:$4 sm:$0xff]  }
 0xdba   :  { %4693 = vmatprep.subr.bf16.mxu0 %v9007_v23  ;;  %4734 = vmatprep.subr.bf16.mxu1 %v9010_v62  ;;  %10005 = vst [vmem:[#allocation32_spill] sm:$0xff] %v9019_v21  ;;  %10006 = vst [vmem:[#allocation33_spill] sm:$0xff] %v9022_v37  ;;  %v9025_v23 = vld [vmem:[#allocation10 + $0x320] ss:$16 sps:$4 sm:$0xff]   ;;  %v9028_v62 = vld [vmem:[#allocation10 + $0x328] ss:$16 sps:$4 sm:$0xff]  }
 0xdbb   :  { %10007 = vst [vmem:[#allocation24_spill] sm:$0xff] %v9025_v23  ;;  %10008 = vst [vmem:[#allocation25_spill] sm:$0xff] %v9028_v62 }
 0xdbd   :  { %4694 = vmatpush2.bf16.msra.mxu0 %v9013_v46  ;;  %4735 = vmatpush2.bf16.msra.mxu1 %v9016_v12  ;;  %v9031_v46 = vld [vmem:[#allocation10 + $0x304] ss:$16 sps:$4 sm:$0xff]   ;;  %v9034_v12 = vld [vmem:[#allocation10 + $0x30c] ss:$16 sps:$4 sm:$0xff]  }
 0xdbe   :  { %4695 = vmatprep.subr.bf16.mxu0 %v9019_v21  ;;  %4736 = vmatprep.subr.bf16.mxu1 %v9022_v37  ;;  %10009 = vst [vmem:[#allocation34_spill] sm:$0xff] %v9031_v46  ;;  %10010 = vst [vmem:[#allocation35_spill] sm:$0xff] %v9034_v12  ;;  %v9037_v21 = vld [vmem:[#allocation10 + $0x300] ss:$16 sps:$4 sm:$0xff]   ;;  %v9040_v37 = vld [vmem:[#allocation10 + $0x308] ss:$16 sps:$4 sm:$0xff]  }
 0xdbf   :  { %10011 = vst [vmem:[#allocation36_spill] sm:$0xff] %v9037_v21  ;;  %10012 = vst [vmem:[#allocation37_spill] sm:$0xff] %v9040_v37 }
 0xdc1   :  { %4696 = vmatpush2.bf16.msra.mxu0 %v9025_v23  ;;  %4737 = vmatpush2.bf16.msra.mxu1 %v9028_v62  ;;  %v4521_v62 = vrot.slane %v9983_v18, 2  ;;  %v4522_v23 = vrot.slane %v9985_v1, 2 }
 0xdc2   :  { %4697 = vmatprep.subr.bf16.mxu0 %v9031_v46  ;;  %4738 = vmatprep.subr.bf16.mxu1 %v9034_v12  ;;  %v4513_v46 = vrot.slane %v9984_v20, 4  ;;  %v4523_v20 = vrot.slane %v8552_v55, 2 }
 0xdc4   :  { %v4529_v12 = vsel %vm1193_vm0, %v4513_v46, %v4521_v62  ;;  %v4515_v62 = vrot.slane %v8559_v24, 4 }
 0xdc5   :  { %4698 = vmatpush2.bf16.msra.mxu0 %v9037_v21  ;;  %4739 = vmatpush2.bf16.msra.mxu1 %v9040_v37  ;;  %v4514_v21 = vrot.slane %v9939_v57, 4 }
 0xdc6   :  { %4793 = vmatprep.subr.bf16.mxu0 %v8858_v13  ;;  %4834 = vmatprep.subr.bf16.mxu1 %v8861_v3  ;;  %v4531_v46 = vsel %vm1193_vm0, %v4515_v62, %v4523_v20 }
 0xdc7   :  { %v4530_v43 = vsel %vm1193_vm0, %v4514_v21, %v4522_v23  ;;  %v4524_v21 = vrot.slane %v8561_v5, 2 }
 0xe48   :  { %v4567_v15 = vpop.f32.mrf.mxu0  ;;  %v4608_v60 = vpop.f32.mrf.mxu1 }
 0xe49   :  { %v4615_v45 = vadd.f32 %v4567_v15, %v4529_v12  ;;  %v4617_v12 = vadd.f32 %v4608_v60, %v4531_v46  ;;  %v4516_v15 = vrot.slane %v8568_v50, 4 }
 0xe4a   :  { %v4569_v37 = vpop.f32.mrf.mxu0  ;;  %v4610_v29 = vpop.f32.mrf.mxu1 }
 0xe4b   :  { %v6153_v13 = vmul.f32 -1.442695, %v4615_v45  ;;  %v4616_v34 = vadd.f32 %v4569_v37, %v4530_v43  ;;  %v6155_v45 = vmul.f32 -1.442695, %v4617_v12  ;;  %v4532_v37 = vsel %vm1193_vm0, %v4516_v15, %v4524_v21 }
 0xe4c   :  { %v4571_v3 = vpop.f32.mrf.mxu0  ;;  %v4612_v16 = vpop.f32.mrf.mxu1 }
 0xe4d   :  { %6757 = vpow2.f32 %v6153_v13  ;;  %v6154_v18 = vmul.f32 -1.442695, %v4616_v34  ;;  %v4618_v3 = vadd.f32 %v4610_v29, %v4532_v37 }
 0xe4e   :  { %v4572_v1 = vpop.f32.mrf.mxu0  ;;  %v4613_v61 = vpop.f32.mrf.mxu1 }
 0xe4f   :  { %6759 = vpow2.f32 %v6154_v18 }
 0xe50   :  { %6761 = vpow2.f32 %v6155_v45 }
 0xe51   :  { %6763 = vtanh.f32 %v4618_v3 }
 0xe5a   :  { %v6758_v13 = vpop.eup %6757 }
 0xe5b   :  { %v4628_v16 = vadd.f32 1.0, %v6758_v13 }
 0xe5c   :  { %v6760_v34 = vpop.eup %6759 }
 0xe5d   :  { %6765 = vrcp.f32 %v4628_v16  ;;  %v4629_v18 = vadd.f32 1.0, %v6760_v34  ;;  %v6762_v1 = vpop.eup %6761  ;;  %v10015_v16 = vld [vmem:[#allocation56_spill] sm:$0xff]  ;;  %v10016_v34 = vld [vmem:[#allocation54_spill] sm:$0xff] }
 0xe5e   :  { %v6764_v61 = vpop.eup %6763  ;;  %v4630_v23 = vadd.f32 1.0, %v6762_v1  ;;  %v10018_v1 = vld [vmem:[#allocation40_spill] sm:$0xff] }
 0xe5f   :  { %6767 = vrcp.f32 %v4629_v18  ;;  %v10017_v18 = vld [vmem:[#allocation39_spill] sm:$0xff] }
 0xe60   :  { %6769 = vrcp.f32 %v4630_v23  ;;  %v10023_v23 = vld [vmem:[#allocation46_spill] sm:$0xff] }
 0xe6a   :  { %v6766_v20 = vpop.eup %6765 }
 0xe6b   :  { %v4639_v43 = vmul.f32 %v6766_v20, %v6764_v61  ;;  %v10019_v61 = vld [vmem:[#allocation41_spill] sm:$0xff]  ;;  %v10020_v20 = vld [vmem:[#allocation43_spill] sm:$0xff] }
 0xe6c   :  { %v6768_v60 = vpop.eup %6767 }
 0xe6d   :  { %v4638_v62 = vmul.f32 %v6768_v60, %v8877_v54  ;;  %v6770_v29 = vpop.eup %6769  ;;  %v10022_v60 = vld [vmem:[#allocation45_spill] sm:$0xff] }
 0xe6f   :  { %v9058_v46 = vadd.f32 %v4639_v43, %v4638_v62  ;;  %v10021_v43 = vld [vmem:[#allocation44_spill] sm:$0xff]  ;;  %v10024_v62 = vld [vmem:[#allocation47_spill] sm:$0xff] }
 0xe71   :  { %6771 = vtanh.f32 %v9058_v46 }
 0xe7e   :  { %v6772_v12 = vpop.eup %6771 }
 0xe7f   :  { %v9061_v21 = vmul.f32 %v6772_v12, %v6770_v29  ;;  %v10025_v29 = vld [vmem:[#allocation48_spill] sm:$0xff]  ;;  %v10026_v12 = vld [vmem:[#allocation49_spill] sm:$0xff] }
 0xe81   :  { %10013 = vst [vmem:[#allocation38_spill] sm:$0xff] %v9061_v21  ;;  %v4644_v15 = vmul.f32 %v9908_v25, %v9061_v21  ;;  %v4643_v45 = vmul.f32 %v9909_v44, %v9061_v21  ;;  %v5047_v37 = vrot.slane %v9061_v21, 4  ;;  %v10032_v21 = vld [vmem:[#allocation32_spill] sm:$0xff] }
 0xe83   :  { %v4646_v3 = vpack.c.bf16 %v4644_v15, %v4644_v15  ;;  %v4645_v13 = vpack.c.bf16 %v4643_v45, %v4643_v45  ;;  %v9070_v54 = vsel %vm2588_vm8, %v8891_v31, %v5047_v37  ;;  %v10014_v31 = vld [vmem:[#allocation57_spill] sm:$0xff]  ;;  %v10027_v15 = vld [vmem:[#allocation27_spill] sm:$0xff]  ;;  %v10028_v45 = vld [vmem:[#allocation28_spill] sm:$0xff] }
 0xe84   :  { %v10029_v37 = vld [vmem:[#allocation29_spill] sm:$0xff] }
 0xe85   :  { %4699 = vmatprep.mubr.bf16.mxu0 %v4646_v3  ;;  %4740 = vmatprep.mubr.bf16.mxu1 %v4646_v3  ;;  %v10030_v3 = vld [vmem:[#allocation30_spill] sm:$0xff] }
 0xe86   :  { %4700 = vmatmul.mubr.bf16.vlgmr.msra.gmra.mxu0 %v4645_v13  ;;  %4741 = vmatmul.mubr.bf16.vlgmr.msra.gmra.mxu1 %v4645_v13  ;;  %v10031_v13 = vld [vmem:[#allocation31_spill] sm:$0xff] }
 0xe87   :  { %4794 = vmatpush1.bf16.msra.mxu0 %v8760_v42  ;;  %4835 = vmatpush1.bf16.msra.mxu1 %v8763_v28 }
 0xe88   :  { %4795 = vmatprep.subr.bf16.mxu0 %v8766_v41  ;;  %4836 = vmatprep.subr.bf16.mxu1 %v8769_v59 }
 0xe8b   :  { %4796 = vmatpush1.bf16.msra.mxu0 %v8772_v49  ;;  %4837 = vmatpush1.bf16.msra.mxu1 %v8775_v33 }
 0xe8c   :  { %4797 = vmatprep.subr.bf16.mxu0 %v8778_v32  ;;  %4838 = vmatprep.subr.bf16.mxu1 %v8781_v39 }
 0xe8f   :  { %4798 = vmatpush1.bf16.msra.mxu0 %v8784_v47  ;;  %4839 = vmatpush1.bf16.msra.mxu1 %v8787_v26 }
 0xe90   :  { %4799 = vmatprep.subr.bf16.mxu0 %v8790_v9  ;;  %4840 = vmatprep.subr.bf16.mxu1 %v8793_v51 }
 0xe93   :  { %4800 = vmatpush1.bf16.msra.mxu0 %v8796_v40  ;;  %4841 = vmatpush1.bf16.msra.mxu1 %v8799_v6 }
 0xe94   :  { %4801 = vmatprep.subr.bf16.mxu0 %v8802_v53  ;;  %4842 = vmatprep.subr.bf16.mxu1 %v8805_v30 }
 0xe97   :  { %4802 = vmatpush1.bf16.msra.mxu0 %v8808_v8  ;;  %4843 = vmatpush1.bf16.msra.mxu1 %v8811_v4 }
 0xe98   :  { %4803 = vmatprep.subr.bf16.mxu0 %v8911_v11  ;;  %4844 = vmatprep.subr.bf16.mxu1 %v8914_v58 }
 0xe9b   :  { %4804 = vmatpush1.bf16.msra.mxu0 %v8917_v17  ;;  %4845 = vmatpush1.bf16.msra.mxu1 %v8920_v63 }
 0xe9c   :  { %4805 = vmatprep.subr.bf16.mxu0 %v8923_v52  ;;  %4846 = vmatprep.subr.bf16.mxu1 %v8926_v0 }
 0xe9f   :  { %4806 = vmatpush1.bf16.msra.mxu0 %v8929_v56  ;;  %4847 = vmatpush1.bf16.msra.mxu1 %v8932_v2 }
 0xea0   :  { %4807 = vmatprep.subr.bf16.mxu0 %v8935_v10  ;;  %4848 = vmatprep.subr.bf16.mxu1 %v8938_v38 }
 0xea3   :  { %4808 = vmatpush1.bf16.msra.mxu0 %v8941_v27  ;;  %4849 = vmatpush1.bf16.msra.mxu1 %v8944_v35 }
 0xea4   :  { %4809 = vmatprep.subr.bf16.mxu0 %v8947_v48  ;;  %4850 = vmatprep.subr.bf16.mxu1 %v8950_v36 }
 0xea7   :  { %4810 = vmatpush2.bf16.msra.mxu0 %v8953_v14  ;;  %4851 = vmatpush2.bf16.msra.mxu1 %v8956_v7 }
 0xea8   :  { %4811 = vmatprep.subr.bf16.mxu0 %v8959_v19  ;;  %4852 = vmatprep.subr.bf16.mxu1 %v8962_v22 }
 0xeab   :  { %4812 = vmatpush2.bf16.msra.mxu0 %v10014_v31  ;;  %4853 = vmatpush2.bf16.msra.mxu1 %v10015_v16 }
 0xeac   :  { %4813 = vmatprep.subr.bf16.mxu0 %v10016_v34  ;;  %4854 = vmatprep.subr.bf16.mxu1 %v10017_v18 }
 0xeaf   :  { %4814 = vmatpush2.bf16.msra.mxu0 %v10018_v1  ;;  %4855 = vmatpush2.bf16.msra.mxu1 %v10019_v61 }
 0xeb0   :  { %4815 = vmatprep.subr.bf16.mxu0 %v10020_v20  ;;  %4856 = vmatprep.subr.bf16.mxu1 %v10021_v43  ;;  %v10043_v43 = vld [vmem:[#allocation53_spill] sm:$0xff]  ;;  %v10044_v20 = vld [vmem:[#allocation55_spill] sm:$0xff] }
 0xeb3   :  { %4816 = vmatpush2.bf16.msra.mxu0 %v10022_v60  ;;  %4857 = vmatpush2.bf16.msra.mxu1 %v10023_v23  ;;  %v10033_v60 = vld [vmem:[#allocation33_spill] sm:$0xff]  ;;  %v10034_v23 = vld [vmem:[#allocation24_spill] sm:$0xff] }
 0xeb4   :  { %4817 = vmatprep.subr.bf16.mxu0 %v10024_v62  ;;  %4858 = vmatprep.subr.bf16.mxu1 %v10025_v29  ;;  %v10035_v62 = vld [vmem:[#allocation25_spill] sm:$0xff]  ;;  %v10036_v29 = vld [vmem:[#allocation34_spill] sm:$0xff] }
 0xeb7   :  { %4818 = vmatpush2.bf16.msra.mxu0 %v10026_v12  ;;  %4859 = vmatpush2.bf16.msra.mxu1 %v10027_v15  ;;  %v10037_v12 = vld [vmem:[#allocation35_spill] sm:$0xff]  ;;  %v10038_v15 = vld [vmem:[#allocation36_spill] sm:$0xff] }
 0xeb8   :  { %4819 = vmatprep.subr.bf16.mxu0 %v10028_v45  ;;  %4860 = vmatprep.subr.bf16.mxu1 %v10029_v37  ;;  %v10039_v45 = vld [vmem:[#allocation37_spill] sm:$0xff]  ;;  %v10040_v37 = vld [vmem:[#allocation42_spill] sm:$0xff] }
 0xebb   :  { %4820 = vmatpush2.bf16.msra.mxu0 %v10030_v3  ;;  %4861 = vmatpush2.bf16.msra.mxu1 %v10031_v13  ;;  %v10041_v3 = vld [vmem:[#allocation58_spill] sm:$0xff] }
 0xebc   :  { %4821 = vmatprep.subr.bf16.mxu0 %v10032_v21  ;;  %4862 = vmatprep.subr.bf16.mxu1 %v10033_v60  ;;  %v10042_v13 = vld [vmem:[#allocation62_spill] sm:$0xff]  ;;  %v4647_v60 = vrot.slane %v10043_v43, 5  ;;  %v4657_v43 = vrot.slane %v8552_v55, 1 }
 0xebd   :  { %v4655_v21 = vrot.slane %v10042_v13, 1 }
 0xebf   :  { %4822 = vmatpush2.bf16.msra.mxu0 %v10034_v23  ;;  %4863 = vmatpush2.bf16.msra.mxu1 %v10035_v62  ;;  %v4656_v23 = vrot.slane %v10044_v20, 1  ;;  %v4663_v62 = vsel %vm1193_vm0, %v4647_v60, %v4655_v21  ;;  %v4649_v21 = vrot.slane %v8559_v24, 5 }
 0xec0   :  { %4823 = vmatprep.subr.bf16.mxu0 %v10036_v29  ;;  %4864 = vmatprep.subr.bf16.mxu1 %v10037_v12  ;;  %v4648_v12 = vrot.slane %v9939_v57, 5 }
 0xec1   :  { %v4665_v60 = vsel %vm1193_vm0, %v4649_v21, %v4657_v43 }
 0xec3   :  { %4824 = vmatpush2.bf16.msra.mxu0 %v10038_v15  ;;  %4865 = vmatpush2.bf16.msra.mxu1 %v10039_v45  ;;  %v4664_v15 = vsel %vm1193_vm0, %v4648_v12, %v4656_v23  ;;  %v4658_v23 = vrot.slane %v8561_v5, 1 }
 0xec4   :  { %4927 = vmatprep.subr.bf16.mxu0 %v10040_v37  ;;  %4968 = vmatprep.subr.bf16.mxu1 %v10041_v3 }
 0xf46   :  { %v4701_v61 = vpop.f32.mrf.mxu0  ;;  %v4742_v29 = vpop.f32.mrf.mxu1 }
 0xf47   :  { %v4749_v1 = vadd.f32 %v4701_v61, %v4663_v62  ;;  %v4751_v61 = vadd.f32 %v4742_v29, %v4665_v60  ;;  %v4650_v62 = vrot.slane %v8568_v50, 5 }
 0xf48   :  { %v4703_v45 = vpop.f32.mrf.mxu0  ;;  %v4744_v18 = vpop.f32.mrf.mxu1 }
 0xf49   :  { %v6156_v37 = vmul.f32 -1.442695, %v4749_v1  ;;  %v4750_v34 = vadd.f32 %v4703_v45, %v4664_v15  ;;  %v6158_v1 = vmul.f32 -1.442695, %v4751_v61  ;;  %v4666_v12 = vsel %vm1193_vm0, %v4650_v62, %v4658_v23 }
 0xf4a   :  { %v4705_v3 = vpop.f32.mrf.mxu0  ;;  %v4746_v16 = vpop.f32.mrf.mxu1 }
 0xf4b   :  { %6773 = vpow2.f32 %v6156_v37  ;;  %v6157_v13 = vmul.f32 -1.442695, %v4750_v34  ;;  %v4752_v16 = vadd.f32 %v4744_v18, %v4666_v12 }
 0xf4c   :  { %v4706_v20 = vpop.f32.mrf.mxu0  ;;  %v4747_v31 = vpop.f32.mrf.mxu1 }
 0xf4d   :  { %6775 = vpow2.f32 %v6157_v13 }
 0xf4e   :  { %6777 = vpow2.f32 %v6158_v1 }
 0xf4f   :  { %6779 = vtanh.f32 %v4752_v16 }
 0xf58   :  { %v6774_v15 = vpop.eup %6773 }
 0xf59   :  { %v4762_v34 = vadd.f32 1.0, %v6774_v15 }
 0xf5a   :  { %v6776_v45 = vpop.eup %6775 }
 0xf5b   :  { %6781 = vrcp.f32 %v4762_v34  ;;  %v4763_v31 = vadd.f32 1.0, %v6776_v45  ;;  %v6778_v20 = vpop.eup %6777 }
 0xf5c   :  { %v6780_v13 = vpop.eup %6779  ;;  %v4764_v3 = vadd.f32 1.0, %v6778_v20 }
 0xf5d   :  { %6783 = vrcp.f32 %v4763_v31 }
 0xf5e   :  { %6785 = vrcp.f32 %v4764_v3  ;;  %v4783_v3 = vrot.slane %v8559_v24, 6 }
 0xf68   :  { %v6782_v43 = vpop.eup %6781 }
 0xf69   :  { %v4773_v29 = vmul.f32 %v6782_v43, %v6780_v13 }
 0xf6a   :  { %v6784_v37 = vpop.eup %6783 }
 0xf6b   :  { %v4772_v21 = vmul.f32 %v6784_v37, %v9058_v46  ;;  %v6786_v18 = vpop.eup %6785 }
 0xf6d   :  { %v9149_v60 = vadd.f32 %v4773_v29, %v4772_v21  ;;  %v4791_v21 = vsel %vm1193_vm0, %v4783_v3, %v8552_v55  ;;  %v6513_v3 = vld [vmem:[#allocation13 + $0x94] ss:$8 sps:$4 sm:$0xff]  }
 0xf6f   :  { %6787 = vtanh.f32 %v9149_v60 }
 0xf7c   :  { %v6788_v61 = vpop.eup %6787 }
 0xf7d   :  { %v9152_v23 = vmul.f32 %v6788_v61, %v6786_v18  ;;  %v4784_v61 = vrot.slane %v8568_v50, 6 }
 0xf7f   :  { %v4778_v62 = vmul.f32 %v9908_v25, %v9152_v23  ;;  %v4777_v1 = vmul.f32 %v9909_v44, %v9152_v23  ;;  %v5050_v12 = vrot.slane %v9152_v23, 3 }
 0xf81   :  { %v4780_v16 = vpack.c.bf16 %v4778_v62, %v4778_v62  ;;  %v4779_v15 = vpack.c.bf16 %v4777_v1, %v4777_v1  ;;  %v9161_v46 = vsel %vm2590_vm9, %v9070_v54, %v5050_v12  ;;  %v4792_v1 = vsel %vm1193_vm0, %v4784_v61, %v8561_v5  ;;  %v6522_v61 = vld [vmem:[#allocation14 + $0x64] ss:$8 sps:$4 sm:$0xff]  }
 0xf83   :  { %4825 = vmatprep.mubr.bf16.mxu0 %v4780_v16  ;;  %4866 = vmatprep.mubr.bf16.mxu1 %v4780_v16 }
 0xf84   :  { %4826 = vmatmul.mubr.bf16.vlgmr.msra.gmra.mxu0 %v4779_v15  ;;  %4867 = vmatmul.mubr.bf16.vlgmr.msra.gmra.mxu1 %v4779_v15 }
 0xf85   :  { %4928 = vmatpush1.bf16.msra.mxu0 %v8760_v42  ;;  %4969 = vmatpush1.bf16.msra.mxu1 %v8763_v28  ;;  %v10047_v42 = vld [vmem:[#allocation54_spill] sm:$0xff]  ;;  %v10048_v28 = vld [vmem:[#allocation39_spill] sm:$0xff] }
 0xf86   :  { %4929 = vmatprep.subr.bf16.mxu0 %v8766_v41  ;;  %4970 = vmatprep.subr.bf16.mxu1 %v8769_v59  ;;  %v10049_v41 = vld [vmem:[#allocation40_spill] sm:$0xff]  ;;  %v10050_v59 = vld [vmem:[#allocation41_spill] sm:$0xff] }
 0xf89   :  { %4930 = vmatpush1.bf16.msra.mxu0 %v8772_v49  ;;  %4971 = vmatpush1.bf16.msra.mxu1 %v8775_v33  ;;  %v10051_v49 = vld [vmem:[#allocation43_spill] sm:$0xff]  ;;  %v10052_v33 = vld [vmem:[#allocation44_spill] sm:$0xff] }
 0xf8a   :  { %4931 = vmatprep.subr.bf16.mxu0 %v8778_v32  ;;  %4972 = vmatprep.subr.bf16.mxu1 %v8781_v39  ;;  %v10053_v32 = vld [vmem:[#allocation45_spill] sm:$0xff]  ;;  %v10054_v39 = vld [vmem:[#allocation46_spill] sm:$0xff] }
 0xf8d   :  { %4932 = vmatpush1.bf16.msra.mxu0 %v8784_v47  ;;  %4973 = vmatpush1.bf16.msra.mxu1 %v8787_v26  ;;  %v10055_v47 = vld [vmem:[#allocation47_spill] sm:$0xff]  ;;  %v10056_v26 = vld [vmem:[#allocation48_spill] sm:$0xff] }
 0xf8e   :  { %4933 = vmatprep.subr.bf16.mxu0 %v8790_v9  ;;  %4974 = vmatprep.subr.bf16.mxu1 %v8793_v51  ;;  %v10057_v9 = vld [vmem:[#allocation49_spill] sm:$0xff]  ;;  %v10058_v51 = vld [vmem:[#allocation27_spill] sm:$0xff] }
 0xf91   :  { %4934 = vmatpush1.bf16.msra.mxu0 %v8796_v40  ;;  %4975 = vmatpush1.bf16.msra.mxu1 %v8799_v6  ;;  %v10059_v40 = vld [vmem:[#allocation28_spill] sm:$0xff]  ;;  %v10060_v6 = vld [vmem:[#allocation29_spill] sm:$0xff] }
 0xf92   :  { %4935 = vmatprep.subr.bf16.mxu0 %v8802_v53  ;;  %4976 = vmatprep.subr.bf16.mxu1 %v8805_v30  ;;  %v10061_v53 = vld [vmem:[#allocation30_spill] sm:$0xff]  ;;  %v10062_v30 = vld [vmem:[#allocation31_spill] sm:$0xff] }
 0xf95   :  { %4936 = vmatpush1.bf16.msra.mxu0 %v8808_v8  ;;  %4977 = vmatpush1.bf16.msra.mxu1 %v8811_v4  ;;  %v10045_v4 = vld [vmem:[#allocation57_spill] sm:$0xff]  ;;  %v10046_v8 = vld [vmem:[#allocation56_spill] sm:$0xff] }
 0xf96   :  { %4937 = vmatprep.subr.bf16.mxu0 %v8911_v11  ;;  %4978 = vmatprep.subr.bf16.mxu1 %v8914_v58  ;;  %v10063_v11 = vld [vmem:[#allocation32_spill] sm:$0xff]  ;;  %v10064_v58 = vld [vmem:[#allocation33_spill] sm:$0xff] }
 0xf99   :  { %4938 = vmatpush1.bf16.msra.mxu0 %v8917_v17  ;;  %4979 = vmatpush1.bf16.msra.mxu1 %v8920_v63  ;;  %v10065_v17 = vld [vmem:[#allocation24_spill] sm:$0xff]  ;;  %v10066_v63 = vld [vmem:[#allocation25_spill] sm:$0xff] }
 0xf9a   :  { %4939 = vmatprep.subr.bf16.mxu0 %v8923_v52  ;;  %4980 = vmatprep.subr.bf16.mxu1 %v8926_v0  ;;  %v10067_v52 = vld [vmem:[#allocation34_spill] sm:$0xff]  ;;  %v10068_v0 = vld [vmem:[#allocation35_spill] sm:$0xff] }
 0xf9d   :  { %4940 = vmatpush1.bf16.msra.mxu0 %v8929_v56  ;;  %4981 = vmatpush1.bf16.msra.mxu1 %v8932_v2  ;;  %v10069_v56 = vld [vmem:[#allocation36_spill] sm:$0xff]  ;;  %v10070_v2 = vld [vmem:[#allocation37_spill] sm:$0xff] }
 0xf9e   :  { %4941 = vmatprep.subr.bf16.mxu0 %v8935_v10  ;;  %4982 = vmatprep.subr.bf16.mxu1 %v8938_v38  ;;  %v10071_v10 = vld [vmem:[#allocation53_spill] sm:$0xff] }
 0xf9f   :  { %v4781_v38 = vrot.slane %v10071_v10, 6 }
 0xfa1   :  { %4942 = vmatpush1.bf16.msra.mxu0 %v8941_v27  ;;  %4983 = vmatpush1.bf16.msra.mxu1 %v8944_v35  ;;  %v10072_v27 = vld [vmem:[#allocation62_spill] sm:$0xff] }
 0xfa2   :  { %4943 = vmatprep.subr.bf16.mxu0 %v8947_v48  ;;  %4984 = vmatprep.subr.bf16.mxu1 %v8950_v36  ;;  %v4789_v35 = vsel %vm1193_vm0, %v4781_v38, %v10072_v27  ;;  %v6489_v38 = vld [vmem:[#allocation13 + $0x14] ss:$8 sps:$4 sm:$0xff]  }
 0xfa5   :  { %4944 = vmatpush2.bf16.msra.mxu0 %v8953_v14  ;;  %4985 = vmatpush2.bf16.msra.mxu1 %v8956_v7  ;;  %v4782_v14 = vrot.slane %v9939_v57, 6 }
 0xfa6   :  { %4945 = vmatprep.subr.bf16.mxu0 %v8959_v19  ;;  %4986 = vmatprep.subr.bf16.mxu1 %v8962_v22  ;;  %v10073_v19 = vld [vmem:[#allocation55_spill] sm:$0xff] }
 0xfa7   :  { %v4790_v22 = vsel %vm1193_vm0, %v4782_v14, %v10073_v19  ;;  %v6495_v14 = vld [vmem:[#allocation13 + $0xf4] ss:$8 sps:$4 sm:$0xff]  }
 0xfa9   :  { %4946 = vmatpush2.bf16.msra.mxu0 %v10045_v4  ;;  %4987 = vmatpush2.bf16.msra.mxu1 %v10046_v8 }
 0xfaa   :  { %4947 = vmatprep.subr.bf16.mxu0 %v10047_v42  ;;  %4988 = vmatprep.subr.bf16.mxu1 %v10048_v28 }
 0xfad   :  { %4948 = vmatpush2.bf16.msra.mxu0 %v10049_v41  ;;  %4989 = vmatpush2.bf16.msra.mxu1 %v10050_v59 }
 0xfae   :  { %4949 = vmatprep.subr.bf16.mxu0 %v10051_v49  ;;  %4990 = vmatprep.subr.bf16.mxu1 %v10052_v33 }
 0xfb1   :  { %4950 = vmatpush2.bf16.msra.mxu0 %v10053_v32  ;;  %4991 = vmatpush2.bf16.msra.mxu1 %v10054_v39 }
 0xfb2   :  { %4951 = vmatprep.subr.bf16.mxu0 %v10055_v47  ;;  %4992 = vmatprep.subr.bf16.mxu1 %v10056_v26 }
 0xfb5   :  { %4952 = vmatpush2.bf16.msra.mxu0 %v10057_v9  ;;  %4993 = vmatpush2.bf16.msra.mxu1 %v10058_v51 }
 0xfb6   :  { %4953 = vmatprep.subr.bf16.mxu0 %v10059_v40  ;;  %4994 = vmatprep.subr.bf16.mxu1 %v10060_v6 }
 0xfb9   :  { %4954 = vmatpush2.bf16.msra.mxu0 %v10061_v53  ;;  %4995 = vmatpush2.bf16.msra.mxu1 %v10062_v30  ;;  %v6469_v30 = vld [vmem:[#allocation13 + $0x70] ss:$8 sps:$4 sm:$0xff]  }
 0xfba   :  { %4955 = vmatprep.subr.bf16.mxu0 %v10063_v11  ;;  %4996 = vmatprep.subr.bf16.mxu1 %v10064_v58  ;;  %v6474_v11 = vld [vmem:[#allocation13 + $0x64] ss:$8 sps:$4 sm:$0xff]   ;;  %v6472_v58 = vld [vmem:[#allocation13 + $0x60] ss:$8 sps:$4 sm:$0xff]  }
 0xfbd   :  { %4956 = vmatpush2.bf16.msra.mxu0 %v10065_v17  ;;  %4997 = vmatpush2.bf16.msra.mxu1 %v10066_v63  ;;  %v6477_v17 = vld [vmem:[#allocation13 + $0x54] ss:$8 sps:$4 sm:$0xff]   ;;  %v6475_v63 = vld [vmem:[#allocation13 + $0x50] ss:$8 sps:$4 sm:$0xff]  }
 0xfbe   :  { %4957 = vmatprep.subr.bf16.mxu0 %v10067_v52  ;;  %4998 = vmatprep.subr.bf16.mxu1 %v10068_v0  ;;  %v6483_v52 = vld [vmem:[#allocation13 + $0x34] ss:$8 sps:$4 sm:$0xff]   ;;  %v6481_v0 = vld [vmem:[#allocation13 + $0x30] ss:$8 sps:$4 sm:$0xff]  }
 0xfc1   :  { %4958 = vmatpush2.bf16.msra.mxu0 %v10069_v56  ;;  %4999 = vmatpush2.bf16.msra.mxu1 %v10070_v2  ;;  %v6486_v56 = vld [vmem:[#allocation13 + $0x24] ss:$8 sps:$4 sm:$0xff]   ;;  %v6484_v2 = vld [vmem:[#allocation13 + $0x20] ss:$8 sps:$4 sm:$0xff]  }
0x1044   :  { %v4827_v48 = vpop.f32.mrf.mxu0  ;;  %v4868_v36 = vpop.f32.mrf.mxu1 }
0x1045   :  { %v4875_v7 = vadd.f32 %v4827_v48, %v4789_v35  ;;  %v4877_v18 = vadd.f32 %v4868_v36, %v4791_v21  ;;  %v6487_v35 = vld [vmem:[#allocation13 + $0x10] ss:$8 sps:$4 sm:$0xff]   ;;  %v6492_v48 = vld [vmem:[#allocation13 + $0x4] ss:$8 sps:$4 sm:$0xff]   ;;  %v6490_v36 = vld [vmem:[#allocation13] ss:$8 sps:$4 sm:$0xff]  }
0x1046   :  { %v4829_v54 = vpop.f32.mrf.mxu0  ;;  %v4870_v34 = vpop.f32.mrf.mxu1  ;;  %v6517_v21 = vld [vmem:[#allocation14 + $0x70] ss:$8 sps:$4 sm:$0xff]  }
0x1047   :  { %v6159_v45 = vmul.f32 -1.442695, %v4875_v7  ;;  %v4876_v31 = vadd.f32 %v4829_v54, %v4790_v22  ;;  %v6161_v62 = vmul.f32 -1.442695, %v4877_v18  ;;  %v4878_v12 = vadd.f32 %v4870_v34, %v4792_v1  ;;  %v6493_v7 = vld [vmem:[#allocation13 + $0xf0] ss:$8 sps:$4 sm:$0xff]  }
0x1048   :  { %v4831_v20 = vpop.f32.mrf.mxu0  ;;  %v4872_v13 = vpop.f32.mrf.mxu1  ;;  %v6498_v22 = vld [vmem:[#allocation13 + $0xe4] ss:$8 sps:$4 sm:$0xff]   ;;  %v6496_v54 = vld [vmem:[#allocation13 + $0xe0] ss:$8 sps:$4 sm:$0xff]   ;;  %v6501_v34 = vld [vmem:[#allocation13 + $0xd4] ss:$8 sps:$4 sm:$0xff]  }
0x1049   :  { %6789 = vpow2.f32 %v6159_v45  ;;  %v6160_v43 = vmul.f32 -1.442695, %v4876_v31  ;;  %v6499_v45 = vld [vmem:[#allocation13 + $0xd0] ss:$8 sps:$4 sm:$0xff]   ;;  %v6504_v31 = vld [vmem:[#allocation13 + $0xc4] ss:$8 sps:$4 sm:$0xff]  }
0x104a   :  { %v4832_v29 = vpop.f32.mrf.mxu0  ;;  %v4873_v37 = vpop.f32.mrf.mxu1  ;;  %v6502_v20 = vld [vmem:[#allocation13 + $0xc0] ss:$8 sps:$4 sm:$0xff]   ;;  %v6507_v13 = vld [vmem:[#allocation13 + $0xb4] ss:$8 sps:$4 sm:$0xff]   ;;  %v6516_v1 = vld [vmem:[#allocation13 + $0x84] ss:$8 sps:$4 sm:$0xff]  }
0x104b   :  { %6791 = vpow2.f32 %v6160_v43  ;;  %v6505_v43 = vld [vmem:[#allocation13 + $0xb0] ss:$8 sps:$4 sm:$0xff]   ;;  %v6510_v29 = vld [vmem:[#allocation13 + $0xa4] ss:$8 sps:$4 sm:$0xff]   ;;  %v6508_v37 = vld [vmem:[#allocation13 + $0xa0] ss:$8 sps:$4 sm:$0xff]  }
0x104c   :  { %6793 = vpow2.f32 %v6161_v62  ;;  %v6519_v18 = vld [vmem:[#allocation14 + $0x74] ss:$8 sps:$4 sm:$0xff]   ;;  %v6511_v62 = vld [vmem:[#allocation13 + $0x90] ss:$8 sps:$4 sm:$0xff]  }
0x104d   :  { %6795 = vtanh.f32 %v4878_v12  ;;  %5538 = vmatprep.subr.bf16.mxu1 %v6519_v18  ;;  %v6520_v12 = vld [vmem:[#allocation14 + $0x60] ss:$8 sps:$4 sm:$0xff]  }
0x1056   :  { %v6790_v16 = vpop.eup %6789 }
0x1057   :  { %v4888_v15 = vadd.f32 1.0, %v6790_v16  ;;  %v6525_v16 = vld [vmem:[#allocation14 + $0x54] ss:$8 sps:$4 sm:$0xff]  }
0x1058   :  { %v6792_v4 = vpop.eup %6791 }
0x1059   :  { %6797 = vrcp.f32 %v4888_v15  ;;  %v4889_v8 = vadd.f32 1.0, %v6792_v4  ;;  %v6794_v42 = vpop.eup %6793  ;;  %v6514_v15 = vld [vmem:[#allocation13 + $0x80] ss:$8 sps:$4 sm:$0xff]   ;;  %v6523_v4 = vld [vmem:[#allocation14 + $0x50] ss:$8 sps:$4 sm:$0xff]  }
0x105a   :  { %v6796_v28 = vpop.eup %6795  ;;  %v4890_v33 = vadd.f32 1.0, %v6794_v42  ;;  %v6526_v42 = vld [vmem:[#allocation14 + $0x40] ss:$8 sps:$4 sm:$0xff]  }
0x105b   :  { %6799 = vrcp.f32 %v4889_v8  ;;  %v6528_v8 = vld [vmem:[#allocation14 + $0x44] ss:$8 sps:$4 sm:$0xff]  }
0x105c   :  { %6801 = vrcp.f32 %v4890_v33  ;;  %v6537_v33 = vld [vmem:[#allocation14 + $0x14] ss:$8 sps:$4 sm:$0xff]  }
0x1066   :  { %v6798_v41 = vpop.eup %6797 }
0x1067   :  { %v4899_v59 = vmul.f32 %v6798_v41, %v6796_v28  ;;  %v6531_v28 = vld [vmem:[#allocation14 + $0x34] ss:$8 sps:$4 sm:$0xff]   ;;  %v6529_v41 = vld [vmem:[#allocation14 + $0x30] ss:$8 sps:$4 sm:$0xff]  }
0x1068   :  { %v6800_v49 = vpop.eup %6799 }
0x1069   :  { %v4898_v32 = vmul.f32 %v6800_v49, %v9149_v60  ;;  %v6802_v47 = vpop.eup %6801  ;;  %v6471_v60 = vld [vmem:[#allocation13 + $0x74] ss:$8 sps:$4 sm:$0xff]   ;;  %v6532_v49 = vld [vmem:[#allocation14 + $0x20] ss:$8 sps:$4 sm:$0xff]  }
0x106a   :  { %5289 = vmatprep.subr.bf16.mxu0 %v6471_v60  ;;  %v6549_v60 = vld [vmem:[#allocation14 + $0xd4] ss:$8 sps:$4 sm:$0xff]  }
0x106b   :  { %v9238_v39 = vadd.f32 %v4899_v59, %v4898_v32  ;;  %v6534_v59 = vld [vmem:[#allocation14 + $0x24] ss:$8 sps:$4 sm:$0xff]   ;;  %v6535_v32 = vld [vmem:[#allocation14 + $0x10] ss:$8 sps:$4 sm:$0xff]  }
0x106d   :  { %6803 = vtanh.f32 %v9238_v39 }
0x107a   :  { %v6804_v26 = vpop.eup %6803 }
0x107b   :  { %v9241_v9 = vmul.f32 %v6804_v26, %v6802_v47  ;;  %v6540_v47 = vld [vmem:[#allocation14 + $0x4] ss:$8 sps:$4 sm:$0xff]   ;;  %v6538_v26 = vld [vmem:[#allocation14] ss:$8 sps:$4 sm:$0xff]  }
0x107d   :  { %v4904_v51 = vmul.f32 %v9908_v25, %v9241_v9  ;;  %v4903_v40 = vmul.f32 %v9909_v44, %v9241_v9  ;;  %v6480_v25 = vld [vmem:[#allocation13 + $0x44] ss:$8 sps:$4 sm:$0xff]   ;;  %v6478_v44 = vld [vmem:[#allocation13 + $0x40] ss:$8 sps:$4 sm:$0xff]  }
0x107f   :  { %v4906_v6 = vpack.c.bf16 %v4904_v51, %v4904_v51  ;;  %v4905_v53 = vpack.c.bf16 %v4903_v40, %v4903_v40  ;;  %v6543_v51 = vld [vmem:[#allocation14 + $0xf4] ss:$8 sps:$4 sm:$0xff]   ;;  %v6541_v40 = vld [vmem:[#allocation14 + $0xf0] ss:$8 sps:$4 sm:$0xff]  }
0x1081   :  { %4959 = vmatprep.mubr.bf16.mxu0 %v4906_v6  ;;  %5000 = vmatprep.mubr.bf16.mxu1 %v4906_v6  ;;  %v6546_v6 = vld [vmem:[#allocation14 + $0xe4] ss:$8 sps:$4 sm:$0xff]  }
0x1082   :  { %4960 = vmatmul.mubr.bf16.vlgmr.msra.gmra.mxu0 %v4905_v53  ;;  %5001 = vmatmul.mubr.bf16.vlgmr.msra.gmra.mxu1 %v4905_v53  ;;  %v6544_v53 = vld [vmem:[#allocation14 + $0xe0] ss:$8 sps:$4 sm:$0xff]  }
0x1083   :  { %5290 = vmatpush1.bf16.msra.mxu0 %v6469_v30  ;;  %5539 = vmatpush1.bf16.msra.mxu1 %v6517_v21  ;;  %v6547_v30 = vld [vmem:[#allocation14 + $0xd0] ss:$8 sps:$4 sm:$0xff]  }
0x1084   :  { %5291 = vmatprep.subr.bf16.mxu0 %v6474_v11  ;;  %5540 = vmatprep.subr.bf16.mxu1 %v6522_v61  ;;  %v6552_v11 = vld [vmem:[#allocation14 + $0xc4] ss:$8 sps:$4 sm:$0xff]  }
0x1087   :  { %5292 = vmatpush1.bf16.msra.mxu0 %v6472_v58  ;;  %5541 = vmatpush1.bf16.msra.mxu1 %v6520_v12  ;;  %v6550_v58 = vld [vmem:[#allocation14 + $0xc0] ss:$8 sps:$4 sm:$0xff]  }
0x1088   :  { %5293 = vmatprep.subr.bf16.mxu0 %v6477_v17  ;;  %5542 = vmatprep.subr.bf16.mxu1 %v6525_v16  ;;  %v6555_v17 = vld [vmem:[#allocation14 + $0xb4] ss:$8 sps:$4 sm:$0xff]  }
0x108b   :  { %5294 = vmatpush1.bf16.msra.mxu0 %v6475_v63  ;;  %5543 = vmatpush1.bf16.msra.mxu1 %v6523_v4  ;;  %v6553_v63 = vld [vmem:[#allocation14 + $0xb0] ss:$8 sps:$4 sm:$0xff]  }
0x108c   :  { %5295 = vmatprep.subr.bf16.mxu0 %v6480_v25  ;;  %5544 = vmatprep.subr.bf16.mxu1 %v6528_v8  ;;  %v6558_v25 = vld [vmem:[#allocation14 + $0xa4] ss:$8 sps:$4 sm:$0xff]  }
0x108f   :  { %5296 = vmatpush1.bf16.msra.mxu0 %v6478_v44  ;;  %5545 = vmatpush1.bf16.msra.mxu1 %v6526_v42  ;;  %v6556_v44 = vld [vmem:[#allocation14 + $0xa0] ss:$8 sps:$4 sm:$0xff]  }
0x1090   :  { %5297 = vmatprep.subr.bf16.mxu0 %v6483_v52  ;;  %5546 = vmatprep.subr.bf16.mxu1 %v6531_v28  ;;  %v4915_v52 = vrot.slane %v10072_v27, 7 }
0x1093   :  { %5298 = vmatpush1.bf16.msra.mxu0 %v6481_v0  ;;  %5547 = vmatpush1.bf16.msra.mxu1 %v6529_v41  ;;  %v4907_v0 = vrot.slane %v10071_v10, 7  ;;  %v4917_v10 = vrot.slane %v8552_v55, 7  ;;  %v5053_v41 = vrot.slane %v9241_v9, 2 }
0x1094   :  { %5299 = vmatprep.subr.bf16.mxu0 %v6486_v56  ;;  %5548 = vmatprep.subr.bf16.mxu1 %v6534_v59  ;;  %v4916_v56 = vrot.slane %v10073_v19, 7 }
0x1097   :  { %5300 = vmatpush1.bf16.msra.mxu0 %v6484_v2  ;;  %5549 = vmatpush1.bf16.msra.mxu1 %v6532_v49  ;;  %v4923_v2 = vsel %vm1193_vm0, %v4907_v0, %v4915_v52 }
0x1098   :  { %5301 = vmatprep.subr.bf16.mxu0 %v6489_v38  ;;  %5550 = vmatprep.subr.bf16.mxu1 %v6537_v33  ;;  %v5065_v33 = vrot.slane %v9152_v23, 7 }
0x109b   :  { %5302 = vmatpush1.bf16.msra.mxu0 %v6487_v35  ;;  %5551 = vmatpush1.bf16.msra.mxu1 %v6535_v32  ;;  %v5063_v32 = vsel %vm2592_vm10, %v9161_v46, %v5053_v41  ;;  %v10079_v46 = vld [vmem:[#allocation63_spill] sm:$0xff] }
0x109c   :  { %5303 = vmatprep.subr.bf16.mxu0 %v6492_v48  ;;  %5552 = vmatprep.subr.bf16.mxu1 %v6540_v47  ;;  %v4908_v48 = vrot.slane %v9939_v57, 7  ;;  %v10074_v47 = vld [vmem:[#allocation38_spill] sm:$0xff] }
0x109f   :  { %5304 = vmatpush1.bf16.msra.mxu0 %v6490_v36  ;;  %5553 = vmatpush1.bf16.msra.mxu1 %v6538_v26  ;;  %v5067_v26 = vrot.slane %v10074_v47, 6 }
0x10a0   :  { %5305 = vmatprep.subr.bf16.mxu0 %v6495_v14  ;;  %5554 = vmatprep.subr.bf16.mxu1 %v6543_v51  ;;  %v4924_v14 = vsel %vm1193_vm0, %v4908_v48, %v4916_v56  ;;  %v6559_v56 = vld [vmem:[#allocation14 + $0x90] ss:$8 sps:$4 sm:$0xff]  }
0x10a1   :  { %v5117_v48 = vld [vmem:[%s9352_s6] sm:$0x3]  ;;  %s9284_s6 = sld [smem:[#allocation3 + $0x2]] }
0x10a3   :  { %5306 = vmatpush2.bf16.msra.mxu0 %v6493_v7  ;;  %5555 = vmatpush2.bf16.msra.mxu1 %v6541_v40 }
0x10a4   :  { %5307 = vmatprep.subr.bf16.mxu0 %v6498_v22  ;;  %5556 = vmatprep.subr.bf16.mxu1 %v6546_v6  ;;  %v10075_v6 = vld [vmem:[#allocation23_spill] sm:$0xff] }
0x10a7   :  { %5308 = vmatpush2.bf16.msra.mxu0 %v6496_v54  ;;  %5557 = vmatpush2.bf16.msra.mxu1 %v6544_v53  ;;  %v5069_v53 = vrot.slane %v10075_v6, 4  ;;  %s5611_s1 = sshra.s32 %s9284_s6, 3  ;;  %s5614_s17 = sand.u32 7, %s9284_s6 }
0x10a8   :  { %5309 = vmatprep.subr.bf16.mxu0 %v6501_v34  ;;  %5558 = vmatprep.subr.bf16.mxu1 %v6549_v60  ;;  %s6254_s19 = sshll.u32 %s5611_s1, 4  ;;  %s6257_s6 = sshll.u32 %s5650_s21, 4 }
0x10a9   :  { %s5617_s0 = sadd.s32 %s6254_s19, %s5614_s17  ;;  %s5656_s11 = sadd.s32 %s6257_s6, %s5653_s2 }
0x10aa   :  { %s5618_s13 = scalar_lea.vmem [#allocation2], %s5617_s0  ;;  %s5657_s14 = scalar_lea.vmem [#allocation2], %s5656_s11 }
0x10ab   :  { %5310 = vmatpush2.bf16.msra.mxu0 %v6499_v45  ;;  %5559 = vmatpush2.bf16.msra.mxu1 %v6547_v30  ;;  %v10076_v30 = vld [vmem:[#allocation26_spill] sm:$0xff]  ;;  %s5670_s17 = scalar_lea.vmem [#allocation2], %s5669_s12  ;;  %s7077_s19 = scalar_lea.vmem %s5695_s16, 256 }
0x10ac   :  { %5311 = vmatprep.subr.bf16.mxu0 %v6504_v31  ;;  %5560 = vmatprep.subr.bf16.mxu1 %v6552_v11  ;;  %v5071_v11 = vrot.slane %v10076_v30, 3  ;;  %p7078_p2 = scmp.ne.s32.totalorder %s5695_s16, %s7077_s19  ;;  %p7083_p4 = scmp.lt.s32.totalorder %s7077_s19, %s7077_s19 }
0x10ae   :  { %p7084_p5 = por %p7083_p4, %p7082_p3 }
0x10af   :  { %5312 = vmatpush2.bf16.msra.mxu0 %v6502_v20  ;;  %5561 = vmatpush2.bf16.msra.mxu1 %v6550_v58  ;;  %v10077_v58 = vld [vmem:[#allocation50_spill] sm:$0xff] }
0x10b0   :  { %5313 = vmatprep.subr.bf16.mxu0 %v6507_v13  ;;  %5562 = vmatprep.subr.bf16.mxu1 %v6555_v17  ;;  %v4909_v13 = vrot.slane %v8559_v24, 7  ;;  %v10078_v23 = vrot.slane %v10077_v58, 5  ;;  %p7085_p6 = pnand %p7084_p5, %p7078_p2 }
0x10b2   :  { %v4925_v57 = vsel %vm1193_vm0, %v4909_v13, %v4917_v10 }
0x10b3   :  { %5314 = vmatpush2.bf16.msra.mxu0 %v6505_v43  ;;  %5563 = vmatpush2.bf16.msra.mxu1 %v6553_v63  ;;  %v5074_v63 = vrot.slane %v10079_v46, 2 }
0x10b4   :  { %5315 = vmatprep.subr.bf16.mxu0 %v6510_v29  ;;  %5564 = vmatprep.subr.bf16.mxu1 %v6558_v25  ;;  %v4918_v29 = vrot.slane %v8561_v5, 7 }
0x10b7   :  { %5316 = vmatpush2.bf16.msra.mxu0 %v6508_v37  ;;  %5565 = vmatpush2.bf16.msra.mxu1 %v6556_v44  ;;  %v4910_v37 = vrot.slane %v8568_v50, 7 }
0x10b8   :  { %5317 = vmatprep.subr.bf16.mxu0 %v6513_v3 }
0x10b9   :  { %v4926_v21 = vsel %vm1193_vm0, %v4910_v37, %v4918_v29 }
0x10bb   :  { %5318 = vmatpush2.bf16.msra.mxu0 %v6511_v62 }
0x10bc   :  { %5319 = vmatprep.subr.bf16.mxu0 %v6516_v1 }
0x10bf   :  { %5320 = vmatpush2.bf16.msra.mxu0 %v6514_v15 }
0x1142   :  { %v4961_v38 = vpop.f32.mrf.mxu0  ;;  %v5002_v35 = vpop.f32.mrf.mxu1 }
0x1143   :  { %v5009_v36 = vadd.f32 %v4961_v38, %v4923_v2  ;;  %v5011_v43 = vadd.f32 %v5002_v35, %v4925_v57  ;;  %v6561_v2 = vld [vmem:[#allocation14 + $0x94] ss:$8 sps:$4 sm:$0xff]   ;;  %v6564_v38 = vld [vmem:[#allocation14 + $0x84] ss:$8 sps:$4 sm:$0xff]   ;;  %v6562_v35 = vld [vmem:[#allocation14 + $0x80] ss:$8 sps:$4 sm:$0xff]  }
0x1144   :  { %v4963_v7 = vpop.f32.mrf.mxu0  ;;  %v5004_v22 = vpop.f32.mrf.mxu1  ;;  %5566 = vmatprep.subr.bf16.mxu1 %v6561_v2 }
0x1145   :  { %v6162_v54 = vmul.f32 -1.442695, %v5009_v36  ;;  %v5010_v34 = vadd.f32 %v4963_v7, %v4924_v14  ;;  %v6164_v3 = vmul.f32 -1.442695, %v5011_v43  ;;  %v5012_v18 = vadd.f32 %v5004_v22, %v4926_v21  ;;  %5567 = vmatpush2.bf16.msra.mxu1 %v6559_v56  ;;  %v10080_v36 = vld [vmem:[#allocation51_spill] sm:$0xff]  ;;  %v10081_v7 = vld [vmem:[#allocation52_spill] sm:$0xff] }
0x1146   :  { %v4965_v45 = vpop.f32.mrf.mxu0  ;;  %v5006_v27 = vpop.f32.mrf.mxu1  ;;  %5568 = vmatprep.subr.bf16.mxu1 %v6564_v38  ;;  %v5122_v14 = vrot.slane %v5117_v48, %v10080_v36  ;;  %v5126_v22 = vrot.slane %v5117_v48, %v10081_v7  ;;  %v5366_v43 = vld [vmem:[%s9354_s8] sm:$0x3]  ;;  %s5627_s8 = sand.u32 7, %s9286_s27  ;;  %s6259_s27 = sshll.u32 %s5676_s23, 4 }
0x1147   :  { %6805 = vpow2.f32 %v6162_v54  ;;  %v6163_v31 = vmul.f32 -1.442695, %v5010_v34  ;;  %v5371_v29 = vrot.slane %v5366_v43, %v10080_v36  ;;  %v5375_v37 = vrot.slane %v5366_v43, %v10081_v7  ;;  %s5630_s30 = sadd.s32 %s6255_s20, %s5627_s8  ;;  %s5682_s1 = sadd.s32 %s6259_s27, %s5679_s26 }
0x1148   :  { %v4966_v19 = vpop.f32.mrf.mxu0  ;;  %v5007_v20 = vpop.f32.mrf.mxu1  ;;  %s5631_s15 = scalar_lea.vmem [#allocation2], %s5630_s30  ;;  %s5683_s18 = scalar_lea.vmem [#allocation2], %s5682_s1 }
0x1149   :  { %6807 = vpow2.f32 %v6163_v31  ;;  %5569 = vmatpush2.bf16.msra.mxu1 %v6562_v35 }
0x114a   :  { %6809 = vpow2.f32 %v6164_v3 }
0x114b   :  { %6811 = vtanh.f32 %v5012_v18 }
0x1154   :  { %v6806_v61 = vpop.eup %6805 }
0x1155   :  { %v5022_v62 = vadd.f32 1.0, %v6806_v61 }
0x1156   :  { %v6808_v55 = vpop.eup %6807 }
0x1157   :  { %6813 = vrcp.f32 %v5022_v62  ;;  %v5023_v1 = vadd.f32 1.0, %v6808_v55  ;;  %v6810_v24 = vpop.eup %6809 }
0x1158   :  { %v6812_v12 = vpop.eup %6811  ;;  %v5024_v5 = vadd.f32 1.0, %v6810_v24 }
0x1159   :  { %6815 = vrcp.f32 %v5023_v1  ;;  %v10082_v1 = vlaneseq }
0x115a   :  { %6817 = vrcp.f32 %v5024_v5 }
0x115b   :  { %vm9320_vm12 = vcmp.lt.s32.totalorder %v10082_v1, 256 }
0x1164   :  { %v6814_v16 = vpop.eup %6813 }
0x1165   :  { %v5033_v15 = vmul.f32 %v6814_v16, %v6812_v12 }
0x1166   :  { %v6816_v4 = vpop.eup %6815 }
0x1167   :  { %v5032_v50 = vmul.f32 %v6816_v4, %v9238_v39  ;;  %v6818_v42 = vpop.eup %6817 }
0x1169   :  { %v5034_v8 = vadd.f32 %v5033_v15, %v5032_v50 }
0x116b   :  { %6819 = vtanh.f32 %v5034_v8 }
0x1178   :  { %v6820_v28 = vpop.eup %6819 }
0x1179   :  { %v5036_v59 = vmul.f32 %v6820_v28, %v6818_v42 }
0x117b   :  { %v5056_v49 = vrot.slane %v5036_v59, 1 }
0x117d   :  { %v5076_v51 = vsel %vm1193_vm0, %v5056_v49, %v9241_v9  ;;  %v5064_v39 = vsel %vm2594_vm11, %v5063_v32, %v5056_v49 }
0x117e   :  { %v5077_v40 = vsel %vm2584_vm6, %v5076_v51, %v5065_v33  ;;  %v5083_v0 = vpack.c.bf16 %v5064_v39, %v5064_v39 }
0x117f   :  { %v5078_v60 = vsel %vm2586_vm7, %v5077_v40, %v5067_v26 }
0x1180   :  { %v5079_v17 = vsel %vm2588_vm8, %v5078_v60, %v10078_v23 }
0x1181   :  { %v5080_v25 = vsel %vm2590_vm9, %v5079_v17, %v5069_v53 }
0x1182   :  { %v5081_v9 = vsel %vm2592_vm10, %v5080_v25, %v5071_v11 }
0x1183   :  { %v5082_v44 = vsel %vm2594_vm11, %v5081_v9, %v5074_v63 }
0x1184   :  { %v5084_v52 = vpack.c.bf16 %v5082_v44, %v5082_v44 }
0x1186   :  { %5321 = vmatprep.mubr.bf16.mxu0 %v5084_v52 }
0x1187   :  { %5322 = vmatmul.mubr.bf16.vlgmr.msra.gmra.mxu0 %v5083_v0 }
0x1247   :  { %v5323_v54 = vpop.f32.mrf.mxu0 }
0x1248   :  { %v5324_v34 = vadd.f32 %v5323_v54, %v5122_v14 }
0x1249   :  { %v5325_v45 = vpop.f32.mrf.mxu0 }
0x124a   :  { %v5326_v27 = vadd.f32 %v5325_v45, %v5126_v22  ;;  %v5330_v31 = vmax.f32 %v5324_v34, 0.0 }
0x124b   :  { %v5327_v10 = vpop.f32.mrf.mxu0 }
0x124c   :  { %v5331_v19 = vmax.f32 %v5326_v27, 0.0  ;;  %v5332_v57 = vpack.c.bf16 %v5330_v31, %v5330_v31 }
0x124d   :  { %v5328_v20 = vpop.f32.mrf.mxu0 }
0x124e   :  { %v5333_v13 = vpack.c.bf16 %v5331_v19, %v5331_v19 }
0x1250   :  { %5570 = vmatprep.mubr.bf16.mxu1 %v5333_v13 }
0x1251   :  { %5571 = vmatmul.mubr.bf16.vlgmr.msra.gmra.mxu1 %v5332_v57 }
0x1311   :  { %v5572_v3 = vpop.f32.mrf.mxu1 }
0x1312   :  { %v5573_v21 = vadd.f32 %v5572_v3, %v5371_v29 }
0x1313   :  { %v5574_v18 = vpop.f32.mrf.mxu1 }
0x1314   :  { %5579 = vst [vmem:[#allocation2] sm:$0xff] %v5573_v21  ;;  %v5575_v61 = vadd.f32 %v5574_v18, %v5375_v37 }
0x1315   :  { %v5576_v62 = vpop.f32.mrf.mxu1 }
0x1316   :  { %5580 = vst [vmem:[#allocation2 + $0x8] sm:$0xff] %v5575_v61 }
0x1317   :  { %v5577_v55 = vpop.f32.mrf.mxu1 }
0x131d   :  { %v5590_v12 = vld [vmem:[%s5589_s4] ss:$8 sm:$0x3] }
0x131e   :  { %v5606_v16 = vld [vmem:[%s5605_s10] ss:$8 sm:$0x3]  ;;  %5595 = vst.msk [vmem:[#allocation16] ss:$8 sm:$0x3] %vm9320_vm12, %v5590_v12 }
0x131f   :  { %5608 = vst.msk [vmem:[#allocation16 + $0x1] ss:$8 sm:$0x3] %vm9320_vm12, %v5606_v16  ;;  %v5619_v15 = vld [vmem:[%s5618_s13] ss:$8 sm:$0x3] }
0x1320   :  { %v5632_v4 = vld [vmem:[%s5631_s15] ss:$8 sm:$0x3]  ;;  %5621 = vst.msk [vmem:[#allocation16 + $0x2] ss:$8 sm:$0x3] %vm9320_vm12, %v5619_v15 }
0x1321   :  { %5634 = vst.msk [vmem:[#allocation16 + $0x3] ss:$8 sm:$0x3] %vm9320_vm12, %v5632_v4  ;;  %v5645_v5 = vld [vmem:[%s5644_s29] ss:$8 sm:$0x3] }
0x1322   :  { %v5658_v50 = vld [vmem:[%s5657_s14] ss:$8 sm:$0x3]  ;;  %5647 = vst.msk [vmem:[#allocation16 + $0x4] ss:$8 sm:$0x3] %vm9320_vm12, %v5645_v5 }
0x1323   :  { %5660 = vst.msk [vmem:[#allocation16 + $0x5] ss:$8 sm:$0x3] %vm9320_vm12, %v5658_v50  ;;  %v5671_v8 = vld [vmem:[%s5670_s17] ss:$8 sm:$0x3] }
0x1324   :  { %v5684_v42 = vld [vmem:[%s5683_s18] ss:$8 sm:$0x3]  ;;  %5673 = vst.msk [vmem:[#allocation16 + $0x6] ss:$8 sm:$0x3] %vm9320_vm12, %v5671_v8 }
0x1325   :  { %5686 = vst.msk [vmem:[#allocation16 + $0x7] ss:$8 sm:$0x3] %vm9320_vm12, %v5684_v42 }
0x1326   :  { %7088 = shalt.err (!%p7085_p6)
}
0x1327   :  { %5697 = dma.vmem_to_hbm [thread:$0]  %s5695_s16, 256, %s9355_s9, [#allocation5]  }
0x1328   :  { %7107 = dma.done.wait [#allocation5], 256  }
0x1329   :  { %7108 = vsyncadd [#allocation5], 4294967040 }
0x132a   :  { %5701 = vsyncpa [#allocation4], 1 }
0x132b   :  { %5702 = vsyncpa [#allocation9], 1 }
0x132c   :  { %5703 = vsyncpa [#allocation12], 1 }
0x132d   :  { %5704 = vsyncpa [#allocation15], 1 }
0x132e   :  { %5705 = vsyncpa [#allocation5], 1 }
0x132f   :  { %5706 = vsyncpa [#allocation6], 1 }

</bundles_post_ra>
